<compile_context>
chip_gen: v7x
topology: tpu7x:2x2x1
jax: 0.10.0
libtpu: 0.0.40
codegen_flags: <defaults>
</compile_context>

<pallas_src>
import jax
import jax.numpy as jnp
import numpy as np
from jax import lax
from jax.experimental import pallas as pl
from jax.experimental.pallas import tpu as pltpu


# ----------------------------------------------------------------------------
# helpers
# ----------------------------------------------------------------------------
def _round_up(x, m):
    return ((x + m - 1) // m) * m


def _pad_to(a, shape):
    pads = [(0, t - s) for s, t in zip(a.shape, shape)]
    if any(p[1] for p in pads):
        return jnp.pad(a, pads)
    return a


def _pick_time_block(T, cap=16):
    """Largest divisor of T that is <= cap (keeps the grid exact, no masking)."""
    for tb in range(min(cap, T), 0, -1):
        if T % tb == 0:
            return tb
    return 1


# ----------------------------------------------------------------------------
# Fused stacked-GRU kernel.
#   grid = (T // TB,)  -- sequential ("arbitrary") over time blocks.
#   Per grid step: TB timesteps, each advancing all L layers, with all L
#   hidden states carried in VMEM scratch (and in vregs inside the TB loop).
# PyTorch GRU semantics per cell:
#   r = sigmoid(x W_ir + b_ir + h W_hr + b_hr)
#   z = sigmoid(x W_iz + b_iz + h W_hz + b_hz)
#   n = tanh   (x W_in + b_in + r * (h W_hn + b_hn))
#   h' = (1 - z) * n + z * h   ==   n + z * (h - n)
# ----------------------------------------------------------------------------
def _gru_stack_kernel(x_ref, h0_ref,
                      w0i_ref, w0h_ref, b0i_ref, b0hn_ref,
                      wri_ref, wrh_ref, bri_ref, brhn_ref,
                      out_ref, hT_ref, h_scratch):
    L, _, Hp = h0_ref.shape
    TB = x_ref.shape[0]
    tb = pl.program_id(0)

    @pl.when(tb == 0)
    def _():
        h_scratch[...] = h0_ref[...]

    # Hoist loop-invariant weight / bias loads out of the timestep loop.
    w0i = w0i_ref[...]
    w0h = w0h_ref[...]
    b0i = b0i_ref[...]
    b0hn = b0hn_ref[...]
    wri = [wri_ref[l] for l in range(L - 1)]
    wrh = [wrh_ref[l] for l in range(L - 1)]
    bri = [bri_ref[l] for l in range(L - 1)]
    brhn = [brhn_ref[l] for l in range(L - 1)]

    def gru_cell(x_b, h, wi, wh, bi, bhn):
        # Two fused matmuls (r|z|n along the 3*Hp lane axis), f32 accumulation.
        gi = jnp.dot(x_b, wi, preferred_element_type=jnp.float32) + bi
        gh = jnp.dot(h.astype(jnp.bfloat16), wh,
                     preferred_element_type=jnp.float32)
        r = jax.nn.sigmoid(gi[:, :Hp] + gh[:, :Hp])
        z = jax.nn.sigmoid(gi[:, Hp:2 * Hp] + gh[:, Hp:2 * Hp])
        n = jnp.tanh(gi[:, 2 * Hp:] + r * (gh[:, 2 * Hp:] + bhn))
        return n + z * (h - n)

    def step(t, hs):
        x_t = x_ref[t]                                   # (Bp, INp) bf16
        h_new = gru_cell(x_t, hs[0], w0i, w0h, b0i, b0hn)
        new_hs = [h_new]
        for l in range(1, L):                            # static, small L
            h_new = gru_cell(h_new.astype(jnp.bfloat16), hs[l],
                             wri[l - 1], wrh[l - 1], bri[l - 1], brhn[l - 1])
            new_hs.append(h_new)
        out_ref[t] = h_new                               # lane-dense (Hp%128==0)
        return tuple(new_hs)

    hs0 = tuple(h_scratch[l] for l in range(L))
    hs_final = lax.fori_loop(0, TB, step, hs0, unroll=True)
    for l in range(L):
        h_scratch[l] = hs_final[l]

    @pl.when(tb == pl.num_programs(0) - 1)
    def _():
        hT_ref[...] = h_scratch[...]


def gru_stack(x, h0, gru_params):
    """x: (T, B, IN) f32 time-major; h0: (L, B, H) f32.
    Returns (outputs (T, B, H) f32 of last layer, h_T (L, B, H) f32)."""
    T, B, IN = x.shape
    L, _, H = h0.shape
    Bp = _round_up(B, 16)         # bf16 sublane packing
    Hp = _round_up(H, 128)        # lane-dense gates / stores
    INp = _round_up(IN, 128)
    TB = _pick_time_block(T)

    def fuse(p, in_dim_p):
        wir, wiz, win, whr, whz, whn, bir, biz, bin_, bhr, bhz, bhn = p
        pad_wi = lambda w: _pad_to(w, (in_dim_p, Hp))
        pad_wh = lambda w: _pad_to(w, (Hp, Hp))
        pad_b = lambda b: _pad_to(b, (1, Hp))
        wi = jnp.concatenate([pad_wi(wir), pad_wi(wiz), pad_wi(win)], axis=1)
        wh = jnp.concatenate([pad_wh(whr), pad_wh(whz), pad_wh(whn)], axis=1)
        # pre-sum r/z biases; b_in goes in the fused vector, b_hn stays apart.
        bi = jnp.concatenate([pad_b(bir + bhr), pad_b(biz + bhz), pad_b(bin_)],
                             axis=1)
        return wi.astype(jnp.bfloat16), wh.astype(jnp.bfloat16), bi, pad_b(bhn)

    w0i, w0h, b0i, b0hn = fuse(gru_params[0], INp)
    if L > 1:
        rest = [fuse(p, Hp) for p in gru_params[1:]]
        wri = jnp.stack([r[0] for r in rest], axis=0)
        wrh = jnp.stack([r[1] for r in rest], axis=0)
        bri = jnp.stack([r[2] for r in rest], axis=0)
        brhn = jnp.stack([r[3] for r in rest], axis=0)
    else:  # dummies (never read) so every operand has a non-empty leading dim
        wri = jnp.zeros((1, Hp, 3 * Hp), jnp.bfloat16)
        wrh = jnp.zeros((1, Hp, 3 * Hp), jnp.bfloat16)
        bri = jnp.zeros((1, 1, 3 * Hp), jnp.float32)
        brhn = jnp.zeros((1, 1, Hp), jnp.float32)
    Lr = wri.shape[0]

    xp = _pad_to(x, (T, Bp, INp)).astype(jnp.bfloat16)
    h0p = _pad_to(h0, (L, Bp, Hp))

    full = lambda shape: pl.BlockSpec(shape, lambda t: (0,) * len(shape))

    flops = (2 * T * Bp * 3 * Hp * (INp + Hp)
             + 2 * T * Bp * (L - 1) * 3 * Hp * (2 * Hp))
    bytes_acc = (xp.size * 2 + T * Bp * Hp * 4 + 2 * h0p.size * 4
                 + (w0i.size + w0h.size + wri.size + wrh.size) * 2)

    outs, hT = pl.pallas_call(
        _gru_stack_kernel,
        out_shape=(jax.ShapeDtypeStruct((T, Bp, Hp), jnp.float32),
                   jax.ShapeDtypeStruct((L, Bp, Hp), jnp.float32)),
        grid_spec=pltpu.PrefetchScalarGridSpec(
            num_scalar_prefetch=0,
            grid=(T // TB,),
            in_specs=[
                pl.BlockSpec((TB, Bp, INp), lambda t: (t, 0, 0)),  # x time block
                full((L, Bp, Hp)),                                 # h0
                full((INp, 3 * Hp)), full((Hp, 3 * Hp)),           # layer-0 W
                full((1, 3 * Hp)), full((1, Hp)),                  # layer-0 b
                full((Lr, Hp, 3 * Hp)), full((Lr, Hp, 3 * Hp)),    # layers>=1 W
                full((Lr, 1, 3 * Hp)), full((Lr, 1, Hp)),          # layers>=1 b
            ],
            out_specs=[
                pl.BlockSpec((TB, Bp, Hp), lambda t: (t, 0, 0)),   # activations
                full((L, Bp, Hp)),                                 # final hidden
            ],
            scratch_shapes=[pltpu.VMEM((L, Bp, Hp), jnp.float32)],
        ),
        compiler_params=pltpu.CompilerParams(
            dimension_semantics=("arbitrary",),        # recurrence is sequential
            vmem_limit_bytes=64 * 1024 * 1024),
        cost_estimate=pl.CostEstimate(
            flops=int(flops),
            transcendentals=int(3 * T * L * Bp * Hp),
            bytes_accessed=int(bytes_acc)),
    )(xp, h0p, w0i, w0h, b0i, b0hn, wri, wrh, bri, brhn)

    return outs[:, :B, :H], hT[:, :B, :H]


# ----------------------------------------------------------------------------
# Tiled dense (vocab projection): bf16 matmul + f32 bias, parallel 2-D grid.
# ----------------------------------------------------------------------------
def _dense_kernel(x_ref, w_ref, b_ref, o_ref):
    o_ref[...] = (jnp.dot(x_ref[...], w_ref[...],
                          preferred_element_type=jnp.float32) + b_ref[...])


def dense(x, w, b, tm_cap=256, tn_cap=512):
    """x: (N, H) f32, w: (H, V) f32, b: (1, V) f32 -> (N, V) f32."""
    N, H = x.shape
    V = w.shape[1]
    Hp = _round_up(H, 128)
    tm = min(tm_cap, _round_up(N, 8))
    tn = min(tn_cap, _round_up(V, 128))
    Np = _round_up(N, tm)
    Vp = _round_up(V, tn)

    xp = _pad_to(x, (Np, Hp)).astype(jnp.bfloat16)
    wp = _pad_to(w, (Hp, Vp)).astype(jnp.bfloat16)
    bp = _pad_to(b, (1, Vp))

    out = pl.pallas_call(
        _dense_kernel,
        out_shape=jax.ShapeDtypeStruct((Np, Vp), jnp.float32),
        grid_spec=pltpu.PrefetchScalarGridSpec(
            num_scalar_prefetch=0,
            grid=(Np // tm, Vp // tn),
            in_specs=[
                pl.BlockSpec((tm, Hp), lambda i, j: (i, 0)),
                pl.BlockSpec((Hp, tn), lambda i, j: (0, j)),
                pl.BlockSpec((1, tn), lambda i, j: (0, j)),
            ],
            out_specs=pl.BlockSpec((tm, tn), lambda i, j: (i, j)),
        ),
        compiler_params=pltpu.CompilerParams(
            dimension_semantics=("parallel", "parallel"),
            vmem_limit_bytes=64 * 1024 * 1024),
        cost_estimate=pl.CostEstimate(
            flops=int(2 * Np * Hp * Vp), transcendentals=0,
            bytes_accessed=int((Np * Hp + Hp * Vp) * 2 + Np * Vp * 4 + Vp * 4)),
    )(xp, wp, bp)
    return out[:N, :V]


# ----------------------------------------------------------------------------
# Parameter init (mirrors init_seq2seq: xavier-uniform weights).
# ----------------------------------------------------------------------------
def xavier_uniform(key, shape, fan_in, fan_out):
    bound = float(np.sqrt(6.0 / (fan_in + fan_out)))
    return jax.random.uniform(key, shape, jnp.float32, -bound, bound)


def init_params(key, vocab_size, embed_size, num_hiddens, num_layers):
    keys = jax.random.split(key, 4 + num_layers)
    params = {}
    params["embedding"] = jax.random.normal(
        keys[0], (vocab_size, embed_size), jnp.float32)    # nn.Embedding: N(0,1)

    gru_layers = []
    for l in range(num_layers):
        in_size = (embed_size + num_hiddens) if l == 0 else num_hiddens
        lk = jax.random.split(keys[1 + l], 12)
        wi = [xavier_uniform(lk[i], (in_size, num_hiddens),
                             in_size, 3 * num_hiddens) for i in range(3)]
        wh = [xavier_uniform(lk[3 + i], (num_hiddens, num_hiddens),
                             num_hiddens, 3 * num_hiddens) for i in range(3)]
        bnd = 1.0 / float(np.sqrt(num_hiddens))
        bi = [jax.random.uniform(lk[6 + i], (1, num_hiddens), jnp.float32, -bnd, bnd)
              for i in range(3)]
        bh = [jax.random.uniform(lk[9 + i], (1, num_hiddens), jnp.float32, -bnd, bnd)
              for i in range(3)]
        gru_layers.append(tuple(wi + wh + bi + bh))
    params["gru"] = gru_layers

    params["dense_w"] = xavier_uniform(
        keys[1 + num_layers], (num_hiddens, vocab_size), num_hiddens, vocab_size)
    bnd = 1.0 / float(np.sqrt(num_hiddens))
    params["dense_b"] = jax.random.uniform(
        keys[2 + num_layers], (1, vocab_size), jnp.float32, -bnd, bnd)
    return params


# ----------------------------------------------------------------------------
# Forward pass == Seq2SeqDecoder.forward(X, state)
# ----------------------------------------------------------------------------
def seq2seq_decoder_forward(params, X, state):
    enc_output, hidden_state = state                 # (T_enc,B,H), (L,B,H)
    embs = params["embedding"][X.T.astype(jnp.int32)]            # (T, B, E)
    T, B, _ = embs.shape
    H = hidden_state.shape[-1]
    context = jnp.broadcast_to(enc_output[-1][None], (T, B, H))
    x = jnp.concatenate([embs, context], axis=-1)                # (T, B, E+H)

    outs, new_hidden = gru_stack(x, hidden_state, params["gru"])
    # TODO(synk): inter-layer dropout skipped (module default dropout=0).

    V = params["dense_w"].shape[1]
    logits = dense(outs.reshape(T * B, H), params["dense_w"], params["dense_b"])
    outputs = logits.reshape(T, B, V).swapaxes(0, 1)             # (B, T, V)
    return outputs, [enc_output, new_hidden]


# ----------------------------------------------------------------------------
# Pure-JAX reference (same bf16-matmul / f32-accumulate precision policy).
# ----------------------------------------------------------------------------
def _forward_ref(params, X, state):
    enc_output, hidden_state = state
    embs = params["embedding"][X.T.astype(jnp.int32)]
    T = embs.shape[0]
    context = jnp.broadcast_to(enc_output[-1][None], (T,) + enc_output[-1].shape)
    x = jnp.concatenate([embs, context], axis=-1)
    new_hidden = []
    for l, p in enumerate(params["gru"]):
        wir, wiz, win, whr, whz, whn, bir, biz, bin_, bhr, bhz, bhn = p
        H = whr.shape[0]
        wi = jnp.concatenate([wir, wiz, win], axis=1).astype(jnp.bfloat16)
        wh = jnp.concatenate([whr, whz, whn], axis=1).astype(jnp.bfloat16)
        bi = jnp.concatenate([bir + bhr, biz + bhz, bin_], axis=1)

        def step(h, xt, wi=wi, wh=wh, bi=bi, bhn=bhn, H=H):
            gi = jnp.dot(xt.astype(jnp.bfloat16), wi,
                         preferred_element_type=jnp.float32) + bi
            gh = jnp.dot(h.astype(jnp.bfloat16), wh,
                         preferred_element_type=jnp.float32)
            r = jax.nn.sigmoid(gi[:, :H] + gh[:, :H])
            z = jax.nn.sigmoid(gi[:, H:2 * H] + gh[:, H:2 * H])
            n = jnp.tanh(gi[:, 2 * H:] + r * (gh[:, 2 * H:] + bhn))
            hn = n + z * (h - n)
            return hn, hn

        hT, outs = jax.lax.scan(step, hidden_state[l], x)
        new_hidden.append(hT)
        x = outs
    T, B, H = x.shape
    logits = (jnp.dot(x.reshape(T * B, H).astype(jnp.bfloat16),
                      params["dense_w"].astype(jnp.bfloat16),
                      preferred_element_type=jnp.float32)
              + params["dense_b"]).reshape(T, B, -1)
    return logits.swapaxes(0, 1), jnp.stack(new_hidden, axis=0)


if __name__ == "__main__":
    vocab_size, embed_size, num_hiddens, num_layers = 64, 32, 32, 2
    batch, num_steps, enc_steps = 4, 8, 8

    key = jax.random.PRNGKey(0)
    k_param, k_x, k_enc, k_hid = jax.random.split(key, 4)
    params = init_params(k_param, vocab_size, embed_size, num_hiddens, num_layers)

    X = jax.random.randint(k_x, (batch, num_steps), 0, vocab_size, jnp.int32)
    enc_output = jax.random.normal(k_enc, (enc_steps, batch, num_hiddens), jnp.float32)
    hidden_state = jax.random.normal(k_hid, (num_layers, batch, num_hiddens), jnp.float32)
    state = (enc_output, hidden_state)

    fwd = jax.jit(seq2seq_decoder_forward)
    outputs, (enc_out_ret, new_hidden) = fwd(params, X, state)
    jax.block_until_ready((outputs, new_hidden))

    ref_out, ref_hidden = _forward_ref(params, X, state)
    assert outputs.shape == (batch, num_steps, vocab_size)
    assert new_hidden.shape == (num_layers, batch, num_hiddens)
    np.testing.assert_allclose(np.asarray(outputs), np.asarray(ref_out),
                               rtol=1e-2, atol=1e-2)
    np.testing.assert_allclose(np.asarray(new_hidden), np.asarray(ref_hidden),
                               rtol=1e-2, atol=1e-2)
    print("KERNEL_OK")
</pallas_src>

<mosaic_0001>
module attributes {stable_mosaic.version = 11 : i64} {
  func.func @_gru_stack_kernel(%arg0: i32, %arg1: memref<8x16x128xbf16, #tpu.memory_space<vmem>>, %arg2: memref<2x16x128xf32, #tpu.memory_space<vmem>>, %arg3: memref<128x384xbf16, #tpu.memory_space<vmem>>, %arg4: memref<128x384xbf16, #tpu.memory_space<vmem>>, %arg5: memref<1x384xf32, #tpu.memory_space<vmem>>, %arg6: memref<1x128xf32, #tpu.memory_space<vmem>>, %arg7: memref<1x128x384xbf16, #tpu.memory_space<vmem>>, %arg8: memref<1x128x384xbf16, #tpu.memory_space<vmem>>, %arg9: memref<1x1x384xf32, #tpu.memory_space<vmem>>, %arg10: memref<1x1x128xf32, #tpu.memory_space<vmem>>, %arg11: memref<8x16x128xf32, #tpu.memory_space<vmem>>, %arg12: memref<2x16x128xf32, #tpu.memory_space<vmem>>, %arg13: memref<2x16x128xf32, #tpu.memory_space<vmem>>) attributes {dimension_semantics = [#tpu.dimension_semantics<arbitrary>], iteration_bounds = array<i64: 1>, scalar_prefetch = 0 : i64, scratch_operands = 1 : i64, tpu.core_type = #tpu.core_type<tc>, window_params = [{transform_indices = @transform_0, window_bounds = array<i64: 8, 16, 128>}, {pipeline_mode = #tpu.pipeline_mode<synchronous>, transform_indices = @transform_1, window_bounds = array<i64: 2, 16, 128>}, {pipeline_mode = #tpu.pipeline_mode<synchronous>, transform_indices = @transform_2, window_bounds = array<i64: 128, 384>}, {pipeline_mode = #tpu.pipeline_mode<synchronous>, transform_indices = @transform_3, window_bounds = array<i64: 128, 384>}, {pipeline_mode = #tpu.pipeline_mode<synchronous>, transform_indices = @transform_4, window_bounds = array<i64: 1, 384>}, {pipeline_mode = #tpu.pipeline_mode<synchronous>, transform_indices = @transform_5, window_bounds = array<i64: 1, 128>}, {pipeline_mode = #tpu.pipeline_mode<synchronous>, transform_indices = @transform_6, window_bounds = array<i64: 1, 128, 384>}, {pipeline_mode = #tpu.pipeline_mode<synchronous>, transform_indices = @transform_7, window_bounds = array<i64: 1, 128, 384>}, {pipeline_mode = #tpu.pipeline_mode<synchronous>, transform_indices = @transform_8, window_bounds = array<i64: 1, 1, 384>}, {pipeline_mode = #tpu.pipeline_mode<synchronous>, transform_indices = @transform_9, window_bounds = array<i64: 1, 1, 128>}, {transform_indices = @transform_10, window_bounds = array<i64: 8, 16, 128>}, {pipeline_mode = #tpu.pipeline_mode<synchronous>, transform_indices = @transform_11, window_bounds = array<i64: 2, 16, 128>}]} {
    %c0_i32 = arith.constant 0 : i32
    %0 = arith.cmpi eq, %arg0, %c0_i32 : i32
    %1 = arith.extui %0 : i1 to i32
    %c0_i32_0 = arith.constant 0 : i32
    %2 = arith.cmpi ne, %1, %c0_i32_0 : i32
    scf.if %2 {
      %c0_129 = arith.constant 0 : index
      %c0_130 = arith.constant 0 : index
      %c0_131 = arith.constant 0 : index
      %588 = vector.load %arg2[%c0_129, %c0_130, %c0_131] : memref<2x16x128xf32, #tpu.memory_space<vmem>>, vector<2x16x128xf32>
      %c0_132 = arith.constant 0 : index
      %c0_133 = arith.constant 0 : index
      %c0_134 = arith.constant 0 : index
      %589 = vector.load %arg13[%c0_132, %c0_133, %c0_134] : memref<2x16x128xf32, #tpu.memory_space<vmem>>, vector<2x16x128xf32>
      tpu.vector_store %arg13[%c0_132, %c0_133, %c0_134], %588 {strides = array<i32>} : memref<2x16x128xf32, #tpu.memory_space<vmem>>, vector<2x16x128xf32>,
    } else {
    }
    %c0 = arith.constant 0 : index
    %c0_1 = arith.constant 0 : index
    %3 = vector.load %arg3[%c0, %c0_1] : memref<128x384xbf16, #tpu.memory_space<vmem>>, vector<128x384xbf16>
    %c0_2 = arith.constant 0 : index
    %c0_3 = arith.constant 0 : index
    %4 = vector.load %arg4[%c0_2, %c0_3] : memref<128x384xbf16, #tpu.memory_space<vmem>>, vector<128x384xbf16>
    %c0_4 = arith.constant 0 : index
    %c0_5 = arith.constant 0 : index
    %5 = vector.load %arg5[%c0_4, %c0_5] : memref<1x384xf32, #tpu.memory_space<vmem>>, vector<1x384xf32>
    %c0_6 = arith.constant 0 : index
    %c0_7 = arith.constant 0 : index
    %6 = vector.load %arg6[%c0_6, %c0_7] : memref<1x128xf32, #tpu.memory_space<vmem>>, vector<1x128xf32>
    %c0_8 = arith.constant 0 : index
    %c0_9 = arith.constant 0 : index
    %c0_10 = arith.constant 0 : index
    %7 = vector.load %arg7[%c0_8, %c0_9, %c0_10] : memref<1x128x384xbf16, #tpu.memory_space<vmem>>, vector<1x128x384xbf16>
    %8 = vector.shape_cast %7 : vector<1x128x384xbf16> to vector<128x384xbf16>
    %c0_11 = arith.constant 0 : index
    %c0_12 = arith.constant 0 : index
    %c0_13 = arith.constant 0 : index
    %9 = vector.load %arg8[%c0_11, %c0_12, %c0_13] : memref<1x128x384xbf16, #tpu.memory_space<vmem>>, vector<1x128x384xbf16>
    %10 = vector.shape_cast %9 : vector<1x128x384xbf16> to vector<128x384xbf16>
    %c0_14 = arith.constant 0 : index
    %c0_15 = arith.constant 0 : index
    %c0_16 = arith.constant 0 : index
    %11 = vector.load %arg9[%c0_14, %c0_15, %c0_16] : memref<1x1x384xf32, #tpu.memory_space<vmem>>, vector<1x1x384xf32>
    %12 = vector.shape_cast %11 : vector<1x1x384xf32> to vector<1x384xf32>
    %c0_17 = arith.constant 0 : index
    %c0_18 = arith.constant 0 : index
    %c0_19 = arith.constant 0 : index
    %13 = vector.load %arg10[%c0_17, %c0_18, %c0_19] : memref<1x1x128xf32, #tpu.memory_space<vmem>>, vector<1x1x128xf32>
    %14 = vector.shape_cast %13 : vector<1x1x128xf32> to vector<1x128xf32>
    %c0_20 = arith.constant 0 : index
    %c0_21 = arith.constant 0 : index
    %c0_22 = arith.constant 0 : index
    %15 = vector.load %arg13[%c0_20, %c0_21, %c0_22] : memref<2x16x128xf32, #tpu.memory_space<vmem>>, vector<1x16x128xf32>
    %16 = vector.shape_cast %15 : vector<1x16x128xf32> to vector<16x128xf32>
    %c1 = arith.constant 1 : index
    %c0_23 = arith.constant 0 : index
    %c0_24 = arith.constant 0 : index
    %17 = vector.load %arg13[%c1, %c0_23, %c0_24] : memref<2x16x128xf32, #tpu.memory_space<vmem>>, vector<1x16x128xf32>
    %18 = vector.shape_cast %17 : vector<1x16x128xf32> to vector<16x128xf32>
    %c0_i32_25 = arith.constant 0 : i32
    %19 = arith.index_cast %c0_i32_25 : i32 to index
    %c0_26 = arith.constant 0 : index
    %c0_27 = arith.constant 0 : index
    %20 = vector.load %arg1[%19, %c0_26, %c0_27] : memref<8x16x128xbf16, #tpu.memory_space<vmem>>, vector<1x16x128xbf16>
    %21 = vector.shape_cast %20 : vector<1x16x128xbf16> to vector<16x128xbf16>
    %cst = arith.constant dense<0.000000e+00> : vector<16x384xf32>
    %22 = tpu.matmul %21, %3, %cst {dimension_numbers = #tpu.dot_dimension_numbers<[1], [0], [0], [1], [0, 0, 1, 1], [], []>} : vector<16x128xbf16>, vector<128x384xbf16>, vector<16x384xf32> -> vector<16x384xf32>
    %23 = vector.broadcast %5 : vector<1x384xf32> to vector<16x384xf32>
    %24 = arith.addf %22, %23 : vector<16x384xf32>
    %25 = arith.truncf %16 : vector<16x128xf32> to vector<16x128xbf16>
    %cst_28 = arith.constant dense<0.000000e+00> : vector<16x384xf32>
    %26 = tpu.matmul %25, %4, %cst_28 {dimension_numbers = #tpu.dot_dimension_numbers<[1], [0], [0], [1], [0, 0, 1, 1], [], []>} : vector<16x128xbf16>, vector<128x384xbf16>, vector<16x384xf32> -> vector<16x384xf32>
    %27 = vector.extract_strided_slice %24 {offsets = [0, 0], sizes = [16, 128], strides = [1, 1]} : vector<16x384xf32> to vector<16x128xf32>
    %28 = vector.extract_strided_slice %26 {offsets = [0, 0], sizes = [16, 128], strides = [1, 1]} : vector<16x384xf32> to vector<16x128xf32>
    %29 = arith.addf %27, %28 : vector<16x128xf32>
    %30 = arith.negf %29 : vector<16x128xf32>
    %31 = math.exp %30 : vector<16x128xf32>
    %cst_29 = arith.constant 1.000000e+00 : f32
    %32 = vector.broadcast %cst_29 : f32 to vector<16x128xf32>
    %33 = arith.addf %32, %31 : vector<16x128xf32>
    %34 = arith.divf %32, %33 : vector<16x128xf32>
    %35 = vector.extract_strided_slice %24 {offsets = [0, 128], sizes = [16, 128], strides = [1, 1]} : vector<16x384xf32> to vector<16x128xf32>
    %36 = vector.extract_strided_slice %26 {offsets = [0, 128], sizes = [16, 128], strides = [1, 1]} : vector<16x384xf32> to vector<16x128xf32>
    %37 = arith.addf %35, %36 : vector<16x128xf32>
    %38 = arith.negf %37 : vector<16x128xf32>
    %39 = math.exp %38 : vector<16x128xf32>
    %cst_30 = arith.constant 1.000000e+00 : f32
    %40 = vector.broadcast %cst_30 : f32 to vector<16x128xf32>
    %41 = arith.addf %40, %39 : vector<16x128xf32>
    %42 = arith.divf %40, %41 : vector<16x128xf32>
    %43 = vector.extract_strided_slice %24 {offsets = [0, 256], sizes = [16, 128], strides = [1, 1]} : vector<16x384xf32> to vector<16x128xf32>
    %44 = vector.extract_strided_slice %26 {offsets = [0, 256], sizes = [16, 128], strides = [1, 1]} : vector<16x384xf32> to vector<16x128xf32>
    %45 = vector.broadcast %6 : vector<1x128xf32> to vector<16x128xf32>
    %46 = arith.addf %44, %45 : vector<16x128xf32>
    %47 = arith.mulf %34, %46 : vector<16x128xf32>
    %48 = arith.addf %43, %47 : vector<16x128xf32>
    %49 = math.tanh %48 : vector<16x128xf32>
    %50 = arith.subf %16, %49 : vector<16x128xf32>
    %51 = arith.mulf %42, %50 : vector<16x128xf32>
    %52 = arith.addf %49, %51 : vector<16x128xf32>
    %53 = arith.truncf %52 : vector<16x128xf32> to vector<16x128xbf16>
    %cst_31 = arith.constant dense<0.000000e+00> : vector<16x384xf32>
    %54 = tpu.matmul %53, %8, %cst_31 {dimension_numbers = #tpu.dot_dimension_numbers<[1], [0], [0], [1], [0, 0, 1, 1], [], []>} : vector<16x128xbf16>, vector<128x384xbf16>, vector<16x384xf32> -> vector<16x384xf32>
    %55 = vector.broadcast %12 : vector<1x384xf32> to vector<16x384xf32>
    %56 = arith.addf %54, %55 : vector<16x384xf32>
    %57 = arith.truncf %18 : vector<16x128xf32> to vector<16x128xbf16>
    %cst_32 = arith.constant dense<0.000000e+00> : vector<16x384xf32>
    %58 = tpu.matmul %57, %10, %cst_32 {dimension_numbers = #tpu.dot_dimension_numbers<[1], [0], [0], [1], [0, 0, 1, 1], [], []>} : vector<16x128xbf16>, vector<128x384xbf16>, vector<16x384xf32> -> vector<16x384xf32>
    %59 = vector.extract_strided_slice %56 {offsets = [0, 0], sizes = [16, 128], strides = [1, 1]} : vector<16x384xf32> to vector<16x128xf32>
    %60 = vector.extract_strided_slice %58 {offsets = [0, 0], sizes = [16, 128], strides = [1, 1]} : vector<16x384xf32> to vector<16x128xf32>
    %61 = arith.addf %59, %60 : vector<16x128xf32>
    %62 = arith.negf %61 : vector<16x128xf32>
    %63 = math.exp %62 : vector<16x128xf32>
    %cst_33 = arith.constant 1.000000e+00 : f32
    %64 = vector.broadcast %cst_33 : f32 to vector<16x128xf32>
    %65 = arith.addf %64, %63 : vector<16x128xf32>
    %66 = arith.divf %64, %65 : vector<16x128xf32>
    %67 = vector.extract_strided_slice %56 {offsets = [0, 128], sizes = [16, 128], strides = [1, 1]} : vector<16x384xf32> to vector<16x128xf32>
    %68 = vector.extract_strided_slice %58 {offsets = [0, 128], sizes = [16, 128], strides = [1, 1]} : vector<16x384xf32> to vector<16x128xf32>
    %69 = arith.addf %67, %68 : vector<16x128xf32>
    %70 = arith.negf %69 : vector<16x128xf32>
    %71 = math.exp %70 : vector<16x128xf32>
    %cst_34 = arith.constant 1.000000e+00 : f32
    %72 = vector.broadcast %cst_34 : f32 to vector<16x128xf32>
    %73 = arith.addf %72, %71 : vector<16x128xf32>
    %74 = arith.divf %72, %73 : vector<16x128xf32>
    %75 = vector.extract_strided_slice %56 {offsets = [0, 256], sizes = [16, 128], strides = [1, 1]} : vector<16x384xf32> to vector<16x128xf32>
    %76 = vector.extract_strided_slice %58 {offsets = [0, 256], sizes = [16, 128], strides = [1, 1]} : vector<16x384xf32> to vector<16x128xf32>
    %77 = vector.broadcast %14 : vector<1x128xf32> to vector<16x128xf32>
    %78 = arith.addf %76, %77 : vector<16x128xf32>
    %79 = arith.mulf %66, %78 : vector<16x128xf32>
    %80 = arith.addf %75, %79 : vector<16x128xf32>
    %81 = math.tanh %80 : vector<16x128xf32>
    %82 = arith.subf %18, %81 : vector<16x128xf32>
    %83 = arith.mulf %74, %82 : vector<16x128xf32>
    %84 = arith.addf %81, %83 : vector<16x128xf32>
    %85 = arith.index_cast %c0_i32_25 : i32 to index
    %c0_35 = arith.constant 0 : index
    %c0_36 = arith.constant 0 : index
    %86 = vector.load %arg11[%85, %c0_35, %c0_36] : memref<8x16x128xf32, #tpu.memory_space<vmem>>, vector<1x16x128xf32>
    %87 = vector.shape_cast %86 : vector<1x16x128xf32> to vector<16x128xf32>
    %88 = vector.shape_cast %84 : vector<16x128xf32> to vector<1x16x128xf32>
    tpu.vector_store %arg11[%85, %c0_35, %c0_36], %88 {strides = array<i32>} : memref<8x16x128xf32, #tpu.memory_space<vmem>>, vector<1x16x128xf32>,
    %c1_i32 = arith.constant 1 : i32
    %89 = arith.index_cast %c1_i32 : i32 to index
    %c0_37 = arith.constant 0 : index
    %c0_38 = arith.constant 0 : index
    %90 = vector.load %arg1[%89, %c0_37, %c0_38] : memref<8x16x128xbf16, #tpu.memory_space<vmem>>, vector<1x16x128xbf16>
    %91 = vector.shape_cast %90 : vector<1x16x128xbf16> to vector<16x128xbf16>
    %cst_39 = arith.constant dense<0.000000e+00> : vector<16x384xf32>
    %92 = tpu.matmul %91, %3, %cst_39 {dimension_numbers = #tpu.dot_dimension_numbers<[1], [0], [0], [1], [0, 0, 1, 1], [], []>} : vector<16x128xbf16>, vector<128x384xbf16>, vector<16x384xf32> -> vector<16x384xf32>
    %93 = vector.broadcast %5 : vector<1x384xf32> to vector<16x384xf32>
    %94 = arith.addf %92, %93 : vector<16x384xf32>
    %95 = arith.truncf %52 : vector<16x128xf32> to vector<16x128xbf16>
    %cst_40 = arith.constant dense<0.000000e+00> : vector<16x384xf32>
    %96 = tpu.matmul %95, %4, %cst_40 {dimension_numbers = #tpu.dot_dimension_numbers<[1], [0], [0], [1], [0, 0, 1, 1], [], []>} : vector<16x128xbf16>, vector<128x384xbf16>, vector<16x384xf32> -> vector<16x384xf32>
    %97 = vector.extract_strided_slice %94 {offsets = [0, 0], sizes = [16, 128], strides = [1, 1]} : vector<16x384xf32> to vector<16x128xf32>
    %98 = vector.extract_strided_slice %96 {offsets = [0, 0], sizes = [16, 128], strides = [1, 1]} : vector<16x384xf32> to vector<16x128xf32>
    %99 = arith.addf %97, %98 : vector<16x128xf32>
    %100 = arith.negf %99 : vector<16x128xf32>
    %101 = math.exp %100 : vector<16x128xf32>
    %cst_41 = arith.constant 1.000000e+00 : f32
    %102 = vector.broadcast %cst_41 : f32 to vector<16x128xf32>
    %103 = arith.addf %102, %101 : vector<16x128xf32>
    %104 = arith.divf %102, %103 : vector<16x128xf32>
    %105 = vector.extract_strided_slice %94 {offsets = [0, 128], sizes = [16, 128], strides = [1, 1]} : vector<16x384xf32> to vector<16x128xf32>
    %106 = vector.extract_strided_slice %96 {offsets = [0, 128], sizes = [16, 128], strides = [1, 1]} : vector<16x384xf32> to vector<16x128xf32>
    %107 = arith.addf %105, %106 : vector<16x128xf32>
    %108 = arith.negf %107 : vector<16x128xf32>
    %109 = math.exp %108 : vector<16x128xf32>
    %cst_42 = arith.constant 1.000000e+00 : f32
    %110 = vector.broadcast %cst_42 : f32 to vector<16x128xf32>
    %111 = arith.addf %110, %109 : vector<16x128xf32>
    %112 = arith.divf %110, %111 : vector<16x128xf32>
    %113 = vector.extract_strided_slice %94 {offsets = [0, 256], sizes = [16, 128], strides = [1, 1]} : vector<16x384xf32> to vector<16x128xf32>
    %114 = vector.extract_strided_slice %96 {offsets = [0, 256], sizes = [16, 128], strides = [1, 1]} : vector<16x384xf32> to vector<16x128xf32>
    %115 = vector.broadcast %6 : vector<1x128xf32> to vector<16x128xf32>
    %116 = arith.addf %114, %115 : vector<16x128xf32>
    %117 = arith.mulf %104, %116 : vector<16x128xf32>
    %118 = arith.addf %113, %117 : vector<16x128xf32>
    %119 = math.tanh %118 : vector<16x128xf32>
    %120 = arith.subf %52, %119 : vector<16x128xf32>
    %121 = arith.mulf %112, %120 : vector<16x128xf32>
    %122 = arith.addf %119, %121 : vector<16x128xf32>
    %123 = arith.truncf %122 : vector<16x128xf32> to vector<16x128xbf16>
    %cst_43 = arith.constant dense<0.000000e+00> : vector<16x384xf32>
    %124 = tpu.matmul %123, %8, %cst_43 {dimension_numbers = #tpu.dot_dimension_numbers<[1], [0], [0], [1], [0, 0, 1, 1], [], []>} : vector<16x128xbf16>, vector<128x384xbf16>, vector<16x384xf32> -> vector<16x384xf32>
    %125 = vector.broadcast %12 : vector<1x384xf32> to vector<16x384xf32>
    %126 = arith.addf %124, %125 : vector<16x384xf32>
    %127 = arith.truncf %84 : vector<16x128xf32> to vector<16x128xbf16>
    %cst_44 = arith.constant dense<0.000000e+00> : vector<16x384xf32>
    %128 = tpu.matmul %127, %10, %cst_44 {dimension_numbers = #tpu.dot_dimension_numbers<[1], [0], [0], [1], [0, 0, 1, 1], [], []>} : vector<16x128xbf16>, vector<128x384xbf16>, vector<16x384xf32> -> vector<16x384xf32>
    %129 = vector.extract_strided_slice %126 {offsets = [0, 0], sizes = [16, 128], strides = [1, 1]} : vector<16x384xf32> to vector<16x128xf32>
    %130 = vector.extract_strided_slice %128 {offsets = [0, 0], sizes = [16, 128], strides = [1, 1]} : vector<16x384xf32> to vector<16x128xf32>
    %131 = arith.addf %129, %130 : vector<16x128xf32>
    %132 = arith.negf %131 : vector<16x128xf32>
    %133 = math.exp %132 : vector<16x128xf32>
    %cst_45 = arith.constant 1.000000e+00 : f32
    %134 = vector.broadcast %cst_45 : f32 to vector<16x128xf32>
    %135 = arith.addf %134, %133 : vector<16x128xf32>
    %136 = arith.divf %134, %135 : vector<16x128xf32>
    %137 = vector.extract_strided_slice %126 {offsets = [0, 128], sizes = [16, 128], strides = [1, 1]} : vector<16x384xf32> to vector<16x128xf32>
    %138 = vector.extract_strided_slice %128 {offsets = [0, 128], sizes = [16, 128], strides = [1, 1]} : vector<16x384xf32> to vector<16x128xf32>
    %139 = arith.addf %137, %138 : vector<16x128xf32>
    %140 = arith.negf %139 : vector<16x128xf32>
    %141 = math.exp %140 : vector<16x128xf32>
    %cst_46 = arith.constant 1.000000e+00 : f32
    %142 = vector.broadcast %cst_46 : f32 to vector<16x128xf32>
    %143 = arith.addf %142, %141 : vector<16x128xf32>
    %144 = arith.divf %142, %143 : vector<16x128xf32>
    %145 = vector.extract_strided_slice %126 {offsets = [0, 256], sizes = [16, 128], strides = [1, 1]} : vector<16x384xf32> to vector<16x128xf32>
    %146 = vector.extract_strided_slice %128 {offsets = [0, 256], sizes = [16, 128], strides = [1, 1]} : vector<16x384xf32> to vector<16x128xf32>
    %147 = vector.broadcast %14 : vector<1x128xf32> to vector<16x128xf32>
    %148 = arith.addf %146, %147 : vector<16x128xf32>
    %149 = arith.mulf %136, %148 : vector<16x128xf32>
    %150 = arith.addf %145, %149 : vector<16x128xf32>
    %151 = math.tanh %150 : vector<16x128xf32>
    %152 = arith.subf %84, %151 : vector<16x128xf32>
    %153 = arith.mulf %144, %152 : vector<16x128xf32>
    %154 = arith.addf %151, %153 : vector<16x128xf32>
    %155 = arith.index_cast %c1_i32 : i32 to index
    %c0_47 = arith.constant 0 : index
    %c0_48 = arith.constant 0 : index
    %156 = vector.load %arg11[%155, %c0_47, %c0_48] : memref<8x16x128xf32, #tpu.memory_space<vmem>>, vector<1x16x128xf32>
    %157 = vector.shape_cast %156 : vector<1x16x128xf32> to vector<16x128xf32>
    %158 = vector.shape_cast %154 : vector<16x128xf32> to vector<1x16x128xf32>
    tpu.vector_store %arg11[%155, %c0_47, %c0_48], %158 {strides = array<i32>} : memref<8x16x128xf32, #tpu.memory_space<vmem>>, vector<1x16x128xf32>,
    %c2_i32 = arith.constant 2 : i32
    %159 = arith.index_cast %c2_i32 : i32 to index
    %c0_49 = arith.constant 0 : index
    %c0_50 = arith.constant 0 : index
    %160 = vector.load %arg1[%159, %c0_49, %c0_50] : memref<8x16x128xbf16, #tpu.memory_space<vmem>>, vector<1x16x128xbf16>
    %161 = vector.shape_cast %160 : vector<1x16x128xbf16> to vector<16x128xbf16>
    %cst_51 = arith.constant dense<0.000000e+00> : vector<16x384xf32>
    %162 = tpu.matmul %161, %3, %cst_51 {dimension_numbers = #tpu.dot_dimension_numbers<[1], [0], [0], [1], [0, 0, 1, 1], [], []>} : vector<16x128xbf16>, vector<128x384xbf16>, vector<16x384xf32> -> vector<16x384xf32>
    %163 = vector.broadcast %5 : vector<1x384xf32> to vector<16x384xf32>
    %164 = arith.addf %162, %163 : vector<16x384xf32>
    %165 = arith.truncf %122 : vector<16x128xf32> to vector<16x128xbf16>
    %cst_52 = arith.constant dense<0.000000e+00> : vector<16x384xf32>
    %166 = tpu.matmul %165, %4, %cst_52 {dimension_numbers = #tpu.dot_dimension_numbers<[1], [0], [0], [1], [0, 0, 1, 1], [], []>} : vector<16x128xbf16>, vector<128x384xbf16>, vector<16x384xf32> -> vector<16x384xf32>
    %167 = vector.extract_strided_slice %164 {offsets = [0, 0], sizes = [16, 128], strides = [1, 1]} : vector<16x384xf32> to vector<16x128xf32>
    %168 = vector.extract_strided_slice %166 {offsets = [0, 0], sizes = [16, 128], strides = [1, 1]} : vector<16x384xf32> to vector<16x128xf32>
    %169 = arith.addf %167, %168 : vector<16x128xf32>
    %170 = arith.negf %169 : vector<16x128xf32>
    %171 = math.exp %170 : vector<16x128xf32>
    %cst_53 = arith.constant 1.000000e+00 : f32
    %172 = vector.broadcast %cst_53 : f32 to vector<16x128xf32>
    %173 = arith.addf %172, %171 : vector<16x128xf32>
    %174 = arith.divf %172, %173 : vector<16x128xf32>
    %175 = vector.extract_strided_slice %164 {offsets = [0, 128], sizes = [16, 128], strides = [1, 1]} : vector<16x384xf32> to vector<16x128xf32>
    %176 = vector.extract_strided_slice %166 {offsets = [0, 128], sizes = [16, 128], strides = [1, 1]} : vector<16x384xf32> to vector<16x128xf32>
    %177 = arith.addf %175, %176 : vector<16x128xf32>
    %178 = arith.negf %177 : vector<16x128xf32>
    %179 = math.exp %178 : vector<16x128xf32>
    %cst_54 = arith.constant 1.000000e+00 : f32
    %180 = vector.broadcast %cst_54 : f32 to vector<16x128xf32>
    %181 = arith.addf %180, %179 : vector<16x128xf32>
    %182 = arith.divf %180, %181 : vector<16x128xf32>
    %183 = vector.extract_strided_slice %164 {offsets = [0, 256], sizes = [16, 128], strides = [1, 1]} : vector<16x384xf32> to vector<16x128xf32>
    %184 = vector.extract_strided_slice %166 {offsets = [0, 256], sizes = [16, 128], strides = [1, 1]} : vector<16x384xf32> to vector<16x128xf32>
    %185 = vector.broadcast %6 : vector<1x128xf32> to vector<16x128xf32>
    %186 = arith.addf %184, %185 : vector<16x128xf32>
    %187 = arith.mulf %174, %186 : vector<16x128xf32>
    %188 = arith.addf %183, %187 : vector<16x128xf32>
    %189 = math.tanh %188 : vector<16x128xf32>
    %190 = arith.subf %122, %189 : vector<16x128xf32>
    %191 = arith.mulf %182, %190 : vector<16x128xf32>
    %192 = arith.addf %189, %191 : vector<16x128xf32>
    %193 = arith.truncf %192 : vector<16x128xf32> to vector<16x128xbf16>
    %cst_55 = arith.constant dense<0.000000e+00> : vector<16x384xf32>
    %194 = tpu.matmul %193, %8, %cst_55 {dimension_numbers = #tpu.dot_dimension_numbers<[1], [0], [0], [1], [0, 0, 1, 1], [], []>} : vector<16x128xbf16>, vector<128x384xbf16>, vector<16x384xf32> -> vector<16x384xf32>
    %195 = vector.broadcast %12 : vector<1x384xf32> to vector<16x384xf32>
    %196 = arith.addf %194, %195 : vector<16x384xf32>
    %197 = arith.truncf %154 : vector<16x128xf32> to vector<16x128xbf16>
    %cst_56 = arith.constant dense<0.000000e+00> : vector<16x384xf32>
    %198 = tpu.matmul %197, %10, %cst_56 {dimension_numbers = #tpu.dot_dimension_numbers<[1], [0], [0], [1], [0, 0, 1, 1], [], []>} : vector<16x128xbf16>, vector<128x384xbf16>, vector<16x384xf32> -> vector<16x384xf32>
    %199 = vector.extract_strided_slice %196 {offsets = [0, 0], sizes = [16, 128], strides = [1, 1]} : vector<16x384xf32> to vector<16x128xf32>
    %200 = vector.extract_strided_slice %198 {offsets = [0, 0], sizes = [16, 128], strides = [1, 1]} : vector<16x384xf32> to vector<16x128xf32>
    %201 = arith.addf %199, %200 : vector<16x128xf32>
    %202 = arith.negf %201 : vector<16x128xf32>
    %203 = math.exp %202 : vector<16x128xf32>
    %cst_57 = arith.constant 1.000000e+00 : f32
    %204 = vector.broadcast %cst_57 : f32 to vector<16x128xf32>
    %205 = arith.addf %204, %203 : vector<16x128xf32>
    %206 = arith.divf %204, %205 : vector<16x128xf32>
    %207 = vector.extract_strided_slice %196 {offsets = [0, 128], sizes = [16, 128], strides = [1, 1]} : vector<16x384xf32> to vector<16x128xf32>
    %208 = vector.extract_strided_slice %198 {offsets = [0, 128], sizes = [16, 128], strides = [1, 1]} : vector<16x384xf32> to vector<16x128xf32>
    %209 = arith.addf %207, %208 : vector<16x128xf32>
    %210 = arith.negf %209 : vector<16x128xf32>
    %211 = math.exp %210 : vector<16x128xf32>
    %cst_58 = arith.constant 1.000000e+00 : f32
    %212 = vector.broadcast %cst_58 : f32 to vector<16x128xf32>
    %213 = arith.addf %212, %211 : vector<16x128xf32>
    %214 = arith.divf %212, %213 : vector<16x128xf32>
    %215 = vector.extract_strided_slice %196 {offsets = [0, 256], sizes = [16, 128], strides = [1, 1]} : vector<16x384xf32> to vector<16x128xf32>
    %216 = vector.extract_strided_slice %198 {offsets = [0, 256], sizes = [16, 128], strides = [1, 1]} : vector<16x384xf32> to vector<16x128xf32>
    %217 = vector.broadcast %14 : vector<1x128xf32> to vector<16x128xf32>
    %218 = arith.addf %216, %217 : vector<16x128xf32>
    %219 = arith.mulf %206, %218 : vector<16x128xf32>
    %220 = arith.addf %215, %219 : vector<16x128xf32>
    %221 = math.tanh %220 : vector<16x128xf32>
    %222 = arith.subf %154, %221 : vector<16x128xf32>
    %223 = arith.mulf %214, %222 : vector<16x128xf32>
    %224 = arith.addf %221, %223 : vector<16x128xf32>
    %225 = arith.index_cast %c2_i32 : i32 to index
    %c0_59 = arith.constant 0 : index
    %c0_60 = arith.constant 0 : index
    %226 = vector.load %arg11[%225, %c0_59, %c0_60] : memref<8x16x128xf32, #tpu.memory_space<vmem>>, vector<1x16x128xf32>
    %227 = vector.shape_cast %226 : vector<1x16x128xf32> to vector<16x128xf32>
    %228 = vector.shape_cast %224 : vector<16x128xf32> to vector<1x16x128xf32>
    tpu.vector_store %arg11[%225, %c0_59, %c0_60], %228 {strides = array<i32>} : memref<8x16x128xf32, #tpu.memory_space<vmem>>, vector<1x16x128xf32>,
    %c3_i32 = arith.constant 3 : i32
    %229 = arith.index_cast %c3_i32 : i32 to index
    %c0_61 = arith.constant 0 : index
    %c0_62 = arith.constant 0 : index
    %230 = vector.load %arg1[%229, %c0_61, %c0_62] : memref<8x16x128xbf16, #tpu.memory_space<vmem>>, vector<1x16x128xbf16>
    %231 = vector.shape_cast %230 : vector<1x16x128xbf16> to vector<16x128xbf16>
    %cst_63 = arith.constant dense<0.000000e+00> : vector<16x384xf32>
    %232 = tpu.matmul %231, %3, %cst_63 {dimension_numbers = #tpu.dot_dimension_numbers<[1], [0], [0], [1], [0, 0, 1, 1], [], []>} : vector<16x128xbf16>, vector<128x384xbf16>, vector<16x384xf32> -> vector<16x384xf32>
    %233 = vector.broadcast %5 : vector<1x384xf32> to vector<16x384xf32>
    %234 = arith.addf %232, %233 : vector<16x384xf32>
    %235 = arith.truncf %192 : vector<16x128xf32> to vector<16x128xbf16>
    %cst_64 = arith.constant dense<0.000000e+00> : vector<16x384xf32>
    %236 = tpu.matmul %235, %4, %cst_64 {dimension_numbers = #tpu.dot_dimension_numbers<[1], [0], [0], [1], [0, 0, 1, 1], [], []>} : vector<16x128xbf16>, vector<128x384xbf16>, vector<16x384xf32> -> vector<16x384xf32>
    %237 = vector.extract_strided_slice %234 {offsets = [0, 0], sizes = [16, 128], strides = [1, 1]} : vector<16x384xf32> to vector<16x128xf32>
    %238 = vector.extract_strided_slice %236 {offsets = [0, 0], sizes = [16, 128], strides = [1, 1]} : vector<16x384xf32> to vector<16x128xf32>
    %239 = arith.addf %237, %238 : vector<16x128xf32>
    %240 = arith.negf %239 : vector<16x128xf32>
    %241 = math.exp %240 : vector<16x128xf32>
    %cst_65 = arith.constant 1.000000e+00 : f32
    %242 = vector.broadcast %cst_65 : f32 to vector<16x128xf32>
    %243 = arith.addf %242, %241 : vector<16x128xf32>
    %244 = arith.divf %242, %243 : vector<16x128xf32>
    %245 = vector.extract_strided_slice %234 {offsets = [0, 128], sizes = [16, 128], strides = [1, 1]} : vector<16x384xf32> to vector<16x128xf32>
    %246 = vector.extract_strided_slice %236 {offsets = [0, 128], sizes = [16, 128], strides = [1, 1]} : vector<16x384xf32> to vector<16x128xf32>
    %247 = arith.addf %245, %246 : vector<16x128xf32>
    %248 = arith.negf %247 : vector<16x128xf32>
    %249 = math.exp %248 : vector<16x128xf32>
    %cst_66 = arith.constant 1.000000e+00 : f32
    %250 = vector.broadcast %cst_66 : f32 to vector<16x128xf32>
    %251 = arith.addf %250, %249 : vector<16x128xf32>
    %252 = arith.divf %250, %251 : vector<16x128xf32>
    %253 = vector.extract_strided_slice %234 {offsets = [0, 256], sizes = [16, 128], strides = [1, 1]} : vector<16x384xf32> to vector<16x128xf32>
    %254 = vector.extract_strided_slice %236 {offsets = [0, 256], sizes = [16, 128], strides = [1, 1]} : vector<16x384xf32> to vector<16x128xf32>
    %255 = vector.broadcast %6 : vector<1x128xf32> to vector<16x128xf32>
    %256 = arith.addf %254, %255 : vector<16x128xf32>
    %257 = arith.mulf %244, %256 : vector<16x128xf32>
    %258 = arith.addf %253, %257 : vector<16x128xf32>
    %259 = math.tanh %258 : vector<16x128xf32>
    %260 = arith.subf %192, %259 : vector<16x128xf32>
    %261 = arith.mulf %252, %260 : vector<16x128xf32>
    %262 = arith.addf %259, %261 : vector<16x128xf32>
    %263 = arith.truncf %262 : vector<16x128xf32> to vector<16x128xbf16>
    %cst_67 = arith.constant dense<0.000000e+00> : vector<16x384xf32>
    %264 = tpu.matmul %263, %8, %cst_67 {dimension_numbers = #tpu.dot_dimension_numbers<[1], [0], [0], [1], [0, 0, 1, 1], [], []>} : vector<16x128xbf16>, vector<128x384xbf16>, vector<16x384xf32> -> vector<16x384xf32>
    %265 = vector.broadcast %12 : vector<1x384xf32> to vector<16x384xf32>
    %266 = arith.addf %264, %265 : vector<16x384xf32>
    %267 = arith.truncf %224 : vector<16x128xf32> to vector<16x128xbf16>
    %cst_68 = arith.constant dense<0.000000e+00> : vector<16x384xf32>
    %268 = tpu.matmul %267, %10, %cst_68 {dimension_numbers = #tpu.dot_dimension_numbers<[1], [0], [0], [1], [0, 0, 1, 1], [], []>} : vector<16x128xbf16>, vector<128x384xbf16>, vector<16x384xf32> -> vector<16x384xf32>
    %269 = vector.extract_strided_slice %266 {offsets = [0, 0], sizes = [16, 128], strides = [1, 1]} : vector<16x384xf32> to vector<16x128xf32>
    %270 = vector.extract_strided_slice %268 {offsets = [0, 0], sizes = [16, 128], strides = [1, 1]} : vector<16x384xf32> to vector<16x128xf32>
    %271 = arith.addf %269, %270 : vector<16x128xf32>
    %272 = arith.negf %271 : vector<16x128xf32>
    %273 = math.exp %272 : vector<16x128xf32>
    %cst_69 = arith.constant 1.000000e+00 : f32
    %274 = vector.broadcast %cst_69 : f32 to vector<16x128xf32>
    %275 = arith.addf %274, %273 : vector<16x128xf32>
    %276 = arith.divf %274, %275 : vector<16x128xf32>
    %277 = vector.extract_strided_slice %266 {offsets = [0, 128], sizes = [16, 128], strides = [1, 1]} : vector<16x384xf32> to vector<16x128xf32>
    %278 = vector.extract_strided_slice %268 {offsets = [0, 128], sizes = [16, 128], strides = [1, 1]} : vector<16x384xf32> to vector<16x128xf32>
    %279 = arith.addf %277, %278 : vector<16x128xf32>
    %280 = arith.negf %279 : vector<16x128xf32>
    %281 = math.exp %280 : vector<16x128xf32>
    %cst_70 = arith.constant 1.000000e+00 : f32
    %282 = vector.broadcast %cst_70 : f32 to vector<16x128xf32>
    %283 = arith.addf %282, %281 : vector<16x128xf32>
    %284 = arith.divf %282, %283 : vector<16x128xf32>
    %285 = vector.extract_strided_slice %266 {offsets = [0, 256], sizes = [16, 128], strides = [1, 1]} : vector<16x384xf32> to vector<16x128xf32>
    %286 = vector.extract_strided_slice %268 {offsets = [0, 256], sizes = [16, 128], strides = [1, 1]} : vector<16x384xf32> to vector<16x128xf32>
    %287 = vector.broadcast %14 : vector<1x128xf32> to vector<16x128xf32>
    %288 = arith.addf %286, %287 : vector<16x128xf32>
    %289 = arith.mulf %276, %288 : vector<16x128xf32>
    %290 = arith.addf %285, %289 : vector<16x128xf32>
    %291 = math.tanh %290 : vector<16x128xf32>
    %292 = arith.subf %224, %291 : vector<16x128xf32>
    %293 = arith.mulf %284, %292 : vector<16x128xf32>
    %294 = arith.addf %291, %293 : vector<16x128xf32>
    %295 = arith.index_cast %c3_i32 : i32 to index
    %c0_71 = arith.constant 0 : index
    %c0_72 = arith.constant 0 : index
    %296 = vector.load %arg11[%295, %c0_71, %c0_72] : memref<8x16x128xf32, #tpu.memory_space<vmem>>, vector<1x16x128xf32>
    %297 = vector.shape_cast %296 : vector<1x16x128xf32> to vector<16x128xf32>
    %298 = vector.shape_cast %294 : vector<16x128xf32> to vector<1x16x128xf32>
    tpu.vector_store %arg11[%295, %c0_71, %c0_72], %298 {strides = array<i32>} : memref<8x16x128xf32, #tpu.memory_space<vmem>>, vector<1x16x128xf32>,
    %c4_i32 = arith.constant 4 : i32
    %299 = arith.index_cast %c4_i32 : i32 to index
    %c0_73 = arith.constant 0 : index
    %c0_74 = arith.constant 0 : index
    %300 = vector.load %arg1[%299, %c0_73, %c0_74] : memref<8x16x128xbf16, #tpu.memory_space<vmem>>, vector<1x16x128xbf16>
    %301 = vector.shape_cast %300 : vector<1x16x128xbf16> to vector<16x128xbf16>
    %cst_75 = arith.constant dense<0.000000e+00> : vector<16x384xf32>
    %302 = tpu.matmul %301, %3, %cst_75 {dimension_numbers = #tpu.dot_dimension_numbers<[1], [0], [0], [1], [0, 0, 1, 1], [], []>} : vector<16x128xbf16>, vector<128x384xbf16>, vector<16x384xf32> -> vector<16x384xf32>
    %303 = vector.broadcast %5 : vector<1x384xf32> to vector<16x384xf32>
    %304 = arith.addf %302, %303 : vector<16x384xf32>
    %305 = arith.truncf %262 : vector<16x128xf32> to vector<16x128xbf16>
    %cst_76 = arith.constant dense<0.000000e+00> : vector<16x384xf32>
    %306 = tpu.matmul %305, %4, %cst_76 {dimension_numbers = #tpu.dot_dimension_numbers<[1], [0], [0], [1], [0, 0, 1, 1], [], []>} : vector<16x128xbf16>, vector<128x384xbf16>, vector<16x384xf32> -> vector<16x384xf32>
    %307 = vector.extract_strided_slice %304 {offsets = [0, 0], sizes = [16, 128], strides = [1, 1]} : vector<16x384xf32> to vector<16x128xf32>
    %308 = vector.extract_strided_slice %306 {offsets = [0, 0], sizes = [16, 128], strides = [1, 1]} : vector<16x384xf32> to vector<16x128xf32>
    %309 = arith.addf %307, %308 : vector<16x128xf32>
    %310 = arith.negf %309 : vector<16x128xf32>
    %311 = math.exp %310 : vector<16x128xf32>
    %cst_77 = arith.constant 1.000000e+00 : f32
    %312 = vector.broadcast %cst_77 : f32 to vector<16x128xf32>
    %313 = arith.addf %312, %311 : vector<16x128xf32>
    %314 = arith.divf %312, %313 : vector<16x128xf32>
    %315 = vector.extract_strided_slice %304 {offsets = [0, 128], sizes = [16, 128], strides = [1, 1]} : vector<16x384xf32> to vector<16x128xf32>
    %316 = vector.extract_strided_slice %306 {offsets = [0, 128], sizes = [16, 128], strides = [1, 1]} : vector<16x384xf32> to vector<16x128xf32>
    %317 = arith.addf %315, %316 : vector<16x128xf32>
    %318 = arith.negf %317 : vector<16x128xf32>
    %319 = math.exp %318 : vector<16x128xf32>
    %cst_78 = arith.constant 1.000000e+00 : f32
    %320 = vector.broadcast %cst_78 : f32 to vector<16x128xf32>
    %321 = arith.addf %320, %319 : vector<16x128xf32>
    %322 = arith.divf %320, %321 : vector<16x128xf32>
    %323 = vector.extract_strided_slice %304 {offsets = [0, 256], sizes = [16, 128], strides = [1, 1]} : vector<16x384xf32> to vector<16x128xf32>
    %324 = vector.extract_strided_slice %306 {offsets = [0, 256], sizes = [16, 128], strides = [1, 1]} : vector<16x384xf32> to vector<16x128xf32>
    %325 = vector.broadcast %6 : vector<1x128xf32> to vector<16x128xf32>
    %326 = arith.addf %324, %325 : vector<16x128xf32>
    %327 = arith.mulf %314, %326 : vector<16x128xf32>
    %328 = arith.addf %323, %327 : vector<16x128xf32>
    %329 = math.tanh %328 : vector<16x128xf32>
    %330 = arith.subf %262, %329 : vector<16x128xf32>
    %331 = arith.mulf %322, %330 : vector<16x128xf32>
    %332 = arith.addf %329, %331 : vector<16x128xf32>
    %333 = arith.truncf %332 : vector<16x128xf32> to vector<16x128xbf16>
    %cst_79 = arith.constant dense<0.000000e+00> : vector<16x384xf32>
    %334 = tpu.matmul %333, %8, %cst_79 {dimension_numbers = #tpu.dot_dimension_numbers<[1], [0], [0], [1], [0, 0, 1, 1], [], []>} : vector<16x128xbf16>, vector<128x384xbf16>, vector<16x384xf32> -> vector<16x384xf32>
    %335 = vector.broadcast %12 : vector<1x384xf32> to vector<16x384xf32>
    %336 = arith.addf %334, %335 : vector<16x384xf32>
    %337 = arith.truncf %294 : vector<16x128xf32> to vector<16x128xbf16>
    %cst_80 = arith.constant dense<0.000000e+00> : vector<16x384xf32>
    %338 = tpu.matmul %337, %10, %cst_80 {dimension_numbers = #tpu.dot_dimension_numbers<[1], [0], [0], [1], [0, 0, 1, 1], [], []>} : vector<16x128xbf16>, vector<128x384xbf16>, vector<16x384xf32> -> vector<16x384xf32>
    %339 = vector.extract_strided_slice %336 {offsets = [0, 0], sizes = [16, 128], strides = [1, 1]} : vector<16x384xf32> to vector<16x128xf32>
    %340 = vector.extract_strided_slice %338 {offsets = [0, 0], sizes = [16, 128], strides = [1, 1]} : vector<16x384xf32> to vector<16x128xf32>
    %341 = arith.addf %339, %340 : vector<16x128xf32>
    %342 = arith.negf %341 : vector<16x128xf32>
    %343 = math.exp %342 : vector<16x128xf32>
    %cst_81 = arith.constant 1.000000e+00 : f32
    %344 = vector.broadcast %cst_81 : f32 to vector<16x128xf32>
    %345 = arith.addf %344, %343 : vector<16x128xf32>
    %346 = arith.divf %344, %345 : vector<16x128xf32>
    %347 = vector.extract_strided_slice %336 {offsets = [0, 128], sizes = [16, 128], strides = [1, 1]} : vector<16x384xf32> to vector<16x128xf32>
    %348 = vector.extract_strided_slice %338 {offsets = [0, 128], sizes = [16, 128], strides = [1, 1]} : vector<16x384xf32> to vector<16x128xf32>
    %349 = arith.addf %347, %348 : vector<16x128xf32>
    %350 = arith.negf %349 : vector<16x128xf32>
    %351 = math.exp %350 : vector<16x128xf32>
    %cst_82 = arith.constant 1.000000e+00 : f32
    %352 = vector.broadcast %cst_82 : f32 to vector<16x128xf32>
    %353 = arith.addf %352, %351 : vector<16x128xf32>
    %354 = arith.divf %352, %353 : vector<16x128xf32>
    %355 = vector.extract_strided_slice %336 {offsets = [0, 256], sizes = [16, 128], strides = [1, 1]} : vector<16x384xf32> to vector<16x128xf32>
    %356 = vector.extract_strided_slice %338 {offsets = [0, 256], sizes = [16, 128], strides = [1, 1]} : vector<16x384xf32> to vector<16x128xf32>
    %357 = vector.broadcast %14 : vector<1x128xf32> to vector<16x128xf32>
    %358 = arith.addf %356, %357 : vector<16x128xf32>
    %359 = arith.mulf %346, %358 : vector<16x128xf32>
    %360 = arith.addf %355, %359 : vector<16x128xf32>
    %361 = math.tanh %360 : vector<16x128xf32>
    %362 = arith.subf %294, %361 : vector<16x128xf32>
    %363 = arith.mulf %354, %362 : vector<16x128xf32>
    %364 = arith.addf %361, %363 : vector<16x128xf32>
    %365 = arith.index_cast %c4_i32 : i32 to index
    %c0_83 = arith.constant 0 : index
    %c0_84 = arith.constant 0 : index
    %366 = vector.load %arg11[%365, %c0_83, %c0_84] : memref<8x16x128xf32, #tpu.memory_space<vmem>>, vector<1x16x128xf32>
    %367 = vector.shape_cast %366 : vector<1x16x128xf32> to vector<16x128xf32>
    %368 = vector.shape_cast %364 : vector<16x128xf32> to vector<1x16x128xf32>
    tpu.vector_store %arg11[%365, %c0_83, %c0_84], %368 {strides = array<i32>} : memref<8x16x128xf32, #tpu.memory_space<vmem>>, vector<1x16x128xf32>,
    %c5_i32 = arith.constant 5 : i32
    %369 = arith.index_cast %c5_i32 : i32 to index
    %c0_85 = arith.constant 0 : index
    %c0_86 = arith.constant 0 : index
    %370 = vector.load %arg1[%369, %c0_85, %c0_86] : memref<8x16x128xbf16, #tpu.memory_space<vmem>>, vector<1x16x128xbf16>
    %371 = vector.shape_cast %370 : vector<1x16x128xbf16> to vector<16x128xbf16>
    %cst_87 = arith.constant dense<0.000000e+00> : vector<16x384xf32>
    %372 = tpu.matmul %371, %3, %cst_87 {dimension_numbers = #tpu.dot_dimension_numbers<[1], [0], [0], [1], [0, 0, 1, 1], [], []>} : vector<16x128xbf16>, vector<128x384xbf16>, vector<16x384xf32> -> vector<16x384xf32>
    %373 = vector.broadcast %5 : vector<1x384xf32> to vector<16x384xf32>
    %374 = arith.addf %372, %373 : vector<16x384xf32>
    %375 = arith.truncf %332 : vector<16x128xf32> to vector<16x128xbf16>
    %cst_88 = arith.constant dense<0.000000e+00> : vector<16x384xf32>
    %376 = tpu.matmul %375, %4, %cst_88 {dimension_numbers = #tpu.dot_dimension_numbers<[1], [0], [0], [1], [0, 0, 1, 1], [], []>} : vector<16x128xbf16>, vector<128x384xbf16>, vector<16x384xf32> -> vector<16x384xf32>
    %377 = vector.extract_strided_slice %374 {offsets = [0, 0], sizes = [16, 128], strides = [1, 1]} : vector<16x384xf32> to vector<16x128xf32>
    %378 = vector.extract_strided_slice %376 {offsets = [0, 0], sizes = [16, 128], strides = [1, 1]} : vector<16x384xf32> to vector<16x128xf32>
    %379 = arith.addf %377, %378 : vector<16x128xf32>
    %380 = arith.negf %379 : vector<16x128xf32>
    %381 = math.exp %380 : vector<16x128xf32>
    %cst_89 = arith.constant 1.000000e+00 : f32
    %382 = vector.broadcast %cst_89 : f32 to vector<16x128xf32>
    %383 = arith.addf %382, %381 : vector<16x128xf32>
    %384 = arith.divf %382, %383 : vector<16x128xf32>
    %385 = vector.extract_strided_slice %374 {offsets = [0, 128], sizes = [16, 128], strides = [1, 1]} : vector<16x384xf32> to vector<16x128xf32>
    %386 = vector.extract_strided_slice %376 {offsets = [0, 128], sizes = [16, 128], strides = [1, 1]} : vector<16x384xf32> to vector<16x128xf32>
    %387 = arith.addf %385, %386 : vector<16x128xf32>
    %388 = arith.negf %387 : vector<16x128xf32>
    %389 = math.exp %388 : vector<16x128xf32>
    %cst_90 = arith.constant 1.000000e+00 : f32
    %390 = vector.broadcast %cst_90 : f32 to vector<16x128xf32>
    %391 = arith.addf %390, %389 : vector<16x128xf32>
    %392 = arith.divf %390, %391 : vector<16x128xf32>
    %393 = vector.extract_strided_slice %374 {offsets = [0, 256], sizes = [16, 128], strides = [1, 1]} : vector<16x384xf32> to vector<16x128xf32>
    %394 = vector.extract_strided_slice %376 {offsets = [0, 256], sizes = [16, 128], strides = [1, 1]} : vector<16x384xf32> to vector<16x128xf32>
    %395 = vector.broadcast %6 : vector<1x128xf32> to vector<16x128xf32>
    %396 = arith.addf %394, %395 : vector<16x128xf32>
    %397 = arith.mulf %384, %396 : vector<16x128xf32>
    %398 = arith.addf %393, %397 : vector<16x128xf32>
    %399 = math.tanh %398 : vector<16x128xf32>
    %400 = arith.subf %332, %399 : vector<16x128xf32>
    %401 = arith.mulf %392, %400 : vector<16x128xf32>
    %402 = arith.addf %399, %401 : vector<16x128xf32>
    %403 = arith.truncf %402 : vector<16x128xf32> to vector<16x128xbf16>
    %cst_91 = arith.constant dense<0.000000e+00> : vector<16x384xf32>
    %404 = tpu.matmul %403, %8, %cst_91 {dimension_numbers = #tpu.dot_dimension_numbers<[1], [0], [0], [1], [0, 0, 1, 1], [], []>} : vector<16x128xbf16>, vector<128x384xbf16>, vector<16x384xf32> -> vector<16x384xf32>
    %405 = vector.broadcast %12 : vector<1x384xf32> to vector<16x384xf32>
    %406 = arith.addf %404, %405 : vector<16x384xf32>
    %407 = arith.truncf %364 : vector<16x128xf32> to vector<16x128xbf16>
    %cst_92 = arith.constant dense<0.000000e+00> : vector<16x384xf32>
    %408 = tpu.matmul %407, %10, %cst_92 {dimension_numbers = #tpu.dot_dimension_numbers<[1], [0], [0], [1], [0, 0, 1, 1], [], []>} : vector<16x128xbf16>, vector<128x384xbf16>, vector<16x384xf32> -> vector<16x384xf32>
    %409 = vector.extract_strided_slice %406 {offsets = [0, 0], sizes = [16, 128], strides = [1, 1]} : vector<16x384xf32> to vector<16x128xf32>
    %410 = vector.extract_strided_slice %408 {offsets = [0, 0], sizes = [16, 128], strides = [1, 1]} : vector<16x384xf32> to vector<16x128xf32>
    %411 = arith.addf %409, %410 : vector<16x128xf32>
    %412 = arith.negf %411 : vector<16x128xf32>
    %413 = math.exp %412 : vector<16x128xf32>
    %cst_93 = arith.constant 1.000000e+00 : f32
    %414 = vector.broadcast %cst_93 : f32 to vector<16x128xf32>
    %415 = arith.addf %414, %413 : vector<16x128xf32>
    %416 = arith.divf %414, %415 : vector<16x128xf32>
    %417 = vector.extract_strided_slice %406 {offsets = [0, 128], sizes = [16, 128], strides = [1, 1]} : vector<16x384xf32> to vector<16x128xf32>
    %418 = vector.extract_strided_slice %408 {offsets = [0, 128], sizes = [16, 128], strides = [1, 1]} : vector<16x384xf32> to vector<16x128xf32>
    %419 = arith.addf %417, %418 : vector<16x128xf32>
    %420 = arith.negf %419 : vector<16x128xf32>
    %421 = math.exp %420 : vector<16x128xf32>
    %cst_94 = arith.constant 1.000000e+00 : f32
    %422 = vector.broadcast %cst_94 : f32 to vector<16x128xf32>
    %423 = arith.addf %422, %421 : vector<16x128xf32>
    %424 = arith.divf %422, %423 : vector<16x128xf32>
    %425 = vector.extract_strided_slice %406 {offsets = [0, 256], sizes = [16, 128], strides = [1, 1]} : vector<16x384xf32> to vector<16x128xf32>
    %426 = vector.extract_strided_slice %408 {offsets = [0, 256], sizes = [16, 128], strides = [1, 1]} : vector<16x384xf32> to vector<16x128xf32>
    %427 = vector.broadcast %14 : vector<1x128xf32> to vector<16x128xf32>
    %428 = arith.addf %426, %427 : vector<16x128xf32>
    %429 = arith.mulf %416, %428 : vector<16x128xf32>
    %430 = arith.addf %425, %429 : vector<16x128xf32>
    %431 = math.tanh %430 : vector<16x128xf32>
    %432 = arith.subf %364, %431 : vector<16x128xf32>
    %433 = arith.mulf %424, %432 : vector<16x128xf32>
    %434 = arith.addf %431, %433 : vector<16x128xf32>
    %435 = arith.index_cast %c5_i32 : i32 to index
    %c0_95 = arith.constant 0 : index
    %c0_96 = arith.constant 0 : index
    %436 = vector.load %arg11[%435, %c0_95, %c0_96] : memref<8x16x128xf32, #tpu.memory_space<vmem>>, vector<1x16x128xf32>
    %437 = vector.shape_cast %436 : vector<1x16x128xf32> to vector<16x128xf32>
    %438 = vector.shape_cast %434 : vector<16x128xf32> to vector<1x16x128xf32>
    tpu.vector_store %arg11[%435, %c0_95, %c0_96], %438 {strides = array<i32>} : memref<8x16x128xf32, #tpu.memory_space<vmem>>, vector<1x16x128xf32>,
    %c6_i32 = arith.constant 6 : i32
    %439 = arith.index_cast %c6_i32 : i32 to index
    %c0_97 = arith.constant 0 : index
    %c0_98 = arith.constant 0 : index
    %440 = vector.load %arg1[%439, %c0_97, %c0_98] : memref<8x16x128xbf16, #tpu.memory_space<vmem>>, vector<1x16x128xbf16>
    %441 = vector.shape_cast %440 : vector<1x16x128xbf16> to vector<16x128xbf16>
    %cst_99 = arith.constant dense<0.000000e+00> : vector<16x384xf32>
    %442 = tpu.matmul %441, %3, %cst_99 {dimension_numbers = #tpu.dot_dimension_numbers<[1], [0], [0], [1], [0, 0, 1, 1], [], []>} : vector<16x128xbf16>, vector<128x384xbf16>, vector<16x384xf32> -> vector<16x384xf32>
    %443 = vector.broadcast %5 : vector<1x384xf32> to vector<16x384xf32>
    %444 = arith.addf %442, %443 : vector<16x384xf32>
    %445 = arith.truncf %402 : vector<16x128xf32> to vector<16x128xbf16>
    %cst_100 = arith.constant dense<0.000000e+00> : vector<16x384xf32>
    %446 = tpu.matmul %445, %4, %cst_100 {dimension_numbers = #tpu.dot_dimension_numbers<[1], [0], [0], [1], [0, 0, 1, 1], [], []>} : vector<16x128xbf16>, vector<128x384xbf16>, vector<16x384xf32> -> vector<16x384xf32>
    %447 = vector.extract_strided_slice %444 {offsets = [0, 0], sizes = [16, 128], strides = [1, 1]} : vector<16x384xf32> to vector<16x128xf32>
    %448 = vector.extract_strided_slice %446 {offsets = [0, 0], sizes = [16, 128], strides = [1, 1]} : vector<16x384xf32> to vector<16x128xf32>
    %449 = arith.addf %447, %448 : vector<16x128xf32>
    %450 = arith.negf %449 : vector<16x128xf32>
    %451 = math.exp %450 : vector<16x128xf32>
    %cst_101 = arith.constant 1.000000e+00 : f32
    %452 = vector.broadcast %cst_101 : f32 to vector<16x128xf32>
    %453 = arith.addf %452, %451 : vector<16x128xf32>
    %454 = arith.divf %452, %453 : vector<16x128xf32>
    %455 = vector.extract_strided_slice %444 {offsets = [0, 128], sizes = [16, 128], strides = [1, 1]} : vector<16x384xf32> to vector<16x128xf32>
    %456 = vector.extract_strided_slice %446 {offsets = [0, 128], sizes = [16, 128], strides = [1, 1]} : vector<16x384xf32> to vector<16x128xf32>
    %457 = arith.addf %455, %456 : vector<16x128xf32>
    %458 = arith.negf %457 : vector<16x128xf32>
    %459 = math.exp %458 : vector<16x128xf32>
    %cst_102 = arith.constant 1.000000e+00 : f32
    %460 = vector.broadcast %cst_102 : f32 to vector<16x128xf32>
    %461 = arith.addf %460, %459 : vector<16x128xf32>
    %462 = arith.divf %460, %461 : vector<16x128xf32>
    %463 = vector.extract_strided_slice %444 {offsets = [0, 256], sizes = [16, 128], strides = [1, 1]} : vector<16x384xf32> to vector<16x128xf32>
    %464 = vector.extract_strided_slice %446 {offsets = [0, 256], sizes = [16, 128], strides = [1, 1]} : vector<16x384xf32> to vector<16x128xf32>
    %465 = vector.broadcast %6 : vector<1x128xf32> to vector<16x128xf32>
    %466 = arith.addf %464, %465 : vector<16x128xf32>
    %467 = arith.mulf %454, %466 : vector<16x128xf32>
    %468 = arith.addf %463, %467 : vector<16x128xf32>
    %469 = math.tanh %468 : vector<16x128xf32>
    %470 = arith.subf %402, %469 : vector<16x128xf32>
    %471 = arith.mulf %462, %470 : vector<16x128xf32>
    %472 = arith.addf %469, %471 : vector<16x128xf32>
    %473 = arith.truncf %472 : vector<16x128xf32> to vector<16x128xbf16>
    %cst_103 = arith.constant dense<0.000000e+00> : vector<16x384xf32>
    %474 = tpu.matmul %473, %8, %cst_103 {dimension_numbers = #tpu.dot_dimension_numbers<[1], [0], [0], [1], [0, 0, 1, 1], [], []>} : vector<16x128xbf16>, vector<128x384xbf16>, vector<16x384xf32> -> vector<16x384xf32>
    %475 = vector.broadcast %12 : vector<1x384xf32> to vector<16x384xf32>
    %476 = arith.addf %474, %475 : vector<16x384xf32>
    %477 = arith.truncf %434 : vector<16x128xf32> to vector<16x128xbf16>
    %cst_104 = arith.constant dense<0.000000e+00> : vector<16x384xf32>
    %478 = tpu.matmul %477, %10, %cst_104 {dimension_numbers = #tpu.dot_dimension_numbers<[1], [0], [0], [1], [0, 0, 1, 1], [], []>} : vector<16x128xbf16>, vector<128x384xbf16>, vector<16x384xf32> -> vector<16x384xf32>
    %479 = vector.extract_strided_slice %476 {offsets = [0, 0], sizes = [16, 128], strides = [1, 1]} : vector<16x384xf32> to vector<16x128xf32>
    %480 = vector.extract_strided_slice %478 {offsets = [0, 0], sizes = [16, 128], strides = [1, 1]} : vector<16x384xf32> to vector<16x128xf32>
    %481 = arith.addf %479, %480 : vector<16x128xf32>
    %482 = arith.negf %481 : vector<16x128xf32>
    %483 = math.exp %482 : vector<16x128xf32>
    %cst_105 = arith.constant 1.000000e+00 : f32
    %484 = vector.broadcast %cst_105 : f32 to vector<16x128xf32>
    %485 = arith.addf %484, %483 : vector<16x128xf32>
    %486 = arith.divf %484, %485 : vector<16x128xf32>
    %487 = vector.extract_strided_slice %476 {offsets = [0, 128], sizes = [16, 128], strides = [1, 1]} : vector<16x384xf32> to vector<16x128xf32>
    %488 = vector.extract_strided_slice %478 {offsets = [0, 128], sizes = [16, 128], strides = [1, 1]} : vector<16x384xf32> to vector<16x128xf32>
    %489 = arith.addf %487, %488 : vector<16x128xf32>
    %490 = arith.negf %489 : vector<16x128xf32>
    %491 = math.exp %490 : vector<16x128xf32>
    %cst_106 = arith.constant 1.000000e+00 : f32
    %492 = vector.broadcast %cst_106 : f32 to vector<16x128xf32>
    %493 = arith.addf %492, %491 : vector<16x128xf32>
    %494 = arith.divf %492, %493 : vector<16x128xf32>
    %495 = vector.extract_strided_slice %476 {offsets = [0, 256], sizes = [16, 128], strides = [1, 1]} : vector<16x384xf32> to vector<16x128xf32>
    %496 = vector.extract_strided_slice %478 {offsets = [0, 256], sizes = [16, 128], strides = [1, 1]} : vector<16x384xf32> to vector<16x128xf32>
    %497 = vector.broadcast %14 : vector<1x128xf32> to vector<16x128xf32>
    %498 = arith.addf %496, %497 : vector<16x128xf32>
    %499 = arith.mulf %486, %498 : vector<16x128xf32>
    %500 = arith.addf %495, %499 : vector<16x128xf32>
    %501 = math.tanh %500 : vector<16x128xf32>
    %502 = arith.subf %434, %501 : vector<16x128xf32>
    %503 = arith.mulf %494, %502 : vector<16x128xf32>
    %504 = arith.addf %501, %503 : vector<16x128xf32>
    %505 = arith.index_cast %c6_i32 : i32 to index
    %c0_107 = arith.constant 0 : index
    %c0_108 = arith.constant 0 : index
    %506 = vector.load %arg11[%505, %c0_107, %c0_108] : memref<8x16x128xf32, #tpu.memory_space<vmem>>, vector<1x16x128xf32>
    %507 = vector.shape_cast %506 : vector<1x16x128xf32> to vector<16x128xf32>
    %508 = vector.shape_cast %504 : vector<16x128xf32> to vector<1x16x128xf32>
    tpu.vector_store %arg11[%505, %c0_107, %c0_108], %508 {strides = array<i32>} : memref<8x16x128xf32, #tpu.memory_space<vmem>>, vector<1x16x128xf32>,
    %c7_i32 = arith.constant 7 : i32
    %509 = arith.index_cast %c7_i32 : i32 to index
    %c0_109 = arith.constant 0 : index
    %c0_110 = arith.constant 0 : index
    %510 = vector.load %arg1[%509, %c0_109, %c0_110] : memref<8x16x128xbf16, #tpu.memory_space<vmem>>, vector<1x16x128xbf16>
    %511 = vector.shape_cast %510 : vector<1x16x128xbf16> to vector<16x128xbf16>
    %cst_111 = arith.constant dense<0.000000e+00> : vector<16x384xf32>
    %512 = tpu.matmul %511, %3, %cst_111 {dimension_numbers = #tpu.dot_dimension_numbers<[1], [0], [0], [1], [0, 0, 1, 1], [], []>} : vector<16x128xbf16>, vector<128x384xbf16>, vector<16x384xf32> -> vector<16x384xf32>
    %513 = vector.broadcast %5 : vector<1x384xf32> to vector<16x384xf32>
    %514 = arith.addf %512, %513 : vector<16x384xf32>
    %515 = arith.truncf %472 : vector<16x128xf32> to vector<16x128xbf16>
    %cst_112 = arith.constant dense<0.000000e+00> : vector<16x384xf32>
    %516 = tpu.matmul %515, %4, %cst_112 {dimension_numbers = #tpu.dot_dimension_numbers<[1], [0], [0], [1], [0, 0, 1, 1], [], []>} : vector<16x128xbf16>, vector<128x384xbf16>, vector<16x384xf32> -> vector<16x384xf32>
    %517 = vector.extract_strided_slice %514 {offsets = [0, 0], sizes = [16, 128], strides = [1, 1]} : vector<16x384xf32> to vector<16x128xf32>
    %518 = vector.extract_strided_slice %516 {offsets = [0, 0], sizes = [16, 128], strides = [1, 1]} : vector<16x384xf32> to vector<16x128xf32>
    %519 = arith.addf %517, %518 : vector<16x128xf32>
    %520 = arith.negf %519 : vector<16x128xf32>
    %521 = math.exp %520 : vector<16x128xf32>
    %cst_113 = arith.constant 1.000000e+00 : f32
    %522 = vector.broadcast %cst_113 : f32 to vector<16x128xf32>
    %523 = arith.addf %522, %521 : vector<16x128xf32>
    %524 = arith.divf %522, %523 : vector<16x128xf32>
    %525 = vector.extract_strided_slice %514 {offsets = [0, 128], sizes = [16, 128], strides = [1, 1]} : vector<16x384xf32> to vector<16x128xf32>
    %526 = vector.extract_strided_slice %516 {offsets = [0, 128], sizes = [16, 128], strides = [1, 1]} : vector<16x384xf32> to vector<16x128xf32>
    %527 = arith.addf %525, %526 : vector<16x128xf32>
    %528 = arith.negf %527 : vector<16x128xf32>
    %529 = math.exp %528 : vector<16x128xf32>
    %cst_114 = arith.constant 1.000000e+00 : f32
    %530 = vector.broadcast %cst_114 : f32 to vector<16x128xf32>
    %531 = arith.addf %530, %529 : vector<16x128xf32>
    %532 = arith.divf %530, %531 : vector<16x128xf32>
    %533 = vector.extract_strided_slice %514 {offsets = [0, 256], sizes = [16, 128], strides = [1, 1]} : vector<16x384xf32> to vector<16x128xf32>
    %534 = vector.extract_strided_slice %516 {offsets = [0, 256], sizes = [16, 128], strides = [1, 1]} : vector<16x384xf32> to vector<16x128xf32>
    %535 = vector.broadcast %6 : vector<1x128xf32> to vector<16x128xf32>
    %536 = arith.addf %534, %535 : vector<16x128xf32>
    %537 = arith.mulf %524, %536 : vector<16x128xf32>
    %538 = arith.addf %533, %537 : vector<16x128xf32>
    %539 = math.tanh %538 : vector<16x128xf32>
    %540 = arith.subf %472, %539 : vector<16x128xf32>
    %541 = arith.mulf %532, %540 : vector<16x128xf32>
    %542 = arith.addf %539, %541 : vector<16x128xf32>
    %543 = arith.truncf %542 : vector<16x128xf32> to vector<16x128xbf16>
    %cst_115 = arith.constant dense<0.000000e+00> : vector<16x384xf32>
    %544 = tpu.matmul %543, %8, %cst_115 {dimension_numbers = #tpu.dot_dimension_numbers<[1], [0], [0], [1], [0, 0, 1, 1], [], []>} : vector<16x128xbf16>, vector<128x384xbf16>, vector<16x384xf32> -> vector<16x384xf32>
    %545 = vector.broadcast %12 : vector<1x384xf32> to vector<16x384xf32>
    %546 = arith.addf %544, %545 : vector<16x384xf32>
    %547 = arith.truncf %504 : vector<16x128xf32> to vector<16x128xbf16>
    %cst_116 = arith.constant dense<0.000000e+00> : vector<16x384xf32>
    %548 = tpu.matmul %547, %10, %cst_116 {dimension_numbers = #tpu.dot_dimension_numbers<[1], [0], [0], [1], [0, 0, 1, 1], [], []>} : vector<16x128xbf16>, vector<128x384xbf16>, vector<16x384xf32> -> vector<16x384xf32>
    %549 = vector.extract_strided_slice %546 {offsets = [0, 0], sizes = [16, 128], strides = [1, 1]} : vector<16x384xf32> to vector<16x128xf32>
    %550 = vector.extract_strided_slice %548 {offsets = [0, 0], sizes = [16, 128], strides = [1, 1]} : vector<16x384xf32> to vector<16x128xf32>
    %551 = arith.addf %549, %550 : vector<16x128xf32>
    %552 = arith.negf %551 : vector<16x128xf32>
    %553 = math.exp %552 : vector<16x128xf32>
    %cst_117 = arith.constant 1.000000e+00 : f32
    %554 = vector.broadcast %cst_117 : f32 to vector<16x128xf32>
    %555 = arith.addf %554, %553 : vector<16x128xf32>
    %556 = arith.divf %554, %555 : vector<16x128xf32>
    %557 = vector.extract_strided_slice %546 {offsets = [0, 128], sizes = [16, 128], strides = [1, 1]} : vector<16x384xf32> to vector<16x128xf32>
    %558 = vector.extract_strided_slice %548 {offsets = [0, 128], sizes = [16, 128], strides = [1, 1]} : vector<16x384xf32> to vector<16x128xf32>
    %559 = arith.addf %557, %558 : vector<16x128xf32>
    %560 = arith.negf %559 : vector<16x128xf32>
    %561 = math.exp %560 : vector<16x128xf32>
    %cst_118 = arith.constant 1.000000e+00 : f32
    %562 = vector.broadcast %cst_118 : f32 to vector<16x128xf32>
    %563 = arith.addf %562, %561 : vector<16x128xf32>
    %564 = arith.divf %562, %563 : vector<16x128xf32>
    %565 = vector.extract_strided_slice %546 {offsets = [0, 256], sizes = [16, 128], strides = [1, 1]} : vector<16x384xf32> to vector<16x128xf32>
    %566 = vector.extract_strided_slice %548 {offsets = [0, 256], sizes = [16, 128], strides = [1, 1]} : vector<16x384xf32> to vector<16x128xf32>
    %567 = vector.broadcast %14 : vector<1x128xf32> to vector<16x128xf32>
    %568 = arith.addf %566, %567 : vector<16x128xf32>
    %569 = arith.mulf %556, %568 : vector<16x128xf32>
    %570 = arith.addf %565, %569 : vector<16x128xf32>
    %571 = math.tanh %570 : vector<16x128xf32>
    %572 = arith.subf %504, %571 : vector<16x128xf32>
    %573 = arith.mulf %564, %572 : vector<16x128xf32>
    %574 = arith.addf %571, %573 : vector<16x128xf32>
    %575 = arith.index_cast %c7_i32 : i32 to index
    %c0_119 = arith.constant 0 : index
    %c0_120 = arith.constant 0 : index
    %576 = vector.load %arg11[%575, %c0_119, %c0_120] : memref<8x16x128xf32, #tpu.memory_space<vmem>>, vector<1x16x128xf32>
    %577 = vector.shape_cast %576 : vector<1x16x128xf32> to vector<16x128xf32>
    %578 = vector.shape_cast %574 : vector<16x128xf32> to vector<1x16x128xf32>
    tpu.vector_store %arg11[%575, %c0_119, %c0_120], %578 {strides = array<i32>} : memref<8x16x128xf32, #tpu.memory_space<vmem>>, vector<1x16x128xf32>,
    %c8_i32 = arith.constant 8 : i32
    %c0_121 = arith.constant 0 : index
    %c0_122 = arith.constant 0 : index
    %c0_123 = arith.constant 0 : index
    %579 = vector.load %arg13[%c0_121, %c0_122, %c0_123] : memref<2x16x128xf32, #tpu.memory_space<vmem>>, vector<1x16x128xf32>
    %580 = vector.shape_cast %579 : vector<1x16x128xf32> to vector<16x128xf32>
    %581 = vector.shape_cast %542 : vector<16x128xf32> to vector<1x16x128xf32>
    tpu.vector_store %arg13[%c0_121, %c0_122, %c0_123], %581 {strides = array<i32>} : memref<2x16x128xf32, #tpu.memory_space<vmem>>, vector<1x16x128xf32>,
    %c1_124 = arith.constant 1 : index
    %c0_125 = arith.constant 0 : index
    %c0_126 = arith.constant 0 : index
    %582 = vector.load %arg13[%c1_124, %c0_125, %c0_126] : memref<2x16x128xf32, #tpu.memory_space<vmem>>, vector<1x16x128xf32>
    %583 = vector.shape_cast %582 : vector<1x16x128xf32> to vector<16x128xf32>
    %584 = vector.shape_cast %574 : vector<16x128xf32> to vector<1x16x128xf32>
    tpu.vector_store %arg13[%c1_124, %c0_125, %c0_126], %584 {strides = array<i32>} : memref<2x16x128xf32, #tpu.memory_space<vmem>>, vector<1x16x128xf32>,
    %c0_i32_127 = arith.constant 0 : i32
    %585 = arith.cmpi eq, %arg0, %c0_i32_127 : i32
    %586 = arith.extui %585 : i1 to i32
    %c0_i32_128 = arith.constant 0 : i32
    %587 = arith.cmpi ne, %586, %c0_i32_128 : i32
    scf.if %587 {
      %c0_129 = arith.constant 0 : index
      %c0_130 = arith.constant 0 : index
      %c0_131 = arith.constant 0 : index
      %588 = vector.load %arg13[%c0_129, %c0_130, %c0_131] : memref<2x16x128xf32, #tpu.memory_space<vmem>>, vector<2x16x128xf32>
      %c0_132 = arith.constant 0 : index
      %c0_133 = arith.constant 0 : index
      %c0_134 = arith.constant 0 : index
      %589 = vector.load %arg12[%c0_132, %c0_133, %c0_134] : memref<2x16x128xf32, #tpu.memory_space<vmem>>, vector<2x16x128xf32>
      tpu.vector_store %arg12[%c0_132, %c0_133, %c0_134], %588 {strides = array<i32>} : memref<2x16x128xf32, #tpu.memory_space<vmem>>, vector<2x16x128xf32>,
    } else {
    }
    return
  }
  func.func @transform_0(%arg0: i32) -> (i32, i32, i32) {
    %c0_i32 = arith.constant 0 : i32
    %c0_i32_0 = arith.constant 0 : i32
    %c0_i32_1 = arith.constant 0 : i32
    return %arg0, %c0_i32, %c0_i32_0 : i32, i32, i32
  }
  func.func @transform_1(%arg0: i32) -> (i32, i32, i32) {
    %c0_i32 = arith.constant 0 : i32
    %c0_i32_0 = arith.constant 0 : i32
    %c0_i32_1 = arith.constant 0 : i32
    %c0_i32_2 = arith.constant 0 : i32
    return %c0_i32, %c0_i32_0, %c0_i32_1 : i32, i32, i32
  }
  func.func @transform_2(%arg0: i32) -> (i32, i32) {
    %c0_i32 = arith.constant 0 : i32
    %c0_i32_0 = arith.constant 0 : i32
    %c0_i32_1 = arith.constant 0 : i32
    return %c0_i32, %c0_i32_0 : i32, i32
  }
  func.func @transform_3(%arg0: i32) -> (i32, i32) {
    %c0_i32 = arith.constant 0 : i32
    %c0_i32_0 = arith.constant 0 : i32
    %c0_i32_1 = arith.constant 0 : i32
    return %c0_i32, %c0_i32_0 : i32, i32
  }
  func.func @transform_4(%arg0: i32) -> (i32, i32) {
    %c0_i32 = arith.constant 0 : i32
    %c0_i32_0 = arith.constant 0 : i32
    %c0_i32_1 = arith.constant 0 : i32
    return %c0_i32, %c0_i32_0 : i32, i32
  }
  func.func @transform_5(%arg0: i32) -> (i32, i32) {
    %c0_i32 = arith.constant 0 : i32
    %c0_i32_0 = arith.constant 0 : i32
    %c0_i32_1 = arith.constant 0 : i32
    return %c0_i32, %c0_i32_0 : i32, i32
  }
  func.func @transform_6(%arg0: i32) -> (i32, i32, i32) {
    %c0_i32 = arith.constant 0 : i32
    %c0_i32_0 = arith.constant 0 : i32
    %c0_i32_1 = arith.constant 0 : i32
    %c0_i32_2 = arith.constant 0 : i32
    return %c0_i32, %c0_i32_0, %c0_i32_1 : i32, i32, i32
  }
  func.func @transform_7(%arg0: i32) -> (i32, i32, i32) {
    %c0_i32 = arith.constant 0 : i32
    %c0_i32_0 = arith.constant 0 : i32
    %c0_i32_1 = arith.constant 0 : i32
    %c0_i32_2 = arith.constant 0 : i32
    return %c0_i32, %c0_i32_0, %c0_i32_1 : i32, i32, i32
  }
  func.func @transform_8(%arg0: i32) -> (i32, i32, i32) {
    %c0_i32 = arith.constant 0 : i32
    %c0_i32_0 = arith.constant 0 : i32
    %c0_i32_1 = arith.constant 0 : i32
    %c0_i32_2 = arith.constant 0 : i32
    return %c0_i32, %c0_i32_0, %c0_i32_1 : i32, i32, i32
  }
  func.func @transform_9(%arg0: i32) -> (i32, i32, i32) {
    %c0_i32 = arith.constant 0 : i32
    %c0_i32_0 = arith.constant 0 : i32
    %c0_i32_1 = arith.constant 0 : i32
    %c0_i32_2 = arith.constant 0 : i32
    return %c0_i32, %c0_i32_0, %c0_i32_1 : i32, i32, i32
  }
  func.func @transform_10(%arg0: i32) -> (i32, i32, i32) {
    %c0_i32 = arith.constant 0 : i32
    %c0_i32_0 = arith.constant 0 : i32
    %c0_i32_1 = arith.constant 0 : i32
    return %arg0, %c0_i32, %c0_i32_0 : i32, i32, i32
  }
  func.func @transform_11(%arg0: i32) -> (i32, i32, i32) {
    %c0_i32 = arith.constant 0 : i32
    %c0_i32_0 = arith.constant 0 : i32
    %c0_i32_1 = arith.constant 0 : i32
    %c0_i32_2 = arith.constant 0 : i32
    return %c0_i32, %c0_i32_0, %c0_i32_1 : i32, i32, i32
  }
}

module attributes {stable_mosaic.version = 11 : i64} {
  func.func @_dense_kernel(%arg0: i32, %arg1: i32, %arg2: memref<32x128xbf16, #tpu.memory_space<vmem>>, %arg3: memref<128x128xbf16, #tpu.memory_space<vmem>>, %arg4: memref<1x128xf32, #tpu.memory_space<vmem>>, %arg5: memref<32x128xf32, #tpu.memory_space<vmem>>) attributes {dimension_semantics = [#tpu.dimension_semantics<parallel>, #tpu.dimension_semantics<parallel>], iteration_bounds = array<i64: 1, 1>, scalar_prefetch = 0 : i64, scratch_operands = 0 : i64, tpu.core_type = #tpu.core_type<tc>, window_params = [{transform_indices = @transform_0, window_bounds = array<i64: 32, 128>}, {transform_indices = @transform_1, window_bounds = array<i64: 128, 128>}, {transform_indices = @transform_2, window_bounds = array<i64: 1, 128>}, {transform_indices = @transform_3, window_bounds = array<i64: 32, 128>}]} {
    %c0 = arith.constant 0 : index
    %c0_0 = arith.constant 0 : index
    %0 = vector.load %arg2[%c0, %c0_0] : memref<32x128xbf16, #tpu.memory_space<vmem>>, vector<32x128xbf16>
    %c0_1 = arith.constant 0 : index
    %c0_2 = arith.constant 0 : index
    %1 = vector.load %arg3[%c0_1, %c0_2] : memref<128x128xbf16, #tpu.memory_space<vmem>>, vector<128x128xbf16>
    %cst = arith.constant dense<0.000000e+00> : vector<32x128xf32>
    %2 = tpu.matmul %0, %1, %cst {dimension_numbers = #tpu.dot_dimension_numbers<[1], [0], [0], [1], [0, 0, 1, 1], [], []>} : vector<32x128xbf16>, vector<128x128xbf16>, vector<32x128xf32> -> vector<32x128xf32>
    %c0_3 = arith.constant 0 : index
    %c0_4 = arith.constant 0 : index
    %3 = vector.load %arg4[%c0_3, %c0_4] : memref<1x128xf32, #tpu.memory_space<vmem>>, vector<1x128xf32>
    %4 = vector.broadcast %3 : vector<1x128xf32> to vector<32x128xf32>
    %5 = arith.addf %2, %4 : vector<32x128xf32>
    %c0_5 = arith.constant 0 : index
    %c0_6 = arith.constant 0 : index
    %6 = vector.load %arg5[%c0_5, %c0_6] : memref<32x128xf32, #tpu.memory_space<vmem>>, vector<32x128xf32>
    tpu.vector_store %arg5[%c0_5, %c0_6], %5 {strides = array<i32>} : memref<32x128xf32, #tpu.memory_space<vmem>>, vector<32x128xf32>,
    return
  }
  func.func @transform_0(%arg0: i32, %arg1: i32) -> (i32, i32) {
    %c0_i32 = arith.constant 0 : i32
    %c0_i32_0 = arith.constant 0 : i32
    return %arg0, %c0_i32 : i32, i32
  }
  func.func @transform_1(%arg0: i32, %arg1: i32) -> (i32, i32) {
    %c0_i32 = arith.constant 0 : i32
    %c0_i32_0 = arith.constant 0 : i32
    return %c0_i32, %arg1 : i32, i32
  }
  func.func @transform_2(%arg0: i32, %arg1: i32) -> (i32, i32) {
    %c0_i32 = arith.constant 0 : i32
    %c0_i32_0 = arith.constant 0 : i32
    return %c0_i32, %arg1 : i32, i32
  }
  func.func @transform_3(%arg0: i32, %arg1: i32) -> (i32, i32) {
    %c0_i32 = arith.constant 0 : i32
    return %arg0, %arg1 : i32, i32
  }
}

</mosaic_0001>

<bundles_post_ra>
// kernel: seq2seq_decoder_forward.3
= control target key start
LH: loop header
LB: loop body
LE: loop exit
PB: predicated region body
PF: predicated region fallthrough
CT: control target
= control target key end

     0   :  { %8 = vsyncpa [#allocation3], 0  ;;  %s449_s0 = inlined_call_operand.hbm [shape: bf16[32,128], index: 0, kind: input, shape index: {}]   ;;  %s450_s1 = inlined_call_operand.hbm [shape: bf16[128,128], index: 1, kind: input, shape index: {}]   ;;  %s451_s2 = inlined_call_operand.hbm [shape: f32[1,128], index: 2, kind: input, shape index: {}]   ;;  %s452_s3 = inlined_call_operand.hbm [shape: f32[32,128], index: 3, kind: output, shape index: {}]  }
   0x1   :  { %9 = vsyncpa [#allocation6], 0 }
   0x2   :  { %10 = vsyncpa [#allocation4], 0  ;;  %s366_s12 = smov [#allocation5]   ;;  %s367_s14 = smov [#allocation2]  }
   0x3   :  { %s28_s13 = sshll.u32 %s366_s12, 4  ;;  %s16_s15 = sshll.u32 %s367_s14, 4  ;;  %s29_s13 = int_to_ptr.vmem [resolvable:$true] %s28_s13  ;;  %s394_s15 = int_to_ptr.vmem [resolvable:$true] %s16_s15 }
   0x4   :  { %s272_s18 = scalar_lea.hbm %s450_s1, 1024 }
   0x5   :  { %p273_p0 = scmp.ne.s32.totalorder %s450_s1, %s272_s18  ;;  %p276_p1 = scmp.lt.u32.totalorder %s272_s18, %s450_s1 }
   0x7   :  { %p278_p2 = pnand %p276_p1, %p273_p0 }
   0x9   :  { %281 = shalt.err (!%p278_p2)
}
   0xa   :  { %s282_s23 = scalar_lea.vmem %s29_s13, 1024  ;;  %p287_p4 = scmp.lt.s32.totalorder %s29_s13, %s29_s13 }
   0xb   :  { %p283_p3 = scmp.ne.s32.totalorder %s29_s13, %s282_s23  ;;  %p288_p5 = scmp.lt.s32.totalorder %s282_s23, %s282_s23 }
   0xd   :  { %p289_p6 = por %p288_p5, %p287_p4 }
   0xf   :  { %p290_p7 = pnand %p289_p6, %p283_p3 }
  0x11   :  { %293 = shalt.err (!%p290_p7)
}
  0x12   :  { %s368_s24 = smov 64   ;;  %s369_s25 = smov 4  }
  0x13   :  { %34 = dma.hbm_to_vmem [thread:$0]  %s450_s1, 1024, %s29_s13, [#allocation6], %s368_s24, %s368_s24, %s369_s25  }
  0x14   :  { %s294_s30 = scalar_lea.hbm %s449_s0, 256 }
  0x15   :  { %p295_p8 = scmp.ne.s32.totalorder %s449_s0, %s294_s30  ;;  %p298_p9 = scmp.lt.u32.totalorder %s294_s30, %s449_s0 }
  0x17   :  { %p300_p10 = pnand %p298_p9, %p295_p8 }
  0x19   :  { %303 = shalt.err (!%p300_p10)
}
  0x1a   :  { %s304_s8 = scalar_lea.vmem %s394_s15, 256  ;;  %p309_p12 = scmp.lt.s32.totalorder %s394_s15, %s394_s15 }
  0x1b   :  { %p305_p11 = scmp.ne.s32.totalorder %s394_s15, %s304_s8  ;;  %p310_p13 = scmp.lt.s32.totalorder %s304_s8, %s304_s8 }
  0x1d   :  { %p311_p0 = por %p310_p13, %p309_p12 }
  0x1f   :  { %p312_p1 = pnand %p311_p0, %p305_p11 }
  0x21   :  { %315 = shalt.err (!%p312_p1)
}
  0x22   :  { %22 = dma.hbm_to_vmem [thread:$0]  %s449_s0, 256, %s394_s15, [#allocation3], %s368_s24, %s368_s24, %s369_s25  }
  0x23   :  { %s370_s10 = smov [#allocation7]   ;;  %s316_s14 = scalar_lea.hbm %s451_s2, 16 }
  0x24   :  { %s41_s11 = sshll.u32 %s370_s10, 4  ;;  %p317_p2 = scmp.ne.s32.totalorder %s451_s2, %s316_s14  ;;  %s42_s11 = int_to_ptr.vmem [resolvable:$true] %s41_s11 }
  0x25   :  { %p320_p3 = scmp.lt.u32.totalorder %s316_s14, %s451_s2 }
  0x27   :  { %p322_p4 = pnand %p320_p3, %p317_p2 }
  0x29   :  { %325 = shalt.err (!%p322_p4)
}
  0x2a   :  { %s326_s20 = scalar_lea.vmem %s42_s11, 16  ;;  %s330_s0 = scalar_lea.vmem %s42_s11, 32 }
  0x2b   :  { %p327_p5 = scmp.ne.s32.totalorder %s42_s11, %s326_s20  ;;  %p331_p6 = scmp.lt.s32.totalorder %s42_s11, %s42_s11 }
  0x2c   :  { %p332_p7 = scmp.lt.s32.totalorder %s330_s0, %s326_s20 }
  0x2e   :  { %p333_p8 = por %p332_p7, %p331_p6 }
  0x30   :  { %p334_p9 = pnand %p333_p8, %p327_p5 }
  0x32   :  { %337 = shalt.err (!%p334_p9)
}
  0x33   :  { %44 = dma.hbm_to_vmem [thread:$0]  %s451_s2, 16, %s42_s11, [#allocation6]  }
  0x34   :  { %360 = dma.done.wait [#allocation3], 256  }
  0x35   :  { %361 = vsyncadd [#allocation3], 4294967040 }
  0x36   :  { %362 = dma.done.wait [#allocation6], 1040  }
  0x37   :  { %363 = vsyncadd [#allocation6], 4294966256  ;;  %v262_v0 = vld [vmem:[#allocation5] sm:$0xff]   ;;  %v263_v1 = vld [vmem:[#allocation5 + $0x8] sm:$0xff]   ;;  %s371_s2 = smov [#allocation8]  }
  0x38   :  { %234 = vmatprep.subr.bf16.mxu0 %v262_v0  ;;  %v264_v2 = vld [vmem:[#allocation5 + $0x10] sm:$0xff]   ;;  %v265_v3 = vld [vmem:[#allocation5 + $0x18] sm:$0xff]   ;;  %v266_v5 = vld [vmem:[#allocation5 + $0x20] sm:$0xff]   ;;  %s200_s22 = sshll.u32 %s371_s2, 4  ;;  %s201_s22 = int_to_ptr.vmem [resolvable:$true] %s200_s22 }
  0x39   :  { %235 = vmatpush3.bf16.msra.mxu0 %v262_v0  ;;  %v270_v4 = vld [vmem:[#allocation2] sm:$0xff]   ;;  %v267_v6 = vld [vmem:[#allocation5 + $0x28] sm:$0xff]   ;;  %v269_v8 = vld [vmem:[#allocation5 + $0x38] sm:$0xff]   ;;  %s338_s23 = scalar_lea.vmem %s201_s22, 512  ;;  %p343_p11 = scmp.lt.s32.totalorder %s201_s22, %s201_s22 }
  0x3a   :  { %236 = vmatprep.subr.bf16.mxu0 %v263_v1  ;;  %250 = vmatprep.mubr.bf16.mxu0 %v270_v4  ;;  %v268_v7 = vld [vmem:[#allocation5 + $0x30] sm:$0xff]   ;;  %v271_v9 = vld [vmem:[#allocation2 + $0x8] sm:$0xff]   ;;  %v213_v10 = vld [vmem:[#allocation7] ss:$0 sm:$0xff]  ;;  %p339_p10 = scmp.ne.s32.totalorder %s201_s22, %s338_s23  ;;  %p344_p12 = scmp.lt.s32.totalorder %s338_s23, %s338_s23 }
  0x3c   :  { %p345_p13 = por %p344_p12, %p343_p11 }
  0x3d   :  { %237 = vmatpush3.bf16.msra.mxu0 %v263_v1 }
  0x3e   :  { %238 = vmatprep.subr.bf16.mxu0 %v264_v2  ;;  %p346_p0 = pnand %p345_p13, %p339_p10 }
  0x41   :  { %239 = vmatpush3.bf16.msra.mxu0 %v264_v2 }
  0x42   :  { %240 = vmatprep.subr.bf16.mxu0 %v265_v3 }
  0x45   :  { %241 = vmatpush3.bf16.msra.mxu0 %v265_v3 }
  0x46   :  { %242 = vmatprep.subr.bf16.mxu0 %v266_v5 }
  0x49   :  { %243 = vmatpush3.bf16.msra.mxu0 %v266_v5 }
  0x4a   :  { %244 = vmatprep.subr.bf16.mxu0 %v267_v6 }
  0x4d   :  { %245 = vmatpush3.bf16.msra.mxu0 %v267_v6 }
  0x4e   :  { %246 = vmatprep.subr.bf16.mxu0 %v268_v7 }
  0x51   :  { %247 = vmatpush3.bf16.msra.mxu0 %v268_v7 }
  0x52   :  { %248 = vmatprep.subr.bf16.mxu0 %v269_v8 }
  0x55   :  { %249 = vmatpush3.bf16.msra.mxu0 %v269_v8 }
  0x58   :  { %251 = vmatmul.mubr.bf16.vlgmr.msra.gmra.mrb[0].mxu0 %v271_v9 }
 0x12b   :  { %v252_v11 = vpop.f32.mrb[0].mxu0 }
 0x12c   :  { %v185_v12 = vadd.f32 %v252_v11, %v213_v10  ;;  %v176_v13 = vpop.f32.mrb[1].mxu0 }
 0x12d   :  { %v177_v14 = vadd.f32 %v213_v10, %v176_v13  ;;  %v253_v15 = vpop.f32.mrb[2].mxu0 }
 0x12e   :  { %193 = vst [vmem:[#allocation8 + $0x10] sm:$0xff] %v185_v12  ;;  %v188_v16 = vadd.f32 %v253_v15, %v213_v10  ;;  %v179_v17 = vpop.f32.mrb[3].mxu0 }
 0x12f   :  { %191 = vst [vmem:[#allocation8] sm:$0xff] %v177_v14  ;;  %v180_v18 = vadd.f32 %v213_v10, %v179_v17 }
 0x130   :  { %194 = vst [vmem:[#allocation8 + $0x18] sm:$0xff] %v188_v16 }
 0x131   :  { %192 = vst [vmem:[#allocation8 + $0x8] sm:$0xff] %v180_v18 }
 0x132   :  { %349 = shalt.err (!%p346_p0)
}
 0x133   :  { %s350_s26 = scalar_lea.hbm %s452_s3, 512 }
 0x134   :  { %p351_p1 = scmp.ne.s32.totalorder %s452_s3, %s350_s26  ;;  %p354_p2 = scmp.lt.u32.totalorder %s350_s26, %s452_s3 }
 0x136   :  { %p356_p3 = pnand %p354_p2, %p351_p1 }
 0x138   :  { %359 = shalt.err (!%p356_p3)
}
 0x139   :  { %s372_s4 = smov 128   ;;  %s373_s5 = smov 8  }
 0x13a   :  { %206 = dma.vmem_to_hbm [thread:$0]  %s201_s22, 512, %s452_s3, [#allocation4], %s372_s4, %s372_s4, %s373_s5  }
 0x13b   :  { %364 = dma.done.wait [#allocation4], 512  }
 0x13c   :  { %365 = vsyncadd [#allocation4], 4294966784 }
 0x13d   :  { %210 = vsyncpa [#allocation3], 1 }
 0x13e   :  { %211 = vsyncpa [#allocation6], 1 }
 0x13f   :  { %212 = vsyncpa [#allocation4], 1 }

// kernel: seq2seq_decoder_forward.2
= control target key start
LH: loop header
LB: loop body
LE: loop exit
PB: predicated region body
PF: predicated region fallthrough
CT: control target
= control target key end

     0   :  { %17 = vsyncpa [#allocation4], 0  ;;  %s9172_s0 = inlined_call_operand.hbm [shape: bf16[8,16,128], index: 0, kind: input, shape index: {}]   ;;  %s9173_s1 = inlined_call_operand.hbm [shape: f32[2,16,128], index: 1, kind: input, shape index: {}]   ;;  %s9174_s2 = inlined_call_operand.hbm [shape: bf16[128,384], index: 2, kind: input, shape index: {}]   ;;  %s9175_s3 = inlined_call_operand.hbm [shape: bf16[128,384], index: 3, kind: input, shape index: {}]   ;;  %s9176_s4 = inlined_call_operand.hbm [shape: f32[1,384], index: 4, kind: input, shape index: {}]   ;;  %s9177_s5 = inlined_call_operand.hbm [shape: f32[1,128], index: 5, kind: input, shape index: {}]   ;;  %s9178_s6 = inlined_call_operand.hbm [shape: bf16[1,128,384], index: 6, kind: input, shape index: {}]   ;;  %s9179_s7 = inlined_call_operand.hbm [shape: bf16[1,128,384], index: 7, kind: input, shape index: {}]   ;;  %s9180_s8 = inlined_call_operand.hbm [shape: f32[1,1,384], index: 8, kind: input, shape index: {}]   ;;  %s9181_s9 = inlined_call_operand.hbm [shape: f32[1,1,128], index: 9, kind: input, shape index: {}]   ;;  %s9182_s10 = inlined_call_operand.hbm [shape: f32[8,16,128], index: 10, kind: output, shape index: {0}]   ;;  %s9183_s11 = inlined_call_operand.hbm [shape: f32[2,16,128], index: 11, kind: output, shape index: {1}]  }
   0x1   :  { %18 = vsyncpa [#allocation7], 0 }
   0x2   :  { %19 = vsyncpa [#allocation10], 0 }
   0x3   :  { %20 = vsyncpa [#allocation13], 0 }
   0x4   :  { %21 = vsyncpa [#allocation16], 0 }
   0x5   :  { %22 = vsyncpa [#allocation19], 0 }
   0x6   :  { %23 = vsyncpa [#allocation5], 0 }
   0x7   :  { %24 = vsyncpa [#allocation22], 0  ;;  %s6674_s17 = smov [#allocation6]   ;;  %s6394_s21 = scalar_lea.hbm %s9173_s1, 512 }
   0x8   :  { %s42_s18 = sshll.u32 %s6674_s17, 4  ;;  %p6395_p0 = scmp.ne.s32.totalorder %s9173_s1, %s6394_s21  ;;  %s43_s18 = int_to_ptr.vmem [resolvable:$true] %s42_s18 }
   0x9   :  { %p6398_p1 = scmp.lt.u32.totalorder %s6394_s21, %s9173_s1 }
   0xb   :  { %p6400_p2 = pnand %p6398_p1, %p6395_p0 }
   0xd   :  { %6403 = shalt.err (!%p6400_p2)
}
   0xe   :  { %s6404_s26 = scalar_lea.vmem %s43_s18, 512  ;;  %p6409_p4 = scmp.lt.s32.totalorder %s43_s18, %s43_s18 }
   0xf   :  { %p6405_p3 = scmp.ne.s32.totalorder %s43_s18, %s6404_s26  ;;  %p6410_p5 = scmp.lt.s32.totalorder %s6404_s26, %s6404_s26 }
  0x11   :  { %p6411_p6 = por %p6410_p5, %p6409_p4 }
  0x13   :  { %p6412_p7 = pnand %p6411_p6, %p6405_p3 }
  0x15   :  { %6415 = shalt.err (!%p6412_p7)
}
  0x16   :  { %s6675_s27 = smov 128   ;;  %s6676_s28 = smov 8  }
  0x17   :  { %48 = dma.hbm_to_vmem [thread:$0]  %s9173_s1, 512, %s43_s18, [#allocation7], %s6675_s27, %s6675_s27, %s6676_s28  }
  0x18   :  { %s6677_s12 = smov [#allocation9]   ;;  %s6678_s14 = smov [#allocation12]  }
  0x19   :  { %s66_s13 = sshll.u32 %s6677_s12, 4  ;;  %s89_s15 = sshll.u32 %s6678_s14, 4  ;;  %s67_s13 = int_to_ptr.vmem [resolvable:$true] %s66_s13  ;;  %s90_s15 = int_to_ptr.vmem [resolvable:$true] %s89_s15 }
  0x1a   :  { %s6416_s19 = scalar_lea.hbm %s9175_s3, 3072 }
  0x1b   :  { %p6417_p8 = scmp.ne.s32.totalorder %s9175_s3, %s6416_s19  ;;  %p6420_p9 = scmp.lt.u32.totalorder %s6416_s19, %s9175_s3 }
  0x1d   :  { %p6422_p10 = pnand %p6420_p9, %p6417_p8 }
  0x1f   :  { %6425 = shalt.err (!%p6422_p10)
}
  0x20   :  { %s6426_s1 = scalar_lea.vmem %s67_s13, 3072  ;;  %p6431_p12 = scmp.lt.s32.totalorder %s67_s13, %s67_s13 }
  0x21   :  { %p6427_p11 = scmp.ne.s32.totalorder %s67_s13, %s6426_s1  ;;  %p6432_p13 = scmp.lt.s32.totalorder %s6426_s1, %s6426_s1 }
  0x23   :  { %p6433_p0 = por %p6432_p13, %p6431_p12 }
  0x25   :  { %p6434_p1 = pnand %p6433_p0, %p6427_p11 }
  0x27   :  { %6437 = shalt.err (!%p6434_p1)
}
  0x28   :  { %s6679_s18 = smov 192   ;;  %s6680_s24 = smov 12  }
  0x29   :  { %72 = dma.hbm_to_vmem [thread:$0]  %s9175_s3, 3072, %s67_s13, [#allocation10], %s6679_s18, %s6679_s18, %s6680_s24  }
  0x2a   :  { %s6438_s12 = scalar_lea.hbm %s9177_s5, 16 }
  0x2b   :  { %p6439_p2 = scmp.ne.s32.totalorder %s9177_s5, %s6438_s12  ;;  %p6442_p3 = scmp.lt.u32.totalorder %s6438_s12, %s9177_s5 }
  0x2d   :  { %p6444_p4 = pnand %p6442_p3, %p6439_p2 }
  0x2f   :  { %6447 = shalt.err (!%p6444_p4)
}
  0x30   :  { %s6448_s20 = scalar_lea.vmem %s90_s15, 16  ;;  %s6452_s21 = scalar_lea.vmem %s90_s15, 32 }
  0x31   :  { %p6449_p5 = scmp.ne.s32.totalorder %s90_s15, %s6448_s20  ;;  %p6453_p6 = scmp.lt.s32.totalorder %s90_s15, %s90_s15 }
  0x32   :  { %p6454_p7 = scmp.lt.s32.totalorder %s6452_s21, %s6448_s20 }
  0x34   :  { %p6455_p8 = por %p6454_p7, %p6453_p6 }
  0x36   :  { %p6456_p9 = pnand %p6455_p8, %p6449_p5 }
  0x38   :  { %6459 = shalt.err (!%p6456_p9)
}
  0x39   :  { %92 = dma.hbm_to_vmem [thread:$0]  %s9177_s5, 16, %s90_s15, [#allocation13]  }
  0x3a   :  { %s6681_s22 = smov [#allocation15]   ;;  %s6682_s1 = smov [#allocation3]  }
  0x3b   :  { %s110_s23 = sshll.u32 %s6681_s22, 4  ;;  %s30_s25 = sshll.u32 %s6682_s1, 4  ;;  %s111_s23 = int_to_ptr.vmem [resolvable:$true] %s110_s23  ;;  %s31_s25 = int_to_ptr.vmem [resolvable:$true] %s30_s25 }
  0x3c   :  { %s6460_s30 = scalar_lea.hbm %s9179_s7, 3072 }
  0x3d   :  { %p6461_p10 = scmp.ne.s32.totalorder %s9179_s7, %s6460_s30  ;;  %p6464_p11 = scmp.lt.u32.totalorder %s6460_s30, %s9179_s7 }
  0x3f   :  { %p6466_p12 = pnand %p6464_p11, %p6461_p10 }
  0x41   :  { %6469 = shalt.err (!%p6466_p12)
}
  0x42   :  { %s6470_s5 = scalar_lea.vmem %s111_s23, 3072  ;;  %p6475_p0 = scmp.lt.s32.totalorder %s111_s23, %s111_s23 }
  0x43   :  { %p6471_p13 = scmp.ne.s32.totalorder %s111_s23, %s6470_s5  ;;  %p6476_p1 = scmp.lt.s32.totalorder %s6470_s5, %s6470_s5 }
  0x45   :  { %p6477_p2 = por %p6476_p1, %p6475_p0 }
  0x47   :  { %p6478_p3 = pnand %p6477_p2, %p6471_p13 }
  0x49   :  { %6481 = shalt.err (!%p6478_p3)
}
  0x4a   :  { %116 = dma.hbm_to_vmem [thread:$0]  %s9179_s7, 3072, %s111_s23, [#allocation16], %s6679_s18, %s6679_s18, %s6680_s24  }
  0x4b   :  { %s6482_s3 = scalar_lea.hbm %s9172_s0, 1024 }
  0x4c   :  { %p6483_p4 = scmp.ne.s32.totalorder %s9172_s0, %s6482_s3  ;;  %p6486_p5 = scmp.lt.u32.totalorder %s6482_s3, %s9172_s0 }
  0x4e   :  { %p6488_p6 = pnand %p6486_p5, %p6483_p4 }
  0x50   :  { %6491 = shalt.err (!%p6488_p6)
}
  0x51   :  { %s6492_s29 = scalar_lea.vmem %s31_s25, 1024  ;;  %p6497_p8 = scmp.lt.s32.totalorder %s31_s25, %s31_s25 }
  0x52   :  { %p6493_p7 = scmp.ne.s32.totalorder %s31_s25, %s6492_s29  ;;  %p6498_p9 = scmp.lt.s32.totalorder %s6492_s29, %s6492_s29 }
  0x54   :  { %p6499_p10 = por %p6498_p9, %p6497_p8 }
  0x56   :  { %p6500_p11 = pnand %p6499_p10, %p6493_p7 }
  0x58   :  { %6503 = shalt.err (!%p6500_p11)
}
  0x59   :  { %s6683_s7 = smov 64   ;;  %s6684_s23 = smov 4  }
  0x5a   :  { %36 = dma.hbm_to_vmem [thread:$0]  %s9172_s0, 1024, %s31_s25, [#allocation4], %s6683_s7, %s6683_s7, %s6684_s23  }
  0x5b   :  { %s6685_s14 = smov [#allocation8]   ;;  %s6686_s17 = smov [#allocation11]  }
  0x5c   :  { %s54_s16 = sshll.u32 %s6685_s14, 4  ;;  %s79_s5 = sshll.u32 %s6686_s17, 4  ;;  %s55_s16 = int_to_ptr.vmem [resolvable:$true] %s54_s16  ;;  %s80_s5 = int_to_ptr.vmem [resolvable:$true] %s79_s5 }
  0x5d   :  { %s6504_s20 = scalar_lea.hbm %s9174_s2, 3072 }
  0x5e   :  { %p6505_p12 = scmp.ne.s32.totalorder %s9174_s2, %s6504_s20  ;;  %p6508_p13 = scmp.lt.u32.totalorder %s6504_s20, %s9174_s2 }
  0x60   :  { %p6510_p0 = pnand %p6508_p13, %p6505_p12 }
  0x62   :  { %6513 = shalt.err (!%p6510_p0)
}
  0x63   :  { %s6514_s0 = scalar_lea.vmem %s55_s16, 3072  ;;  %p6519_p2 = scmp.lt.s32.totalorder %s55_s16, %s55_s16 }
  0x64   :  { %p6515_p1 = scmp.ne.s32.totalorder %s55_s16, %s6514_s0  ;;  %p6520_p3 = scmp.lt.s32.totalorder %s6514_s0, %s6514_s0 }
  0x66   :  { %p6521_p4 = por %p6520_p3, %p6519_p2 }
  0x68   :  { %p6522_p5 = pnand %p6521_p4, %p6515_p1 }
  0x6a   :  { %6525 = shalt.err (!%p6522_p5)
}
  0x6b   :  { %60 = dma.hbm_to_vmem [thread:$0]  %s9174_s2, 3072, %s55_s16, [#allocation7], %s6679_s18, %s6679_s18, %s6680_s24  }
  0x6c   :  { %s6526_s7 = scalar_lea.hbm %s9176_s4, 48 }
  0x6d   :  { %p6527_p6 = scmp.ne.s32.totalorder %s9176_s4, %s6526_s7  ;;  %p6530_p7 = scmp.lt.u32.totalorder %s6526_s7, %s9176_s4 }
  0x6f   :  { %p6532_p8 = pnand %p6530_p7, %p6527_p6 }
  0x71   :  { %6535 = shalt.err (!%p6532_p8)
}
  0x72   :  { %s6536_s17 = scalar_lea.vmem %s80_s5, 48  ;;  %s6540_s15 = scalar_lea.vmem %s80_s5, 64 }
  0x73   :  { %p6537_p9 = scmp.ne.s32.totalorder %s80_s5, %s6536_s17  ;;  %p6541_p10 = scmp.lt.s32.totalorder %s80_s5, %s80_s5 }
  0x74   :  { %p6542_p11 = scmp.lt.s32.totalorder %s6540_s15, %s6536_s17 }
  0x76   :  { %p6543_p12 = por %p6542_p11, %p6541_p10 }
  0x78   :  { %p6544_p13 = pnand %p6543_p12, %p6537_p9 }
  0x7a   :  { %6547 = shalt.err (!%p6544_p13)
}
  0x7b   :  { %82 = dma.hbm_to_vmem [thread:$0]  %s9176_s4, 48, %s80_s5, [#allocation10]  }
  0x7c   :  { %s6687_s19 = smov [#allocation14]   ;;  %s6688_s21 = smov [#allocation17]  }
  0x7d   :  { %s98_s20 = sshll.u32 %s6687_s19, 4  ;;  %s123_s3 = sshll.u32 %s6688_s21, 4  ;;  %s99_s20 = int_to_ptr.vmem [resolvable:$true] %s98_s20  ;;  %s124_s3 = int_to_ptr.vmem [resolvable:$true] %s123_s3 }
  0x7e   :  { %s6548_s0 = scalar_lea.hbm %s9178_s6, 3072 }
  0x7f   :  { %p6549_p0 = scmp.ne.s32.totalorder %s9178_s6, %s6548_s0  ;;  %p6552_p1 = scmp.lt.u32.totalorder %s6548_s0, %s9178_s6 }
  0x81   :  { %p6554_p2 = pnand %p6552_p1, %p6549_p0 }
  0x83   :  { %6557 = shalt.err (!%p6554_p2)
}
  0x84   :  { %s6558_s4 = scalar_lea.vmem %s99_s20, 3072  ;;  %p6563_p4 = scmp.lt.s32.totalorder %s99_s20, %s99_s20 }
  0x85   :  { %p6559_p3 = scmp.ne.s32.totalorder %s99_s20, %s6558_s4  ;;  %p6564_p5 = scmp.lt.s32.totalorder %s6558_s4, %s6558_s4 }
  0x87   :  { %p6565_p6 = por %p6564_p5, %p6563_p4 }
  0x89   :  { %p6566_p7 = pnand %p6565_p6, %p6559_p3 }
  0x8b   :  { %6569 = shalt.err (!%p6566_p7)
}
  0x8c   :  { %104 = dma.hbm_to_vmem [thread:$0]  %s9178_s6, 3072, %s99_s20, [#allocation13], %s6679_s18, %s6679_s18, %s6680_s24  }
  0x8d   :  { %s6570_s12 = scalar_lea.hbm %s9180_s8, 48 }
  0x8e   :  { %p6571_p8 = scmp.ne.s32.totalorder %s9180_s8, %s6570_s12  ;;  %p6574_p9 = scmp.lt.u32.totalorder %s6570_s12, %s9180_s8 }
  0x90   :  { %p6576_p10 = pnand %p6574_p9, %p6571_p8 }
  0x92   :  { %6579 = shalt.err (!%p6576_p10)
}
  0x93   :  { %s6580_s16 = scalar_lea.vmem %s124_s3, 48  ;;  %s6584_s19 = scalar_lea.vmem %s124_s3, 64 }
  0x94   :  { %p6581_p11 = scmp.ne.s32.totalorder %s124_s3, %s6580_s16  ;;  %p6585_p12 = scmp.lt.s32.totalorder %s124_s3, %s124_s3 }
  0x95   :  { %p6586_p13 = scmp.lt.s32.totalorder %s6584_s19, %s6580_s16 }
  0x97   :  { %p6587_p0 = por %p6586_p13, %p6585_p12 }
  0x99   :  { %p6588_p1 = pnand %p6587_p0, %p6581_p11 }
  0x9b   :  { %6591 = shalt.err (!%p6588_p1)
}
  0x9c   :  { %126 = dma.hbm_to_vmem [thread:$0]  %s9180_s8, 48, %s124_s3, [#allocation16]  }
  0x9d   :  { %s6689_s24 = smov [#allocation18]   ;;  %s6592_s22 = scalar_lea.hbm %s9181_s9, 16 }
  0x9e   :  { %s133_s20 = sshll.u32 %s6689_s24, 4  ;;  %p6593_p2 = scmp.ne.s32.totalorder %s9181_s9, %s6592_s22  ;;  %s134_s20 = int_to_ptr.vmem [resolvable:$true] %s133_s20 }
  0x9f   :  { %p6596_p3 = scmp.lt.u32.totalorder %s6592_s22, %s9181_s9 }
  0xa1   :  { %p6598_p4 = pnand %p6596_p3, %p6593_p2 }
  0xa3   :  { %6601 = shalt.err (!%p6598_p4)
}
  0xa4   :  { %s6602_s29 = scalar_lea.vmem %s134_s20, 16  ;;  %s6606_s8 = scalar_lea.vmem %s134_s20, 32 }
  0xa5   :  { %p6603_p5 = scmp.ne.s32.totalorder %s134_s20, %s6602_s29  ;;  %p6607_p6 = scmp.lt.s32.totalorder %s134_s20, %s134_s20 }
  0xa6   :  { %p6608_p7 = scmp.lt.s32.totalorder %s6606_s8, %s6602_s29 }
  0xa8   :  { %p6609_p8 = por %p6608_p7, %p6607_p6 }
  0xaa   :  { %p6610_p9 = pnand %p6609_p8, %p6603_p5 }
  0xac   :  { %6613 = shalt.err (!%p6610_p9)
}
  0xad   :  { %136 = dma.hbm_to_vmem [thread:$0]  %s9181_s9, 16, %s134_s20, [#allocation19]  }
  0xae   :  { %6658 = dma.done.wait [#allocation4], 1024  }
  0xaf   :  { %6659 = vsyncadd [#allocation4], 4294966272 }
  0xb0   :  { %6660 = dma.done.wait [#allocation7], 3584  }
  0xb1   :  { %6661 = vsyncadd [#allocation7], 4294963712 }
  0xb2   :  { %6662 = dma.done.wait [#allocation10], 3120  }
  0xb3   :  { %6663 = vsyncadd [#allocation10], 4294964176 }
  0xb4   :  { %6664 = dma.done.wait [#allocation13], 3088  }
  0xb5   :  { %6665 = vsyncadd [#allocation13], 4294964208 }
  0xb6   :  { %6666 = dma.done.wait [#allocation16], 3120  }
  0xb7   :  { %6667 = vsyncadd [#allocation16], 4294964176 }
  0xb8   :  { %6668 = dma.done.wait [#allocation19], 16  }
  0xb9   :  { %6669 = vsyncadd [#allocation19], 4294967280  ;;  %v9210_v0 = vmov 0.0   ;;  %v9184_v1 = vmov 0   ;;  %vm6692_vm0 = vmmov 0   ;;  %v5673_v25 = vld [vmem:[#allocation3] sm:$0xff]  }
  0xba   :  { %4855 = vmatprep.subr.bf16.mxu1 %v9210_v0  ;;  %501 = vmatprep.mubr.bf16.mxu0 %v9184_v1  ;;  %v6894_v2 = vld [vmem:[#allocation8 + $0x4] ss:$12 sps:$4 sm:$0xff]   ;;  %v6896_v3 = vld [vmem:[#allocation8] ss:$12 sps:$4 sm:$0xff]   ;;  %v6899_v4 = vld [vmem:[#allocation8 + $0x1c] ss:$12 sps:$4 sm:$0xff]  }
  0xbb   :  { %4871 = vmatprep.mubr.msk.bf16.mxu1 %vm6692_vm0, %v9210_v0  ;;  %469 = vmatprep.subr.bf16.mxu0 %v6894_v2  ;;  %v6902_v5 = vld [vmem:[#allocation8 + $0x18] ss:$12 sps:$4 sm:$0xff]   ;;  %v6905_v6 = vld [vmem:[#allocation8 + $0x34] ss:$12 sps:$4 sm:$0xff]   ;;  %v6908_v7 = vld [vmem:[#allocation8 + $0x30] ss:$12 sps:$4 sm:$0xff]  }
  0xbc   :  { %470 = vmatpush1.bf16.msra.mxu0 %v6896_v3  ;;  %v6911_v8 = vld [vmem:[#allocation8 + $0x4c] ss:$12 sps:$4 sm:$0xff]   ;;  %v6913_v9 = vld [vmem:[#allocation8 + $0x8] ss:$12 sps:$4 sm:$0xff]   ;;  %v6920_v11 = vld [vmem:[#allocation8 + $0x64] ss:$12 sps:$4 sm:$0xff]  }
  0xbd   :  { %471 = vmatprep.subr.bf16.mxu0 %v6899_v4  ;;  %v6916_v10 = vld [vmem:[#allocation8 + $0x48] ss:$12 sps:$4 sm:$0xff]   ;;  %4856 = vmatpush3.bf16.msra.mxu1 %v6913_v9  ;;  %v6923_v12 = vld [vmem:[#allocation8 + $0x20] ss:$12 sps:$4 sm:$0xff]   ;;  %v6929_v14 = vld [vmem:[#allocation8 + $0x38] ss:$12 sps:$4 sm:$0xff]  }
  0xbe   :  { %4857 = vmatprep.subr.bf16.mxu1 %v9210_v0  ;;  %v6926_v13 = vld [vmem:[#allocation8 + $0x60] ss:$12 sps:$4 sm:$0xff]   ;;  %v6932_v15 = vld [vmem:[#allocation8 + $0x7c] ss:$12 sps:$4 sm:$0xff]   ;;  %v6935_v16 = vld [vmem:[#allocation8 + $0x78] ss:$12 sps:$4 sm:$0xff]  }
  0xbf   :  { %v6939_v17 = vld [vmem:[#allocation8 + $0x50] ss:$12 sps:$4 sm:$0xff]   ;;  %v6942_v18 = vld [vmem:[#allocation8 + $0x94] ss:$12 sps:$4 sm:$0xff]   ;;  %v6952_v21 = vld [vmem:[#allocation8 + $0xac] ss:$12 sps:$4 sm:$0xff]  }
  0xc0   :  { %472 = vmatpush1.bf16.msra.mxu0 %v6902_v5  ;;  %v6945_v19 = vld [vmem:[#allocation8 + $0x90] ss:$12 sps:$4 sm:$0xff]   ;;  %v6949_v20 = vld [vmem:[#allocation8 + $0x68] ss:$12 sps:$4 sm:$0xff]   ;;  %v6959_v23 = vld [vmem:[#allocation8 + $0x80] ss:$12 sps:$4 sm:$0xff]  }
  0xc1   :  { %473 = vmatprep.subr.bf16.mxu0 %v6905_v6  ;;  %4858 = vmatpush3.bf16.msra.mxu1 %v6923_v12  ;;  %v6956_v22 = vld [vmem:[#allocation8 + $0xa8] ss:$12 sps:$4 sm:$0xff]   ;;  %v6962_v24 = vld [vmem:[#allocation9 + $0x4] ss:$12 sps:$4 sm:$0xff]   ;;  %v6965_v26 = vld [vmem:[#allocation9] ss:$12 sps:$4 sm:$0xff]  }
  0xc2   :  { %4859 = vmatprep.subr.bf16.mxu1 %v9210_v0  ;;  %v6969_v27 = vld [vmem:[#allocation8 + $0x98] ss:$12 sps:$4 sm:$0xff]   ;;  %v6972_v28 = vld [vmem:[#allocation9 + $0x1c] ss:$12 sps:$4 sm:$0xff]   ;;  %v6982_v31 = vld [vmem:[#allocation9 + $0x34] ss:$12 sps:$4 sm:$0xff]  }
  0xc3   :  { %v6975_v29 = vld [vmem:[#allocation9 + $0x18] ss:$12 sps:$4 sm:$0xff]   ;;  %v6979_v30 = vld [vmem:[#allocation8 + $0xb0] ss:$12 sps:$4 sm:$0xff]   ;;  %v6992_v34 = vld [vmem:[#allocation9 + $0x8] ss:$12 sps:$4 sm:$0xff]  }
  0xc4   :  { %474 = vmatpush1.bf16.msra.mxu0 %v6908_v7  ;;  %v6985_v32 = vld [vmem:[#allocation9 + $0x30] ss:$12 sps:$4 sm:$0xff]   ;;  %v6988_v33 = vld [vmem:[#allocation9 + $0x4c] ss:$12 sps:$4 sm:$0xff]   ;;  %v6996_v35 = vld [vmem:[#allocation9 + $0x48] ss:$12 sps:$4 sm:$0xff]  }
  0xc5   :  { %475 = vmatprep.subr.bf16.mxu0 %v6911_v8  ;;  %4860 = vmatpush3.bf16.msra.mxu1 %v6929_v14  ;;  %v6998_v36 = vld [vmem:[#allocation9 + $0x20] ss:$12 sps:$4 sm:$0xff]   ;;  %v7000_v37 = vld [vmem:[#allocation9 + $0x64] ss:$12 sps:$4 sm:$0xff]   ;;  %v7012_v40 = vld [vmem:[#allocation9 + $0x7c] ss:$12 sps:$4 sm:$0xff]  }
  0xc6   :  { %4861 = vmatprep.subr.bf16.mxu1 %v9210_v0  ;;  %v7006_v38 = vld [vmem:[#allocation9 + $0x60] ss:$12 sps:$4 sm:$0xff]   ;;  %v7008_v39 = vld [vmem:[#allocation9 + $0x38] ss:$12 sps:$4 sm:$0xff]   ;;  %v7020_v42 = vld [vmem:[#allocation9 + $0x50] ss:$12 sps:$4 sm:$0xff]  }
  0xc7   :  { %v7018_v41 = vld [vmem:[#allocation9 + $0x78] ss:$12 sps:$4 sm:$0xff]   ;;  %v7022_v43 = vld [vmem:[#allocation9 + $0x94] ss:$12 sps:$4 sm:$0xff]   ;;  %v7028_v44 = vld [vmem:[#allocation9 + $0x90] ss:$12 sps:$4 sm:$0xff]  }
  0xc8   :  { %476 = vmatpush1.bf16.msra.mxu0 %v6916_v10  ;;  %9382 = vst [vmem:[#allocation31_spill] sm:$0xff] %v7018_v41  ;;  %9383 = vst [vmem:[#allocation32_spill] sm:$0xff] %v7022_v43  ;;  %v7030_v45 = vld [vmem:[#allocation9 + $0x68] ss:$12 sps:$4 sm:$0xff]   ;;  %v7032_v46 = vld [vmem:[#allocation9 + $0xac] ss:$12 sps:$4 sm:$0xff]  }
  0xc9   :  { %477 = vmatprep.subr.bf16.mxu0 %v6920_v11  ;;  %4862 = vmatpush3.bf16.msra.mxu1 %v6939_v17  ;;  %9384 = vst [vmem:[#allocation33_spill] sm:$0xff] %v7028_v44  ;;  %9385 = vst [vmem:[#allocation34_spill] sm:$0xff] %v7032_v46  ;;  %v7038_v47 = vld [vmem:[#allocation9 + $0xa8] ss:$12 sps:$4 sm:$0xff]   ;;  %v7040_v48 = vld [vmem:[#allocation6] sm:$0xff]  ;;  %s6693_s9 = smov [#allocation20]  }
  0xca   :  { %4863 = vmatprep.subr.bf16.mxu1 %v9210_v0  ;;  %9386 = vst [vmem:[#allocation35_spill] sm:$0xff] %v7038_v47  ;;  %v7042_v49 = vld [vmem:[#allocation6 + $0x8] sm:$0xff]  ;;  %v7050_v51 = vld [vmem:[#allocation9 + $0x98] ss:$12 sps:$4 sm:$0xff]   ;;  %v7058_v53 = vld [vmem:[#allocation9 + $0xb0] ss:$12 sps:$4 sm:$0xff]  }
  0xcb   :  { %v7044_v50 = vld [vmem:[#allocation9 + $0x80] ss:$12 sps:$4 sm:$0xff]   ;;  %9388 = vst [vmem:[#allocation37_spill] sm:$0xff] %v7050_v51  ;;  %v553_v52 = vpack.c.bf16 %v7042_v49, %v7040_v48  ;;  %9389 = vst [vmem:[#allocation38_spill] sm:$0xff] %v7058_v53  ;;  %v7068_v55 = vld [vmem:[#allocation14] ss:$12 sps:$4 sm:$0xff]  }
  0xcc   :  { %478 = vmatpush1.bf16.msra.mxu0 %v6926_v13  ;;  %9387 = vst [vmem:[#allocation36_spill] sm:$0xff] %v7044_v50  ;;  %v7066_v54 = vld [vmem:[#allocation14 + $0x4] ss:$12 sps:$4 sm:$0xff]   ;;  %9391 = vst [vmem:[#allocation40_spill] sm:$0xff] %v7068_v55  ;;  %v7070_v56 = vld [vmem:[#allocation14 + $0x8] ss:$12 sps:$4 sm:$0xff]  }
  0xcd   :  { %479 = vmatprep.subr.bf16.mxu0 %v6932_v15  ;;  %4864 = vmatpush3.bf16.msra.mxu1 %v6949_v20  ;;  %9390 = vst [vmem:[#allocation39_spill] sm:$0xff] %v7066_v54  ;;  %9392 = vst [vmem:[#allocation41_spill] sm:$0xff] %v7070_v56  ;;  %v7075_v57 = vld [vmem:[#allocation14 + $0x1c] ss:$12 sps:$4 sm:$0xff]   ;;  %v7078_v58 = vld [vmem:[#allocation14 + $0x18] ss:$12 sps:$4 sm:$0xff]  }
  0xce   :  { %4865 = vmatprep.subr.bf16.mxu1 %v9210_v0  ;;  %9393 = vst [vmem:[#allocation42_spill] sm:$0xff] %v7075_v57  ;;  %9394 = vst [vmem:[#allocation43_spill] sm:$0xff] %v7078_v58  ;;  %v7080_v59 = vld [vmem:[#allocation14 + $0x20] ss:$12 sps:$4 sm:$0xff]   ;;  %v7088_v61 = vld [vmem:[#allocation14 + $0x30] ss:$12 sps:$4 sm:$0xff]  }
  0xcf   :  { %9395 = vst [vmem:[#allocation44_spill] sm:$0xff] %v7080_v59  ;;  %v7085_v60 = vld [vmem:[#allocation14 + $0x34] ss:$12 sps:$4 sm:$0xff]   ;;  %9397 = vst [vmem:[#allocation46_spill] sm:$0xff] %v7088_v61  ;;  %v7090_v62 = vld [vmem:[#allocation14 + $0x38] ss:$12 sps:$4 sm:$0xff]  }
  0xd0   :  { %480 = vmatpush1.bf16.msra.mxu0 %v6935_v16  ;;  %9396 = vst [vmem:[#allocation45_spill] sm:$0xff] %v7085_v60  ;;  %9398 = vst [vmem:[#allocation47_spill] sm:$0xff] %v7090_v62  ;;  %v7095_v63 = vld [vmem:[#allocation14 + $0x4c] ss:$12 sps:$4 sm:$0xff]   ;;  %s4364_s5 = sshll.u32 %s6693_s9, 4  ;;  %s6694_s7 = smov [#allocation21]   ;;  %s4365_s5 = int_to_ptr.vmem [resolvable:$true] %s4364_s5 }
  0xd1   :  { %481 = vmatprep.subr.bf16.mxu0 %v6942_v18  ;;  %4866 = vmatpush3.bf16.msra.mxu1 %v6959_v23  ;;  %9399 = vst [vmem:[#allocation48_spill] sm:$0xff] %v7095_v63  ;;  %s4376_s23 = sshll.u32 %s6694_s7, 4  ;;  %s6614_s30 = scalar_lea.vmem %s4365_s5, 2048  ;;  %s9135_s23 = int_to_ptr.vmem [resolvable:$true] %s4376_s23 }
  0xd2   :  { %4867 = vmatprep.subr.bf16.mxu1 %v9210_v0  ;;  %p6615_p10 = scmp.ne.s32.totalorder %s4365_s5, %s6614_s30  ;;  %p6619_p11 = scmp.lt.s32.totalorder %s4365_s5, %s4365_s5 }
  0xd3   :  { %p6620_p12 = scmp.lt.s32.totalorder %s6614_s30, %s6614_s30 }
  0xd4   :  { %482 = vmatpush1.bf16.msra.mxu0 %v6945_v19 }
  0xd5   :  { %483 = vmatprep.subr.bf16.mxu0 %v6952_v21  ;;  %4868 = vmatpush3.bf16.msra.mxu1 %v6969_v27  ;;  %p6621_p13 = por %p6620_p12, %p6619_p11 }
  0xd6   :  { %4869 = vmatprep.subr.bf16.mxu1 %v9210_v0 }
  0xd7   :  { %p6622_p0 = pnand %p6621_p13, %p6615_p10 }
  0xd8   :  { %484 = vmatpush1.bf16.msra.mxu0 %v6956_v22 }
  0xd9   :  { %682 = vmatprep.subr.bf16.mxu0 %v6962_v24  ;;  %4870 = vmatpush3.bf16.msra.mxu1 %v6979_v30 }
  0xda   :  { %4875 = vmatprep.subr.bf16.mxu1 %v9210_v0 }
  0xdb   :  { %502 = vmatmul.mubr.bf16.vlgmr.msra.gmra.mrb[0].mxu0 %v5673_v25 }
  0xdc   :  { %683 = vmatpush1.bf16.msra.mxu0 %v6965_v26  ;;  %714 = vmatprep.mubr.bf16.mxu0 %v9184_v1 }
  0xdd   :  { %684 = vmatprep.subr.bf16.mxu0 %v6972_v28  ;;  %4872 = vmatmul.mubr.bf16.vlgmr.msra.gmra.mrb[0].mxu1 %v5673_v25  ;;  %v7098_v25 = vld [vmem:[#allocation14 + $0x48] ss:$12 sps:$4 sm:$0xff]  }
  0xde   :  { %4876 = vmatpush3.bf16.msra.mxu1 %v6992_v34  ;;  %4891 = vmatprep.mubr.msk.bf16.mxu1 %vm6692_vm0, %v9210_v0  ;;  %9400 = vst [vmem:[#allocation49_spill] sm:$0xff] %v7098_v25 }
  0xdf   :  { %4877 = vmatprep.subr.bf16.mxu1 %v9210_v0 }
  0xe0   :  { %685 = vmatpush1.bf16.msra.mxu0 %v6975_v29 }
  0xe1   :  { %686 = vmatprep.subr.bf16.mxu0 %v6982_v31 }
  0xe2   :  { %4878 = vmatpush3.bf16.msra.mxu1 %v6998_v36 }
  0xe3   :  { %4879 = vmatprep.subr.bf16.mxu1 %v9210_v0 }
  0xe4   :  { %687 = vmatpush1.bf16.msra.mxu0 %v6985_v32 }
  0xe5   :  { %688 = vmatprep.subr.bf16.mxu0 %v6988_v33 }
  0xe6   :  { %4880 = vmatpush3.bf16.msra.mxu1 %v7008_v39 }
  0xe7   :  { %4881 = vmatprep.subr.bf16.mxu1 %v9210_v0 }
  0xe8   :  { %689 = vmatpush1.bf16.msra.mxu0 %v6996_v35 }
  0xe9   :  { %690 = vmatprep.subr.bf16.mxu0 %v7000_v37 }
  0xea   :  { %4882 = vmatpush3.bf16.msra.mxu1 %v7020_v42 }
  0xeb   :  { %4883 = vmatprep.subr.bf16.mxu1 %v9210_v0 }
  0xec   :  { %691 = vmatpush1.bf16.msra.mxu0 %v7006_v38 }
  0xed   :  { %692 = vmatprep.subr.bf16.mxu0 %v7012_v40 }
  0xee   :  { %4884 = vmatpush3.bf16.msra.mxu1 %v7030_v45 }
  0xef   :  { %4885 = vmatprep.subr.bf16.mxu1 %v9210_v0 }
  0xf0   :  { %693 = vmatpush1.bf16.msra.mxu0 %v7018_v41 }
  0xf1   :  { %694 = vmatprep.subr.bf16.mxu0 %v7022_v43 }
  0xf2   :  { %4886 = vmatpush3.bf16.msra.mxu1 %v7044_v50 }
  0xf3   :  { %4887 = vmatprep.subr.bf16.mxu1 %v9210_v0 }
  0xf4   :  { %695 = vmatpush1.bf16.msra.mxu0 %v7028_v44 }
  0xf5   :  { %696 = vmatprep.subr.bf16.mxu0 %v7032_v46 }
  0xf6   :  { %4888 = vmatpush3.bf16.msra.mxu1 %v7050_v51 }
  0xf7   :  { %4889 = vmatprep.subr.bf16.mxu1 %v9210_v0 }
  0xf8   :  { %697 = vmatpush1.bf16.msra.mxu0 %v7038_v47 }
  0xf9   :  { %959 = vmatprep.subr.bf16.mxu0 %v7066_v54 }
  0xfa   :  { %4890 = vmatpush3.bf16.msra.mxu1 %v7058_v53 }
  0xfb   :  { %715 = vmatmul.mubr.bf16.vlgmr.msra.gmra.mrb[0].mxu0 %v553_v52  ;;  %4895 = vmatprep.subr.bf16.mxu1 %v9210_v0 }
  0xfc   :  { %991 = vmatprep.mubr.bf16.mxu0 %v9184_v1  ;;  %960 = vmatpush1.bf16.msra.mxu0 %v7068_v55  ;;  %v7105_v1 = vld [vmem:[#allocation14 + $0x64] ss:$12 sps:$4 sm:$0xff]  }
  0xfd   :  { %4892 = vmatmul.mubr.bf16.vlgmr.msra.gmra.mrb[4].mxu1 %v553_v52  ;;  %961 = vmatprep.subr.bf16.mxu0 %v7075_v57  ;;  %v7100_v52 = vld [vmem:[#allocation14 + $0x50] ss:$12 sps:$4 sm:$0xff]   ;;  %9402 = vst [vmem:[#allocation51_spill] sm:$0xff] %v7105_v1 }
  0xfe   :  { %4911 = vmatprep.mubr.msk.bf16.mxu1 %vm6692_vm0, %v9210_v0  ;;  %4896 = vmatpush3.bf16.msra.mxu1 %v7070_v56  ;;  %9401 = vst [vmem:[#allocation50_spill] sm:$0xff] %v7100_v52  ;;  %v244_v56 = vld [vmem:[#allocation11] sm:$0x7] }
  0xff   :  { %4897 = vmatprep.subr.bf16.mxu1 %v9210_v0 }
 0x100   :  { %962 = vmatpush1.bf16.msra.mxu0 %v7078_v58  ;;  %v320_v58 = vlaneseq }
 0x101   :  { %963 = vmatprep.subr.bf16.mxu0 %v7085_v60  ;;  %v7112_v60 = vld [vmem:[#allocation14 + $0x7c] ss:$12 sps:$4 sm:$0xff]  }
 0x102   :  { %4898 = vmatpush3.bf16.msra.mxu1 %v7080_v59  ;;  %9405 = vst [vmem:[#allocation54_spill] sm:$0xff] %v7112_v60  ;;  %v7127_v59 = vld [vmem:[#allocation14 + $0x90] ss:$12 sps:$4 sm:$0xff]   ;;  %v7149_v57 = vshrl.u32 %v320_v58, 7 }
 0x103   :  { %4899 = vmatprep.subr.bf16.mxu1 %v9210_v0  ;;  %9409 = vst [vmem:[#allocation58_spill] sm:$0xff] %v7127_v59 }
 0x104   :  { %964 = vmatpush1.bf16.msra.mxu0 %v7088_v61  ;;  %v7108_v61 = vld [vmem:[#allocation14 + $0x60] ss:$12 sps:$4 sm:$0xff]   ;;  %9415 = vst [vmem:[#allocation64_spill] sm:$0xff] %v7149_v57 }
 0x105   :  { %965 = vmatprep.subr.bf16.mxu0 %v7095_v63  ;;  %9403 = vst [vmem:[#allocation52_spill] sm:$0xff] %v7108_v61  ;;  %v7117_v63 = vld [vmem:[#allocation14 + $0x78] ss:$12 sps:$4 sm:$0xff]  }
 0x106   :  { %4900 = vmatpush3.bf16.msra.mxu1 %v7090_v62  ;;  %v7110_v62 = vld [vmem:[#allocation14 + $0x68] ss:$12 sps:$4 sm:$0xff]   ;;  %9406 = vst [vmem:[#allocation55_spill] sm:$0xff] %v7117_v63 }
 0x107   :  { %4901 = vmatprep.subr.bf16.mxu1 %v9210_v0  ;;  %9404 = vst [vmem:[#allocation53_spill] sm:$0xff] %v7110_v62 }
 0x108   :  { %966 = vmatpush1.bf16.msra.mxu0 %v7098_v25  ;;  %v7119_v25 = vld [vmem:[#allocation14 + $0x80] ss:$12 sps:$4 sm:$0xff]  }
 0x109   :  { %967 = vmatprep.subr.bf16.mxu0 %v7105_v1  ;;  %9407 = vst [vmem:[#allocation56_spill] sm:$0xff] %v7119_v25  ;;  %v7129_v1 = vld [vmem:[#allocation14 + $0x98] ss:$12 sps:$4 sm:$0xff]  }
 0x10a   :  { %4902 = vmatpush3.bf16.msra.mxu1 %v7100_v52  ;;  %v7123_v52 = vld [vmem:[#allocation14 + $0x94] ss:$12 sps:$4 sm:$0xff]   ;;  %9410 = vst [vmem:[#allocation59_spill] sm:$0xff] %v7129_v1 }
 0x10b   :  { %4903 = vmatprep.subr.bf16.mxu1 %v9210_v0  ;;  %9408 = vst [vmem:[#allocation57_spill] sm:$0xff] %v7123_v52 }
 0x10c   :  { %968 = vmatpush1.bf16.msra.mxu0 %v7108_v61  ;;  %v7139_v61 = vld [vmem:[#allocation14 + $0xb0] ss:$12 sps:$4 sm:$0xff]  }
 0x10d   :  { %969 = vmatprep.subr.bf16.mxu0 %v7112_v60  ;;  %v7137_v60 = vld [vmem:[#allocation14 + $0xa8] ss:$12 sps:$4 sm:$0xff]   ;;  %9413 = vst [vmem:[#allocation62_spill] sm:$0xff] %v7139_v61 }
 0x10e   :  { %4904 = vmatpush3.bf16.msra.mxu1 %v7110_v62  ;;  %v7133_v62 = vld [vmem:[#allocation14 + $0xac] ss:$12 sps:$4 sm:$0xff]   ;;  %9412 = vst [vmem:[#allocation61_spill] sm:$0xff] %v7137_v60 }
 0x10f   :  { %4905 = vmatprep.subr.bf16.mxu1 %v9210_v0  ;;  %9411 = vst [vmem:[#allocation60_spill] sm:$0xff] %v7133_v62 }
 0x110   :  { %970 = vmatpush1.bf16.msra.mxu0 %v7117_v63 }
 0x111   :  { %971 = vmatprep.subr.bf16.mxu0 %v7123_v52 }
 0x112   :  { %4906 = vmatpush3.bf16.msra.mxu1 %v7119_v25  ;;  %v7143_v25 = vld [vmem:[#allocation15 + $0x4] ss:$12 sps:$4 sm:$0xff]  }
 0x113   :  { %4907 = vmatprep.subr.bf16.mxu1 %v9210_v0  ;;  %9414 = vst [vmem:[#allocation63_spill] sm:$0xff] %v7143_v25 }
 0x114   :  { %972 = vmatpush1.bf16.msra.mxu0 %v7127_v59 }
 0x115   :  { %973 = vmatprep.subr.bf16.mxu0 %v7133_v62  ;;  %v9215_v62 = vsub.s32 0, %v7149_v57 }
 0x116   :  { %4908 = vmatpush3.bf16.msra.mxu1 %v7129_v1 }
 0x117   :  { %4909 = vmatprep.subr.bf16.mxu1 %v9210_v0  ;;  %v7154_v55 = vrot.slane %v244_v56, %v9215_v62 }
 0x118   :  { %974 = vmatpush1.bf16.msra.mxu0 %v7137_v60 }
 0x119   :  { %1172 = vmatprep.subr.bf16.mxu0 %v7143_v25  ;;  %9416 = vst [vmem:[#allocation65_spill] sm:$0xff] %v7154_v55  ;;  %v9224_v25 = vsub.s32 1, %v7149_v57 }
 0x11a   :  { %4910 = vmatpush3.bf16.msra.mxu1 %v7139_v61 }
 0x11b   :  { %4915 = vmatprep.subr.bf16.mxu1 %v9210_v0  ;;  %v7161_v58 = vrot.slane %v244_v56, %v9224_v25 }
 0x11d   :  { %9417 = vst [vmem:[#allocation66_spill] sm:$0xff] %v7161_v58 }
 0x1b0   :  { %v546_v59 = vpop.f32.mrb[0].mxu1 }
 0x1b1   :  { %v4873_v1 = vpop.f32.mrb[1].mxu1 }
 0x1b2   :  { %v549_v52 = vpop.f32.mrb[2].mxu1 }
 0x1b3   :  { %v4874_v63 = vpop.f32.mrb[3].mxu1 }
 0x1ce   :  { %v716_v60 = vpop.f32.mrb[0].mxu0 }
 0x1cf   :  { %v5495_v61 = vadd.f32 %v716_v60, %v7154_v55  ;;  %v718_v0 = vpop.f32.mrb[1].mxu0 }
 0x1d0   :  { %v720_v54 = vpop.f32.mrb[2].mxu0  ;;  %v759_v62 = vpop.f32.mrb[4].mxu1  ;;  %v5496_v46 = vadd.f32 %v718_v0, %v7161_v58 }
 0x1d1   :  { %v4446_v1 = vmul.f32 -1.442695, %v5495_v61  ;;  %v5497_v63 = vadd.f32 %v720_v54, %v7154_v55  ;;  %v722_v53 = vpop.f32.mrb[3].mxu0  ;;  %v4893_v51 = vpop.f32.mrb[5].mxu1 }
 0x1d2   :  { %v762_v60 = vpop.f32.mrb[6].mxu1  ;;  %v5498_v44 = vadd.f32 %v722_v53, %v7161_v58  ;;  %v4448_v50 = vmul.f32 -1.442695, %v5496_v46 }
 0x1d3   :  { %5780 = vpow2.f32 %v4446_v1  ;;  %v4447_v47 = vmul.f32 -1.442695, %v5497_v63  ;;  %v4894_v43 = vpop.f32.mrb[7].mxu1  ;;  %v7166_v63 = vld [vmem:[#allocation12] ss:$0 sm:$0xff] }
 0x1d4   :  { %v4449_v41 = vmul.f32 -1.442695, %v5498_v44  ;;  %9418 = vst [vmem:[#allocation67_spill] sm:$0xff] %v7166_v63  ;;  %v800_v43 = vadd.f32 %v7166_v63, %v759_v62 }
 0x1d5   :  { %5782 = vpow2.f32 %v4447_v47  ;;  %v9227_v47 = vsub.s32 2, %v7149_v57 }
 0x1d6   :  { %5784 = vpow2.f32 %v4448_v50 }
 0x1d7   :  { %v7170_v0 = vrot.slane %v244_v56, %v9227_v47 }
 0x1d9   :  { %v547_v53 = vadd.f32 %v546_v59, %v7170_v0 }
 0x1dd   :  { %v5781_v61 = vpop.eup %5780 }
 0x1de   :  { %v774_v54 = vadd.f32 1.0, %v5781_v61 }
 0x1df   :  { %v5783_v55 = vpop.eup %5782 }
 0x1e0   :  { %5786 = vrcp.f32 %v774_v54  ;;  %v775_v1 = vadd.f32 1.0, %v5783_v55  ;;  %v5785_v46 = vpop.eup %5784  ;;  %v801_v55 = vadd.f32 %v7166_v63, %v762_v60  ;;  %v550_v54 = vadd.f32 %v549_v52, %v7170_v0 }
 0x1e1   :  { %5788 = vpow2.f32 %v4449_v41  ;;  %v788_v61 = vadd.f32 1.0, %v5785_v46 }
 0x1e2   :  { %5790 = vrcp.f32 %v775_v1 }
 0x1ea   :  { %v5787_v51 = vpop.eup %5786 }
 0x1eb   :  { %v5789_v44 = vpop.eup %5788  ;;  %v802_v50 = vmul.f32 %v5787_v51, %v800_v43 }
 0x1ec   :  { %v5791_v41 = vpop.eup %5790  ;;  %v789_v58 = vadd.f32 1.0, %v5789_v44  ;;  %v7182_v44 = vld [vmem:[#allocation15] ss:$12 sps:$4 sm:$0xff]  }
 0x1ed   :  { %v804_v1 = vadd.f32 %v802_v50, %v547_v53  ;;  %v803_v25 = vmul.f32 %v5791_v41, %v801_v55  ;;  %v7190_v53 = vld [vmem:[#allocation15 + $0x1c] ss:$12 sps:$4 sm:$0xff]   ;;  %v9420_v50 = vmov 0   ;;  %v7211_v41 = vld [vmem:[#allocation15 + $0x38] ss:$12 sps:$4 sm:$0xff]  }
 0x1ee   :  { %v7209_v55 = vld [vmem:[#allocation15 + $0x30] ss:$12 sps:$4 sm:$0xff]  }
 0x1ef   :  { %5792 = vtanh.f32 %v804_v1  ;;  %v805_v56 = vadd.f32 %v803_v25, %v550_v54  ;;  %v7184_v25 = vld [vmem:[#allocation15 + $0x8] ss:$12 sps:$4 sm:$0xff]   ;;  %v7221_v1 = vld [vmem:[#allocation15 + $0x50] ss:$12 sps:$4 sm:$0xff]  }
 0x1f0   :  { %5794 = vrcp.f32 %v788_v61  ;;  %v7215_v61 = vld [vmem:[#allocation15 + $0x4c] ss:$12 sps:$4 sm:$0xff]   ;;  %v7219_v54 = vld [vmem:[#allocation15 + $0x48] ss:$12 sps:$4 sm:$0xff]   ;;  %9421 = vst [vmem:[#allocation68_spill] sm:$0xff] %v7221_v1 }
 0x1f1   :  { %5796 = vtanh.f32 %v805_v56  ;;  %v7225_v56 = vld [vmem:[#allocation15 + $0x64] ss:$12 sps:$4 sm:$0xff]  }
 0x1f2   :  { %5798 = vrcp.f32 %v789_v58  ;;  %9422 = vst [vmem:[#allocation69_spill] sm:$0xff] %v7225_v56 }
 0x1f9   :  { %v5793_v62 = vpop.eup %5792 }
 0x1fa   :  { %v5795_v47 = vpop.eup %5794  ;;  %v808_v57 = vsub.f32 %v7040_v48, %v5793_v62  ;;  %v7196_v48 = vld [vmem:[#allocation15 + $0x18] ss:$12 sps:$4 sm:$0xff]  }
 0x1fb   :  { %v5797_v59 = vpop.eup %5796 }
 0x1fc   :  { %v809_v43 = vsub.f32 %v7042_v49, %v5797_v59  ;;  %v810_v60 = vmul.f32 %v5795_v47, %v808_v57  ;;  %v5799_v51 = vpop.eup %5798  ;;  %v7198_v49 = vld [vmem:[#allocation15 + $0x20] ss:$12 sps:$4 sm:$0xff]   ;;  %v9419_v57 = vmov 0.0  }
 0x1fd   :  { %v7202_v47 = vld [vmem:[#allocation15 + $0x34] ss:$12 sps:$4 sm:$0xff]  }
 0x1fe   :  { %v811_v46 = vmul.f32 %v5799_v51, %v809_v43  ;;  %v7178_v63 = vadd.f32 %v5793_v62, %v810_v60  ;;  %v7229_v62 = vld [vmem:[#allocation15 + $0x60] ss:$12 sps:$4 sm:$0xff]   ;;  %v7235_v43 = vld [vmem:[#allocation15 + $0x7c] ss:$12 sps:$4 sm:$0xff]   ;;  %v7239_v60 = vld [vmem:[#allocation15 + $0x78] ss:$12 sps:$4 sm:$0xff]  }
 0x1ff   :  { %9423 = vst [vmem:[#allocation70_spill] sm:$0xff] %v7229_v62  ;;  %9425 = vst [vmem:[#allocation72_spill] sm:$0xff] %v7235_v43  ;;  %v7241_v51 = vld [vmem:[#allocation15 + $0x80] ss:$12 sps:$4 sm:$0xff]  }
 0x200   :  { %v7180_v52 = vadd.f32 %v5797_v59, %v811_v46  ;;  %v7231_v59 = vld [vmem:[#allocation15 + $0x68] ss:$12 sps:$4 sm:$0xff]   ;;  %9426 = vst [vmem:[#allocation73_spill] sm:$0xff] %v7239_v60  ;;  %9427 = vst [vmem:[#allocation74_spill] sm:$0xff] %v7241_v51 }
 0x201   :  { %9424 = vst [vmem:[#allocation71_spill] sm:$0xff] %v7231_v59  ;;  %v7245_v46 = vld [vmem:[#allocation15 + $0x94] ss:$12 sps:$4 sm:$0xff]  }
 0x202   :  { %v7188_v58 = vpack.c.bf16 %v7180_v52, %v7178_v63  ;;  %9428 = vst [vmem:[#allocation75_spill] sm:$0xff] %v7245_v46 }
 0x204   :  { %992 = vmatmul.mubr.bf16.vlgmr.msra.gmra.mrb[4].mxu0 %v7188_v58  ;;  %4912 = vmatmul.mubr.bf16.vlgmr.msra.gmra.mrb[8].mxu1 %v7188_v58 }
 0x205   :  { %1173 = vmatpush1.bf16.msra.mxu0 %v7182_v44  ;;  %4916 = vmatpush3.bf16.msra.mxu1 %v7184_v25 }
 0x206   :  { %1174 = vmatprep.subr.bf16.mxu0 %v7190_v53  ;;  %4917 = vmatprep.subr.bf16.mxu1 %v9419_v57 }
 0x207   :  { %1204 = vmatprep.mubr.bf16.mxu0 %v9420_v50  ;;  %4931 = vmatprep.mubr.msk.bf16.mxu1 %vm6692_vm0, %v9419_v57 }
 0x209   :  { %1175 = vmatpush1.bf16.msra.mxu0 %v7196_v48  ;;  %4918 = vmatpush3.bf16.msra.mxu1 %v7198_v49 }
 0x20a   :  { %1176 = vmatprep.subr.bf16.mxu0 %v7202_v47  ;;  %4919 = vmatprep.subr.bf16.mxu1 %v9419_v57 }
 0x20d   :  { %1177 = vmatpush1.bf16.msra.mxu0 %v7209_v55  ;;  %4920 = vmatpush3.bf16.msra.mxu1 %v7211_v41 }
 0x20e   :  { %1178 = vmatprep.subr.bf16.mxu0 %v7215_v61  ;;  %4921 = vmatprep.subr.bf16.mxu1 %v9419_v57 }
 0x211   :  { %1179 = vmatpush1.bf16.msra.mxu0 %v7219_v54  ;;  %4922 = vmatpush3.bf16.msra.mxu1 %v7221_v1  ;;  %v7251_v1 = vld [vmem:[#allocation15 + $0x98] ss:$12 sps:$4 sm:$0xff]  }
 0x212   :  { %1180 = vmatprep.subr.bf16.mxu0 %v7225_v56  ;;  %4923 = vmatprep.subr.bf16.mxu1 %v9419_v57  ;;  %v7249_v56 = vld [vmem:[#allocation15 + $0x90] ss:$12 sps:$4 sm:$0xff]  }
 0x215   :  { %1181 = vmatpush1.bf16.msra.mxu0 %v7229_v62  ;;  %4924 = vmatpush3.bf16.msra.mxu1 %v7231_v59  ;;  %v7255_v59 = vld [vmem:[#allocation15 + $0xac] ss:$12 sps:$4 sm:$0xff]   ;;  %v7257_v62 = vld [vmem:[#allocation15 + $0xa8] ss:$12 sps:$4 sm:$0xff]  }
 0x216   :  { %1182 = vmatprep.subr.bf16.mxu0 %v7235_v43  ;;  %4925 = vmatprep.subr.bf16.mxu1 %v9419_v57  ;;  %v7261_v43 = vld [vmem:[#allocation15 + $0xb0] ss:$12 sps:$4 sm:$0xff]  }
 0x219   :  { %1183 = vmatpush1.bf16.msra.mxu0 %v7239_v60  ;;  %4926 = vmatpush3.bf16.msra.mxu1 %v7241_v51  ;;  %v7263_v60 = vld [vmem:[#allocation6 + $0x10] sm:$0xff]  ;;  %v7265_v51 = vld [vmem:[#allocation6 + $0x18] sm:$0xff] }
 0x21a   :  { %1184 = vmatprep.subr.bf16.mxu0 %v7245_v46  ;;  %4927 = vmatprep.subr.bf16.mxu1 %v9419_v57  ;;  %v1043_v46 = vpack.c.bf16 %v7265_v51, %v7263_v60 }
 0x21d   :  { %1185 = vmatpush1.bf16.msra.mxu0 %v7249_v56  ;;  %4928 = vmatpush3.bf16.msra.mxu1 %v7251_v1 }
 0x21e   :  { %1186 = vmatprep.subr.bf16.mxu0 %v7255_v59  ;;  %4929 = vmatprep.subr.bf16.mxu1 %v9419_v57 }
 0x221   :  { %1187 = vmatpush1.bf16.msra.mxu0 %v7257_v62  ;;  %4930 = vmatpush3.bf16.msra.mxu1 %v7261_v43 }
 0x222   :  { %1315 = vmatprep.subr.bf16.mxu0 %v6894_v2  ;;  %4935 = vmatprep.subr.bf16.mxu1 %v9419_v57  ;;  %v5773_v2 = vld [vmem:[#allocation3 + $0x8] sm:$0xff]  }
 0x224   :  { %1205 = vmatmul.mubr.bf16.vlgmr.msra.gmra.mrb[4].mxu0 %v1043_v46  ;;  %4932 = vmatmul.mubr.bf16.vlgmr.msra.gmra.mrb[12].mxu1 %v1043_v46 }
 0x225   :  { %1316 = vmatpush1.bf16.msra.mxu0 %v6896_v3  ;;  %4936 = vmatpush3.bf16.msra.mxu1 %v6913_v9  ;;  %v9429_v3 = vld [vmem:[#allocation31_spill] sm:$0xff] }
 0x226   :  { %1317 = vmatprep.subr.bf16.mxu0 %v6899_v4  ;;  %4937 = vmatprep.subr.bf16.mxu1 %v9419_v57  ;;  %v9430_v4 = vld [vmem:[#allocation36_spill] sm:$0xff]  ;;  %v9435_v9 = vld [vmem:[#allocation35_spill] sm:$0xff] }
 0x227   :  { %1347 = vmatprep.mubr.bf16.mxu0 %v9420_v50  ;;  %4951 = vmatprep.mubr.msk.bf16.mxu1 %vm6692_vm0, %v9419_v57 }
 0x229   :  { %1318 = vmatpush1.bf16.msra.mxu0 %v6902_v5  ;;  %4938 = vmatpush3.bf16.msra.mxu1 %v6923_v12  ;;  %v9431_v5 = vld [vmem:[#allocation32_spill] sm:$0xff] }
 0x22a   :  { %1319 = vmatprep.subr.bf16.mxu0 %v6905_v6  ;;  %4939 = vmatprep.subr.bf16.mxu1 %v9419_v57  ;;  %v9432_v6 = vld [vmem:[#allocation33_spill] sm:$0xff]  ;;  %v9438_v12 = vld [vmem:[#allocation40_spill] sm:$0xff] }
 0x22d   :  { %1320 = vmatpush1.bf16.msra.mxu0 %v6908_v7  ;;  %4940 = vmatpush3.bf16.msra.mxu1 %v6929_v14  ;;  %v9433_v7 = vld [vmem:[#allocation37_spill] sm:$0xff]  ;;  %v9440_v14 = vld [vmem:[#allocation42_spill] sm:$0xff] }
 0x22e   :  { %1321 = vmatprep.subr.bf16.mxu0 %v6911_v8  ;;  %4941 = vmatprep.subr.bf16.mxu1 %v9419_v57  ;;  %v9434_v8 = vld [vmem:[#allocation34_spill] sm:$0xff] }
 0x231   :  { %1322 = vmatpush1.bf16.msra.mxu0 %v6916_v10  ;;  %4942 = vmatpush3.bf16.msra.mxu1 %v6939_v17  ;;  %v9436_v10 = vld [vmem:[#allocation38_spill] sm:$0xff]  ;;  %v9443_v17 = vld [vmem:[#allocation45_spill] sm:$0xff] }
 0x232   :  { %1323 = vmatprep.subr.bf16.mxu0 %v6920_v11  ;;  %4943 = vmatprep.subr.bf16.mxu1 %v9419_v57  ;;  %v9437_v11 = vld [vmem:[#allocation39_spill] sm:$0xff] }
 0x235   :  { %1324 = vmatpush1.bf16.msra.mxu0 %v6926_v13  ;;  %4944 = vmatpush3.bf16.msra.mxu1 %v6949_v20  ;;  %v9439_v13 = vld [vmem:[#allocation41_spill] sm:$0xff]  ;;  %v9446_v20 = vld [vmem:[#allocation48_spill] sm:$0xff] }
 0x236   :  { %1325 = vmatprep.subr.bf16.mxu0 %v6932_v15  ;;  %4945 = vmatprep.subr.bf16.mxu1 %v9419_v57  ;;  %v9441_v15 = vld [vmem:[#allocation43_spill] sm:$0xff] }
 0x239   :  { %1326 = vmatpush1.bf16.msra.mxu0 %v6935_v16  ;;  %4946 = vmatpush3.bf16.msra.mxu1 %v6959_v23  ;;  %v9442_v16 = vld [vmem:[#allocation44_spill] sm:$0xff]  ;;  %v9449_v23 = vld [vmem:[#allocation51_spill] sm:$0xff] }
 0x23a   :  { %1327 = vmatprep.subr.bf16.mxu0 %v6942_v18  ;;  %4947 = vmatprep.subr.bf16.mxu1 %v9419_v57  ;;  %v9444_v18 = vld [vmem:[#allocation46_spill] sm:$0xff] }
 0x23d   :  { %1328 = vmatpush1.bf16.msra.mxu0 %v6945_v19  ;;  %4948 = vmatpush3.bf16.msra.mxu1 %v6969_v27  ;;  %v9445_v19 = vld [vmem:[#allocation47_spill] sm:$0xff]  ;;  %v9452_v27 = vld [vmem:[#allocation54_spill] sm:$0xff] }
 0x23e   :  { %1329 = vmatprep.subr.bf16.mxu0 %v6952_v21  ;;  %4949 = vmatprep.subr.bf16.mxu1 %v9419_v57  ;;  %v9447_v21 = vld [vmem:[#allocation49_spill] sm:$0xff] }
 0x241   :  { %1330 = vmatpush1.bf16.msra.mxu0 %v6956_v22  ;;  %4950 = vmatpush3.bf16.msra.mxu1 %v6979_v30  ;;  %v9448_v22 = vld [vmem:[#allocation50_spill] sm:$0xff]  ;;  %v9455_v30 = vld [vmem:[#allocation57_spill] sm:$0xff] }
 0x242   :  { %1399 = vmatprep.subr.bf16.mxu0 %v6962_v24  ;;  %4955 = vmatprep.subr.bf16.mxu1 %v9419_v57  ;;  %v9450_v24 = vld [vmem:[#allocation52_spill] sm:$0xff] }
 0x244   :  { %1348 = vmatmul.mubr.bf16.vlgmr.msra.gmra.mrb[8].mxu0 %v5773_v2  ;;  %4952 = vmatmul.mubr.bf16.vlgmr.msra.gmra.mrb[16].mxu1 %v5773_v2 }
 0x245   :  { %1400 = vmatpush1.bf16.msra.mxu0 %v6965_v26  ;;  %4956 = vmatpush3.bf16.msra.mxu1 %v6992_v34  ;;  %v9451_v26 = vld [vmem:[#allocation53_spill] sm:$0xff] }
 0x246   :  { %1401 = vmatprep.subr.bf16.mxu0 %v6972_v28  ;;  %4957 = vmatprep.subr.bf16.mxu1 %v9419_v57  ;;  %v9453_v28 = vld [vmem:[#allocation55_spill] sm:$0xff]  ;;  %v9459_v34 = vld [vmem:[#allocation61_spill] sm:$0xff] }
 0x247   :  { %1431 = vmatprep.mubr.bf16.mxu0 %v9420_v50  ;;  %4971 = vmatprep.mubr.msk.bf16.mxu1 %vm6692_vm0, %v9419_v57 }
 0x249   :  { %1402 = vmatpush1.bf16.msra.mxu0 %v6975_v29  ;;  %4958 = vmatpush3.bf16.msra.mxu1 %v6998_v36  ;;  %v9454_v29 = vld [vmem:[#allocation56_spill] sm:$0xff]  ;;  %v9461_v36 = vld [vmem:[#allocation63_spill] sm:$0xff] }
 0x24a   :  { %1403 = vmatprep.subr.bf16.mxu0 %v6982_v31  ;;  %4959 = vmatprep.subr.bf16.mxu1 %v9419_v57  ;;  %v9456_v31 = vld [vmem:[#allocation58_spill] sm:$0xff] }
 0x24d   :  { %1404 = vmatpush1.bf16.msra.mxu0 %v6985_v32  ;;  %4960 = vmatpush3.bf16.msra.mxu1 %v7008_v39  ;;  %v9457_v32 = vld [vmem:[#allocation59_spill] sm:$0xff] }
 0x24e   :  { %1405 = vmatprep.subr.bf16.mxu0 %v6988_v33  ;;  %4961 = vmatprep.subr.bf16.mxu1 %v9419_v57  ;;  %v9458_v33 = vld [vmem:[#allocation60_spill] sm:$0xff] }
 0x251   :  { %1406 = vmatpush1.bf16.msra.mxu0 %v6996_v35  ;;  %4962 = vmatpush3.bf16.msra.mxu1 %v7020_v42  ;;  %v9460_v35 = vld [vmem:[#allocation62_spill] sm:$0xff] }
 0x252   :  { %1407 = vmatprep.subr.bf16.mxu0 %v7000_v37  ;;  %4963 = vmatprep.subr.bf16.mxu1 %v9419_v57  ;;  %v310_v42 = vld [vmem:[#allocation17] sm:$0x7] }
 0x255   :  { %1408 = vmatpush1.bf16.msra.mxu0 %v7006_v38  ;;  %4964 = vmatpush3.bf16.msra.mxu1 %v7030_v45  ;;  %v9462_v45 = vld [vmem:[#allocation64_spill] sm:$0xff] }
 0x256   :  { %1409 = vmatprep.subr.bf16.mxu0 %v7012_v40  ;;  %4965 = vmatprep.subr.bf16.mxu1 %v9419_v57 }
 0x259   :  { %1410 = vmatpush1.bf16.msra.mxu0 %v9429_v3  ;;  %4966 = vmatpush3.bf16.msra.mxu1 %v9430_v4 }
 0x25a   :  { %1411 = vmatprep.subr.bf16.mxu0 %v9431_v5  ;;  %4967 = vmatprep.subr.bf16.mxu1 %v9419_v57 }
 0x25d   :  { %1412 = vmatpush1.bf16.msra.mxu0 %v9432_v6  ;;  %4968 = vmatpush3.bf16.msra.mxu1 %v9433_v7 }
 0x25e   :  { %1413 = vmatprep.subr.bf16.mxu0 %v9434_v8  ;;  %4969 = vmatprep.subr.bf16.mxu1 %v9419_v57 }
 0x261   :  { %1414 = vmatpush1.bf16.msra.mxu0 %v9435_v9  ;;  %4970 = vmatpush3.bf16.msra.mxu1 %v9436_v10 }
 0x262   :  { %1526 = vmatprep.subr.bf16.mxu0 %v9437_v11  ;;  %4975 = vmatprep.subr.bf16.mxu1 %v9419_v57 }
 0x264   :  { %1432 = vmatmul.mubr.bf16.vlgmr.msra.gmra.mrb[8].mxu0 %v7188_v58  ;;  %4972 = vmatmul.mubr.bf16.vlgmr.msra.gmra.mrb[20].mxu1 %v7188_v58  ;;  %v9463_v58 = vsub.s32 0, %v9462_v45 }
 0x265   :  { %1527 = vmatpush1.bf16.msra.mxu0 %v9438_v12  ;;  %4976 = vmatpush3.bf16.msra.mxu1 %v9439_v13  ;;  %v9464_v13 = vsub.s32 1, %v9462_v45 }
 0x266   :  { %1528 = vmatprep.subr.bf16.mxu0 %v9440_v14  ;;  %4977 = vmatprep.subr.bf16.mxu1 %v9419_v57  ;;  %v7384_v46 = vrot.slane %v310_v42, %v9463_v58 }
 0x267   :  { %1558 = vmatprep.mubr.bf16.mxu0 %v9420_v50  ;;  %4991 = vmatprep.mubr.msk.bf16.mxu1 %vm6692_vm0, %v9419_v57  ;;  %v7390_v14 = vrot.slane %v310_v42, %v9464_v13 }
 0x269   :  { %1529 = vmatpush1.bf16.msra.mxu0 %v9441_v15  ;;  %4978 = vmatpush3.bf16.msra.mxu1 %v9442_v16  ;;  %9465 = vst [vmem:[#allocation31_spill] sm:$0xff] %v7390_v14 }
 0x26a   :  { %1530 = vmatprep.subr.bf16.mxu0 %v9443_v17  ;;  %4979 = vmatprep.subr.bf16.mxu1 %v9419_v57 }
 0x26d   :  { %1531 = vmatpush1.bf16.msra.mxu0 %v9444_v18  ;;  %4980 = vmatpush3.bf16.msra.mxu1 %v9445_v19 }
 0x26e   :  { %1532 = vmatprep.subr.bf16.mxu0 %v9446_v20  ;;  %4981 = vmatprep.subr.bf16.mxu1 %v9419_v57 }
 0x271   :  { %1533 = vmatpush1.bf16.msra.mxu0 %v9447_v21  ;;  %4982 = vmatpush3.bf16.msra.mxu1 %v9448_v22 }
 0x272   :  { %1534 = vmatprep.subr.bf16.mxu0 %v9449_v23  ;;  %4983 = vmatprep.subr.bf16.mxu1 %v9419_v57 }
 0x275   :  { %1535 = vmatpush1.bf16.msra.mxu0 %v9450_v24  ;;  %4984 = vmatpush3.bf16.msra.mxu1 %v9451_v26  ;;  %v7394_v24 = vld [vmem:[#allocation18] ss:$0 sm:$0xff]  ;;  %v9466_v26 = vsub.s32 2, %v9462_v45 }
 0x276   :  { %1536 = vmatprep.subr.bf16.mxu0 %v9452_v27  ;;  %4985 = vmatprep.subr.bf16.mxu1 %v9419_v57 }
 0x277   :  { %v7398_v27 = vrot.slane %v310_v42, %v9466_v26 }
 0x279   :  { %1537 = vmatpush1.bf16.msra.mxu0 %v9453_v28  ;;  %4986 = vmatpush3.bf16.msra.mxu1 %v9454_v29 }
 0x27a   :  { %1538 = vmatprep.subr.bf16.mxu0 %v9455_v30  ;;  %4987 = vmatprep.subr.bf16.mxu1 %v9419_v57 }
 0x27d   :  { %1539 = vmatpush1.bf16.msra.mxu0 %v9456_v31  ;;  %4988 = vmatpush3.bf16.msra.mxu1 %v9457_v32 }
 0x27e   :  { %1540 = vmatprep.subr.bf16.mxu0 %v9458_v33  ;;  %4989 = vmatprep.subr.bf16.mxu1 %v9419_v57 }
 0x281   :  { %1541 = vmatpush1.bf16.msra.mxu0 %v9459_v34  ;;  %4990 = vmatpush3.bf16.msra.mxu1 %v9460_v35 }
 0x282   :  { %1611 = vmatprep.subr.bf16.mxu0 %v9461_v36  ;;  %4995 = vmatprep.subr.bf16.mxu1 %v9419_v57 }
 0x2d7   :  { %v1036_v37 = vpop.f32.mrb[8].mxu1 }
 0x2d8   :  { %v4913_v38 = vpop.f32.mrb[9].mxu1  ;;  %v1037_v33 = vadd.f32 %v1036_v37, %v7398_v27 }
 0x2d9   :  { %v1039_v39 = vpop.f32.mrb[10].mxu1 }
 0x2da   :  { %v4914_v40 = vpop.f32.mrb[11].mxu1  ;;  %v1040_v38 = vadd.f32 %v1039_v39, %v7398_v27 }
 0x2f7   :  { %v1206_v2 = vpop.f32.mrb[4].mxu0  ;;  %v1249_v3 = vpop.f32.mrb[12].mxu1 }
 0x2f8   :  { %v5499_v4 = vadd.f32 %v1206_v2, %v7384_v46  ;;  %v1208_v5 = vpop.f32.mrb[5].mxu0  ;;  %v4933_v6 = vpop.f32.mrb[13].mxu1  ;;  %v1290_v28 = vadd.f32 %v7394_v24, %v1249_v3 }
 0x2f9   :  { %v1210_v7 = vpop.f32.mrb[6].mxu0  ;;  %v1252_v8 = vpop.f32.mrb[14].mxu1  ;;  %v5500_v16 = vadd.f32 %v1208_v5, %v7390_v14 }
 0x2fa   :  { %v4499_v9 = vmul.f32 -1.442695, %v5499_v4  ;;  %v5501_v10 = vadd.f32 %v1210_v7, %v7384_v46  ;;  %v1212_v11 = vpop.f32.mrb[7].mxu0  ;;  %v4934_v12 = vpop.f32.mrb[15].mxu1  ;;  %v1291_v30 = vadd.f32 %v7394_v24, %v1252_v8 }
 0x2fb   :  { %v5502_v17 = vadd.f32 %v1212_v11, %v7390_v14  ;;  %v4501_v18 = vmul.f32 -1.442695, %v5500_v16 }
 0x2fc   :  { %5800 = vpow2.f32 %v4499_v9  ;;  %v4500_v15 = vmul.f32 -1.442695, %v5501_v10 }
 0x2fd   :  { %v4502_v20 = vmul.f32 -1.442695, %v5502_v17  ;;  %v9467_v17 = vld [vmem:[#allocation65_spill] sm:$0xff] }
 0x2fe   :  { %5802 = vpow2.f32 %v4500_v15 }
 0x2ff   :  { %5804 = vpow2.f32 %v4501_v18 }
 0x306   :  { %v5801_v19 = vpop.eup %5800 }
 0x307   :  { %v1264_v21 = vadd.f32 1.0, %v5801_v19 }
 0x308   :  { %v5803_v22 = vpop.eup %5802 }
 0x309   :  { %5806 = vrcp.f32 %v1264_v21  ;;  %v1265_v23 = vadd.f32 1.0, %v5803_v22  ;;  %v5805_v29 = vpop.eup %5804 }
 0x30a   :  { %5808 = vpow2.f32 %v4502_v20  ;;  %v1278_v36 = vadd.f32 1.0, %v5805_v29  ;;  %v9468_v29 = vld [vmem:[#allocation66_spill] sm:$0xff] }
 0x30b   :  { %5810 = vrcp.f32 %v1265_v23 }
 0x313   :  { %v5807_v31 = vpop.eup %5806 }
 0x314   :  { %v5809_v32 = vpop.eup %5808  ;;  %v1292_v34 = vmul.f32 %v5807_v31, %v1290_v28 }
 0x315   :  { %v5811_v35 = vpop.eup %5810  ;;  %v1279_v45 = vadd.f32 1.0, %v5809_v32 }
 0x316   :  { %v1294_v40 = vadd.f32 %v1292_v34, %v1037_v33  ;;  %v1293_v58 = vmul.f32 %v5811_v35, %v1291_v30 }
 0x317   :  { %v1392_v2 = vpop.f32.mrb[16].mxu1 }
 0x318   :  { %5812 = vtanh.f32 %v1294_v40  ;;  %v1295_v42 = vadd.f32 %v1293_v58, %v1040_v38  ;;  %v4953_v4 = vpop.f32.mrb[17].mxu1  ;;  %v9469_v58 = vld [vmem:[#allocation67_spill] sm:$0xff] }
 0x319   :  { %5814 = vrcp.f32 %v1278_v36  ;;  %v1395_v3 = vpop.f32.mrb[18].mxu1 }
 0x31a   :  { %5816 = vtanh.f32 %v1295_v42  ;;  %v4954_v5 = vpop.f32.mrb[19].mxu1 }
 0x31b   :  { %5818 = vrcp.f32 %v1279_v45  ;;  %v1393_v5 = vadd.f32 %v1392_v2, %v7170_v0 }
 0x322   :  { %v5813_v6 = vpop.eup %5812 }
 0x323   :  { %v5815_v7 = vpop.eup %5814  ;;  %v1298_v37 = vsub.f32 %v7263_v60, %v5813_v6 }
 0x324   :  { %v5817_v8 = vpop.eup %5816 }
 0x325   :  { %v1299_v9 = vsub.f32 %v7265_v51, %v5817_v8  ;;  %v1300_v39 = vmul.f32 %v5815_v7, %v1298_v37  ;;  %v5819_v10 = vpop.eup %5818 }
 0x327   :  { %v1301_v11 = vmul.f32 %v5819_v10, %v1299_v9  ;;  %v7406_v12 = vadd.f32 %v5813_v6, %v1300_v39  ;;  %v1396_v9 = vadd.f32 %v1395_v3, %v7170_v0 }
 0x329   :  { %v7408_v13 = vadd.f32 %v5817_v8, %v1301_v11  ;;  %1304 = vst [vmem:[#allocation20] sm:$0xff] %v7406_v12 }
 0x32b   :  { %1305 = vst [vmem:[#allocation20 + $0x8] sm:$0xff] %v7408_v13 }
 0x337   :  { %v1433_v15 = vpop.f32.mrb[8].mxu0  ;;  %v1476_v16 = vpop.f32.mrb[20].mxu1 }
 0x338   :  { %v5503_v18 = vadd.f32 %v1433_v15, %v9467_v17  ;;  %v1435_v19 = vpop.f32.mrb[9].mxu0  ;;  %v4973_v60 = vpop.f32.mrb[21].mxu1  ;;  %v1511_v45 = vadd.f32 %v9469_v58, %v1476_v16 }
 0x339   :  { %v1437_v20 = vpop.f32.mrb[10].mxu0  ;;  %v1479_v21 = vpop.f32.mrb[22].mxu1  ;;  %v5504_v30 = vadd.f32 %v1435_v19, %v9468_v29 }
 0x33a   :  { %v4505_v51 = vmul.f32 -1.442695, %v5503_v18  ;;  %v5505_v22 = vadd.f32 %v1437_v20, %v9467_v17  ;;  %v1439_v23 = vpop.f32.mrb[11].mxu0  ;;  %v4974_v26 = vpop.f32.mrb[23].mxu1  ;;  %v1512_v7 = vadd.f32 %v9469_v58, %v1479_v21  ;;  %v7534_v58 = vld [vmem:[#allocation8 + $0x90] ss:$12 sps:$4 sm:$0xff]  }
 0x33b   :  { %v5506_v31 = vadd.f32 %v1439_v23, %v9468_v29  ;;  %v4507_v32 = vmul.f32 -1.442695, %v5504_v30  ;;  %v7497_v26 = vld [vmem:[#allocation8 + $0x38] ss:$12 sps:$4 sm:$0xff]   ;;  %v7504_v30 = vld [vmem:[#allocation8 + $0x48] ss:$12 sps:$4 sm:$0xff]  }
 0x33c   :  { %5820 = vpow2.f32 %v4505_v51  ;;  %v4506_v28 = vmul.f32 -1.442695, %v5505_v22 }
 0x33d   :  { %v4508_v34 = vmul.f32 -1.442695, %v5506_v31  ;;  %v7507_v31 = vld [vmem:[#allocation8 + $0x50] ss:$12 sps:$4 sm:$0xff]  }
 0x33e   :  { %5822 = vpow2.f32 %v4506_v28  ;;  %v7500_v28 = vld [vmem:[#allocation8 + $0x4c] ss:$12 sps:$4 sm:$0xff]  }
 0x33f   :  { %5824 = vpow2.f32 %v4507_v32  ;;  %v7510_v32 = vld [vmem:[#allocation8 + $0x64] ss:$12 sps:$4 sm:$0xff]  }
 0x346   :  { %v5821_v33 = vpop.eup %5820 }
 0x347   :  { %v1491_v35 = vadd.f32 1.0, %v5821_v33  ;;  %v7514_v33 = vld [vmem:[#allocation8 + $0x60] ss:$12 sps:$4 sm:$0xff]  }
 0x348   :  { %v5823_v36 = vpop.eup %5822 }
 0x349   :  { %5826 = vrcp.f32 %v1491_v35  ;;  %v1492_v38 = vadd.f32 1.0, %v5823_v36  ;;  %v5825_v40 = vpop.eup %5824  ;;  %v7520_v35 = vld [vmem:[#allocation8 + $0x7c] ss:$12 sps:$4 sm:$0xff]   ;;  %v7524_v36 = vld [vmem:[#allocation8 + $0x78] ss:$12 sps:$4 sm:$0xff]  }
 0x34a   :  { %5828 = vpow2.f32 %v4508_v34  ;;  %v1505_v8 = vadd.f32 1.0, %v5825_v40  ;;  %v7517_v34 = vld [vmem:[#allocation8 + $0x68] ss:$12 sps:$4 sm:$0xff]  }
 0x34b   :  { %5830 = vrcp.f32 %v1492_v38  ;;  %v7527_v38 = vld [vmem:[#allocation8 + $0x80] ss:$12 sps:$4 sm:$0xff]  }
 0x34c   :  { %v7530_v40 = vld [vmem:[#allocation8 + $0x94] ss:$12 sps:$4 sm:$0xff]  }
 0x353   :  { %v5827_v42 = vpop.eup %5826 }
 0x354   :  { %v5829_v4 = vpop.eup %5828  ;;  %v1513_v6 = vmul.f32 %v5827_v42, %v1511_v45  ;;  %v7537_v45 = vld [vmem:[#allocation8 + $0x98] ss:$12 sps:$4 sm:$0xff]  }
 0x355   :  { %v5831_v37 = vpop.eup %5830  ;;  %v1506_v15 = vadd.f32 1.0, %v5829_v4  ;;  %v7540_v42 = vld [vmem:[#allocation8 + $0xac] ss:$12 sps:$4 sm:$0xff]   ;;  %v5774_v4 = vld [vmem:[#allocation3 + $0x10] sm:$0xff]  }
 0x356   :  { %v1515_v39 = vadd.f32 %v1513_v6, %v1393_v5  ;;  %v1514_v10 = vmul.f32 %v5831_v37, %v1512_v7  ;;  %v7544_v5 = vld [vmem:[#allocation8 + $0xa8] ss:$12 sps:$4 sm:$0xff]   ;;  %v7547_v6 = vld [vmem:[#allocation8 + $0xb0] ss:$12 sps:$4 sm:$0xff]   ;;  %v7554_v37 = vld [vmem:[#allocation9] ss:$12 sps:$4 sm:$0xff]  }
 0x357   :  { %v7550_v7 = vld [vmem:[#allocation9 + $0x4] ss:$12 sps:$4 sm:$0xff]  }
 0x358   :  { %5832 = vtanh.f32 %v1515_v39  ;;  %v1516_v11 = vadd.f32 %v1514_v10, %v1396_v9  ;;  %v7560_v9 = vld [vmem:[#allocation9 + $0x1c] ss:$12 sps:$4 sm:$0xff]   ;;  %v7567_v39 = vld [vmem:[#allocation9 + $0x18] ss:$12 sps:$4 sm:$0xff]   ;;  %v7570_v10 = vld [vmem:[#allocation9 + $0x20] ss:$12 sps:$4 sm:$0xff]  }
 0x359   :  { %5834 = vrcp.f32 %v1505_v8  ;;  %v7557_v8 = vld [vmem:[#allocation9 + $0x8] ss:$12 sps:$4 sm:$0xff]  }
 0x35a   :  { %5836 = vtanh.f32 %v1516_v11  ;;  %v7573_v11 = vld [vmem:[#allocation9 + $0x34] ss:$12 sps:$4 sm:$0xff]  }
 0x35b   :  { %5838 = vrcp.f32 %v1506_v15  ;;  %v7577_v15 = vld [vmem:[#allocation9 + $0x30] ss:$12 sps:$4 sm:$0xff]  }
 0x35c   :  { %9478 = vst [vmem:[#allocation36_spill] sm:$0xff] %v7577_v15 }
 0x362   :  { %v5833_v16 = vpop.eup %5832 }
 0x363   :  { %v5835_v18 = vpop.eup %5834  ;;  %v1519_v19 = vsub.f32 %v7178_v63, %v5833_v16  ;;  %v9470_v63 = vld [vmem:[#allocation68_spill] sm:$0xff] }
 0x364   :  { %v5837_v2 = vpop.eup %5836 }
 0x365   :  { %v1520_v60 = vsub.f32 %v7180_v52, %v5837_v2  ;;  %v1521_v20 = vmul.f32 %v5835_v18, %v1519_v19  ;;  %v5839_v21 = vpop.eup %5838  ;;  %v9471_v52 = vld [vmem:[#allocation69_spill] sm:$0xff]  ;;  %v7583_v18 = vld [vmem:[#allocation9 + $0x4c] ss:$12 sps:$4 sm:$0xff]   ;;  %v7587_v19 = vld [vmem:[#allocation9 + $0x48] ss:$12 sps:$4 sm:$0xff]  }
 0x366   :  { %9480 = vst [vmem:[#allocation33_spill] sm:$0xff] %v7583_v18  ;;  %9481 = vst [vmem:[#allocation37_spill] sm:$0xff] %v7587_v19 }
 0x367   :  { %v1522_v51 = vmul.f32 %v5839_v21, %v1520_v60  ;;  %v7422_v22 = vadd.f32 %v5833_v16, %v1521_v20  ;;  %v7580_v16 = vld [vmem:[#allocation9 + $0x38] ss:$12 sps:$4 sm:$0xff]   ;;  %v7597_v20 = vld [vmem:[#allocation9 + $0x60] ss:$12 sps:$4 sm:$0xff]   ;;  %v7600_v21 = vld [vmem:[#allocation9 + $0x68] ss:$12 sps:$4 sm:$0xff]  }
 0x368   :  { %9479 = vst [vmem:[#allocation32_spill] sm:$0xff] %v7580_v16  ;;  %v7593_v60 = vld [vmem:[#allocation9 + $0x64] ss:$12 sps:$4 sm:$0xff]   ;;  %9484 = vst [vmem:[#allocation38_spill] sm:$0xff] %v7597_v20 }
 0x369   :  { %v7424_v3 = vadd.f32 %v5837_v2, %v1522_v51  ;;  %v7590_v2 = vld [vmem:[#allocation9 + $0x50] ss:$12 sps:$4 sm:$0xff]   ;;  %9483 = vst [vmem:[#allocation35_spill] sm:$0xff] %v7593_v60  ;;  %9485 = vst [vmem:[#allocation39_spill] sm:$0xff] %v7600_v21 }
 0x36a   :  { %9482 = vst [vmem:[#allocation34_spill] sm:$0xff] %v7590_v2  ;;  %v7603_v51 = vld [vmem:[#allocation9 + $0x7c] ss:$12 sps:$4 sm:$0xff]  }
 0x36b   :  { %v7428_v23 = vpack.c.bf16 %v7424_v3, %v7422_v22  ;;  %9486 = vst [vmem:[#allocation40_spill] sm:$0xff] %v7603_v51 }
 0x36d   :  { %1559 = vmatmul.mubr.bf16.vlgmr.msra.gmra.mrb[12].mxu0 %v7428_v23  ;;  %4992 = vmatmul.mubr.bf16.vlgmr.msra.gmra.mrb[24].mxu1 %v7428_v23 }
 0x36e   :  { %1612 = vmatpush1.bf16.msra.mxu0 %v7182_v44  ;;  %4996 = vmatpush3.bf16.msra.mxu1 %v7184_v25  ;;  %v9472_v44 = vld [vmem:[#allocation70_spill] sm:$0xff]  ;;  %v9473_v25 = vld [vmem:[#allocation71_spill] sm:$0xff] }
 0x36f   :  { %1613 = vmatprep.subr.bf16.mxu0 %v7190_v53  ;;  %4997 = vmatprep.subr.bf16.mxu1 %v9419_v57  ;;  %v9474_v53 = vld [vmem:[#allocation72_spill] sm:$0xff] }
 0x370   :  { %1643 = vmatprep.mubr.bf16.mxu0 %v9420_v50  ;;  %5011 = vmatprep.mubr.msk.bf16.mxu1 %vm6692_vm0, %v9419_v57 }
 0x372   :  { %1614 = vmatpush1.bf16.msra.mxu0 %v7196_v48  ;;  %4998 = vmatpush3.bf16.msra.mxu1 %v7198_v49  ;;  %v9475_v48 = vld [vmem:[#allocation73_spill] sm:$0xff]  ;;  %v9476_v49 = vld [vmem:[#allocation74_spill] sm:$0xff] }
 0x373   :  { %1615 = vmatprep.subr.bf16.mxu0 %v7202_v47  ;;  %4999 = vmatprep.subr.bf16.mxu1 %v9419_v57  ;;  %v9477_v47 = vld [vmem:[#allocation75_spill] sm:$0xff] }
 0x376   :  { %1616 = vmatpush1.bf16.msra.mxu0 %v7209_v55  ;;  %5000 = vmatpush3.bf16.msra.mxu1 %v7211_v41  ;;  %v1610_v55 = vpack.c.bf16 %v7408_v13, %v7406_v12  ;;  %v7467_v41 = vld [vmem:[#allocation8 + $0x4] ss:$12 sps:$4 sm:$0xff]  }
 0x377   :  { %1617 = vmatprep.subr.bf16.mxu0 %v7215_v61  ;;  %5001 = vmatprep.subr.bf16.mxu1 %v9419_v57  ;;  %v7471_v61 = vld [vmem:[#allocation8] ss:$12 sps:$4 sm:$0xff]  }
 0x37a   :  { %1618 = vmatpush1.bf16.msra.mxu0 %v7219_v54  ;;  %5002 = vmatpush3.bf16.msra.mxu1 %v9470_v63  ;;  %v7474_v54 = vld [vmem:[#allocation8 + $0x8] ss:$12 sps:$4 sm:$0xff]   ;;  %v7607_v63 = vld [vmem:[#allocation9 + $0x78] ss:$12 sps:$4 sm:$0xff]  }
 0x37b   :  { %1619 = vmatprep.subr.bf16.mxu0 %v9471_v52  ;;  %5003 = vmatprep.subr.bf16.mxu1 %v9419_v57  ;;  %9487 = vst [vmem:[#allocation41_spill] sm:$0xff] %v7607_v63  ;;  %v7610_v52 = vld [vmem:[#allocation9 + $0x80] ss:$12 sps:$4 sm:$0xff]  }
 0x37c   :  { %9488 = vst [vmem:[#allocation42_spill] sm:$0xff] %v7610_v52 }
 0x37e   :  { %1620 = vmatpush1.bf16.msra.mxu0 %v9472_v44  ;;  %5004 = vmatpush3.bf16.msra.mxu1 %v9473_v25  ;;  %v7613_v44 = vld [vmem:[#allocation9 + $0x94] ss:$12 sps:$4 sm:$0xff]   ;;  %v7617_v25 = vld [vmem:[#allocation9 + $0x90] ss:$12 sps:$4 sm:$0xff]  }
 0x37f   :  { %1621 = vmatprep.subr.bf16.mxu0 %v9474_v53  ;;  %5005 = vmatprep.subr.bf16.mxu1 %v9419_v57  ;;  %9489 = vst [vmem:[#allocation43_spill] sm:$0xff] %v7613_v44  ;;  %9490 = vst [vmem:[#allocation44_spill] sm:$0xff] %v7617_v25  ;;  %v7620_v53 = vld [vmem:[#allocation9 + $0x98] ss:$12 sps:$4 sm:$0xff]  }
 0x380   :  { %9491 = vst [vmem:[#allocation45_spill] sm:$0xff] %v7620_v53 }
 0x382   :  { %1622 = vmatpush1.bf16.msra.mxu0 %v9475_v48  ;;  %5006 = vmatpush3.bf16.msra.mxu1 %v9476_v49  ;;  %v7623_v48 = vld [vmem:[#allocation9 + $0xac] ss:$12 sps:$4 sm:$0xff]   ;;  %v7627_v49 = vld [vmem:[#allocation9 + $0xa8] ss:$12 sps:$4 sm:$0xff]  }
 0x383   :  { %1623 = vmatprep.subr.bf16.mxu0 %v9477_v47  ;;  %5007 = vmatprep.subr.bf16.mxu1 %v9419_v57  ;;  %9492 = vst [vmem:[#allocation46_spill] sm:$0xff] %v7623_v48  ;;  %9493 = vst [vmem:[#allocation47_spill] sm:$0xff] %v7627_v49  ;;  %v7630_v47 = vld [vmem:[#allocation9 + $0xb0] ss:$12 sps:$4 sm:$0xff]  }
 0x384   :  { %9494 = vst [vmem:[#allocation48_spill] sm:$0xff] %v7630_v47 }
 0x386   :  { %1624 = vmatpush1.bf16.msra.mxu0 %v7249_v56  ;;  %5008 = vmatpush3.bf16.msra.mxu1 %v7251_v1  ;;  %v7477_v1 = vld [vmem:[#allocation8 + $0x1c] ss:$12 sps:$4 sm:$0xff]   ;;  %v7484_v56 = vld [vmem:[#allocation8 + $0x18] ss:$12 sps:$4 sm:$0xff]  }
 0x387   :  { %1625 = vmatprep.subr.bf16.mxu0 %v7255_v59  ;;  %5009 = vmatprep.subr.bf16.mxu1 %v9419_v57  ;;  %v7490_v59 = vld [vmem:[#allocation8 + $0x34] ss:$12 sps:$4 sm:$0xff]  }
 0x38a   :  { %1626 = vmatpush1.bf16.msra.mxu0 %v7257_v62  ;;  %5010 = vmatpush3.bf16.msra.mxu1 %v7261_v43  ;;  %v7487_v62 = vld [vmem:[#allocation8 + $0x20] ss:$12 sps:$4 sm:$0xff]   ;;  %v7494_v43 = vld [vmem:[#allocation8 + $0x30] ss:$12 sps:$4 sm:$0xff]  }
 0x38b   :  { %1749 = vmatprep.subr.bf16.mxu0 %v7467_v41  ;;  %5015 = vmatprep.subr.bf16.mxu1 %v9419_v57 }
 0x38d   :  { %1644 = vmatmul.mubr.bf16.vlgmr.msra.gmra.mrb[12].mxu0 %v1610_v55  ;;  %5012 = vmatmul.mubr.bf16.vlgmr.msra.gmra.mrb[28].mxu1 %v1610_v55  ;;  %v7633_v55 = vld [vmem:[#allocation14 + $0x4] ss:$12 sps:$4 sm:$0xff]  }
 0x38e   :  { %1750 = vmatpush1.bf16.msra.mxu0 %v7471_v61  ;;  %5016 = vmatpush3.bf16.msra.mxu1 %v7474_v54  ;;  %9495 = vst [vmem:[#allocation49_spill] sm:$0xff] %v7633_v55 }
 0x38f   :  { %1751 = vmatprep.subr.bf16.mxu0 %v7477_v1  ;;  %5017 = vmatprep.subr.bf16.mxu1 %v9419_v57 }
 0x390   :  { %1781 = vmatprep.mubr.bf16.mxu0 %v9420_v50  ;;  %5031 = vmatprep.mubr.msk.bf16.mxu1 %vm6692_vm0, %v9419_v57 }
 0x392   :  { %1752 = vmatpush1.bf16.msra.mxu0 %v7484_v56  ;;  %5018 = vmatpush3.bf16.msra.mxu1 %v7487_v62 }
 0x393   :  { %1753 = vmatprep.subr.bf16.mxu0 %v7490_v59  ;;  %5019 = vmatprep.subr.bf16.mxu1 %v9419_v57 }
 0x396   :  { %1754 = vmatpush1.bf16.msra.mxu0 %v7494_v43  ;;  %5020 = vmatpush3.bf16.msra.mxu1 %v7497_v26 }
 0x397   :  { %1755 = vmatprep.subr.bf16.mxu0 %v7500_v28  ;;  %5021 = vmatprep.subr.bf16.mxu1 %v9419_v57 }
 0x39a   :  { %1756 = vmatpush1.bf16.msra.mxu0 %v7504_v30  ;;  %5022 = vmatpush3.bf16.msra.mxu1 %v7507_v31 }
 0x39b   :  { %1757 = vmatprep.subr.bf16.mxu0 %v7510_v32  ;;  %5023 = vmatprep.subr.bf16.mxu1 %v9419_v57 }
 0x39e   :  { %1758 = vmatpush1.bf16.msra.mxu0 %v7514_v33  ;;  %5024 = vmatpush3.bf16.msra.mxu1 %v7517_v34 }
 0x39f   :  { %1759 = vmatprep.subr.bf16.mxu0 %v7520_v35  ;;  %5025 = vmatprep.subr.bf16.mxu1 %v9419_v57 }
 0x3a2   :  { %1760 = vmatpush1.bf16.msra.mxu0 %v7524_v36  ;;  %5026 = vmatpush3.bf16.msra.mxu1 %v7527_v38 }
 0x3a3   :  { %1761 = vmatprep.subr.bf16.mxu0 %v7530_v40  ;;  %5027 = vmatprep.subr.bf16.mxu1 %v9419_v57 }
 0x3a6   :  { %1762 = vmatpush1.bf16.msra.mxu0 %v7534_v58  ;;  %5028 = vmatpush3.bf16.msra.mxu1 %v7537_v45 }
 0x3a7   :  { %1763 = vmatprep.subr.bf16.mxu0 %v7540_v42  ;;  %5029 = vmatprep.subr.bf16.mxu1 %v9419_v57 }
 0x3aa   :  { %1764 = vmatpush1.bf16.msra.mxu0 %v7544_v5  ;;  %5030 = vmatpush3.bf16.msra.mxu1 %v7547_v6 }
 0x3ab   :  { %1833 = vmatprep.subr.bf16.mxu0 %v7550_v7  ;;  %5035 = vmatprep.subr.bf16.mxu1 %v9419_v57 }
 0x3ad   :  { %1782 = vmatmul.mubr.bf16.vlgmr.msra.gmra.mrb[16].mxu0 %v5774_v4  ;;  %5032 = vmatmul.mubr.bf16.vlgmr.msra.gmra.mrb[32].mxu1 %v5774_v4  ;;  %v7639_v4 = vld [vmem:[#allocation14] ss:$12 sps:$4 sm:$0xff]  }
 0x3ae   :  { %1834 = vmatpush1.bf16.msra.mxu0 %v7554_v37  ;;  %5036 = vmatpush3.bf16.msra.mxu1 %v7557_v8  ;;  %9496 = vst [vmem:[#allocation50_spill] sm:$0xff] %v7639_v4 }
 0x3af   :  { %1835 = vmatprep.subr.bf16.mxu0 %v7560_v9  ;;  %5037 = vmatprep.subr.bf16.mxu1 %v9419_v57 }
 0x3b0   :  { %1865 = vmatprep.mubr.bf16.mxu0 %v9420_v50  ;;  %5051 = vmatprep.mubr.msk.bf16.mxu1 %vm6692_vm0, %v9419_v57 }
 0x3b2   :  { %1836 = vmatpush1.bf16.msra.mxu0 %v7567_v39  ;;  %5038 = vmatpush3.bf16.msra.mxu1 %v7570_v10 }
 0x3b3   :  { %1837 = vmatprep.subr.bf16.mxu0 %v7573_v11  ;;  %5039 = vmatprep.subr.bf16.mxu1 %v9419_v57 }
 0x3b6   :  { %1838 = vmatpush1.bf16.msra.mxu0 %v7577_v15  ;;  %5040 = vmatpush3.bf16.msra.mxu1 %v7580_v16 }
 0x3b7   :  { %1839 = vmatprep.subr.bf16.mxu0 %v7583_v18  ;;  %5041 = vmatprep.subr.bf16.mxu1 %v9419_v57 }
 0x3ba   :  { %1840 = vmatpush1.bf16.msra.mxu0 %v7587_v19  ;;  %5042 = vmatpush3.bf16.msra.mxu1 %v7590_v2 }
 0x3bb   :  { %1841 = vmatprep.subr.bf16.mxu0 %v7593_v60  ;;  %5043 = vmatprep.subr.bf16.mxu1 %v9419_v57 }
 0x3be   :  { %1842 = vmatpush1.bf16.msra.mxu0 %v7597_v20  ;;  %5044 = vmatpush3.bf16.msra.mxu1 %v7600_v21 }
 0x3bf   :  { %1843 = vmatprep.subr.bf16.mxu0 %v7603_v51  ;;  %5045 = vmatprep.subr.bf16.mxu1 %v9419_v57 }
 0x3c2   :  { %1844 = vmatpush1.bf16.msra.mxu0 %v7607_v63  ;;  %5046 = vmatpush3.bf16.msra.mxu1 %v7610_v52 }
 0x3c3   :  { %1845 = vmatprep.subr.bf16.mxu0 %v7613_v44  ;;  %5047 = vmatprep.subr.bf16.mxu1 %v9419_v57 }
 0x3c6   :  { %1846 = vmatpush1.bf16.msra.mxu0 %v7617_v25  ;;  %5048 = vmatpush3.bf16.msra.mxu1 %v7620_v53 }
 0x3c7   :  { %1847 = vmatprep.subr.bf16.mxu0 %v7623_v48  ;;  %5049 = vmatprep.subr.bf16.mxu1 %v9419_v57  ;;  %v7642_v48 = vld [vmem:[#allocation14 + $0x8] ss:$12 sps:$4 sm:$0xff]  }
 0x3c8   :  { %9497 = vst [vmem:[#allocation51_spill] sm:$0xff] %v7642_v48 }
 0x3ca   :  { %1848 = vmatpush1.bf16.msra.mxu0 %v7627_v49  ;;  %5050 = vmatpush3.bf16.msra.mxu1 %v7630_v47  ;;  %v7645_v49 = vld [vmem:[#allocation14 + $0x1c] ss:$12 sps:$4 sm:$0xff]   ;;  %v7668_v47 = vld [vmem:[#allocation14 + $0x4c] ss:$12 sps:$4 sm:$0xff]  }
 0x3cb   :  { %1960 = vmatprep.subr.bf16.mxu0 %v7633_v55  ;;  %5055 = vmatprep.subr.bf16.mxu1 %v9419_v57  ;;  %9498 = vst [vmem:[#allocation52_spill] sm:$0xff] %v7645_v49  ;;  %v7665_v55 = vld [vmem:[#allocation14 + $0x38] ss:$12 sps:$4 sm:$0xff]   ;;  %9504 = vst [vmem:[#allocation58_spill] sm:$0xff] %v7668_v47 }
 0x3cc   :  { %9503 = vst [vmem:[#allocation57_spill] sm:$0xff] %v7665_v55 }
 0x3cd   :  { %1866 = vmatmul.mubr.bf16.vlgmr.msra.gmra.mrb[16].mxu0 %v7428_v23  ;;  %5052 = vmatmul.mubr.bf16.vlgmr.msra.gmra.mrb[36].mxu1 %v7428_v23  ;;  %v7652_v23 = vld [vmem:[#allocation14 + $0x18] ss:$12 sps:$4 sm:$0xff]  }
 0x3ce   :  { %1961 = vmatpush1.bf16.msra.mxu0 %v7639_v4  ;;  %5056 = vmatpush3.bf16.msra.mxu1 %v7642_v48  ;;  %9499 = vst [vmem:[#allocation53_spill] sm:$0xff] %v7652_v23  ;;  %v7655_v4 = vld [vmem:[#allocation14 + $0x20] ss:$12 sps:$4 sm:$0xff]  }
 0x3cf   :  { %1962 = vmatprep.subr.bf16.mxu0 %v7645_v49  ;;  %5057 = vmatprep.subr.bf16.mxu1 %v9419_v57  ;;  %9500 = vst [vmem:[#allocation54_spill] sm:$0xff] %v7655_v4  ;;  %v7658_v48 = vld [vmem:[#allocation14 + $0x34] ss:$12 sps:$4 sm:$0xff]   ;;  %v7662_v49 = vld [vmem:[#allocation14 + $0x30] ss:$12 sps:$4 sm:$0xff]  }
 0x3d0   :  { %1992 = vmatprep.mubr.bf16.mxu0 %v9420_v50  ;;  %5071 = vmatprep.mubr.msk.bf16.mxu1 %vm6692_vm0, %v9419_v57  ;;  %9501 = vst [vmem:[#allocation55_spill] sm:$0xff] %v7658_v48  ;;  %9502 = vst [vmem:[#allocation56_spill] sm:$0xff] %v7662_v49 }
 0x3d2   :  { %1963 = vmatpush1.bf16.msra.mxu0 %v7652_v23  ;;  %5058 = vmatpush3.bf16.msra.mxu1 %v7655_v4  ;;  %v7672_v4 = vld [vmem:[#allocation14 + $0x48] ss:$12 sps:$4 sm:$0xff]   ;;  %v7678_v23 = vld [vmem:[#allocation14 + $0x64] ss:$12 sps:$4 sm:$0xff]  }
 0x3d3   :  { %1964 = vmatprep.subr.bf16.mxu0 %v7658_v48  ;;  %5059 = vmatprep.subr.bf16.mxu1 %v9419_v57  ;;  %9505 = vst [vmem:[#allocation59_spill] sm:$0xff] %v7672_v4  ;;  %v7675_v48 = vld [vmem:[#allocation14 + $0x50] ss:$12 sps:$4 sm:$0xff]   ;;  %9507 = vst [vmem:[#allocation61_spill] sm:$0xff] %v7678_v23 }
 0x3d4   :  { %9506 = vst [vmem:[#allocation60_spill] sm:$0xff] %v7675_v48 }
 0x3d6   :  { %1965 = vmatpush1.bf16.msra.mxu0 %v7662_v49  ;;  %5060 = vmatpush3.bf16.msra.mxu1 %v7665_v55  ;;  %v7682_v55 = vld [vmem:[#allocation14 + $0x60] ss:$12 sps:$4 sm:$0xff]   ;;  %v7688_v49 = vld [vmem:[#allocation14 + $0x7c] ss:$12 sps:$4 sm:$0xff]  }
 0x3d7   :  { %1966 = vmatprep.subr.bf16.mxu0 %v7668_v47  ;;  %5061 = vmatprep.subr.bf16.mxu1 %v9419_v57  ;;  %9508 = vst [vmem:[#allocation62_spill] sm:$0xff] %v7682_v55  ;;  %v7685_v47 = vld [vmem:[#allocation14 + $0x68] ss:$12 sps:$4 sm:$0xff]   ;;  %9510 = vst [vmem:[#allocation64_spill] sm:$0xff] %v7688_v49 }
 0x3d8   :  { %9509 = vst [vmem:[#allocation63_spill] sm:$0xff] %v7685_v47 }
 0x3da   :  { %1967 = vmatpush1.bf16.msra.mxu0 %v7672_v4  ;;  %5062 = vmatpush3.bf16.msra.mxu1 %v7675_v48  ;;  %v7692_v48 = vld [vmem:[#allocation14 + $0x78] ss:$12 sps:$4 sm:$0xff]   ;;  %v7698_v4 = vld [vmem:[#allocation14 + $0x94] ss:$12 sps:$4 sm:$0xff]  }
 0x3db   :  { %1968 = vmatprep.subr.bf16.mxu0 %v7678_v23  ;;  %5063 = vmatprep.subr.bf16.mxu1 %v9419_v57  ;;  %9511 = vst [vmem:[#allocation65_spill] sm:$0xff] %v7692_v48  ;;  %v7695_v23 = vld [vmem:[#allocation14 + $0x80] ss:$12 sps:$4 sm:$0xff]   ;;  %9513 = vst [vmem:[#allocation67_spill] sm:$0xff] %v7698_v4 }
 0x3dc   :  { %9512 = vst [vmem:[#allocation66_spill] sm:$0xff] %v7695_v23 }
 0x3de   :  { %1969 = vmatpush1.bf16.msra.mxu0 %v7682_v55  ;;  %5064 = vmatpush3.bf16.msra.mxu1 %v7685_v47  ;;  %v7702_v47 = vld [vmem:[#allocation14 + $0x90] ss:$12 sps:$4 sm:$0xff]   ;;  %v7708_v55 = vld [vmem:[#allocation14 + $0xac] ss:$12 sps:$4 sm:$0xff]  }
 0x3df   :  { %1970 = vmatprep.subr.bf16.mxu0 %v7688_v49  ;;  %5065 = vmatprep.subr.bf16.mxu1 %v9419_v57  ;;  %9514 = vst [vmem:[#allocation68_spill] sm:$0xff] %v7702_v47  ;;  %v7705_v49 = vld [vmem:[#allocation14 + $0x98] ss:$12 sps:$4 sm:$0xff]   ;;  %9516 = vst [vmem:[#allocation70_spill] sm:$0xff] %v7708_v55 }
 0x3e0   :  { %9515 = vst [vmem:[#allocation69_spill] sm:$0xff] %v7705_v49 }
 0x3e2   :  { %1971 = vmatpush1.bf16.msra.mxu0 %v7692_v48  ;;  %5066 = vmatpush3.bf16.msra.mxu1 %v7695_v23  ;;  %v7712_v23 = vld [vmem:[#allocation14 + $0xa8] ss:$12 sps:$4 sm:$0xff]   ;;  %v7718_v48 = vld [vmem:[#allocation15 + $0x4] ss:$12 sps:$4 sm:$0xff]  }
 0x3e3   :  { %1972 = vmatprep.subr.bf16.mxu0 %v7698_v4  ;;  %5067 = vmatprep.subr.bf16.mxu1 %v9419_v57  ;;  %9517 = vst [vmem:[#allocation71_spill] sm:$0xff] %v7712_v23  ;;  %v7715_v4 = vld [vmem:[#allocation14 + $0xb0] ss:$12 sps:$4 sm:$0xff]   ;;  %9519 = vst [vmem:[#allocation73_spill] sm:$0xff] %v7718_v48 }
 0x3e4   :  { %9518 = vst [vmem:[#allocation72_spill] sm:$0xff] %v7715_v4 }
 0x3e6   :  { %1973 = vmatpush1.bf16.msra.mxu0 %v7702_v47  ;;  %5068 = vmatpush3.bf16.msra.mxu1 %v7705_v49 }
 0x3e7   :  { %1974 = vmatprep.subr.bf16.mxu0 %v7708_v55  ;;  %5069 = vmatprep.subr.bf16.mxu1 %v9419_v57 }
 0x3ea   :  { %1975 = vmatpush1.bf16.msra.mxu0 %v7712_v23  ;;  %5070 = vmatpush3.bf16.msra.mxu1 %v7715_v4 }
 0x3eb   :  { %2045 = vmatprep.subr.bf16.mxu0 %v7718_v48  ;;  %5075 = vmatprep.subr.bf16.mxu1 %v9419_v57 }
 0x440   :  { %v1603_v49 = vpop.f32.mrb[24].mxu1 }
 0x441   :  { %v4993_v47 = vpop.f32.mrb[25].mxu1 }
 0x442   :  { %v1606_v53 = vpop.f32.mrb[26].mxu1 }
 0x443   :  { %v4994_v55 = vpop.f32.mrb[27].mxu1 }
 0x460   :  { %v1645_v25 = vpop.f32.mrb[12].mxu0  ;;  %v1688_v44 = vpop.f32.mrb[28].mxu1 }
 0x461   :  { %v5507_v52 = vadd.f32 %v1645_v25, %v7384_v46  ;;  %v1647_v63 = vpop.f32.mrb[13].mxu0  ;;  %v5013_v23 = vpop.f32.mrb[29].mxu1 }
 0x462   :  { %v1649_v51 = vpop.f32.mrb[14].mxu0  ;;  %v1691_v21 = vpop.f32.mrb[30].mxu1  ;;  %v5508_v47 = vadd.f32 %v1647_v63, %v7390_v14 }
 0x463   :  { %v4509_v20 = vmul.f32 -1.442695, %v5507_v52  ;;  %v5509_v4 = vadd.f32 %v1649_v51, %v7384_v46  ;;  %v1651_v60 = vpop.f32.mrb[15].mxu0  ;;  %v5014_v2 = vpop.f32.mrb[31].mxu1 }
 0x464   :  { %v5510_v55 = vadd.f32 %v1651_v60, %v7390_v14  ;;  %v4511_v19 = vmul.f32 -1.442695, %v5508_v47  ;;  %v1723_v2 = vadd.f32 %v7394_v24, %v1688_v44  ;;  %v1724_v60 = vadd.f32 %v7394_v24, %v1691_v21 }
 0x465   :  { %5840 = vpow2.f32 %v4509_v20  ;;  %v4510_v48 = vmul.f32 -1.442695, %v5509_v4 }
 0x466   :  { %v4512_v16 = vmul.f32 -1.442695, %v5510_v55 }
 0x467   :  { %5842 = vpow2.f32 %v4510_v48  ;;  %v1604_v48 = vadd.f32 %v1603_v49, %v7398_v27 }
 0x468   :  { %5844 = vpow2.f32 %v4511_v19 }
 0x46f   :  { %v5841_v18 = vpop.eup %5840 }
 0x470   :  { %v1703_v25 = vadd.f32 1.0, %v5841_v18  ;;  %v1607_v18 = vadd.f32 %v1606_v53, %v7398_v27 }
 0x471   :  { %v5843_v15 = vpop.eup %5842 }
 0x472   :  { %5846 = vrcp.f32 %v1703_v25  ;;  %v1704_v23 = vadd.f32 1.0, %v5843_v15  ;;  %v5845_v51 = vpop.eup %5844 }
 0x473   :  { %5848 = vpow2.f32 %v4512_v16  ;;  %v1717_v47 = vadd.f32 1.0, %v5845_v51 }
 0x474   :  { %5850 = vrcp.f32 %v1704_v23 }
 0x47c   :  { %v5847_v20 = vpop.eup %5846 }
 0x47d   :  { %v5849_v52 = vpop.eup %5848  ;;  %v1725_v63 = vmul.f32 %v5847_v20, %v1723_v2 }
 0x47e   :  { %v5851_v4 = vpop.eup %5850  ;;  %v1718_v16 = vadd.f32 1.0, %v5849_v52 }
 0x47f   :  { %v1727_v55 = vadd.f32 %v1725_v63, %v1604_v48  ;;  %v1726_v19 = vmul.f32 %v5851_v4, %v1724_v60 }
 0x480   :  { %v1826_v25 = vpop.f32.mrb[32].mxu1 }
 0x481   :  { %5852 = vtanh.f32 %v1727_v55  ;;  %v1728_v15 = vadd.f32 %v1726_v19, %v1607_v18  ;;  %v5033_v23 = vpop.f32.mrb[33].mxu1 }
 0x482   :  { %5854 = vrcp.f32 %v1717_v47  ;;  %v1829_v44 = vpop.f32.mrb[34].mxu1 }
 0x483   :  { %5856 = vtanh.f32 %v1728_v15  ;;  %v5034_v14 = vpop.f32.mrb[35].mxu1 }
 0x484   :  { %5858 = vrcp.f32 %v1718_v16 }
 0x48b   :  { %v5853_v49 = vpop.eup %5852 }
 0x48c   :  { %v5855_v2 = vpop.eup %5854  ;;  %v1731_v24 = vsub.f32 %v7406_v12, %v5853_v49 }
 0x48d   :  { %v5857_v21 = vpop.eup %5856 }
 0x48e   :  { %v1732_v51 = vsub.f32 %v7408_v13, %v5857_v21  ;;  %v1733_v53 = vmul.f32 %v5855_v2, %v1731_v24  ;;  %v5859_v20 = vpop.eup %5858 }
 0x490   :  { %v1734_v48 = vmul.f32 %v5859_v20, %v1732_v51  ;;  %v7732_v63 = vadd.f32 %v5853_v49, %v1733_v53 }
 0x492   :  { %v7734_v60 = vadd.f32 %v5857_v21, %v1734_v48  ;;  %1738 = vst [vmem:[#allocation20 + $0x10] sm:$0xff] %v7732_v63 }
 0x494   :  { %1739 = vst [vmem:[#allocation20 + $0x18] sm:$0xff] %v7734_v60 }
 0x4a0   :  { %v1867_v14 = vpop.f32.mrb[16].mxu0  ;;  %v1910_v52 = vpop.f32.mrb[36].mxu1 }
 0x4a1   :  { %v5511_v4 = vadd.f32 %v1867_v14, %v9467_v17  ;;  %v1869_v47 = vpop.f32.mrb[17].mxu0  ;;  %v5053_v12 = vpop.f32.mrb[37].mxu1 }
 0x4a2   :  { %v1871_v18 = vpop.f32.mrb[18].mxu0  ;;  %v1913_v55 = vpop.f32.mrb[38].mxu1  ;;  %v5512_v49 = vadd.f32 %v1869_v47, %v9468_v29  ;;  %v1827_v47 = vadd.f32 %v1826_v25, %v7170_v0 }
 0x4a3   :  { %v4514_v13 = vmul.f32 -1.442695, %v5511_v4  ;;  %v5513_v19 = vadd.f32 %v1871_v18, %v9467_v17  ;;  %v1873_v15 = vpop.f32.mrb[19].mxu0  ;;  %v5054_v16 = vpop.f32.mrb[39].mxu1  ;;  %v7742_v4 = vld [vmem:[#allocation12] ss:$0 sm:$0xff] }
 0x4a4   :  { %v5514_v2 = vadd.f32 %v1873_v15, %v9468_v29  ;;  %v4516_v24 = vmul.f32 -1.442695, %v5512_v49  ;;  %v1945_v12 = vadd.f32 %v7742_v4, %v1910_v52  ;;  %v1946_v15 = vadd.f32 %v7742_v4, %v1913_v55 }
 0x4a5   :  { %5860 = vpow2.f32 %v4514_v13  ;;  %v4515_v23 = vmul.f32 -1.442695, %v5513_v19  ;;  %v1830_v49 = vadd.f32 %v1829_v44, %v7170_v0 }
 0x4a6   :  { %v4517_v51 = vmul.f32 -1.442695, %v5514_v2 }
 0x4a7   :  { %5862 = vpow2.f32 %v4515_v23 }
 0x4a8   :  { %5864 = vpow2.f32 %v4516_v24 }
 0x4af   :  { %v5861_v21 = vpop.eup %5860 }
 0x4b0   :  { %v1925_v53 = vadd.f32 1.0, %v5861_v21 }
 0x4b1   :  { %v5863_v20 = vpop.eup %5862 }
 0x4b2   :  { %5866 = vrcp.f32 %v1925_v53  ;;  %v1926_v48 = vadd.f32 1.0, %v5863_v20  ;;  %v5865_v14 = vpop.eup %5864 }
 0x4b3   :  { %5868 = vpow2.f32 %v4517_v51  ;;  %v1939_v23 = vadd.f32 1.0, %v5865_v14 }
 0x4b4   :  { %5870 = vrcp.f32 %v1926_v48 }
 0x4bc   :  { %v5867_v18 = vpop.eup %5866 }
 0x4bd   :  { %v5869_v13 = vpop.eup %5868  ;;  %v1947_v19 = vmul.f32 %v5867_v18, %v1945_v12 }
 0x4be   :  { %v5871_v16 = vpop.eup %5870  ;;  %v1940_v51 = vadd.f32 1.0, %v5869_v13 }
 0x4bf   :  { %v1949_v2 = vadd.f32 %v1947_v19, %v1827_v47  ;;  %v1948_v24 = vmul.f32 %v5871_v16, %v1946_v15  ;;  %v7760_v47 = vld [vmem:[#allocation15] ss:$12 sps:$4 sm:$0xff]   ;;  %v7773_v19 = vld [vmem:[#allocation15 + $0x18] ss:$12 sps:$4 sm:$0xff]  }
 0x4c0   :  { %v7776_v15 = vld [vmem:[#allocation15 + $0x20] ss:$12 sps:$4 sm:$0xff]  }
 0x4c1   :  { %5872 = vtanh.f32 %v1949_v2  ;;  %v1950_v21 = vadd.f32 %v1948_v24, %v1830_v49  ;;  %v7779_v16 = vld [vmem:[#allocation15 + $0x34] ss:$12 sps:$4 sm:$0xff]   ;;  %v7786_v49 = vld [vmem:[#allocation15 + $0x38] ss:$12 sps:$4 sm:$0xff]  }
 0x4c2   :  { %5874 = vrcp.f32 %v1939_v23  ;;  %v7783_v23 = vld [vmem:[#allocation15 + $0x30] ss:$12 sps:$4 sm:$0xff]   ;;  %v7789_v2 = vld [vmem:[#allocation15 + $0x4c] ss:$12 sps:$4 sm:$0xff]   ;;  %v7793_v24 = vld [vmem:[#allocation15 + $0x48] ss:$12 sps:$4 sm:$0xff]  }
 0x4c3   :  { %5876 = vtanh.f32 %v1950_v21  ;;  %v7796_v21 = vld [vmem:[#allocation15 + $0x50] ss:$12 sps:$4 sm:$0xff]  }
 0x4c4   :  { %5878 = vrcp.f32 %v1940_v51  ;;  %v7799_v51 = vld [vmem:[#allocation15 + $0x64] ss:$12 sps:$4 sm:$0xff]  }
 0x4cb   :  { %v5873_v52 = vpop.eup %5872 }
 0x4cc   :  { %v5875_v53 = vpop.eup %5874  ;;  %v1953_v20 = vsub.f32 %v7422_v22, %v5873_v52  ;;  %v7763_v22 = vld [vmem:[#allocation15 + $0x8] ss:$12 sps:$4 sm:$0xff]  }
 0x4cd   :  { %v5877_v25 = vpop.eup %5876 }
 0x4ce   :  { %v1954_v48 = vsub.f32 %v7424_v3, %v5877_v25  ;;  %v1955_v55 = vmul.f32 %v5875_v53, %v1953_v20  ;;  %v5879_v12 = vpop.eup %5878  ;;  %v7766_v3 = vld [vmem:[#allocation15 + $0x1c] ss:$12 sps:$4 sm:$0xff]  }
 0x4cf   :  { %v7806_v53 = vld [vmem:[#allocation15 + $0x68] ss:$12 sps:$4 sm:$0xff]  }
 0x4d0   :  { %v1956_v14 = vmul.f32 %v5879_v12, %v1954_v48  ;;  %v7750_v18 = vadd.f32 %v5873_v52, %v1955_v55  ;;  %v7803_v52 = vld [vmem:[#allocation15 + $0x60] ss:$12 sps:$4 sm:$0xff]   ;;  %v7809_v20 = vld [vmem:[#allocation15 + $0x7c] ss:$12 sps:$4 sm:$0xff]  }
 0x4d1   :  { %9520 = vst [vmem:[#allocation74_spill] sm:$0xff] %v7809_v20  ;;  %v7816_v48 = vld [vmem:[#allocation15 + $0x80] ss:$12 sps:$4 sm:$0xff]   ;;  %v7823_v12 = vld [vmem:[#allocation15 + $0x90] ss:$12 sps:$4 sm:$0xff]  }
 0x4d2   :  { %v7752_v44 = vadd.f32 %v5877_v25, %v1956_v14  ;;  %v7813_v25 = vld [vmem:[#allocation15 + $0x78] ss:$12 sps:$4 sm:$0xff]   ;;  %9521 = vst [vmem:[#allocation75_spill] sm:$0xff] %v7816_v48  ;;  %v7819_v55 = vld [vmem:[#allocation15 + $0x94] ss:$12 sps:$4 sm:$0xff]   ;;  %9523 = vst [vmem:[#allocation77_spill] sm:$0xff] %v7823_v12 }
 0x4d3   :  { %9522 = vst [vmem:[#allocation76_spill] sm:$0xff] %v7819_v55  ;;  %v7826_v14 = vld [vmem:[#allocation15 + $0x98] ss:$12 sps:$4 sm:$0xff]  }
 0x4d4   :  { %v7756_v13 = vpack.c.bf16 %v7752_v44, %v7750_v18 }
 0x4d6   :  { %1993 = vmatmul.mubr.bf16.vlgmr.msra.gmra.mrb[20].mxu0 %v7756_v13  ;;  %5072 = vmatmul.mubr.bf16.vlgmr.msra.gmra.mrb[40].mxu1 %v7756_v13 }
 0x4d7   :  { %2046 = vmatpush1.bf16.msra.mxu0 %v7760_v47  ;;  %5076 = vmatpush3.bf16.msra.mxu1 %v7763_v22 }
 0x4d8   :  { %2047 = vmatprep.subr.bf16.mxu0 %v7766_v3  ;;  %5077 = vmatprep.subr.bf16.mxu1 %v9419_v57 }
 0x4d9   :  { %2077 = vmatprep.mubr.bf16.mxu0 %v9420_v50  ;;  %5091 = vmatprep.mubr.msk.bf16.mxu1 %vm6692_vm0, %v9419_v57 }
 0x4db   :  { %2048 = vmatpush1.bf16.msra.mxu0 %v7773_v19  ;;  %5078 = vmatpush3.bf16.msra.mxu1 %v7776_v15 }
 0x4dc   :  { %2049 = vmatprep.subr.bf16.mxu0 %v7779_v16  ;;  %5079 = vmatprep.subr.bf16.mxu1 %v9419_v57 }
 0x4df   :  { %2050 = vmatpush1.bf16.msra.mxu0 %v7783_v23  ;;  %5080 = vmatpush3.bf16.msra.mxu1 %v7786_v49 }
 0x4e0   :  { %2051 = vmatprep.subr.bf16.mxu0 %v7789_v2  ;;  %5081 = vmatprep.subr.bf16.mxu1 %v9419_v57 }
 0x4e3   :  { %2052 = vmatpush1.bf16.msra.mxu0 %v7793_v24  ;;  %5082 = vmatpush3.bf16.msra.mxu1 %v7796_v21 }
 0x4e4   :  { %2053 = vmatprep.subr.bf16.mxu0 %v7799_v51  ;;  %5083 = vmatprep.subr.bf16.mxu1 %v9419_v57 }
 0x4e7   :  { %2054 = vmatpush1.bf16.msra.mxu0 %v7803_v52  ;;  %5084 = vmatpush3.bf16.msra.mxu1 %v7806_v53 }
 0x4e8   :  { %2055 = vmatprep.subr.bf16.mxu0 %v7809_v20  ;;  %5085 = vmatprep.subr.bf16.mxu1 %v9419_v57  ;;  %v7829_v20 = vld [vmem:[#allocation15 + $0xac] ss:$12 sps:$4 sm:$0xff]  }
 0x4eb   :  { %2056 = vmatpush1.bf16.msra.mxu0 %v7813_v25  ;;  %5086 = vmatpush3.bf16.msra.mxu1 %v7816_v48  ;;  %v7833_v48 = vld [vmem:[#allocation15 + $0xa8] ss:$12 sps:$4 sm:$0xff]  }
 0x4ec   :  { %2057 = vmatprep.subr.bf16.mxu0 %v7819_v55  ;;  %5087 = vmatprep.subr.bf16.mxu1 %v9419_v57  ;;  %v7836_v55 = vld [vmem:[#allocation15 + $0xb0] ss:$12 sps:$4 sm:$0xff]  }
 0x4ef   :  { %2058 = vmatpush1.bf16.msra.mxu0 %v7823_v12  ;;  %5088 = vmatpush3.bf16.msra.mxu1 %v7826_v14  ;;  %v2044_v12 = vpack.c.bf16 %v7734_v60, %v7732_v63 }
 0x4f0   :  { %2059 = vmatprep.subr.bf16.mxu0 %v7829_v20  ;;  %5089 = vmatprep.subr.bf16.mxu1 %v9419_v57 }
 0x4f3   :  { %2060 = vmatpush1.bf16.msra.mxu0 %v7833_v48  ;;  %5090 = vmatpush3.bf16.msra.mxu1 %v7836_v55 }
 0x4f4   :  { %2183 = vmatprep.subr.bf16.mxu0 %v7467_v41  ;;  %5095 = vmatprep.subr.bf16.mxu1 %v9419_v57  ;;  %v5775_v41 = vld [vmem:[#allocation3 + $0x18] sm:$0xff]  }
 0x4f6   :  { %2078 = vmatmul.mubr.bf16.vlgmr.msra.gmra.mrb[20].mxu0 %v2044_v12  ;;  %5092 = vmatmul.mubr.bf16.vlgmr.msra.gmra.mrb[44].mxu1 %v2044_v12  ;;  %v9555_v12 = vld [vmem:[#allocation63_spill] sm:$0xff] }
 0x4f7   :  { %2184 = vmatpush1.bf16.msra.mxu0 %v7471_v61  ;;  %5096 = vmatpush3.bf16.msra.mxu1 %v7474_v54  ;;  %v9524_v61 = vld [vmem:[#allocation36_spill] sm:$0xff] }
 0x4f8   :  { %2185 = vmatprep.subr.bf16.mxu0 %v7477_v1  ;;  %5097 = vmatprep.subr.bf16.mxu1 %v9419_v57  ;;  %v9525_v54 = vld [vmem:[#allocation32_spill] sm:$0xff]  ;;  %v9526_v1 = vld [vmem:[#allocation33_spill] sm:$0xff] }
 0x4f9   :  { %2215 = vmatprep.mubr.bf16.mxu0 %v9420_v50  ;;  %5111 = vmatprep.mubr.msk.bf16.mxu1 %vm6692_vm0, %v9419_v57 }
 0x4fb   :  { %2186 = vmatpush1.bf16.msra.mxu0 %v7484_v56  ;;  %5098 = vmatpush3.bf16.msra.mxu1 %v7487_v62  ;;  %v9527_v56 = vld [vmem:[#allocation37_spill] sm:$0xff]  ;;  %v9528_v62 = vld [vmem:[#allocation34_spill] sm:$0xff] }
 0x4fc   :  { %2187 = vmatprep.subr.bf16.mxu0 %v7490_v59  ;;  %5099 = vmatprep.subr.bf16.mxu1 %v9419_v57  ;;  %v9529_v59 = vld [vmem:[#allocation35_spill] sm:$0xff] }
 0x4ff   :  { %2188 = vmatpush1.bf16.msra.mxu0 %v7494_v43  ;;  %5100 = vmatpush3.bf16.msra.mxu1 %v7497_v26  ;;  %v9530_v43 = vld [vmem:[#allocation38_spill] sm:$0xff]  ;;  %v9531_v26 = vld [vmem:[#allocation39_spill] sm:$0xff] }
 0x500   :  { %2189 = vmatprep.subr.bf16.mxu0 %v7500_v28  ;;  %5101 = vmatprep.subr.bf16.mxu1 %v9419_v57  ;;  %v9532_v28 = vld [vmem:[#allocation40_spill] sm:$0xff] }
 0x503   :  { %2190 = vmatpush1.bf16.msra.mxu0 %v7504_v30  ;;  %5102 = vmatpush3.bf16.msra.mxu1 %v7507_v31  ;;  %v9533_v30 = vld [vmem:[#allocation41_spill] sm:$0xff]  ;;  %v9534_v31 = vld [vmem:[#allocation42_spill] sm:$0xff] }
 0x504   :  { %2191 = vmatprep.subr.bf16.mxu0 %v7510_v32  ;;  %5103 = vmatprep.subr.bf16.mxu1 %v9419_v57  ;;  %v9535_v32 = vld [vmem:[#allocation43_spill] sm:$0xff] }
 0x507   :  { %2192 = vmatpush1.bf16.msra.mxu0 %v7514_v33  ;;  %5104 = vmatpush3.bf16.msra.mxu1 %v7517_v34  ;;  %v9536_v33 = vld [vmem:[#allocation44_spill] sm:$0xff]  ;;  %v9537_v34 = vld [vmem:[#allocation45_spill] sm:$0xff] }
 0x508   :  { %2193 = vmatprep.subr.bf16.mxu0 %v7520_v35  ;;  %5105 = vmatprep.subr.bf16.mxu1 %v9419_v57  ;;  %v9538_v35 = vld [vmem:[#allocation46_spill] sm:$0xff] }
 0x50b   :  { %2194 = vmatpush1.bf16.msra.mxu0 %v7524_v36  ;;  %5106 = vmatpush3.bf16.msra.mxu1 %v7527_v38  ;;  %v9539_v36 = vld [vmem:[#allocation47_spill] sm:$0xff]  ;;  %v9540_v38 = vld [vmem:[#allocation48_spill] sm:$0xff] }
 0x50c   :  { %2195 = vmatprep.subr.bf16.mxu0 %v7530_v40  ;;  %5107 = vmatprep.subr.bf16.mxu1 %v9419_v57  ;;  %v9541_v40 = vld [vmem:[#allocation49_spill] sm:$0xff] }
 0x50f   :  { %2196 = vmatpush1.bf16.msra.mxu0 %v7534_v58  ;;  %5108 = vmatpush3.bf16.msra.mxu1 %v7537_v45  ;;  %v9542_v58 = vld [vmem:[#allocation50_spill] sm:$0xff]  ;;  %v9543_v45 = vld [vmem:[#allocation51_spill] sm:$0xff] }
 0x510   :  { %2197 = vmatprep.subr.bf16.mxu0 %v7540_v42  ;;  %5109 = vmatprep.subr.bf16.mxu1 %v9419_v57  ;;  %v9544_v42 = vld [vmem:[#allocation52_spill] sm:$0xff] }
 0x513   :  { %2198 = vmatpush1.bf16.msra.mxu0 %v7544_v5  ;;  %5110 = vmatpush3.bf16.msra.mxu1 %v7547_v6  ;;  %v9545_v5 = vld [vmem:[#allocation53_spill] sm:$0xff]  ;;  %v9546_v6 = vld [vmem:[#allocation54_spill] sm:$0xff] }
 0x514   :  { %2267 = vmatprep.subr.bf16.mxu0 %v7550_v7  ;;  %5115 = vmatprep.subr.bf16.mxu1 %v9419_v57  ;;  %v9547_v7 = vld [vmem:[#allocation55_spill] sm:$0xff] }
 0x516   :  { %2216 = vmatmul.mubr.bf16.vlgmr.msra.gmra.mrb[24].mxu0 %v5775_v41  ;;  %5112 = vmatmul.mubr.bf16.vlgmr.msra.gmra.mrb[48].mxu1 %v5775_v41  ;;  %v9556_v41 = vld [vmem:[#allocation64_spill] sm:$0xff] }
 0x517   :  { %2268 = vmatpush1.bf16.msra.mxu0 %v7554_v37  ;;  %5116 = vmatpush3.bf16.msra.mxu1 %v7557_v8  ;;  %v9548_v37 = vld [vmem:[#allocation56_spill] sm:$0xff]  ;;  %v9549_v8 = vld [vmem:[#allocation57_spill] sm:$0xff] }
 0x518   :  { %2269 = vmatprep.subr.bf16.mxu0 %v7560_v9  ;;  %5117 = vmatprep.subr.bf16.mxu1 %v9419_v57  ;;  %v9550_v9 = vld [vmem:[#allocation58_spill] sm:$0xff] }
 0x519   :  { %2299 = vmatprep.mubr.bf16.mxu0 %v9420_v50  ;;  %5131 = vmatprep.mubr.msk.bf16.mxu1 %vm6692_vm0, %v9419_v57 }
 0x51b   :  { %2270 = vmatpush1.bf16.msra.mxu0 %v7567_v39  ;;  %5118 = vmatpush3.bf16.msra.mxu1 %v7570_v10  ;;  %v9551_v39 = vld [vmem:[#allocation59_spill] sm:$0xff]  ;;  %v9552_v10 = vld [vmem:[#allocation60_spill] sm:$0xff] }
 0x51c   :  { %2271 = vmatprep.subr.bf16.mxu0 %v7573_v11  ;;  %5119 = vmatprep.subr.bf16.mxu1 %v9419_v57  ;;  %v9553_v11 = vld [vmem:[#allocation61_spill] sm:$0xff] }
 0x51f   :  { %2272 = vmatpush1.bf16.msra.mxu0 %v9524_v61  ;;  %5120 = vmatpush3.bf16.msra.mxu1 %v9525_v54  ;;  %v9557_v61 = vld [vmem:[#allocation65_spill] sm:$0xff]  ;;  %v9558_v54 = vld [vmem:[#allocation66_spill] sm:$0xff] }
 0x520   :  { %2273 = vmatprep.subr.bf16.mxu0 %v9526_v1  ;;  %5121 = vmatprep.subr.bf16.mxu1 %v9419_v57  ;;  %v9559_v1 = vld [vmem:[#allocation67_spill] sm:$0xff] }
 0x523   :  { %2274 = vmatpush1.bf16.msra.mxu0 %v9527_v56  ;;  %5122 = vmatpush3.bf16.msra.mxu1 %v9528_v62  ;;  %v9560_v56 = vld [vmem:[#allocation68_spill] sm:$0xff]  ;;  %v9561_v62 = vld [vmem:[#allocation69_spill] sm:$0xff] }
 0x524   :  { %2275 = vmatprep.subr.bf16.mxu0 %v9529_v59  ;;  %5123 = vmatprep.subr.bf16.mxu1 %v9419_v57  ;;  %v9562_v59 = vld [vmem:[#allocation70_spill] sm:$0xff] }
 0x527   :  { %2276 = vmatpush1.bf16.msra.mxu0 %v9530_v43  ;;  %5124 = vmatpush3.bf16.msra.mxu1 %v9531_v26  ;;  %v9563_v43 = vld [vmem:[#allocation71_spill] sm:$0xff]  ;;  %v9564_v26 = vld [vmem:[#allocation72_spill] sm:$0xff] }
 0x528   :  { %2277 = vmatprep.subr.bf16.mxu0 %v9532_v28  ;;  %5125 = vmatprep.subr.bf16.mxu1 %v9419_v57  ;;  %v9565_v28 = vld [vmem:[#allocation73_spill] sm:$0xff] }
 0x52b   :  { %2278 = vmatpush1.bf16.msra.mxu0 %v9533_v30  ;;  %5126 = vmatpush3.bf16.msra.mxu1 %v9534_v31 }
 0x52c   :  { %2279 = vmatprep.subr.bf16.mxu0 %v9535_v32  ;;  %5127 = vmatprep.subr.bf16.mxu1 %v9419_v57 }
 0x52f   :  { %2280 = vmatpush1.bf16.msra.mxu0 %v9536_v33  ;;  %5128 = vmatpush3.bf16.msra.mxu1 %v9537_v34 }
 0x530   :  { %2281 = vmatprep.subr.bf16.mxu0 %v9538_v35  ;;  %5129 = vmatprep.subr.bf16.mxu1 %v9419_v57 }
 0x533   :  { %2282 = vmatpush1.bf16.msra.mxu0 %v9539_v36  ;;  %5130 = vmatpush3.bf16.msra.mxu1 %v9540_v38 }
 0x534   :  { %2394 = vmatprep.subr.bf16.mxu0 %v9541_v40  ;;  %5135 = vmatprep.subr.bf16.mxu1 %v9419_v57 }
 0x536   :  { %2300 = vmatmul.mubr.bf16.vlgmr.msra.gmra.mrb[24].mxu0 %v7756_v13  ;;  %5132 = vmatmul.mubr.bf16.vlgmr.msra.gmra.mrb[52].mxu1 %v7756_v13  ;;  %v9554_v13 = vld [vmem:[#allocation62_spill] sm:$0xff] }
 0x537   :  { %2395 = vmatpush1.bf16.msra.mxu0 %v9542_v58  ;;  %5136 = vmatpush3.bf16.msra.mxu1 %v9543_v45 }
 0x538   :  { %2396 = vmatprep.subr.bf16.mxu0 %v9544_v42  ;;  %5137 = vmatprep.subr.bf16.mxu1 %v9419_v57 }
 0x539   :  { %2426 = vmatprep.mubr.bf16.mxu0 %v9420_v50  ;;  %5151 = vmatprep.mubr.msk.bf16.mxu1 %vm6692_vm0, %v9419_v57 }
 0x53b   :  { %2397 = vmatpush1.bf16.msra.mxu0 %v9545_v5  ;;  %5138 = vmatpush3.bf16.msra.mxu1 %v9546_v6 }
 0x53c   :  { %2398 = vmatprep.subr.bf16.mxu0 %v9547_v7  ;;  %5139 = vmatprep.subr.bf16.mxu1 %v9419_v57 }
 0x53f   :  { %2399 = vmatpush1.bf16.msra.mxu0 %v9548_v37  ;;  %5140 = vmatpush3.bf16.msra.mxu1 %v9549_v8  ;;  %v9566_v8 = vld [vmem:[#allocation31_spill] sm:$0xff] }
 0x540   :  { %2400 = vmatprep.subr.bf16.mxu0 %v9550_v9  ;;  %5141 = vmatprep.subr.bf16.mxu1 %v9419_v57 }
 0x543   :  { %2401 = vmatpush1.bf16.msra.mxu0 %v9551_v39  ;;  %5142 = vmatpush3.bf16.msra.mxu1 %v9552_v10 }
 0x544   :  { %2402 = vmatprep.subr.bf16.mxu0 %v9553_v11  ;;  %5143 = vmatprep.subr.bf16.mxu1 %v9419_v57 }
 0x547   :  { %2403 = vmatpush1.bf16.msra.mxu0 %v9554_v13  ;;  %5144 = vmatpush3.bf16.msra.mxu1 %v9555_v12 }
 0x548   :  { %2404 = vmatprep.subr.bf16.mxu0 %v9556_v41  ;;  %5145 = vmatprep.subr.bf16.mxu1 %v9419_v57 }
 0x54b   :  { %2405 = vmatpush1.bf16.msra.mxu0 %v9557_v61  ;;  %5146 = vmatpush3.bf16.msra.mxu1 %v9558_v54 }
 0x54c   :  { %2406 = vmatprep.subr.bf16.mxu0 %v9559_v1  ;;  %5147 = vmatprep.subr.bf16.mxu1 %v9419_v57  ;;  %v7954_v1 = vld [vmem:[#allocation18] ss:$0 sm:$0xff] }
 0x54f   :  { %2407 = vmatpush1.bf16.msra.mxu0 %v9560_v56  ;;  %5148 = vmatpush3.bf16.msra.mxu1 %v9561_v62 }
 0x550   :  { %2408 = vmatprep.subr.bf16.mxu0 %v9562_v59  ;;  %5149 = vmatprep.subr.bf16.mxu1 %v9419_v57 }
 0x553   :  { %2409 = vmatpush1.bf16.msra.mxu0 %v9563_v43  ;;  %5150 = vmatpush3.bf16.msra.mxu1 %v9564_v26 }
 0x554   :  { %2479 = vmatprep.subr.bf16.mxu0 %v9565_v28  ;;  %5155 = vmatprep.subr.bf16.mxu1 %v9419_v57 }
 0x5a9   :  { %v2037_v30 = vpop.f32.mrb[40].mxu1 }
 0x5aa   :  { %v5073_v31 = vpop.f32.mrb[41].mxu1  ;;  %v2038_v43 = vadd.f32 %v2037_v30, %v7398_v27 }
 0x5ab   :  { %v2040_v32 = vpop.f32.mrb[42].mxu1 }
 0x5ac   :  { %v5074_v33 = vpop.f32.mrb[43].mxu1 }
 0x5c9   :  { %v2079_v34 = vpop.f32.mrb[20].mxu0  ;;  %v2122_v35 = vpop.f32.mrb[44].mxu1 }
 0x5ca   :  { %v5515_v36 = vadd.f32 %v2079_v34, %v7384_v46  ;;  %v2081_v38 = vpop.f32.mrb[21].mxu0  ;;  %v5093_v40 = vpop.f32.mrb[45].mxu1  ;;  %v2157_v56 = vadd.f32 %v7954_v1, %v2122_v35  ;;  %v2041_v34 = vadd.f32 %v2040_v32, %v7398_v27 }
 0x5cb   :  { %v2083_v58 = vpop.f32.mrb[22].mxu0  ;;  %v2125_v45 = vpop.f32.mrb[46].mxu1  ;;  %v5516_v9 = vadd.f32 %v2081_v38, %v9566_v8 }
 0x5cc   :  { %v4518_v42 = vmul.f32 -1.442695, %v5515_v36  ;;  %v5517_v5 = vadd.f32 %v2083_v58, %v7384_v46  ;;  %v2085_v6 = vpop.f32.mrb[23].mxu0  ;;  %v5094_v7 = vpop.f32.mrb[47].mxu1  ;;  %v2158_v28 = vadd.f32 %v7954_v1, %v2125_v45 }
 0x5cd   :  { %v5518_v39 = vadd.f32 %v2085_v6, %v9566_v8  ;;  %v4520_v10 = vmul.f32 -1.442695, %v5516_v9 }
 0x5ce   :  { %5880 = vpow2.f32 %v4518_v42  ;;  %v4519_v37 = vmul.f32 -1.442695, %v5517_v5 }
 0x5cf   :  { %v4521_v13 = vmul.f32 -1.442695, %v5518_v39 }
 0x5d0   :  { %5882 = vpow2.f32 %v4519_v37 }
 0x5d1   :  { %5884 = vpow2.f32 %v4520_v10 }
 0x5d8   :  { %v5881_v11 = vpop.eup %5880 }
 0x5d9   :  { %v2137_v12 = vadd.f32 1.0, %v5881_v11 }
 0x5da   :  { %v5883_v41 = vpop.eup %5882 }
 0x5db   :  { %5886 = vrcp.f32 %v2137_v12  ;;  %v2138_v61 = vadd.f32 1.0, %v5883_v41  ;;  %v5885_v54 = vpop.eup %5884 }
 0x5dc   :  { %5888 = vpow2.f32 %v4521_v13  ;;  %v2151_v33 = vadd.f32 1.0, %v5885_v54 }
 0x5dd   :  { %5890 = vrcp.f32 %v2138_v61 }
 0x5e5   :  { %v5887_v62 = vpop.eup %5886 }
 0x5e6   :  { %v5889_v59 = vpop.eup %5888  ;;  %v2159_v26 = vmul.f32 %v5887_v62, %v2157_v56 }
 0x5e7   :  { %v5891_v31 = vpop.eup %5890  ;;  %v2152_v42 = vadd.f32 1.0, %v5889_v59 }
 0x5e8   :  { %v2161_v36 = vadd.f32 %v2159_v26, %v2038_v43  ;;  %v2160_v38 = vmul.f32 %v5891_v31, %v2158_v28 }
 0x5e9   :  { %v2260_v40 = vpop.f32.mrb[48].mxu1 }
 0x5ea   :  { %5892 = vtanh.f32 %v2161_v36  ;;  %v2162_v58 = vadd.f32 %v2160_v38, %v2041_v34  ;;  %v5113_v5 = vpop.f32.mrb[49].mxu1 }
 0x5eb   :  { %5894 = vrcp.f32 %v2151_v33  ;;  %v2263_v35 = vpop.f32.mrb[50].mxu1 }
 0x5ec   :  { %5896 = vtanh.f32 %v2162_v58  ;;  %v5114_v6 = vpop.f32.mrb[51].mxu1 }
 0x5ed   :  { %5898 = vrcp.f32 %v2152_v42 }
 0x5f4   :  { %v5893_v30 = vpop.eup %5892 }
 0x5f5   :  { %v5895_v7 = vpop.eup %5894  ;;  %v2165_v45 = vsub.f32 %v7732_v63, %v5893_v30 }
 0x5f6   :  { %v5897_v37 = vpop.eup %5896 }
 0x5f7   :  { %v2166_v9 = vsub.f32 %v7734_v60, %v5897_v37  ;;  %v2167_v32 = vmul.f32 %v5895_v7, %v2165_v45  ;;  %v5899_v39 = vpop.eup %5898 }
 0x5f9   :  { %v2168_v10 = vmul.f32 %v5899_v39, %v2166_v9  ;;  %v7962_v11 = vadd.f32 %v5893_v30, %v2167_v32 }
 0x5fb   :  { %v7964_v13 = vadd.f32 %v5897_v37, %v2168_v10  ;;  %2172 = vst [vmem:[#allocation20 + $0x20] sm:$0xff] %v7962_v11  ;;  %v2261_v37 = vadd.f32 %v2260_v40, %v7170_v0 }
 0x5fd   :  { %2173 = vst [vmem:[#allocation20 + $0x28] sm:$0xff] %v7964_v13 }
 0x609   :  { %v2301_v12 = vpop.f32.mrb[24].mxu0  ;;  %v2344_v41 = vpop.f32.mrb[52].mxu1 }
 0x60a   :  { %v5519_v61 = vadd.f32 %v2301_v12, %v9467_v17  ;;  %v2303_v54 = vpop.f32.mrb[25].mxu0  ;;  %v5133_v63 = vpop.f32.mrb[53].mxu1  ;;  %v2379_v30 = vadd.f32 %v7742_v4, %v2344_v41  ;;  %v2264_v12 = vadd.f32 %v2263_v35, %v7170_v0 }
 0x60b   :  { %v2305_v56 = vpop.f32.mrb[26].mxu0  ;;  %v2347_v62 = vpop.f32.mrb[54].mxu1  ;;  %v5520_v31 = vadd.f32 %v2303_v54, %v9468_v29 }
 0x60c   :  { %v4523_v60 = vmul.f32 -1.442695, %v5519_v61  ;;  %v5521_v59 = vadd.f32 %v2305_v56, %v9467_v17  ;;  %v2307_v43 = vpop.f32.mrb[27].mxu0  ;;  %v5134_v26 = vpop.f32.mrb[55].mxu1  ;;  %v2380_v32 = vadd.f32 %v7742_v4, %v2347_v62 }
 0x60d   :  { %v5522_v33 = vadd.f32 %v2307_v43, %v9468_v29  ;;  %v4525_v34 = vmul.f32 -1.442695, %v5520_v31 }
 0x60e   :  { %5900 = vpow2.f32 %v4523_v60  ;;  %v4524_v28 = vmul.f32 -1.442695, %v5521_v59 }
 0x60f   :  { %v4526_v38 = vmul.f32 -1.442695, %v5522_v33  ;;  %v8080_v33 = vld [vmem:[#allocation8 + $0x78] ss:$12 sps:$4 sm:$0xff]  }
 0x610   :  { %5902 = vpow2.f32 %v4524_v28 }
 0x611   :  { %5904 = vpow2.f32 %v4525_v34  ;;  %v8083_v34 = vld [vmem:[#allocation8 + $0x80] ss:$12 sps:$4 sm:$0xff]  }
 0x618   :  { %v5901_v36 = vpop.eup %5900 }
 0x619   :  { %v2359_v58 = vadd.f32 1.0, %v5901_v36  ;;  %v8086_v36 = vld [vmem:[#allocation8 + $0x94] ss:$12 sps:$4 sm:$0xff]  }
 0x61a   :  { %v5903_v42 = vpop.eup %5902 }
 0x61b   :  { %5906 = vrcp.f32 %v2359_v58  ;;  %v2360_v5 = vadd.f32 1.0, %v5903_v42  ;;  %v5905_v6 = vpop.eup %5904  ;;  %v8093_v58 = vld [vmem:[#allocation8 + $0x98] ss:$12 sps:$4 sm:$0xff]  }
 0x61c   :  { %5908 = vpow2.f32 %v4526_v38  ;;  %v2373_v10 = vadd.f32 1.0, %v5905_v6  ;;  %v8090_v38 = vld [vmem:[#allocation8 + $0x90] ss:$12 sps:$4 sm:$0xff]   ;;  %v8096_v42 = vld [vmem:[#allocation8 + $0xac] ss:$12 sps:$4 sm:$0xff]  }
 0x61d   :  { %5910 = vrcp.f32 %v2360_v5  ;;  %v5776_v5 = vld [vmem:[#allocation3 + $0x20] sm:$0xff]   ;;  %v8100_v6 = vld [vmem:[#allocation8 + $0xa8] ss:$12 sps:$4 sm:$0xff]  }
 0x625   :  { %v5907_v7 = vpop.eup %5906 }
 0x626   :  { %v5909_v45 = vpop.eup %5908  ;;  %v2381_v9 = vmul.f32 %v5907_v7, %v2379_v30  ;;  %v8103_v30 = vld [vmem:[#allocation8 + $0xb0] ss:$12 sps:$4 sm:$0xff]  }
 0x627   :  { %v5911_v39 = vpop.eup %5910  ;;  %v2374_v56 = vadd.f32 1.0, %v5909_v45  ;;  %v8106_v7 = vld [vmem:[#allocation9 + $0x4] ss:$12 sps:$4 sm:$0xff]   ;;  %v8110_v45 = vld [vmem:[#allocation9] ss:$12 sps:$4 sm:$0xff]  }
 0x628   :  { %v2383_v61 = vadd.f32 %v2381_v9, %v2261_v37  ;;  %v2382_v54 = vmul.f32 %v5911_v39, %v2380_v32  ;;  %v8113_v37 = vld [vmem:[#allocation9 + $0x8] ss:$12 sps:$4 sm:$0xff]   ;;  %v8123_v32 = vld [vmem:[#allocation9 + $0x18] ss:$12 sps:$4 sm:$0xff]   ;;  %v8126_v39 = vld [vmem:[#allocation9 + $0x20] ss:$12 sps:$4 sm:$0xff]  }
 0x629   :  { %v8116_v9 = vld [vmem:[#allocation9 + $0x1c] ss:$12 sps:$4 sm:$0xff]  }
 0x62a   :  { %5912 = vtanh.f32 %v2383_v61  ;;  %v2384_v63 = vadd.f32 %v2382_v54, %v2264_v12  ;;  %v8133_v12 = vld [vmem:[#allocation9 + $0x30] ss:$12 sps:$4 sm:$0xff]   ;;  %v8136_v61 = vld [vmem:[#allocation9 + $0x38] ss:$12 sps:$4 sm:$0xff]  }
 0x62b   :  { %5914 = vrcp.f32 %v2373_v10  ;;  %v8129_v10 = vld [vmem:[#allocation9 + $0x34] ss:$12 sps:$4 sm:$0xff]   ;;  %9571 = vst [vmem:[#allocation36_spill] sm:$0xff] %v8133_v12  ;;  %9572 = vst [vmem:[#allocation32_spill] sm:$0xff] %v8136_v61  ;;  %v8139_v54 = vld [vmem:[#allocation9 + $0x4c] ss:$12 sps:$4 sm:$0xff]  }
 0x62c   :  { %5916 = vtanh.f32 %v2384_v63  ;;  %9573 = vst [vmem:[#allocation33_spill] sm:$0xff] %v8139_v54  ;;  %v8143_v63 = vld [vmem:[#allocation9 + $0x48] ss:$12 sps:$4 sm:$0xff]  }
 0x62d   :  { %5918 = vrcp.f32 %v2374_v56  ;;  %9574 = vst [vmem:[#allocation37_spill] sm:$0xff] %v8143_v63  ;;  %v8146_v56 = vld [vmem:[#allocation9 + $0x50] ss:$12 sps:$4 sm:$0xff]  }
 0x62e   :  { %9575 = vst [vmem:[#allocation34_spill] sm:$0xff] %v8146_v56 }
 0x634   :  { %v5913_v41 = vpop.eup %5912 }
 0x635   :  { %v5915_v60 = vpop.eup %5914  ;;  %v2387_v59 = vsub.f32 %v7750_v18, %v5913_v41  ;;  %v9567_v18 = vld [vmem:[#allocation74_spill] sm:$0xff] }
 0x636   :  { %v5917_v40 = vpop.eup %5916 }
 0x637   :  { %v2388_v43 = vsub.f32 %v7752_v44, %v5917_v40  ;;  %v2389_v4 = vmul.f32 %v5915_v60, %v2387_v59  ;;  %v5919_v62 = vpop.eup %5918  ;;  %v9568_v44 = vld [vmem:[#allocation75_spill] sm:$0xff]  ;;  %v8156_v59 = vld [vmem:[#allocation9 + $0x68] ss:$12 sps:$4 sm:$0xff]  }
 0x638   :  { %v8153_v60 = vld [vmem:[#allocation9 + $0x60] ss:$12 sps:$4 sm:$0xff]   ;;  %9578 = vst [vmem:[#allocation39_spill] sm:$0xff] %v8156_v59 }
 0x639   :  { %v2390_v26 = vmul.f32 %v5919_v62, %v2388_v43  ;;  %v7978_v28 = vadd.f32 %v5913_v41, %v2389_v4  ;;  %v8149_v41 = vld [vmem:[#allocation9 + $0x64] ss:$12 sps:$4 sm:$0xff]   ;;  %9577 = vst [vmem:[#allocation38_spill] sm:$0xff] %v8153_v60  ;;  %v8166_v4 = vld [vmem:[#allocation9 + $0x80] ss:$12 sps:$4 sm:$0xff]  }
 0x63a   :  { %9576 = vst [vmem:[#allocation35_spill] sm:$0xff] %v8149_v41  ;;  %v8163_v43 = vld [vmem:[#allocation9 + $0x78] ss:$12 sps:$4 sm:$0xff]   ;;  %9581 = vst [vmem:[#allocation42_spill] sm:$0xff] %v8166_v4  ;;  %v8169_v62 = vld [vmem:[#allocation9 + $0x94] ss:$12 sps:$4 sm:$0xff]  }
 0x63b   :  { %v7980_v35 = vadd.f32 %v5917_v40, %v2390_v26  ;;  %v8159_v40 = vld [vmem:[#allocation9 + $0x7c] ss:$12 sps:$4 sm:$0xff]   ;;  %9580 = vst [vmem:[#allocation41_spill] sm:$0xff] %v8163_v43  ;;  %9582 = vst [vmem:[#allocation43_spill] sm:$0xff] %v8169_v62 }
 0x63c   :  { %9579 = vst [vmem:[#allocation40_spill] sm:$0xff] %v8159_v40  ;;  %v8173_v26 = vld [vmem:[#allocation9 + $0x90] ss:$12 sps:$4 sm:$0xff]  }
 0x63d   :  { %v7984_v31 = vpack.c.bf16 %v7980_v35, %v7978_v28  ;;  %9583 = vst [vmem:[#allocation44_spill] sm:$0xff] %v8173_v26 }
 0x63f   :  { %2427 = vmatmul.mubr.bf16.vlgmr.msra.gmra.mrb[28].mxu0 %v7984_v31  ;;  %5152 = vmatmul.mubr.bf16.vlgmr.msra.gmra.mrb[56].mxu1 %v7984_v31 }
 0x640   :  { %2480 = vmatpush1.bf16.msra.mxu0 %v7760_v47  ;;  %5156 = vmatpush3.bf16.msra.mxu1 %v7763_v22  ;;  %v9569_v47 = vld [vmem:[#allocation76_spill] sm:$0xff]  ;;  %v9570_v22 = vld [vmem:[#allocation77_spill] sm:$0xff] }
 0x641   :  { %2481 = vmatprep.subr.bf16.mxu0 %v7766_v3  ;;  %5157 = vmatprep.subr.bf16.mxu1 %v9419_v57  ;;  %v2478_v3 = vpack.c.bf16 %v7964_v13, %v7962_v11 }
 0x642   :  { %2511 = vmatprep.mubr.bf16.mxu0 %v9420_v50  ;;  %5171 = vmatprep.mubr.msk.bf16.mxu1 %vm6692_vm0, %v9419_v57 }
 0x644   :  { %2482 = vmatpush1.bf16.msra.mxu0 %v7773_v19  ;;  %5158 = vmatpush3.bf16.msra.mxu1 %v7776_v15  ;;  %v8023_v19 = vld [vmem:[#allocation8 + $0x4] ss:$12 sps:$4 sm:$0xff]   ;;  %v8027_v15 = vld [vmem:[#allocation8] ss:$12 sps:$4 sm:$0xff]  }
 0x645   :  { %2483 = vmatprep.subr.bf16.mxu0 %v7779_v16  ;;  %5159 = vmatprep.subr.bf16.mxu1 %v9419_v57  ;;  %v8030_v16 = vld [vmem:[#allocation8 + $0x8] ss:$12 sps:$4 sm:$0xff]  }
 0x648   :  { %2484 = vmatpush1.bf16.msra.mxu0 %v7783_v23  ;;  %5160 = vmatpush3.bf16.msra.mxu1 %v7786_v49  ;;  %v8033_v23 = vld [vmem:[#allocation8 + $0x1c] ss:$12 sps:$4 sm:$0xff]   ;;  %v8040_v49 = vld [vmem:[#allocation8 + $0x18] ss:$12 sps:$4 sm:$0xff]  }
 0x649   :  { %2485 = vmatprep.subr.bf16.mxu0 %v7789_v2  ;;  %5161 = vmatprep.subr.bf16.mxu1 %v9419_v57  ;;  %v8043_v2 = vld [vmem:[#allocation8 + $0x20] ss:$12 sps:$4 sm:$0xff]  }
 0x64c   :  { %2486 = vmatpush1.bf16.msra.mxu0 %v7793_v24  ;;  %5162 = vmatpush3.bf16.msra.mxu1 %v7796_v21  ;;  %v8046_v24 = vld [vmem:[#allocation8 + $0x34] ss:$12 sps:$4 sm:$0xff]   ;;  %v8050_v21 = vld [vmem:[#allocation8 + $0x30] ss:$12 sps:$4 sm:$0xff]  }
 0x64d   :  { %2487 = vmatprep.subr.bf16.mxu0 %v7799_v51  ;;  %5163 = vmatprep.subr.bf16.mxu1 %v9419_v57  ;;  %v8053_v51 = vld [vmem:[#allocation8 + $0x38] ss:$12 sps:$4 sm:$0xff]  }
 0x650   :  { %2488 = vmatpush1.bf16.msra.mxu0 %v7803_v52  ;;  %5164 = vmatpush3.bf16.msra.mxu1 %v7806_v53  ;;  %v8056_v52 = vld [vmem:[#allocation8 + $0x4c] ss:$12 sps:$4 sm:$0xff]   ;;  %v8060_v53 = vld [vmem:[#allocation8 + $0x48] ss:$12 sps:$4 sm:$0xff]  }
 0x651   :  { %2489 = vmatprep.subr.bf16.mxu0 %v9567_v18  ;;  %5165 = vmatprep.subr.bf16.mxu1 %v9419_v57  ;;  %v8176_v18 = vld [vmem:[#allocation9 + $0x98] ss:$12 sps:$4 sm:$0xff]  }
 0x652   :  { %9584 = vst [vmem:[#allocation45_spill] sm:$0xff] %v8176_v18 }
 0x654   :  { %2490 = vmatpush1.bf16.msra.mxu0 %v7813_v25  ;;  %5166 = vmatpush3.bf16.msra.mxu1 %v9568_v44  ;;  %v8066_v25 = vld [vmem:[#allocation8 + $0x64] ss:$12 sps:$4 sm:$0xff]   ;;  %v8179_v44 = vld [vmem:[#allocation9 + $0xac] ss:$12 sps:$4 sm:$0xff]  }
 0x655   :  { %2491 = vmatprep.subr.bf16.mxu0 %v9569_v47  ;;  %5167 = vmatprep.subr.bf16.mxu1 %v9419_v57  ;;  %9585 = vst [vmem:[#allocation46_spill] sm:$0xff] %v8179_v44  ;;  %v8183_v47 = vld [vmem:[#allocation9 + $0xa8] ss:$12 sps:$4 sm:$0xff]  }
 0x656   :  { %9586 = vst [vmem:[#allocation47_spill] sm:$0xff] %v8183_v47 }
 0x658   :  { %2492 = vmatpush1.bf16.msra.mxu0 %v9570_v22  ;;  %5168 = vmatpush3.bf16.msra.mxu1 %v7826_v14  ;;  %v8076_v14 = vld [vmem:[#allocation8 + $0x7c] ss:$12 sps:$4 sm:$0xff]  }
 0x659   :  { %2493 = vmatprep.subr.bf16.mxu0 %v7829_v20  ;;  %5169 = vmatprep.subr.bf16.mxu1 %v9419_v57  ;;  %v8063_v20 = vld [vmem:[#allocation8 + $0x50] ss:$12 sps:$4 sm:$0xff]  }
 0x65a   :  { %v8186_v22 = vld [vmem:[#allocation9 + $0xb0] ss:$12 sps:$4 sm:$0xff]  }
 0x65b   :  { %9587 = vst [vmem:[#allocation48_spill] sm:$0xff] %v8186_v22 }
 0x65c   :  { %2494 = vmatpush1.bf16.msra.mxu0 %v7833_v48  ;;  %5170 = vmatpush3.bf16.msra.mxu1 %v7836_v55  ;;  %v8070_v48 = vld [vmem:[#allocation8 + $0x60] ss:$12 sps:$4 sm:$0xff]   ;;  %v8073_v55 = vld [vmem:[#allocation8 + $0x68] ss:$12 sps:$4 sm:$0xff]  }
 0x65d   :  { %2617 = vmatprep.subr.bf16.mxu0 %v8023_v19  ;;  %5175 = vmatprep.subr.bf16.mxu1 %v9419_v57 }
 0x65f   :  { %2512 = vmatmul.mubr.bf16.vlgmr.msra.gmra.mrb[28].mxu0 %v2478_v3  ;;  %5172 = vmatmul.mubr.bf16.vlgmr.msra.gmra.mrb[60].mxu1 %v2478_v3  ;;  %v8189_v3 = vld [vmem:[#allocation14 + $0x4] ss:$12 sps:$4 sm:$0xff]  }
 0x660   :  { %2618 = vmatpush1.bf16.msra.mxu0 %v8027_v15  ;;  %5176 = vmatpush3.bf16.msra.mxu1 %v8030_v16  ;;  %9588 = vst [vmem:[#allocation49_spill] sm:$0xff] %v8189_v3 }
 0x661   :  { %2619 = vmatprep.subr.bf16.mxu0 %v8033_v23  ;;  %5177 = vmatprep.subr.bf16.mxu1 %v9419_v57 }
 0x662   :  { %2649 = vmatprep.mubr.bf16.mxu0 %v9420_v50  ;;  %5191 = vmatprep.mubr.msk.bf16.mxu1 %vm6692_vm0, %v9419_v57 }
 0x664   :  { %2620 = vmatpush1.bf16.msra.mxu0 %v8040_v49  ;;  %5178 = vmatpush3.bf16.msra.mxu1 %v8043_v2 }
 0x665   :  { %2621 = vmatprep.subr.bf16.mxu0 %v8046_v24  ;;  %5179 = vmatprep.subr.bf16.mxu1 %v9419_v57 }
 0x668   :  { %2622 = vmatpush1.bf16.msra.mxu0 %v8050_v21  ;;  %5180 = vmatpush3.bf16.msra.mxu1 %v8053_v51 }
 0x669   :  { %2623 = vmatprep.subr.bf16.mxu0 %v8056_v52  ;;  %5181 = vmatprep.subr.bf16.mxu1 %v9419_v57 }
 0x66c   :  { %2624 = vmatpush1.bf16.msra.mxu0 %v8060_v53  ;;  %5182 = vmatpush3.bf16.msra.mxu1 %v8063_v20 }
 0x66d   :  { %2625 = vmatprep.subr.bf16.mxu0 %v8066_v25  ;;  %5183 = vmatprep.subr.bf16.mxu1 %v9419_v57 }
 0x670   :  { %2626 = vmatpush1.bf16.msra.mxu0 %v8070_v48  ;;  %5184 = vmatpush3.bf16.msra.mxu1 %v8073_v55 }
 0x671   :  { %2627 = vmatprep.subr.bf16.mxu0 %v8076_v14  ;;  %5185 = vmatprep.subr.bf16.mxu1 %v9419_v57 }
 0x674   :  { %2628 = vmatpush1.bf16.msra.mxu0 %v8080_v33  ;;  %5186 = vmatpush3.bf16.msra.mxu1 %v8083_v34 }
 0x675   :  { %2629 = vmatprep.subr.bf16.mxu0 %v8086_v36  ;;  %5187 = vmatprep.subr.bf16.mxu1 %v9419_v57 }
 0x678   :  { %2630 = vmatpush1.bf16.msra.mxu0 %v8090_v38  ;;  %5188 = vmatpush3.bf16.msra.mxu1 %v8093_v58 }
 0x679   :  { %2631 = vmatprep.subr.bf16.mxu0 %v8096_v42  ;;  %5189 = vmatprep.subr.bf16.mxu1 %v9419_v57 }
 0x67c   :  { %2632 = vmatpush1.bf16.msra.mxu0 %v8100_v6  ;;  %5190 = vmatpush3.bf16.msra.mxu1 %v8103_v30 }
 0x67d   :  { %2701 = vmatprep.subr.bf16.mxu0 %v8106_v7  ;;  %5195 = vmatprep.subr.bf16.mxu1 %v9419_v57 }
 0x67f   :  { %2650 = vmatmul.mubr.bf16.vlgmr.msra.gmra.mrb[32].mxu0 %v5776_v5  ;;  %5192 = vmatmul.mubr.bf16.vlgmr.msra.gmra.mrb[64].mxu1 %v5776_v5  ;;  %v8195_v5 = vld [vmem:[#allocation14] ss:$12 sps:$4 sm:$0xff]  }
 0x680   :  { %2702 = vmatpush1.bf16.msra.mxu0 %v8110_v45  ;;  %5196 = vmatpush3.bf16.msra.mxu1 %v8113_v37  ;;  %9589 = vst [vmem:[#allocation50_spill] sm:$0xff] %v8195_v5 }
 0x681   :  { %2703 = vmatprep.subr.bf16.mxu0 %v8116_v9  ;;  %5197 = vmatprep.subr.bf16.mxu1 %v9419_v57 }
 0x682   :  { %2733 = vmatprep.mubr.bf16.mxu0 %v9420_v50  ;;  %5211 = vmatprep.mubr.msk.bf16.mxu1 %vm6692_vm0, %v9419_v57 }
 0x684   :  { %2704 = vmatpush1.bf16.msra.mxu0 %v8123_v32  ;;  %5198 = vmatpush3.bf16.msra.mxu1 %v8126_v39 }
 0x685   :  { %2705 = vmatprep.subr.bf16.mxu0 %v8129_v10  ;;  %5199 = vmatprep.subr.bf16.mxu1 %v9419_v57 }
 0x688   :  { %2706 = vmatpush1.bf16.msra.mxu0 %v8133_v12  ;;  %5200 = vmatpush3.bf16.msra.mxu1 %v8136_v61 }
 0x689   :  { %2707 = vmatprep.subr.bf16.mxu0 %v8139_v54  ;;  %5201 = vmatprep.subr.bf16.mxu1 %v9419_v57 }
 0x68c   :  { %2708 = vmatpush1.bf16.msra.mxu0 %v8143_v63  ;;  %5202 = vmatpush3.bf16.msra.mxu1 %v8146_v56 }
 0x68d   :  { %2709 = vmatprep.subr.bf16.mxu0 %v8149_v41  ;;  %5203 = vmatprep.subr.bf16.mxu1 %v9419_v57 }
 0x690   :  { %2710 = vmatpush1.bf16.msra.mxu0 %v8153_v60  ;;  %5204 = vmatpush3.bf16.msra.mxu1 %v8156_v59 }
 0x691   :  { %2711 = vmatprep.subr.bf16.mxu0 %v8159_v40  ;;  %5205 = vmatprep.subr.bf16.mxu1 %v9419_v57 }
 0x694   :  { %2712 = vmatpush1.bf16.msra.mxu0 %v8163_v43  ;;  %5206 = vmatpush3.bf16.msra.mxu1 %v8166_v4 }
 0x695   :  { %2713 = vmatprep.subr.bf16.mxu0 %v8169_v62  ;;  %5207 = vmatprep.subr.bf16.mxu1 %v9419_v57 }
 0x698   :  { %2714 = vmatpush1.bf16.msra.mxu0 %v8173_v26  ;;  %5208 = vmatpush3.bf16.msra.mxu1 %v8176_v18 }
 0x699   :  { %2715 = vmatprep.subr.bf16.mxu0 %v8179_v44  ;;  %5209 = vmatprep.subr.bf16.mxu1 %v9419_v57  ;;  %v8198_v44 = vld [vmem:[#allocation14 + $0x8] ss:$12 sps:$4 sm:$0xff]  }
 0x69a   :  { %9590 = vst [vmem:[#allocation51_spill] sm:$0xff] %v8198_v44 }
 0x69c   :  { %2716 = vmatpush1.bf16.msra.mxu0 %v8183_v47  ;;  %5210 = vmatpush3.bf16.msra.mxu1 %v8186_v22  ;;  %v8201_v47 = vld [vmem:[#allocation14 + $0x1c] ss:$12 sps:$4 sm:$0xff]   ;;  %v8224_v22 = vld [vmem:[#allocation14 + $0x4c] ss:$12 sps:$4 sm:$0xff]  }
 0x69d   :  { %2828 = vmatprep.subr.bf16.mxu0 %v8189_v3  ;;  %5215 = vmatprep.subr.bf16.mxu1 %v9419_v57  ;;  %9591 = vst [vmem:[#allocation52_spill] sm:$0xff] %v8201_v47  ;;  %v8221_v3 = vld [vmem:[#allocation14 + $0x38] ss:$12 sps:$4 sm:$0xff]   ;;  %9597 = vst [vmem:[#allocation58_spill] sm:$0xff] %v8224_v22 }
 0x69e   :  { %9596 = vst [vmem:[#allocation57_spill] sm:$0xff] %v8221_v3 }
 0x69f   :  { %2734 = vmatmul.mubr.bf16.vlgmr.msra.gmra.mrb[32].mxu0 %v7984_v31  ;;  %5212 = vmatmul.mubr.bf16.vlgmr.msra.gmra.mrb[68].mxu1 %v7984_v31  ;;  %v8208_v31 = vld [vmem:[#allocation14 + $0x18] ss:$12 sps:$4 sm:$0xff]  }
 0x6a0   :  { %2829 = vmatpush1.bf16.msra.mxu0 %v8195_v5  ;;  %5216 = vmatpush3.bf16.msra.mxu1 %v8198_v44  ;;  %9592 = vst [vmem:[#allocation53_spill] sm:$0xff] %v8208_v31  ;;  %v8211_v5 = vld [vmem:[#allocation14 + $0x20] ss:$12 sps:$4 sm:$0xff]  }
 0x6a1   :  { %2830 = vmatprep.subr.bf16.mxu0 %v8201_v47  ;;  %5217 = vmatprep.subr.bf16.mxu1 %v9419_v57  ;;  %9593 = vst [vmem:[#allocation54_spill] sm:$0xff] %v8211_v5  ;;  %v8214_v44 = vld [vmem:[#allocation14 + $0x34] ss:$12 sps:$4 sm:$0xff]   ;;  %v8218_v47 = vld [vmem:[#allocation14 + $0x30] ss:$12 sps:$4 sm:$0xff]  }
 0x6a2   :  { %2860 = vmatprep.mubr.bf16.mxu0 %v9420_v50  ;;  %5231 = vmatprep.mubr.msk.bf16.mxu1 %vm6692_vm0, %v9419_v57  ;;  %9594 = vst [vmem:[#allocation55_spill] sm:$0xff] %v8214_v44  ;;  %9595 = vst [vmem:[#allocation56_spill] sm:$0xff] %v8218_v47 }
 0x6a4   :  { %2831 = vmatpush1.bf16.msra.mxu0 %v8208_v31  ;;  %5218 = vmatpush3.bf16.msra.mxu1 %v8211_v5  ;;  %v8228_v5 = vld [vmem:[#allocation14 + $0x48] ss:$12 sps:$4 sm:$0xff]   ;;  %v8234_v31 = vld [vmem:[#allocation14 + $0x64] ss:$12 sps:$4 sm:$0xff]  }
 0x6a5   :  { %2832 = vmatprep.subr.bf16.mxu0 %v8214_v44  ;;  %5219 = vmatprep.subr.bf16.mxu1 %v9419_v57  ;;  %9598 = vst [vmem:[#allocation59_spill] sm:$0xff] %v8228_v5  ;;  %v8231_v44 = vld [vmem:[#allocation14 + $0x50] ss:$12 sps:$4 sm:$0xff]   ;;  %9600 = vst [vmem:[#allocation61_spill] sm:$0xff] %v8234_v31 }
 0x6a6   :  { %9599 = vst [vmem:[#allocation60_spill] sm:$0xff] %v8231_v44 }
 0x6a8   :  { %2833 = vmatpush1.bf16.msra.mxu0 %v8218_v47  ;;  %5220 = vmatpush3.bf16.msra.mxu1 %v8221_v3  ;;  %v8238_v3 = vld [vmem:[#allocation14 + $0x60] ss:$12 sps:$4 sm:$0xff]   ;;  %v8244_v47 = vld [vmem:[#allocation14 + $0x7c] ss:$12 sps:$4 sm:$0xff]  }
 0x6a9   :  { %2834 = vmatprep.subr.bf16.mxu0 %v8224_v22  ;;  %5221 = vmatprep.subr.bf16.mxu1 %v9419_v57  ;;  %9601 = vst [vmem:[#allocation62_spill] sm:$0xff] %v8238_v3  ;;  %v8241_v22 = vld [vmem:[#allocation14 + $0x68] ss:$12 sps:$4 sm:$0xff]   ;;  %9603 = vst [vmem:[#allocation64_spill] sm:$0xff] %v8244_v47 }
 0x6aa   :  { %9602 = vst [vmem:[#allocation63_spill] sm:$0xff] %v8241_v22 }
 0x6ac   :  { %2835 = vmatpush1.bf16.msra.mxu0 %v8228_v5  ;;  %5222 = vmatpush3.bf16.msra.mxu1 %v8231_v44  ;;  %v8248_v44 = vld [vmem:[#allocation14 + $0x78] ss:$12 sps:$4 sm:$0xff]   ;;  %v8254_v5 = vld [vmem:[#allocation14 + $0x94] ss:$12 sps:$4 sm:$0xff]  }
 0x6ad   :  { %2836 = vmatprep.subr.bf16.mxu0 %v8234_v31  ;;  %5223 = vmatprep.subr.bf16.mxu1 %v9419_v57  ;;  %9604 = vst [vmem:[#allocation65_spill] sm:$0xff] %v8248_v44  ;;  %v8251_v31 = vld [vmem:[#allocation14 + $0x80] ss:$12 sps:$4 sm:$0xff]   ;;  %9606 = vst [vmem:[#allocation67_spill] sm:$0xff] %v8254_v5 }
 0x6ae   :  { %9605 = vst [vmem:[#allocation66_spill] sm:$0xff] %v8251_v31 }
 0x6b0   :  { %2837 = vmatpush1.bf16.msra.mxu0 %v8238_v3  ;;  %5224 = vmatpush3.bf16.msra.mxu1 %v8241_v22  ;;  %v8258_v22 = vld [vmem:[#allocation14 + $0x90] ss:$12 sps:$4 sm:$0xff]   ;;  %v8264_v3 = vld [vmem:[#allocation14 + $0xac] ss:$12 sps:$4 sm:$0xff]  }
 0x6b1   :  { %2838 = vmatprep.subr.bf16.mxu0 %v8244_v47  ;;  %5225 = vmatprep.subr.bf16.mxu1 %v9419_v57  ;;  %9607 = vst [vmem:[#allocation68_spill] sm:$0xff] %v8258_v22  ;;  %v8261_v47 = vld [vmem:[#allocation14 + $0x98] ss:$12 sps:$4 sm:$0xff]   ;;  %9609 = vst [vmem:[#allocation70_spill] sm:$0xff] %v8264_v3 }
 0x6b2   :  { %9608 = vst [vmem:[#allocation69_spill] sm:$0xff] %v8261_v47 }
 0x6b4   :  { %2839 = vmatpush1.bf16.msra.mxu0 %v8248_v44  ;;  %5226 = vmatpush3.bf16.msra.mxu1 %v8251_v31  ;;  %v8268_v31 = vld [vmem:[#allocation14 + $0xa8] ss:$12 sps:$4 sm:$0xff]   ;;  %v8274_v44 = vld [vmem:[#allocation15 + $0x4] ss:$12 sps:$4 sm:$0xff]  }
 0x6b5   :  { %2840 = vmatprep.subr.bf16.mxu0 %v8254_v5  ;;  %5227 = vmatprep.subr.bf16.mxu1 %v9419_v57  ;;  %9610 = vst [vmem:[#allocation71_spill] sm:$0xff] %v8268_v31  ;;  %v8271_v5 = vld [vmem:[#allocation14 + $0xb0] ss:$12 sps:$4 sm:$0xff]   ;;  %9612 = vst [vmem:[#allocation73_spill] sm:$0xff] %v8274_v44 }
 0x6b6   :  { %9611 = vst [vmem:[#allocation72_spill] sm:$0xff] %v8271_v5 }
 0x6b8   :  { %2841 = vmatpush1.bf16.msra.mxu0 %v8258_v22  ;;  %5228 = vmatpush3.bf16.msra.mxu1 %v8261_v47 }
 0x6b9   :  { %2842 = vmatprep.subr.bf16.mxu0 %v8264_v3  ;;  %5229 = vmatprep.subr.bf16.mxu1 %v9419_v57 }
 0x6bc   :  { %2843 = vmatpush1.bf16.msra.mxu0 %v8268_v31  ;;  %5230 = vmatpush3.bf16.msra.mxu1 %v8271_v5 }
 0x6bd   :  { %2913 = vmatprep.subr.bf16.mxu0 %v8274_v44  ;;  %5235 = vmatprep.subr.bf16.mxu1 %v9419_v57 }
 0x712   :  { %v2471_v47 = vpop.f32.mrb[56].mxu1 }
 0x713   :  { %v5153_v22 = vpop.f32.mrb[57].mxu1 }
 0x714   :  { %v2474_v18 = vpop.f32.mrb[58].mxu1 }
 0x715   :  { %v5154_v3 = vpop.f32.mrb[59].mxu1 }
 0x732   :  { %v2513_v26 = vpop.f32.mrb[28].mxu0  ;;  %v2556_v62 = vpop.f32.mrb[60].mxu1 }
 0x733   :  { %v5523_v4 = vadd.f32 %v2513_v26, %v7384_v46  ;;  %v2515_v43 = vpop.f32.mrb[29].mxu0  ;;  %v5173_v31 = vpop.f32.mrb[61].mxu1 }
 0x734   :  { %v2517_v40 = vpop.f32.mrb[30].mxu0  ;;  %v2559_v59 = vpop.f32.mrb[62].mxu1  ;;  %v5524_v22 = vadd.f32 %v2515_v43, %v9566_v8 }
 0x735   :  { %v4527_v60 = vmul.f32 -1.442695, %v5523_v4  ;;  %v5525_v5 = vadd.f32 %v2517_v40, %v7384_v46  ;;  %v2519_v41 = vpop.f32.mrb[31].mxu0  ;;  %v5174_v56 = vpop.f32.mrb[63].mxu1 }
 0x736   :  { %v5526_v3 = vadd.f32 %v2519_v41, %v9566_v8  ;;  %v4529_v63 = vmul.f32 -1.442695, %v5524_v22  ;;  %v2591_v56 = vadd.f32 %v7954_v1, %v2556_v62  ;;  %v2592_v41 = vadd.f32 %v7954_v1, %v2559_v59 }
 0x737   :  { %5920 = vpow2.f32 %v4527_v60  ;;  %v4528_v44 = vmul.f32 -1.442695, %v5525_v5 }
 0x738   :  { %v4530_v61 = vmul.f32 -1.442695, %v5526_v3 }
 0x739   :  { %5922 = vpow2.f32 %v4528_v44  ;;  %v2472_v44 = vadd.f32 %v2471_v47, %v7398_v27 }
 0x73a   :  { %5924 = vpow2.f32 %v4529_v63 }
 0x741   :  { %v5921_v54 = vpop.eup %5920 }
 0x742   :  { %v2571_v26 = vadd.f32 1.0, %v5921_v54  ;;  %v2475_v54 = vadd.f32 %v2474_v18, %v7398_v27 }
 0x743   :  { %v5923_v12 = vpop.eup %5922 }
 0x744   :  { %5926 = vrcp.f32 %v2571_v26  ;;  %v2572_v31 = vadd.f32 1.0, %v5923_v12  ;;  %v5925_v40 = vpop.eup %5924 }
 0x745   :  { %5928 = vpow2.f32 %v4530_v61  ;;  %v2585_v22 = vadd.f32 1.0, %v5925_v40 }
 0x746   :  { %5930 = vrcp.f32 %v2572_v31 }
 0x74e   :  { %v5927_v60 = vpop.eup %5926 }
 0x74f   :  { %v5929_v4 = vpop.eup %5928  ;;  %v2593_v43 = vmul.f32 %v5927_v60, %v2591_v56 }
 0x750   :  { %v5931_v5 = vpop.eup %5930  ;;  %v2586_v61 = vadd.f32 1.0, %v5929_v4 }
 0x751   :  { %v2595_v3 = vadd.f32 %v2593_v43, %v2472_v44  ;;  %v2594_v63 = vmul.f32 %v5931_v5, %v2592_v41 }
 0x752   :  { %v2694_v26 = vpop.f32.mrb[64].mxu1 }
 0x753   :  { %5932 = vtanh.f32 %v2595_v3  ;;  %v2596_v12 = vadd.f32 %v2594_v63, %v2475_v54  ;;  %v5193_v31 = vpop.f32.mrb[65].mxu1 }
 0x754   :  { %5934 = vrcp.f32 %v2585_v22  ;;  %v2697_v62 = vpop.f32.mrb[66].mxu1 }
 0x755   :  { %5936 = vtanh.f32 %v2596_v12  ;;  %v5194_v8 = vpop.f32.mrb[67].mxu1 }
 0x756   :  { %5938 = vrcp.f32 %v2586_v61 }
 0x75d   :  { %v5933_v47 = vpop.eup %5932 }
 0x75e   :  { %v5935_v56 = vpop.eup %5934  ;;  %v2599_v1 = vsub.f32 %v7962_v11, %v5933_v47 }
 0x75f   :  { %v5937_v59 = vpop.eup %5936 }
 0x760   :  { %v2600_v40 = vsub.f32 %v7964_v13, %v5937_v59  ;;  %v2601_v18 = vmul.f32 %v5935_v56, %v2599_v1  ;;  %v5939_v60 = vpop.eup %5938 }
 0x762   :  { %v2602_v44 = vmul.f32 %v5939_v60, %v2600_v40  ;;  %v8288_v43 = vadd.f32 %v5933_v47, %v2601_v18 }
 0x764   :  { %v8290_v41 = vadd.f32 %v5937_v59, %v2602_v44  ;;  %2606 = vst [vmem:[#allocation20 + $0x30] sm:$0xff] %v8288_v43 }
 0x766   :  { %2607 = vst [vmem:[#allocation20 + $0x38] sm:$0xff] %v8290_v41 }
 0x772   :  { %v2735_v8 = vpop.f32.mrb[32].mxu0  ;;  %v2778_v4 = vpop.f32.mrb[68].mxu1 }
 0x773   :  { %v5527_v5 = vadd.f32 %v2735_v8, %v9467_v17  ;;  %v2737_v22 = vpop.f32.mrb[33].mxu0  ;;  %v5213_v11 = vpop.f32.mrb[69].mxu1 }
 0x774   :  { %v2739_v54 = vpop.f32.mrb[34].mxu0  ;;  %v2781_v3 = vpop.f32.mrb[70].mxu1  ;;  %v5528_v47 = vadd.f32 %v2737_v22, %v9468_v29  ;;  %v2695_v22 = vadd.f32 %v2694_v26, %v7170_v0 }
 0x775   :  { %v4532_v13 = vmul.f32 -1.442695, %v5527_v5  ;;  %v5529_v63 = vadd.f32 %v2739_v54, %v9467_v17  ;;  %v2741_v12 = vpop.f32.mrb[35].mxu0  ;;  %v5214_v61 = vpop.f32.mrb[71].mxu1  ;;  %v8298_v5 = vld [vmem:[#allocation12] ss:$0 sm:$0xff] }
 0x776   :  { %v5530_v56 = vadd.f32 %v2741_v12, %v9468_v29  ;;  %v4534_v1 = vmul.f32 -1.442695, %v5528_v47  ;;  %v2813_v11 = vadd.f32 %v8298_v5, %v2778_v4  ;;  %v2814_v12 = vadd.f32 %v8298_v5, %v2781_v3 }
 0x777   :  { %5940 = vpow2.f32 %v4532_v13  ;;  %v4533_v31 = vmul.f32 -1.442695, %v5529_v63  ;;  %v2698_v47 = vadd.f32 %v2697_v62, %v7170_v0 }
 0x778   :  { %v4535_v40 = vmul.f32 -1.442695, %v5530_v56 }
 0x779   :  { %5942 = vpow2.f32 %v4533_v31 }
 0x77a   :  { %5944 = vpow2.f32 %v4534_v1 }
 0x781   :  { %v5941_v59 = vpop.eup %5940 }
 0x782   :  { %v2793_v18 = vadd.f32 1.0, %v5941_v59 }
 0x783   :  { %v5943_v60 = vpop.eup %5942 }
 0x784   :  { %5946 = vrcp.f32 %v2793_v18  ;;  %v2794_v44 = vadd.f32 1.0, %v5943_v60  ;;  %v5945_v8 = vpop.eup %5944 }
 0x785   :  { %5948 = vpow2.f32 %v4535_v40  ;;  %v2807_v31 = vadd.f32 1.0, %v5945_v8 }
 0x786   :  { %5950 = vrcp.f32 %v2794_v44 }
 0x78e   :  { %v5947_v54 = vpop.eup %5946 }
 0x78f   :  { %v5949_v13 = vpop.eup %5948  ;;  %v2815_v63 = vmul.f32 %v5947_v54, %v2813_v11 }
 0x790   :  { %v5951_v61 = vpop.eup %5950  ;;  %v2808_v40 = vadd.f32 1.0, %v5949_v13 }
 0x791   :  { %v2817_v56 = vadd.f32 %v2815_v63, %v2695_v22  ;;  %v2816_v1 = vmul.f32 %v5951_v61, %v2814_v12  ;;  %v8316_v22 = vld [vmem:[#allocation15] ss:$12 sps:$4 sm:$0xff]   ;;  %v8329_v63 = vld [vmem:[#allocation15 + $0x18] ss:$12 sps:$4 sm:$0xff]  }
 0x792   :  { %v8332_v12 = vld [vmem:[#allocation15 + $0x20] ss:$12 sps:$4 sm:$0xff]  }
 0x793   :  { %5952 = vtanh.f32 %v2817_v56  ;;  %v2818_v59 = vadd.f32 %v2816_v1, %v2698_v47  ;;  %v8335_v61 = vld [vmem:[#allocation15 + $0x34] ss:$12 sps:$4 sm:$0xff]   ;;  %v8342_v47 = vld [vmem:[#allocation15 + $0x38] ss:$12 sps:$4 sm:$0xff]  }
 0x794   :  { %5954 = vrcp.f32 %v2807_v31  ;;  %v8339_v31 = vld [vmem:[#allocation15 + $0x30] ss:$12 sps:$4 sm:$0xff]   ;;  %v8345_v56 = vld [vmem:[#allocation15 + $0x4c] ss:$12 sps:$4 sm:$0xff]   ;;  %v8349_v1 = vld [vmem:[#allocation15 + $0x48] ss:$12 sps:$4 sm:$0xff]  }
 0x795   :  { %5956 = vtanh.f32 %v2818_v59  ;;  %v8352_v59 = vld [vmem:[#allocation15 + $0x50] ss:$12 sps:$4 sm:$0xff]  }
 0x796   :  { %5958 = vrcp.f32 %v2808_v40  ;;  %v8355_v40 = vld [vmem:[#allocation15 + $0x64] ss:$12 sps:$4 sm:$0xff]  }
 0x79d   :  { %v5953_v4 = vpop.eup %5952 }
 0x79e   :  { %v5955_v18 = vpop.eup %5954  ;;  %v2821_v60 = vsub.f32 %v7978_v28, %v5953_v4  ;;  %v8319_v28 = vld [vmem:[#allocation15 + $0x8] ss:$12 sps:$4 sm:$0xff]  }
 0x79f   :  { %v5957_v26 = vpop.eup %5956 }
 0x7a0   :  { %v2822_v44 = vsub.f32 %v7980_v35, %v5957_v26  ;;  %v2823_v3 = vmul.f32 %v5955_v18, %v2821_v60  ;;  %v5959_v11 = vpop.eup %5958  ;;  %v8322_v35 = vld [vmem:[#allocation15 + $0x1c] ss:$12 sps:$4 sm:$0xff]  }
 0x7a1   :  { %v8362_v18 = vld [vmem:[#allocation15 + $0x68] ss:$12 sps:$4 sm:$0xff]  }
 0x7a2   :  { %v2824_v8 = vmul.f32 %v5959_v11, %v2822_v44  ;;  %v8306_v54 = vadd.f32 %v5953_v4, %v2823_v3  ;;  %v8359_v4 = vld [vmem:[#allocation15 + $0x60] ss:$12 sps:$4 sm:$0xff]   ;;  %v8365_v60 = vld [vmem:[#allocation15 + $0x7c] ss:$12 sps:$4 sm:$0xff]  }
 0x7a3   :  { %9613 = vst [vmem:[#allocation74_spill] sm:$0xff] %v8365_v60  ;;  %v8372_v44 = vld [vmem:[#allocation15 + $0x80] ss:$12 sps:$4 sm:$0xff]   ;;  %v8379_v11 = vld [vmem:[#allocation15 + $0x90] ss:$12 sps:$4 sm:$0xff]  }
 0x7a4   :  { %v8308_v62 = vadd.f32 %v5957_v26, %v2824_v8  ;;  %v8369_v26 = vld [vmem:[#allocation15 + $0x78] ss:$12 sps:$4 sm:$0xff]   ;;  %9614 = vst [vmem:[#allocation75_spill] sm:$0xff] %v8372_v44  ;;  %v8375_v3 = vld [vmem:[#allocation15 + $0x94] ss:$12 sps:$4 sm:$0xff]   ;;  %9616 = vst [vmem:[#allocation77_spill] sm:$0xff] %v8379_v11 }
 0x7a5   :  { %9615 = vst [vmem:[#allocation76_spill] sm:$0xff] %v8375_v3  ;;  %v8382_v8 = vld [vmem:[#allocation15 + $0x98] ss:$12 sps:$4 sm:$0xff]  }
 0x7a6   :  { %v8312_v13 = vpack.c.bf16 %v8308_v62, %v8306_v54 }
 0x7a8   :  { %2861 = vmatmul.mubr.bf16.vlgmr.msra.gmra.mrb[36].mxu0 %v8312_v13  ;;  %5232 = vmatmul.mubr.bf16.vlgmr.msra.gmra.mrb[72].mxu1 %v8312_v13 }
 0x7a9   :  { %2914 = vmatpush1.bf16.msra.mxu0 %v8316_v22  ;;  %5236 = vmatpush3.bf16.msra.mxu1 %v8319_v28 }
 0x7aa   :  { %2915 = vmatprep.subr.bf16.mxu0 %v8322_v35  ;;  %5237 = vmatprep.subr.bf16.mxu1 %v9419_v57 }
 0x7ab   :  { %2945 = vmatprep.mubr.bf16.mxu0 %v9420_v50  ;;  %5251 = vmatprep.mubr.msk.bf16.mxu1 %vm6692_vm0, %v9419_v57 }
 0x7ad   :  { %2916 = vmatpush1.bf16.msra.mxu0 %v8329_v63  ;;  %5238 = vmatpush3.bf16.msra.mxu1 %v8332_v12 }
 0x7ae   :  { %2917 = vmatprep.subr.bf16.mxu0 %v8335_v61  ;;  %5239 = vmatprep.subr.bf16.mxu1 %v9419_v57 }
 0x7b1   :  { %2918 = vmatpush1.bf16.msra.mxu0 %v8339_v31  ;;  %5240 = vmatpush3.bf16.msra.mxu1 %v8342_v47 }
 0x7b2   :  { %2919 = vmatprep.subr.bf16.mxu0 %v8345_v56  ;;  %5241 = vmatprep.subr.bf16.mxu1 %v9419_v57 }
 0x7b5   :  { %2920 = vmatpush1.bf16.msra.mxu0 %v8349_v1  ;;  %5242 = vmatpush3.bf16.msra.mxu1 %v8352_v59 }
 0x7b6   :  { %2921 = vmatprep.subr.bf16.mxu0 %v8355_v40  ;;  %5243 = vmatprep.subr.bf16.mxu1 %v9419_v57 }
 0x7b9   :  { %2922 = vmatpush1.bf16.msra.mxu0 %v8359_v4  ;;  %5244 = vmatpush3.bf16.msra.mxu1 %v8362_v18 }
 0x7ba   :  { %2923 = vmatprep.subr.bf16.mxu0 %v8365_v60  ;;  %5245 = vmatprep.subr.bf16.mxu1 %v9419_v57  ;;  %v8385_v60 = vld [vmem:[#allocation15 + $0xac] ss:$12 sps:$4 sm:$0xff]  }
 0x7bd   :  { %2924 = vmatpush1.bf16.msra.mxu0 %v8369_v26  ;;  %5246 = vmatpush3.bf16.msra.mxu1 %v8372_v44  ;;  %v8389_v44 = vld [vmem:[#allocation15 + $0xa8] ss:$12 sps:$4 sm:$0xff]  }
 0x7be   :  { %2925 = vmatprep.subr.bf16.mxu0 %v8375_v3  ;;  %5247 = vmatprep.subr.bf16.mxu1 %v9419_v57  ;;  %v8392_v3 = vld [vmem:[#allocation15 + $0xb0] ss:$12 sps:$4 sm:$0xff]  }
 0x7c1   :  { %2926 = vmatpush1.bf16.msra.mxu0 %v8379_v11  ;;  %5248 = vmatpush3.bf16.msra.mxu1 %v8382_v8  ;;  %v2912_v11 = vpack.c.bf16 %v8290_v41, %v8288_v43 }
 0x7c2   :  { %2927 = vmatprep.subr.bf16.mxu0 %v8385_v60  ;;  %5249 = vmatprep.subr.bf16.mxu1 %v9419_v57 }
 0x7c5   :  { %2928 = vmatpush1.bf16.msra.mxu0 %v8389_v44  ;;  %5250 = vmatpush3.bf16.msra.mxu1 %v8392_v3 }
 0x7c6   :  { %3051 = vmatprep.subr.bf16.mxu0 %v8023_v19  ;;  %5255 = vmatprep.subr.bf16.mxu1 %v9419_v57  ;;  %v5777_v19 = vld [vmem:[#allocation3 + $0x28] sm:$0xff]  }
 0x7c8   :  { %2946 = vmatmul.mubr.bf16.vlgmr.msra.gmra.mrb[36].mxu0 %v2912_v11  ;;  %5252 = vmatmul.mubr.bf16.vlgmr.msra.gmra.mrb[76].mxu1 %v2912_v11  ;;  %v9648_v11 = vld [vmem:[#allocation63_spill] sm:$0xff] }
 0x7c9   :  { %3052 = vmatpush1.bf16.msra.mxu0 %v8027_v15  ;;  %5256 = vmatpush3.bf16.msra.mxu1 %v8030_v16  ;;  %v9617_v15 = vld [vmem:[#allocation36_spill] sm:$0xff] }
 0x7ca   :  { %3053 = vmatprep.subr.bf16.mxu0 %v8033_v23  ;;  %5257 = vmatprep.subr.bf16.mxu1 %v9419_v57  ;;  %v9618_v16 = vld [vmem:[#allocation32_spill] sm:$0xff]  ;;  %v9619_v23 = vld [vmem:[#allocation33_spill] sm:$0xff] }
 0x7cb   :  { %3083 = vmatprep.mubr.bf16.mxu0 %v9420_v50  ;;  %5271 = vmatprep.mubr.msk.bf16.mxu1 %vm6692_vm0, %v9419_v57 }
 0x7cd   :  { %3054 = vmatpush1.bf16.msra.mxu0 %v8040_v49  ;;  %5258 = vmatpush3.bf16.msra.mxu1 %v8043_v2  ;;  %v9620_v49 = vld [vmem:[#allocation37_spill] sm:$0xff]  ;;  %v9621_v2 = vld [vmem:[#allocation34_spill] sm:$0xff] }
 0x7ce   :  { %3055 = vmatprep.subr.bf16.mxu0 %v8046_v24  ;;  %5259 = vmatprep.subr.bf16.mxu1 %v9419_v57  ;;  %v9622_v24 = vld [vmem:[#allocation35_spill] sm:$0xff] }
 0x7d1   :  { %3056 = vmatpush1.bf16.msra.mxu0 %v8050_v21  ;;  %5260 = vmatpush3.bf16.msra.mxu1 %v8053_v51  ;;  %v9623_v21 = vld [vmem:[#allocation38_spill] sm:$0xff]  ;;  %v9624_v51 = vld [vmem:[#allocation39_spill] sm:$0xff] }
 0x7d2   :  { %3057 = vmatprep.subr.bf16.mxu0 %v8056_v52  ;;  %5261 = vmatprep.subr.bf16.mxu1 %v9419_v57  ;;  %v9625_v52 = vld [vmem:[#allocation40_spill] sm:$0xff] }
 0x7d5   :  { %3058 = vmatpush1.bf16.msra.mxu0 %v8060_v53  ;;  %5262 = vmatpush3.bf16.msra.mxu1 %v8063_v20  ;;  %v9626_v53 = vld [vmem:[#allocation41_spill] sm:$0xff]  ;;  %v9627_v20 = vld [vmem:[#allocation42_spill] sm:$0xff] }
 0x7d6   :  { %3059 = vmatprep.subr.bf16.mxu0 %v8066_v25  ;;  %5263 = vmatprep.subr.bf16.mxu1 %v9419_v57  ;;  %v9628_v25 = vld [vmem:[#allocation43_spill] sm:$0xff] }
 0x7d9   :  { %3060 = vmatpush1.bf16.msra.mxu0 %v8070_v48  ;;  %5264 = vmatpush3.bf16.msra.mxu1 %v8073_v55  ;;  %v9629_v48 = vld [vmem:[#allocation44_spill] sm:$0xff]  ;;  %v9630_v55 = vld [vmem:[#allocation45_spill] sm:$0xff] }
 0x7da   :  { %3061 = vmatprep.subr.bf16.mxu0 %v8076_v14  ;;  %5265 = vmatprep.subr.bf16.mxu1 %v9419_v57  ;;  %v9631_v14 = vld [vmem:[#allocation46_spill] sm:$0xff] }
 0x7dd   :  { %3062 = vmatpush1.bf16.msra.mxu0 %v8080_v33  ;;  %5266 = vmatpush3.bf16.msra.mxu1 %v8083_v34  ;;  %v9632_v33 = vld [vmem:[#allocation47_spill] sm:$0xff]  ;;  %v9633_v34 = vld [vmem:[#allocation48_spill] sm:$0xff] }
 0x7de   :  { %3063 = vmatprep.subr.bf16.mxu0 %v8086_v36  ;;  %5267 = vmatprep.subr.bf16.mxu1 %v9419_v57  ;;  %v9634_v36 = vld [vmem:[#allocation49_spill] sm:$0xff] }
 0x7e1   :  { %3064 = vmatpush1.bf16.msra.mxu0 %v8090_v38  ;;  %5268 = vmatpush3.bf16.msra.mxu1 %v8093_v58  ;;  %v9635_v38 = vld [vmem:[#allocation50_spill] sm:$0xff]  ;;  %v9636_v58 = vld [vmem:[#allocation51_spill] sm:$0xff] }
 0x7e2   :  { %3065 = vmatprep.subr.bf16.mxu0 %v8096_v42  ;;  %5269 = vmatprep.subr.bf16.mxu1 %v9419_v57  ;;  %v9637_v42 = vld [vmem:[#allocation52_spill] sm:$0xff] }
 0x7e5   :  { %3066 = vmatpush1.bf16.msra.mxu0 %v8100_v6  ;;  %5270 = vmatpush3.bf16.msra.mxu1 %v8103_v30  ;;  %v9638_v6 = vld [vmem:[#allocation53_spill] sm:$0xff]  ;;  %v9639_v30 = vld [vmem:[#allocation54_spill] sm:$0xff] }
 0x7e6   :  { %3135 = vmatprep.subr.bf16.mxu0 %v8106_v7  ;;  %5275 = vmatprep.subr.bf16.mxu1 %v9419_v57  ;;  %v9640_v7 = vld [vmem:[#allocation55_spill] sm:$0xff] }
 0x7e8   :  { %3084 = vmatmul.mubr.bf16.vlgmr.msra.gmra.mrb[40].mxu0 %v5777_v19  ;;  %5272 = vmatmul.mubr.bf16.vlgmr.msra.gmra.mrb[80].mxu1 %v5777_v19  ;;  %v9649_v19 = vld [vmem:[#allocation64_spill] sm:$0xff] }
 0x7e9   :  { %3136 = vmatpush1.bf16.msra.mxu0 %v8110_v45  ;;  %5276 = vmatpush3.bf16.msra.mxu1 %v8113_v37  ;;  %v9641_v45 = vld [vmem:[#allocation56_spill] sm:$0xff]  ;;  %v9642_v37 = vld [vmem:[#allocation57_spill] sm:$0xff] }
 0x7ea   :  { %3137 = vmatprep.subr.bf16.mxu0 %v8116_v9  ;;  %5277 = vmatprep.subr.bf16.mxu1 %v9419_v57  ;;  %v9643_v9 = vld [vmem:[#allocation58_spill] sm:$0xff] }
 0x7eb   :  { %3167 = vmatprep.mubr.bf16.mxu0 %v9420_v50  ;;  %5291 = vmatprep.mubr.msk.bf16.mxu1 %vm6692_vm0, %v9419_v57 }
 0x7ed   :  { %3138 = vmatpush1.bf16.msra.mxu0 %v8123_v32  ;;  %5278 = vmatpush3.bf16.msra.mxu1 %v8126_v39  ;;  %v9644_v32 = vld [vmem:[#allocation59_spill] sm:$0xff]  ;;  %v9645_v39 = vld [vmem:[#allocation60_spill] sm:$0xff] }
 0x7ee   :  { %3139 = vmatprep.subr.bf16.mxu0 %v8129_v10  ;;  %5279 = vmatprep.subr.bf16.mxu1 %v9419_v57  ;;  %v9646_v10 = vld [vmem:[#allocation61_spill] sm:$0xff] }
 0x7f1   :  { %3140 = vmatpush1.bf16.msra.mxu0 %v9617_v15  ;;  %5280 = vmatpush3.bf16.msra.mxu1 %v9618_v16  ;;  %v9650_v15 = vld [vmem:[#allocation65_spill] sm:$0xff]  ;;  %v9651_v16 = vld [vmem:[#allocation66_spill] sm:$0xff] }
 0x7f2   :  { %3141 = vmatprep.subr.bf16.mxu0 %v9619_v23  ;;  %5281 = vmatprep.subr.bf16.mxu1 %v9419_v57  ;;  %v9652_v23 = vld [vmem:[#allocation67_spill] sm:$0xff] }
 0x7f5   :  { %3142 = vmatpush1.bf16.msra.mxu0 %v9620_v49  ;;  %5282 = vmatpush3.bf16.msra.mxu1 %v9621_v2  ;;  %v9653_v49 = vld [vmem:[#allocation68_spill] sm:$0xff]  ;;  %v9654_v2 = vld [vmem:[#allocation69_spill] sm:$0xff] }
 0x7f6   :  { %3143 = vmatprep.subr.bf16.mxu0 %v9622_v24  ;;  %5283 = vmatprep.subr.bf16.mxu1 %v9419_v57  ;;  %v9655_v24 = vld [vmem:[#allocation70_spill] sm:$0xff] }
 0x7f9   :  { %3144 = vmatpush1.bf16.msra.mxu0 %v9623_v21  ;;  %5284 = vmatpush3.bf16.msra.mxu1 %v9624_v51  ;;  %v9656_v21 = vld [vmem:[#allocation71_spill] sm:$0xff]  ;;  %v9657_v51 = vld [vmem:[#allocation72_spill] sm:$0xff] }
 0x7fa   :  { %3145 = vmatprep.subr.bf16.mxu0 %v9625_v52  ;;  %5285 = vmatprep.subr.bf16.mxu1 %v9419_v57  ;;  %v9658_v52 = vld [vmem:[#allocation73_spill] sm:$0xff] }
 0x7fd   :  { %3146 = vmatpush1.bf16.msra.mxu0 %v9626_v53  ;;  %5286 = vmatpush3.bf16.msra.mxu1 %v9627_v20 }
 0x7fe   :  { %3147 = vmatprep.subr.bf16.mxu0 %v9628_v25  ;;  %5287 = vmatprep.subr.bf16.mxu1 %v9419_v57 }
 0x801   :  { %3148 = vmatpush1.bf16.msra.mxu0 %v9629_v48  ;;  %5288 = vmatpush3.bf16.msra.mxu1 %v9630_v55 }
 0x802   :  { %3149 = vmatprep.subr.bf16.mxu0 %v9631_v14  ;;  %5289 = vmatprep.subr.bf16.mxu1 %v9419_v57 }
 0x805   :  { %3150 = vmatpush1.bf16.msra.mxu0 %v9632_v33  ;;  %5290 = vmatpush3.bf16.msra.mxu1 %v9633_v34 }
 0x806   :  { %3262 = vmatprep.subr.bf16.mxu0 %v9634_v36  ;;  %5295 = vmatprep.subr.bf16.mxu1 %v9419_v57 }
 0x808   :  { %3168 = vmatmul.mubr.bf16.vlgmr.msra.gmra.mrb[40].mxu0 %v8312_v13  ;;  %5292 = vmatmul.mubr.bf16.vlgmr.msra.gmra.mrb[84].mxu1 %v8312_v13  ;;  %v9647_v13 = vld [vmem:[#allocation62_spill] sm:$0xff] }
 0x809   :  { %3263 = vmatpush1.bf16.msra.mxu0 %v9635_v38  ;;  %5296 = vmatpush3.bf16.msra.mxu1 %v9636_v58 }
 0x80a   :  { %3264 = vmatprep.subr.bf16.mxu0 %v9637_v42  ;;  %5297 = vmatprep.subr.bf16.mxu1 %v9419_v57 }
 0x80b   :  { %3294 = vmatprep.mubr.bf16.mxu0 %v9420_v50  ;;  %5311 = vmatprep.mubr.msk.bf16.mxu1 %vm6692_vm0, %v9419_v57 }
 0x80d   :  { %3265 = vmatpush1.bf16.msra.mxu0 %v9638_v6  ;;  %5298 = vmatpush3.bf16.msra.mxu1 %v9639_v30 }
 0x80e   :  { %3266 = vmatprep.subr.bf16.mxu0 %v9640_v7  ;;  %5299 = vmatprep.subr.bf16.mxu1 %v9419_v57 }
 0x811   :  { %3267 = vmatpush1.bf16.msra.mxu0 %v9641_v45  ;;  %5300 = vmatpush3.bf16.msra.mxu1 %v9642_v37  ;;  %v9659_v37 = vld [vmem:[#allocation31_spill] sm:$0xff] }
 0x812   :  { %3268 = vmatprep.subr.bf16.mxu0 %v9643_v9  ;;  %5301 = vmatprep.subr.bf16.mxu1 %v9419_v57 }
 0x815   :  { %3269 = vmatpush1.bf16.msra.mxu0 %v9644_v32  ;;  %5302 = vmatpush3.bf16.msra.mxu1 %v9645_v39 }
 0x816   :  { %3270 = vmatprep.subr.bf16.mxu0 %v9646_v10  ;;  %5303 = vmatprep.subr.bf16.mxu1 %v9419_v57 }
 0x819   :  { %3271 = vmatpush1.bf16.msra.mxu0 %v9647_v13  ;;  %5304 = vmatpush3.bf16.msra.mxu1 %v9648_v11 }
 0x81a   :  { %3272 = vmatprep.subr.bf16.mxu0 %v9649_v19  ;;  %5305 = vmatprep.subr.bf16.mxu1 %v9419_v57 }
 0x81d   :  { %3273 = vmatpush1.bf16.msra.mxu0 %v9650_v15  ;;  %5306 = vmatpush3.bf16.msra.mxu1 %v9651_v16 }
 0x81e   :  { %3274 = vmatprep.subr.bf16.mxu0 %v9652_v23  ;;  %5307 = vmatprep.subr.bf16.mxu1 %v9419_v57  ;;  %v8510_v23 = vld [vmem:[#allocation18] ss:$0 sm:$0xff] }
 0x821   :  { %3275 = vmatpush1.bf16.msra.mxu0 %v9653_v49  ;;  %5308 = vmatpush3.bf16.msra.mxu1 %v9654_v2 }
 0x822   :  { %3276 = vmatprep.subr.bf16.mxu0 %v9655_v24  ;;  %5309 = vmatprep.subr.bf16.mxu1 %v9419_v57 }
 0x825   :  { %3277 = vmatpush1.bf16.msra.mxu0 %v9656_v21  ;;  %5310 = vmatpush3.bf16.msra.mxu1 %v9657_v51 }
 0x826   :  { %3347 = vmatprep.subr.bf16.mxu0 %v9658_v52  ;;  %5315 = vmatprep.subr.bf16.mxu1 %v9419_v57 }
 0x87b   :  { %v2905_v53 = vpop.f32.mrb[72].mxu1 }
 0x87c   :  { %v5233_v20 = vpop.f32.mrb[73].mxu1  ;;  %v2906_v21 = vadd.f32 %v2905_v53, %v7398_v27 }
 0x87d   :  { %v2908_v25 = vpop.f32.mrb[74].mxu1 }
 0x87e   :  { %v5234_v48 = vpop.f32.mrb[75].mxu1 }
 0x89b   :  { %v2947_v55 = vpop.f32.mrb[36].mxu0  ;;  %v2990_v14 = vpop.f32.mrb[76].mxu1 }
 0x89c   :  { %v5531_v33 = vadd.f32 %v2947_v55, %v7384_v46  ;;  %v2949_v34 = vpop.f32.mrb[37].mxu0  ;;  %v5253_v36 = vpop.f32.mrb[77].mxu1  ;;  %v3025_v49 = vadd.f32 %v8510_v23, %v2990_v14  ;;  %v2909_v55 = vadd.f32 %v2908_v25, %v7398_v27 }
 0x89d   :  { %v2951_v38 = vpop.f32.mrb[38].mxu0  ;;  %v2993_v58 = vpop.f32.mrb[78].mxu1  ;;  %v5532_v9 = vadd.f32 %v2949_v34, %v9659_v37 }
 0x89e   :  { %v4536_v42 = vmul.f32 -1.442695, %v5531_v33  ;;  %v5533_v6 = vadd.f32 %v2951_v38, %v7384_v46  ;;  %v2953_v30 = vpop.f32.mrb[39].mxu0  ;;  %v5254_v7 = vpop.f32.mrb[79].mxu1  ;;  %v3026_v52 = vadd.f32 %v8510_v23, %v2993_v58 }
 0x89f   :  { %v5534_v32 = vadd.f32 %v2953_v30, %v9659_v37  ;;  %v4538_v39 = vmul.f32 -1.442695, %v5532_v9 }
 0x8a0   :  { %5960 = vpow2.f32 %v4536_v42  ;;  %v4537_v45 = vmul.f32 -1.442695, %v5533_v6 }
 0x8a1   :  { %v4539_v13 = vmul.f32 -1.442695, %v5534_v32 }
 0x8a2   :  { %5962 = vpow2.f32 %v4537_v45 }
 0x8a3   :  { %5964 = vpow2.f32 %v4538_v39 }
 0x8aa   :  { %v5961_v10 = vpop.eup %5960 }
 0x8ab   :  { %v3005_v11 = vadd.f32 1.0, %v5961_v10 }
 0x8ac   :  { %v5963_v19 = vpop.eup %5962 }
 0x8ad   :  { %5966 = vrcp.f32 %v3005_v11  ;;  %v3006_v15 = vadd.f32 1.0, %v5963_v19  ;;  %v5965_v16 = vpop.eup %5964 }
 0x8ae   :  { %5968 = vpow2.f32 %v4539_v13  ;;  %v3019_v48 = vadd.f32 1.0, %v5965_v16 }
 0x8af   :  { %5970 = vrcp.f32 %v3006_v15 }
 0x8b7   :  { %v5967_v2 = vpop.eup %5966 }
 0x8b8   :  { %v5969_v24 = vpop.eup %5968  ;;  %v3027_v51 = vmul.f32 %v5967_v2, %v3025_v49 }
 0x8b9   :  { %v5971_v20 = vpop.eup %5970  ;;  %v3020_v42 = vadd.f32 1.0, %v5969_v24 }
 0x8ba   :  { %v3029_v33 = vadd.f32 %v3027_v51, %v2906_v21  ;;  %v3028_v34 = vmul.f32 %v5971_v20, %v3026_v52 }
 0x8bb   :  { %v3128_v36 = vpop.f32.mrb[80].mxu1 }
 0x8bc   :  { %5972 = vtanh.f32 %v3029_v33  ;;  %v3030_v38 = vadd.f32 %v3028_v34, %v2909_v55  ;;  %v5273_v6 = vpop.f32.mrb[81].mxu1 }
 0x8bd   :  { %5974 = vrcp.f32 %v3019_v48  ;;  %v3131_v14 = vpop.f32.mrb[82].mxu1 }
 0x8be   :  { %5976 = vtanh.f32 %v3030_v38  ;;  %v5274_v30 = vpop.f32.mrb[83].mxu1 }
 0x8bf   :  { %5978 = vrcp.f32 %v3020_v42 }
 0x8c6   :  { %v5973_v53 = vpop.eup %5972 }
 0x8c7   :  { %v5975_v7 = vpop.eup %5974  ;;  %v3033_v58 = vsub.f32 %v8288_v43, %v5973_v53 }
 0x8c8   :  { %v5977_v45 = vpop.eup %5976 }
 0x8c9   :  { %v3034_v9 = vsub.f32 %v8290_v41, %v5977_v45  ;;  %v3035_v25 = vmul.f32 %v5975_v7, %v3033_v58  ;;  %v5979_v32 = vpop.eup %5978 }
 0x8cb   :  { %v3036_v39 = vmul.f32 %v5979_v32, %v3034_v9  ;;  %v8518_v10 = vadd.f32 %v5973_v53, %v3035_v25 }
 0x8cd   :  { %v8520_v13 = vadd.f32 %v5977_v45, %v3036_v39  ;;  %3040 = vst [vmem:[#allocation20 + $0x40] sm:$0xff] %v8518_v10  ;;  %v3129_v45 = vadd.f32 %v3128_v36, %v7170_v0 }
 0x8cf   :  { %3041 = vst [vmem:[#allocation20 + $0x48] sm:$0xff] %v8520_v13 }
 0x8db   :  { %v3169_v11 = vpop.f32.mrb[40].mxu0  ;;  %v3212_v19 = vpop.f32.mrb[84].mxu1 }
 0x8dc   :  { %v5535_v15 = vadd.f32 %v3169_v11, %v9467_v17  ;;  %v3171_v16 = vpop.f32.mrb[41].mxu0  ;;  %v5293_v43 = vpop.f32.mrb[85].mxu1  ;;  %v3247_v53 = vadd.f32 %v8298_v5, %v3212_v19  ;;  %v3132_v11 = vadd.f32 %v3131_v14, %v7170_v0 }
 0x8dd   :  { %v3173_v49 = vpop.f32.mrb[42].mxu0  ;;  %v3215_v2 = vpop.f32.mrb[86].mxu1  ;;  %v5536_v20 = vadd.f32 %v3171_v16, %v9468_v29 }
 0x8de   :  { %v4541_v41 = vmul.f32 -1.442695, %v5535_v15  ;;  %v5537_v24 = vadd.f32 %v3173_v49, %v9467_v17  ;;  %v3175_v21 = vpop.f32.mrb[43].mxu0  ;;  %v5294_v51 = vpop.f32.mrb[87].mxu1  ;;  %v3248_v25 = vadd.f32 %v8298_v5, %v3215_v2 }
 0x8df   :  { %v5538_v48 = vadd.f32 %v3175_v21, %v9468_v29  ;;  %v4543_v55 = vmul.f32 -1.442695, %v5536_v20 }
 0x8e0   :  { %5980 = vpow2.f32 %v4541_v41  ;;  %v4542_v52 = vmul.f32 -1.442695, %v5537_v24 }
 0x8e1   :  { %v4544_v34 = vmul.f32 -1.442695, %v5538_v48  ;;  %v8636_v48 = vld [vmem:[#allocation8 + $0x78] ss:$12 sps:$4 sm:$0xff]  }
 0x8e2   :  { %5982 = vpow2.f32 %v4542_v52 }
 0x8e3   :  { %5984 = vpow2.f32 %v4543_v55  ;;  %v8639_v55 = vld [vmem:[#allocation8 + $0x80] ss:$12 sps:$4 sm:$0xff]  }
 0x8ea   :  { %v5981_v33 = vpop.eup %5980 }
 0x8eb   :  { %v3227_v38 = vadd.f32 1.0, %v5981_v33  ;;  %v8642_v33 = vld [vmem:[#allocation8 + $0x94] ss:$12 sps:$4 sm:$0xff]  }
 0x8ec   :  { %v5983_v42 = vpop.eup %5982 }
 0x8ed   :  { %5986 = vrcp.f32 %v3227_v38  ;;  %v3228_v6 = vadd.f32 1.0, %v5983_v42  ;;  %v5985_v30 = vpop.eup %5984  ;;  %v8649_v38 = vld [vmem:[#allocation8 + $0x98] ss:$12 sps:$4 sm:$0xff]  }
 0x8ee   :  { %5988 = vpow2.f32 %v4544_v34  ;;  %v3241_v39 = vadd.f32 1.0, %v5985_v30  ;;  %v8646_v34 = vld [vmem:[#allocation8 + $0x90] ss:$12 sps:$4 sm:$0xff]   ;;  %v8652_v42 = vld [vmem:[#allocation8 + $0xac] ss:$12 sps:$4 sm:$0xff]  }
 0x8ef   :  { %5990 = vrcp.f32 %v3228_v6  ;;  %v5778_v6 = vld [vmem:[#allocation3 + $0x30] sm:$0xff]  }
 0x8f0   :  { %v8656_v30 = vld [vmem:[#allocation8 + $0xa8] ss:$12 sps:$4 sm:$0xff]  }
 0x8f7   :  { %v5987_v7 = vpop.eup %5986 }
 0x8f8   :  { %v5989_v58 = vpop.eup %5988  ;;  %v3249_v9 = vmul.f32 %v5987_v7, %v3247_v53  ;;  %v8659_v53 = vld [vmem:[#allocation8 + $0xb0] ss:$12 sps:$4 sm:$0xff]  }
 0x8f9   :  { %v5991_v32 = vpop.eup %5990  ;;  %v3242_v49 = vadd.f32 1.0, %v5989_v58  ;;  %v8662_v7 = vld [vmem:[#allocation9 + $0x4] ss:$12 sps:$4 sm:$0xff]   ;;  %v8666_v58 = vld [vmem:[#allocation9] ss:$12 sps:$4 sm:$0xff]  }
 0x8fa   :  { %v3251_v15 = vadd.f32 %v3249_v9, %v3129_v45  ;;  %v3250_v16 = vmul.f32 %v5991_v32, %v3248_v25  ;;  %v8669_v45 = vld [vmem:[#allocation9 + $0x8] ss:$12 sps:$4 sm:$0xff]   ;;  %v8679_v25 = vld [vmem:[#allocation9 + $0x18] ss:$12 sps:$4 sm:$0xff]   ;;  %v8682_v32 = vld [vmem:[#allocation9 + $0x20] ss:$12 sps:$4 sm:$0xff]  }
 0x8fb   :  { %v8672_v9 = vld [vmem:[#allocation9 + $0x1c] ss:$12 sps:$4 sm:$0xff]  }
 0x8fc   :  { %5992 = vtanh.f32 %v3251_v15  ;;  %v3252_v43 = vadd.f32 %v3250_v16, %v3132_v11  ;;  %v8689_v11 = vld [vmem:[#allocation9 + $0x30] ss:$12 sps:$4 sm:$0xff]   ;;  %v8692_v15 = vld [vmem:[#allocation9 + $0x38] ss:$12 sps:$4 sm:$0xff]  }
 0x8fd   :  { %5994 = vrcp.f32 %v3241_v39  ;;  %v8685_v39 = vld [vmem:[#allocation9 + $0x34] ss:$12 sps:$4 sm:$0xff]   ;;  %9664 = vst [vmem:[#allocation36_spill] sm:$0xff] %v8689_v11  ;;  %9665 = vst [vmem:[#allocation32_spill] sm:$0xff] %v8692_v15  ;;  %v8695_v16 = vld [vmem:[#allocation9 + $0x4c] ss:$12 sps:$4 sm:$0xff]  }
 0x8fe   :  { %5996 = vtanh.f32 %v3252_v43  ;;  %9666 = vst [vmem:[#allocation33_spill] sm:$0xff] %v8695_v16  ;;  %v8699_v43 = vld [vmem:[#allocation9 + $0x48] ss:$12 sps:$4 sm:$0xff]  }
 0x8ff   :  { %5998 = vrcp.f32 %v3242_v49  ;;  %9667 = vst [vmem:[#allocation37_spill] sm:$0xff] %v8699_v43  ;;  %v8702_v49 = vld [vmem:[#allocation9 + $0x50] ss:$12 sps:$4 sm:$0xff]  }
 0x900   :  { %9668 = vst [vmem:[#allocation34_spill] sm:$0xff] %v8702_v49 }
 0x906   :  { %v5993_v19 = vpop.eup %5992 }
 0x907   :  { %v5995_v41 = vpop.eup %5994  ;;  %v3255_v24 = vsub.f32 %v8306_v54, %v5993_v19  ;;  %v9660_v54 = vld [vmem:[#allocation74_spill] sm:$0xff] }
 0x908   :  { %v5997_v36 = vpop.eup %5996 }
 0x909   :  { %v3256_v21 = vsub.f32 %v8308_v62, %v5997_v36  ;;  %v3257_v5 = vmul.f32 %v5995_v41, %v3255_v24  ;;  %v5999_v2 = vpop.eup %5998  ;;  %v9661_v62 = vld [vmem:[#allocation75_spill] sm:$0xff]  ;;  %v8712_v24 = vld [vmem:[#allocation9 + $0x68] ss:$12 sps:$4 sm:$0xff]  }
 0x90a   :  { %v8709_v41 = vld [vmem:[#allocation9 + $0x60] ss:$12 sps:$4 sm:$0xff]   ;;  %9671 = vst [vmem:[#allocation39_spill] sm:$0xff] %v8712_v24 }
 0x90b   :  { %v3258_v51 = vmul.f32 %v5999_v2, %v3256_v21  ;;  %v8534_v52 = vadd.f32 %v5993_v19, %v3257_v5  ;;  %v8705_v19 = vld [vmem:[#allocation9 + $0x64] ss:$12 sps:$4 sm:$0xff]   ;;  %9670 = vst [vmem:[#allocation38_spill] sm:$0xff] %v8709_v41  ;;  %v8722_v5 = vld [vmem:[#allocation9 + $0x80] ss:$12 sps:$4 sm:$0xff]  }
 0x90c   :  { %9669 = vst [vmem:[#allocation35_spill] sm:$0xff] %v8705_v19  ;;  %v8719_v21 = vld [vmem:[#allocation9 + $0x78] ss:$12 sps:$4 sm:$0xff]   ;;  %9674 = vst [vmem:[#allocation42_spill] sm:$0xff] %v8722_v5  ;;  %v8725_v2 = vld [vmem:[#allocation9 + $0x94] ss:$12 sps:$4 sm:$0xff]  }
 0x90d   :  { %v8536_v14 = vadd.f32 %v5997_v36, %v3258_v51  ;;  %v8715_v36 = vld [vmem:[#allocation9 + $0x7c] ss:$12 sps:$4 sm:$0xff]   ;;  %9673 = vst [vmem:[#allocation41_spill] sm:$0xff] %v8719_v21  ;;  %9675 = vst [vmem:[#allocation43_spill] sm:$0xff] %v8725_v2 }
 0x90e   :  { %9672 = vst [vmem:[#allocation40_spill] sm:$0xff] %v8715_v36  ;;  %v8729_v51 = vld [vmem:[#allocation9 + $0x90] ss:$12 sps:$4 sm:$0xff]  }
 0x90f   :  { %v8540_v20 = vpack.c.bf16 %v8536_v14, %v8534_v52  ;;  %9676 = vst [vmem:[#allocation44_spill] sm:$0xff] %v8729_v51 }
 0x911   :  { %3295 = vmatmul.mubr.bf16.vlgmr.msra.gmra.mrb[44].mxu0 %v8540_v20  ;;  %5312 = vmatmul.mubr.bf16.vlgmr.msra.gmra.mrb[88].mxu1 %v8540_v20 }
 0x912   :  { %3348 = vmatpush1.bf16.msra.mxu0 %v8316_v22  ;;  %5316 = vmatpush3.bf16.msra.mxu1 %v8319_v28  ;;  %v9662_v22 = vld [vmem:[#allocation76_spill] sm:$0xff]  ;;  %v9663_v28 = vld [vmem:[#allocation77_spill] sm:$0xff] }
 0x913   :  { %3349 = vmatprep.subr.bf16.mxu0 %v8322_v35  ;;  %5317 = vmatprep.subr.bf16.mxu1 %v9419_v57  ;;  %v3346_v35 = vpack.c.bf16 %v8520_v13, %v8518_v10 }
 0x914   :  { %3379 = vmatprep.mubr.bf16.mxu0 %v9420_v50  ;;  %5331 = vmatprep.mubr.msk.bf16.mxu1 %vm6692_vm0, %v9419_v57 }
 0x916   :  { %3350 = vmatpush1.bf16.msra.mxu0 %v8329_v63  ;;  %5318 = vmatpush3.bf16.msra.mxu1 %v8332_v12  ;;  %v8579_v63 = vld [vmem:[#allocation8 + $0x4] ss:$12 sps:$4 sm:$0xff]   ;;  %v8583_v12 = vld [vmem:[#allocation8] ss:$12 sps:$4 sm:$0xff]  }
 0x917   :  { %3351 = vmatprep.subr.bf16.mxu0 %v8335_v61  ;;  %5319 = vmatprep.subr.bf16.mxu1 %v9419_v57  ;;  %v8586_v61 = vld [vmem:[#allocation8 + $0x8] ss:$12 sps:$4 sm:$0xff]  }
 0x91a   :  { %3352 = vmatpush1.bf16.msra.mxu0 %v8339_v31  ;;  %5320 = vmatpush3.bf16.msra.mxu1 %v8342_v47  ;;  %v8589_v31 = vld [vmem:[#allocation8 + $0x1c] ss:$12 sps:$4 sm:$0xff]   ;;  %v8596_v47 = vld [vmem:[#allocation8 + $0x18] ss:$12 sps:$4 sm:$0xff]  }
 0x91b   :  { %3353 = vmatprep.subr.bf16.mxu0 %v8345_v56  ;;  %5321 = vmatprep.subr.bf16.mxu1 %v9419_v57  ;;  %v8599_v56 = vld [vmem:[#allocation8 + $0x20] ss:$12 sps:$4 sm:$0xff]  }
 0x91e   :  { %3354 = vmatpush1.bf16.msra.mxu0 %v8349_v1  ;;  %5322 = vmatpush3.bf16.msra.mxu1 %v8352_v59  ;;  %v8602_v1 = vld [vmem:[#allocation8 + $0x34] ss:$12 sps:$4 sm:$0xff]   ;;  %v8606_v59 = vld [vmem:[#allocation8 + $0x30] ss:$12 sps:$4 sm:$0xff]  }
 0x91f   :  { %3355 = vmatprep.subr.bf16.mxu0 %v8355_v40  ;;  %5323 = vmatprep.subr.bf16.mxu1 %v9419_v57  ;;  %v8609_v40 = vld [vmem:[#allocation8 + $0x38] ss:$12 sps:$4 sm:$0xff]  }
 0x922   :  { %3356 = vmatpush1.bf16.msra.mxu0 %v8359_v4  ;;  %5324 = vmatpush3.bf16.msra.mxu1 %v8362_v18  ;;  %v8612_v4 = vld [vmem:[#allocation8 + $0x4c] ss:$12 sps:$4 sm:$0xff]   ;;  %v8616_v18 = vld [vmem:[#allocation8 + $0x48] ss:$12 sps:$4 sm:$0xff]  }
 0x923   :  { %3357 = vmatprep.subr.bf16.mxu0 %v9660_v54  ;;  %5325 = vmatprep.subr.bf16.mxu1 %v9419_v57  ;;  %v8732_v54 = vld [vmem:[#allocation9 + $0x98] ss:$12 sps:$4 sm:$0xff]  }
 0x924   :  { %9677 = vst [vmem:[#allocation45_spill] sm:$0xff] %v8732_v54 }
 0x926   :  { %3358 = vmatpush1.bf16.msra.mxu0 %v8369_v26  ;;  %5326 = vmatpush3.bf16.msra.mxu1 %v9661_v62  ;;  %v8622_v26 = vld [vmem:[#allocation8 + $0x64] ss:$12 sps:$4 sm:$0xff]   ;;  %v8735_v62 = vld [vmem:[#allocation9 + $0xac] ss:$12 sps:$4 sm:$0xff]  }
 0x927   :  { %3359 = vmatprep.subr.bf16.mxu0 %v9662_v22  ;;  %5327 = vmatprep.subr.bf16.mxu1 %v9419_v57  ;;  %9678 = vst [vmem:[#allocation46_spill] sm:$0xff] %v8735_v62  ;;  %v8739_v22 = vld [vmem:[#allocation9 + $0xa8] ss:$12 sps:$4 sm:$0xff]  }
 0x928   :  { %9679 = vst [vmem:[#allocation47_spill] sm:$0xff] %v8739_v22 }
 0x92a   :  { %3360 = vmatpush1.bf16.msra.mxu0 %v9663_v28  ;;  %5328 = vmatpush3.bf16.msra.mxu1 %v8382_v8  ;;  %v8632_v8 = vld [vmem:[#allocation8 + $0x7c] ss:$12 sps:$4 sm:$0xff]  }
 0x92b   :  { %3361 = vmatprep.subr.bf16.mxu0 %v8385_v60  ;;  %5329 = vmatprep.subr.bf16.mxu1 %v9419_v57  ;;  %v8619_v60 = vld [vmem:[#allocation8 + $0x50] ss:$12 sps:$4 sm:$0xff]  }
 0x92c   :  { %v8742_v28 = vld [vmem:[#allocation9 + $0xb0] ss:$12 sps:$4 sm:$0xff]  }
 0x92d   :  { %9680 = vst [vmem:[#allocation48_spill] sm:$0xff] %v8742_v28 }
 0x92e   :  { %3362 = vmatpush1.bf16.msra.mxu0 %v8389_v44  ;;  %5330 = vmatpush3.bf16.msra.mxu1 %v8392_v3  ;;  %v8626_v44 = vld [vmem:[#allocation8 + $0x60] ss:$12 sps:$4 sm:$0xff]   ;;  %v8629_v3 = vld [vmem:[#allocation8 + $0x68] ss:$12 sps:$4 sm:$0xff]  }
 0x92f   :  { %3485 = vmatprep.subr.bf16.mxu0 %v8579_v63  ;;  %5335 = vmatprep.subr.bf16.mxu1 %v9419_v57 }
 0x931   :  { %3380 = vmatmul.mubr.bf16.vlgmr.msra.gmra.mrb[44].mxu0 %v3346_v35  ;;  %5332 = vmatmul.mubr.bf16.vlgmr.msra.gmra.mrb[92].mxu1 %v3346_v35  ;;  %v8745_v35 = vld [vmem:[#allocation14 + $0x4] ss:$12 sps:$4 sm:$0xff]  }
 0x932   :  { %3486 = vmatpush1.bf16.msra.mxu0 %v8583_v12  ;;  %5336 = vmatpush3.bf16.msra.mxu1 %v8586_v61  ;;  %9681 = vst [vmem:[#allocation49_spill] sm:$0xff] %v8745_v35 }
 0x933   :  { %3487 = vmatprep.subr.bf16.mxu0 %v8589_v31  ;;  %5337 = vmatprep.subr.bf16.mxu1 %v9419_v57 }
 0x934   :  { %3517 = vmatprep.mubr.bf16.mxu0 %v9420_v50  ;;  %5351 = vmatprep.mubr.msk.bf16.mxu1 %vm6692_vm0, %v9419_v57 }
 0x936   :  { %3488 = vmatpush1.bf16.msra.mxu0 %v8596_v47  ;;  %5338 = vmatpush3.bf16.msra.mxu1 %v8599_v56 }
 0x937   :  { %3489 = vmatprep.subr.bf16.mxu0 %v8602_v1  ;;  %5339 = vmatprep.subr.bf16.mxu1 %v9419_v57 }
 0x93a   :  { %3490 = vmatpush1.bf16.msra.mxu0 %v8606_v59  ;;  %5340 = vmatpush3.bf16.msra.mxu1 %v8609_v40 }
 0x93b   :  { %3491 = vmatprep.subr.bf16.mxu0 %v8612_v4  ;;  %5341 = vmatprep.subr.bf16.mxu1 %v9419_v57 }
 0x93e   :  { %3492 = vmatpush1.bf16.msra.mxu0 %v8616_v18  ;;  %5342 = vmatpush3.bf16.msra.mxu1 %v8619_v60 }
 0x93f   :  { %3493 = vmatprep.subr.bf16.mxu0 %v8622_v26  ;;  %5343 = vmatprep.subr.bf16.mxu1 %v9419_v57 }
 0x942   :  { %3494 = vmatpush1.bf16.msra.mxu0 %v8626_v44  ;;  %5344 = vmatpush3.bf16.msra.mxu1 %v8629_v3 }
 0x943   :  { %3495 = vmatprep.subr.bf16.mxu0 %v8632_v8  ;;  %5345 = vmatprep.subr.bf16.mxu1 %v9419_v57 }
 0x946   :  { %3496 = vmatpush1.bf16.msra.mxu0 %v8636_v48  ;;  %5346 = vmatpush3.bf16.msra.mxu1 %v8639_v55 }
 0x947   :  { %3497 = vmatprep.subr.bf16.mxu0 %v8642_v33  ;;  %5347 = vmatprep.subr.bf16.mxu1 %v9419_v57 }
 0x94a   :  { %3498 = vmatpush1.bf16.msra.mxu0 %v8646_v34  ;;  %5348 = vmatpush3.bf16.msra.mxu1 %v8649_v38 }
 0x94b   :  { %3499 = vmatprep.subr.bf16.mxu0 %v8652_v42  ;;  %5349 = vmatprep.subr.bf16.mxu1 %v9419_v57 }
 0x94e   :  { %3500 = vmatpush1.bf16.msra.mxu0 %v8656_v30  ;;  %5350 = vmatpush3.bf16.msra.mxu1 %v8659_v53 }
 0x94f   :  { %3569 = vmatprep.subr.bf16.mxu0 %v8662_v7  ;;  %5355 = vmatprep.subr.bf16.mxu1 %v9419_v57 }
 0x951   :  { %3518 = vmatmul.mubr.bf16.vlgmr.msra.gmra.mrb[48].mxu0 %v5778_v6  ;;  %5352 = vmatmul.mubr.bf16.vlgmr.msra.gmra.mrb[96].mxu1 %v5778_v6  ;;  %v8751_v6 = vld [vmem:[#allocation14] ss:$12 sps:$4 sm:$0xff]  }
 0x952   :  { %3570 = vmatpush1.bf16.msra.mxu0 %v8666_v58  ;;  %5356 = vmatpush3.bf16.msra.mxu1 %v8669_v45  ;;  %9682 = vst [vmem:[#allocation50_spill] sm:$0xff] %v8751_v6 }
 0x953   :  { %3571 = vmatprep.subr.bf16.mxu0 %v8672_v9  ;;  %5357 = vmatprep.subr.bf16.mxu1 %v9419_v57 }
 0x954   :  { %3601 = vmatprep.mubr.bf16.mxu0 %v9420_v50  ;;  %5371 = vmatprep.mubr.msk.bf16.mxu1 %vm6692_vm0, %v9419_v57 }
 0x956   :  { %3572 = vmatpush1.bf16.msra.mxu0 %v8679_v25  ;;  %5358 = vmatpush3.bf16.msra.mxu1 %v8682_v32 }
 0x957   :  { %3573 = vmatprep.subr.bf16.mxu0 %v8685_v39  ;;  %5359 = vmatprep.subr.bf16.mxu1 %v9419_v57 }
 0x95a   :  { %3574 = vmatpush1.bf16.msra.mxu0 %v8689_v11  ;;  %5360 = vmatpush3.bf16.msra.mxu1 %v8692_v15 }
 0x95b   :  { %3575 = vmatprep.subr.bf16.mxu0 %v8695_v16  ;;  %5361 = vmatprep.subr.bf16.mxu1 %v9419_v57 }
 0x95e   :  { %3576 = vmatpush1.bf16.msra.mxu0 %v8699_v43  ;;  %5362 = vmatpush3.bf16.msra.mxu1 %v8702_v49 }
 0x95f   :  { %3577 = vmatprep.subr.bf16.mxu0 %v8705_v19  ;;  %5363 = vmatprep.subr.bf16.mxu1 %v9419_v57 }
 0x962   :  { %3578 = vmatpush1.bf16.msra.mxu0 %v8709_v41  ;;  %5364 = vmatpush3.bf16.msra.mxu1 %v8712_v24 }
 0x963   :  { %3579 = vmatprep.subr.bf16.mxu0 %v8715_v36  ;;  %5365 = vmatprep.subr.bf16.mxu1 %v9419_v57 }
 0x966   :  { %3580 = vmatpush1.bf16.msra.mxu0 %v8719_v21  ;;  %5366 = vmatpush3.bf16.msra.mxu1 %v8722_v5 }
 0x967   :  { %3581 = vmatprep.subr.bf16.mxu0 %v8725_v2  ;;  %5367 = vmatprep.subr.bf16.mxu1 %v9419_v57 }
 0x96a   :  { %3582 = vmatpush1.bf16.msra.mxu0 %v8729_v51  ;;  %5368 = vmatpush3.bf16.msra.mxu1 %v8732_v54 }
 0x96b   :  { %3583 = vmatprep.subr.bf16.mxu0 %v8735_v62  ;;  %5369 = vmatprep.subr.bf16.mxu1 %v9419_v57  ;;  %v8754_v62 = vld [vmem:[#allocation14 + $0x8] ss:$12 sps:$4 sm:$0xff]  }
 0x96c   :  { %9683 = vst [vmem:[#allocation51_spill] sm:$0xff] %v8754_v62 }
 0x96e   :  { %3584 = vmatpush1.bf16.msra.mxu0 %v8739_v22  ;;  %5370 = vmatpush3.bf16.msra.mxu1 %v8742_v28  ;;  %v8757_v22 = vld [vmem:[#allocation14 + $0x1c] ss:$12 sps:$4 sm:$0xff]   ;;  %v8780_v28 = vld [vmem:[#allocation14 + $0x4c] ss:$12 sps:$4 sm:$0xff]  }
 0x96f   :  { %3696 = vmatprep.subr.bf16.mxu0 %v8745_v35  ;;  %5375 = vmatprep.subr.bf16.mxu1 %v9419_v57  ;;  %9684 = vst [vmem:[#allocation52_spill] sm:$0xff] %v8757_v22  ;;  %v8777_v35 = vld [vmem:[#allocation14 + $0x38] ss:$12 sps:$4 sm:$0xff]   ;;  %9690 = vst [vmem:[#allocation58_spill] sm:$0xff] %v8780_v28 }
 0x970   :  { %9689 = vst [vmem:[#allocation57_spill] sm:$0xff] %v8777_v35 }
 0x971   :  { %3602 = vmatmul.mubr.bf16.vlgmr.msra.gmra.mrb[48].mxu0 %v8540_v20  ;;  %5372 = vmatmul.mubr.bf16.vlgmr.msra.gmra.mrb[100].mxu1 %v8540_v20  ;;  %v8764_v20 = vld [vmem:[#allocation14 + $0x18] ss:$12 sps:$4 sm:$0xff]  }
 0x972   :  { %3697 = vmatpush1.bf16.msra.mxu0 %v8751_v6  ;;  %5376 = vmatpush3.bf16.msra.mxu1 %v8754_v62  ;;  %9685 = vst [vmem:[#allocation53_spill] sm:$0xff] %v8764_v20  ;;  %v8767_v6 = vld [vmem:[#allocation14 + $0x20] ss:$12 sps:$4 sm:$0xff]  }
 0x973   :  { %3698 = vmatprep.subr.bf16.mxu0 %v8757_v22  ;;  %5377 = vmatprep.subr.bf16.mxu1 %v9419_v57  ;;  %9686 = vst [vmem:[#allocation54_spill] sm:$0xff] %v8767_v6  ;;  %v8770_v62 = vld [vmem:[#allocation14 + $0x34] ss:$12 sps:$4 sm:$0xff]   ;;  %v8774_v22 = vld [vmem:[#allocation14 + $0x30] ss:$12 sps:$4 sm:$0xff]  }
 0x974   :  { %3728 = vmatprep.mubr.bf16.mxu0 %v9420_v50  ;;  %5391 = vmatprep.mubr.msk.bf16.mxu1 %vm6692_vm0, %v9419_v57  ;;  %9687 = vst [vmem:[#allocation55_spill] sm:$0xff] %v8770_v62  ;;  %9688 = vst [vmem:[#allocation56_spill] sm:$0xff] %v8774_v22 }
 0x976   :  { %3699 = vmatpush1.bf16.msra.mxu0 %v8764_v20  ;;  %5378 = vmatpush3.bf16.msra.mxu1 %v8767_v6  ;;  %v8784_v6 = vld [vmem:[#allocation14 + $0x48] ss:$12 sps:$4 sm:$0xff]   ;;  %v8790_v20 = vld [vmem:[#allocation14 + $0x64] ss:$12 sps:$4 sm:$0xff]  }
 0x977   :  { %3700 = vmatprep.subr.bf16.mxu0 %v8770_v62  ;;  %5379 = vmatprep.subr.bf16.mxu1 %v9419_v57  ;;  %9691 = vst [vmem:[#allocation59_spill] sm:$0xff] %v8784_v6  ;;  %v8787_v62 = vld [vmem:[#allocation14 + $0x50] ss:$12 sps:$4 sm:$0xff]   ;;  %9693 = vst [vmem:[#allocation61_spill] sm:$0xff] %v8790_v20 }
 0x978   :  { %9692 = vst [vmem:[#allocation60_spill] sm:$0xff] %v8787_v62 }
 0x97a   :  { %3701 = vmatpush1.bf16.msra.mxu0 %v8774_v22  ;;  %5380 = vmatpush3.bf16.msra.mxu1 %v8777_v35  ;;  %v8794_v35 = vld [vmem:[#allocation14 + $0x60] ss:$12 sps:$4 sm:$0xff]   ;;  %v8800_v22 = vld [vmem:[#allocation14 + $0x7c] ss:$12 sps:$4 sm:$0xff]  }
 0x97b   :  { %3702 = vmatprep.subr.bf16.mxu0 %v8780_v28  ;;  %5381 = vmatprep.subr.bf16.mxu1 %v9419_v57  ;;  %9694 = vst [vmem:[#allocation62_spill] sm:$0xff] %v8794_v35  ;;  %v8797_v28 = vld [vmem:[#allocation14 + $0x68] ss:$12 sps:$4 sm:$0xff]   ;;  %9696 = vst [vmem:[#allocation64_spill] sm:$0xff] %v8800_v22 }
 0x97c   :  { %9695 = vst [vmem:[#allocation63_spill] sm:$0xff] %v8797_v28 }
 0x97e   :  { %3703 = vmatpush1.bf16.msra.mxu0 %v8784_v6  ;;  %5382 = vmatpush3.bf16.msra.mxu1 %v8787_v62  ;;  %v8804_v62 = vld [vmem:[#allocation14 + $0x78] ss:$12 sps:$4 sm:$0xff]   ;;  %v8810_v6 = vld [vmem:[#allocation14 + $0x94] ss:$12 sps:$4 sm:$0xff]  }
 0x97f   :  { %3704 = vmatprep.subr.bf16.mxu0 %v8790_v20  ;;  %5383 = vmatprep.subr.bf16.mxu1 %v9419_v57  ;;  %9697 = vst [vmem:[#allocation65_spill] sm:$0xff] %v8804_v62  ;;  %v8807_v20 = vld [vmem:[#allocation14 + $0x80] ss:$12 sps:$4 sm:$0xff]   ;;  %9699 = vst [vmem:[#allocation67_spill] sm:$0xff] %v8810_v6 }
 0x980   :  { %9698 = vst [vmem:[#allocation66_spill] sm:$0xff] %v8807_v20 }
 0x982   :  { %3705 = vmatpush1.bf16.msra.mxu0 %v8794_v35  ;;  %5384 = vmatpush3.bf16.msra.mxu1 %v8797_v28  ;;  %v8814_v28 = vld [vmem:[#allocation14 + $0x90] ss:$12 sps:$4 sm:$0xff]   ;;  %v8820_v35 = vld [vmem:[#allocation14 + $0xac] ss:$12 sps:$4 sm:$0xff]  }
 0x983   :  { %3706 = vmatprep.subr.bf16.mxu0 %v8800_v22  ;;  %5385 = vmatprep.subr.bf16.mxu1 %v9419_v57  ;;  %9700 = vst [vmem:[#allocation68_spill] sm:$0xff] %v8814_v28  ;;  %v8817_v22 = vld [vmem:[#allocation14 + $0x98] ss:$12 sps:$4 sm:$0xff]   ;;  %9702 = vst [vmem:[#allocation70_spill] sm:$0xff] %v8820_v35 }
 0x984   :  { %9701 = vst [vmem:[#allocation69_spill] sm:$0xff] %v8817_v22 }
 0x986   :  { %3707 = vmatpush1.bf16.msra.mxu0 %v8804_v62  ;;  %5386 = vmatpush3.bf16.msra.mxu1 %v8807_v20  ;;  %v8824_v20 = vld [vmem:[#allocation14 + $0xa8] ss:$12 sps:$4 sm:$0xff]   ;;  %v8830_v62 = vld [vmem:[#allocation15 + $0x4] ss:$12 sps:$4 sm:$0xff]  }
 0x987   :  { %3708 = vmatprep.subr.bf16.mxu0 %v8810_v6  ;;  %5387 = vmatprep.subr.bf16.mxu1 %v9419_v57  ;;  %9703 = vst [vmem:[#allocation71_spill] sm:$0xff] %v8824_v20  ;;  %v8827_v6 = vld [vmem:[#allocation14 + $0xb0] ss:$12 sps:$4 sm:$0xff]   ;;  %9705 = vst [vmem:[#allocation73_spill] sm:$0xff] %v8830_v62 }
 0x988   :  { %9704 = vst [vmem:[#allocation72_spill] sm:$0xff] %v8827_v6 }
 0x98a   :  { %3709 = vmatpush1.bf16.msra.mxu0 %v8814_v28  ;;  %5388 = vmatpush3.bf16.msra.mxu1 %v8817_v22 }
 0x98b   :  { %3710 = vmatprep.subr.bf16.mxu0 %v8820_v35  ;;  %5389 = vmatprep.subr.bf16.mxu1 %v9419_v57 }
 0x98e   :  { %3711 = vmatpush1.bf16.msra.mxu0 %v8824_v20  ;;  %5390 = vmatpush3.bf16.msra.mxu1 %v8827_v6 }
 0x98f   :  { %3781 = vmatprep.subr.bf16.mxu0 %v8830_v62  ;;  %5395 = vmatprep.subr.bf16.mxu1 %v9419_v57 }
 0x9e4   :  { %v3339_v22 = vpop.f32.mrb[88].mxu1 }
 0x9e5   :  { %v5313_v28 = vpop.f32.mrb[89].mxu1 }
 0x9e6   :  { %v3342_v54 = vpop.f32.mrb[90].mxu1 }
 0x9e7   :  { %v5314_v35 = vpop.f32.mrb[91].mxu1 }
 0xa04   :  { %v3381_v51 = vpop.f32.mrb[44].mxu0  ;;  %v3424_v2 = vpop.f32.mrb[92].mxu1 }
 0xa05   :  { %v5539_v5 = vadd.f32 %v3381_v51, %v7384_v46  ;;  %v3383_v21 = vpop.f32.mrb[45].mxu0  ;;  %v5333_v20 = vpop.f32.mrb[93].mxu1 }
 0xa06   :  { %v3385_v36 = vpop.f32.mrb[46].mxu0  ;;  %v3427_v24 = vpop.f32.mrb[94].mxu1  ;;  %v5540_v28 = vadd.f32 %v3383_v21, %v9659_v37 }
 0xa07   :  { %v4545_v41 = vmul.f32 -1.442695, %v5539_v5  ;;  %v5541_v6 = vadd.f32 %v3385_v36, %v7384_v46  ;;  %v3387_v19 = vpop.f32.mrb[47].mxu0  ;;  %v5334_v49 = vpop.f32.mrb[95].mxu1 }
 0xa08   :  { %v5542_v35 = vadd.f32 %v3387_v19, %v9659_v37  ;;  %v4547_v43 = vmul.f32 -1.442695, %v5540_v28  ;;  %v3459_v49 = vadd.f32 %v8510_v23, %v3424_v2  ;;  %v3460_v19 = vadd.f32 %v8510_v23, %v3427_v24 }
 0xa09   :  { %6000 = vpow2.f32 %v4545_v41  ;;  %v4546_v62 = vmul.f32 -1.442695, %v5541_v6 }
 0xa0a   :  { %v4548_v15 = vmul.f32 -1.442695, %v5542_v35 }
 0xa0b   :  { %6002 = vpow2.f32 %v4546_v62  ;;  %v3340_v62 = vadd.f32 %v3339_v22, %v7398_v27 }
 0xa0c   :  { %6004 = vpow2.f32 %v4547_v43 }
 0xa13   :  { %v6001_v16 = vpop.eup %6000 }
 0xa14   :  { %v3439_v51 = vadd.f32 1.0, %v6001_v16  ;;  %v3343_v16 = vadd.f32 %v3342_v54, %v7398_v27 }
 0xa15   :  { %v6003_v11 = vpop.eup %6002 }
 0xa16   :  { %6006 = vrcp.f32 %v3439_v51  ;;  %v3440_v20 = vadd.f32 1.0, %v6003_v11  ;;  %v6005_v36 = vpop.eup %6004 }
 0xa17   :  { %6008 = vpow2.f32 %v4548_v15  ;;  %v3453_v28 = vadd.f32 1.0, %v6005_v36 }
 0xa18   :  { %6010 = vrcp.f32 %v3440_v20 }
 0xa20   :  { %v6007_v41 = vpop.eup %6006 }
 0xa21   :  { %v6009_v5 = vpop.eup %6008  ;;  %v3461_v21 = vmul.f32 %v6007_v41, %v3459_v49 }
 0xa22   :  { %v6011_v6 = vpop.eup %6010  ;;  %v3454_v15 = vadd.f32 1.0, %v6009_v5 }
 0xa23   :  { %v3463_v35 = vadd.f32 %v3461_v21, %v3340_v62  ;;  %v3462_v43 = vmul.f32 %v6011_v6, %v3460_v19 }
 0xa24   :  { %v3562_v51 = vpop.f32.mrb[96].mxu1 }
 0xa25   :  { %6012 = vtanh.f32 %v3463_v35  ;;  %v3464_v11 = vadd.f32 %v3462_v43, %v3343_v16  ;;  %v5353_v20 = vpop.f32.mrb[97].mxu1 }
 0xa26   :  { %6014 = vrcp.f32 %v3453_v28  ;;  %v3565_v2 = vpop.f32.mrb[98].mxu1 }
 0xa27   :  { %6016 = vtanh.f32 %v3464_v11  ;;  %v5354_v37 = vpop.f32.mrb[99].mxu1 }
 0xa28   :  { %6018 = vrcp.f32 %v3454_v15 }
 0xa2f   :  { %v6013_v22 = vpop.eup %6012 }
 0xa30   :  { %v6015_v49 = vpop.eup %6014  ;;  %v3467_v23 = vsub.f32 %v8518_v10, %v6013_v22 }
 0xa31   :  { %v6017_v24 = vpop.eup %6016 }
 0xa32   :  { %v3468_v36 = vsub.f32 %v8520_v13, %v6017_v24  ;;  %v3469_v54 = vmul.f32 %v6015_v49, %v3467_v23  ;;  %v6019_v41 = vpop.eup %6018 }
 0xa34   :  { %v3470_v62 = vmul.f32 %v6019_v41, %v3468_v36  ;;  %v8844_v21 = vadd.f32 %v6013_v22, %v3469_v54 }
 0xa36   :  { %v8846_v19 = vadd.f32 %v6017_v24, %v3470_v62  ;;  %3474 = vst [vmem:[#allocation20 + $0x50] sm:$0xff] %v8844_v21 }
 0xa38   :  { %3475 = vst [vmem:[#allocation20 + $0x58] sm:$0xff] %v8846_v19 }
 0xa44   :  { %v3603_v37 = vpop.f32.mrb[48].mxu0  ;;  %v3646_v5 = vpop.f32.mrb[100].mxu1 }
 0xa45   :  { %v5543_v6 = vadd.f32 %v3603_v37, %v9467_v17  ;;  %v3605_v28 = vpop.f32.mrb[49].mxu0  ;;  %v5373_v10 = vpop.f32.mrb[101].mxu1 }
 0xa46   :  { %v3607_v16 = vpop.f32.mrb[50].mxu0  ;;  %v3649_v35 = vpop.f32.mrb[102].mxu1  ;;  %v5544_v22 = vadd.f32 %v3605_v28, %v9468_v29  ;;  %v3563_v28 = vadd.f32 %v3562_v51, %v7170_v0 }
 0xa47   :  { %v4550_v13 = vmul.f32 -1.442695, %v5543_v6  ;;  %v5545_v43 = vadd.f32 %v3607_v16, %v9467_v17  ;;  %v3609_v11 = vpop.f32.mrb[51].mxu0  ;;  %v5374_v15 = vpop.f32.mrb[103].mxu1  ;;  %v8854_v6 = vld [vmem:[#allocation12] ss:$0 sm:$0xff] }
 0xa48   :  { %v5546_v49 = vadd.f32 %v3609_v11, %v9468_v29  ;;  %v4552_v23 = vmul.f32 -1.442695, %v5544_v22  ;;  %v3681_v10 = vadd.f32 %v8854_v6, %v3646_v5  ;;  %v3682_v11 = vadd.f32 %v8854_v6, %v3649_v35 }
 0xa49   :  { %6020 = vpow2.f32 %v4550_v13  ;;  %v4551_v20 = vmul.f32 -1.442695, %v5545_v43  ;;  %v3566_v22 = vadd.f32 %v3565_v2, %v7170_v0 }
 0xa4a   :  { %v4553_v36 = vmul.f32 -1.442695, %v5546_v49 }
 0xa4b   :  { %6022 = vpow2.f32 %v4551_v20 }
 0xa4c   :  { %6024 = vpow2.f32 %v4552_v23 }
 0xa53   :  { %v6021_v24 = vpop.eup %6020 }
 0xa54   :  { %v3661_v54 = vadd.f32 1.0, %v6021_v24 }
 0xa55   :  { %v6023_v41 = vpop.eup %6022 }
 0xa56   :  { %6026 = vrcp.f32 %v3661_v54  ;;  %v3662_v62 = vadd.f32 1.0, %v6023_v41  ;;  %v6025_v37 = vpop.eup %6024 }
 0xa57   :  { %6028 = vpow2.f32 %v4553_v36  ;;  %v3675_v20 = vadd.f32 1.0, %v6025_v37 }
 0xa58   :  { %6030 = vrcp.f32 %v3662_v62 }
 0xa60   :  { %v6027_v16 = vpop.eup %6026 }
 0xa61   :  { %v6029_v13 = vpop.eup %6028  ;;  %v3683_v43 = vmul.f32 %v6027_v16, %v3681_v10 }
 0xa62   :  { %v6031_v15 = vpop.eup %6030  ;;  %v3676_v36 = vadd.f32 1.0, %v6029_v13 }
 0xa63   :  { %v3685_v49 = vadd.f32 %v3683_v43, %v3563_v28  ;;  %v3684_v23 = vmul.f32 %v6031_v15, %v3682_v11  ;;  %v8872_v28 = vld [vmem:[#allocation15] ss:$12 sps:$4 sm:$0xff]   ;;  %v8885_v43 = vld [vmem:[#allocation15 + $0x18] ss:$12 sps:$4 sm:$0xff]  }
 0xa64   :  { %v8888_v11 = vld [vmem:[#allocation15 + $0x20] ss:$12 sps:$4 sm:$0xff]  }
 0xa65   :  { %6032 = vtanh.f32 %v3685_v49  ;;  %v3686_v24 = vadd.f32 %v3684_v23, %v3566_v22  ;;  %v8891_v15 = vld [vmem:[#allocation15 + $0x34] ss:$12 sps:$4 sm:$0xff]   ;;  %v8898_v22 = vld [vmem:[#allocation15 + $0x38] ss:$12 sps:$4 sm:$0xff]  }
 0xa66   :  { %6034 = vrcp.f32 %v3675_v20  ;;  %v8895_v20 = vld [vmem:[#allocation15 + $0x30] ss:$12 sps:$4 sm:$0xff]   ;;  %v8901_v49 = vld [vmem:[#allocation15 + $0x4c] ss:$12 sps:$4 sm:$0xff]   ;;  %v8905_v23 = vld [vmem:[#allocation15 + $0x48] ss:$12 sps:$4 sm:$0xff]  }
 0xa67   :  { %6036 = vtanh.f32 %v3686_v24  ;;  %v8908_v24 = vld [vmem:[#allocation15 + $0x50] ss:$12 sps:$4 sm:$0xff]  }
 0xa68   :  { %6038 = vrcp.f32 %v3676_v36  ;;  %v8911_v36 = vld [vmem:[#allocation15 + $0x64] ss:$12 sps:$4 sm:$0xff]  }
 0xa6f   :  { %v6033_v5 = vpop.eup %6032 }
 0xa70   :  { %v6035_v54 = vpop.eup %6034  ;;  %v3689_v41 = vsub.f32 %v8534_v52, %v6033_v5  ;;  %v8875_v52 = vld [vmem:[#allocation15 + $0x8] ss:$12 sps:$4 sm:$0xff]  }
 0xa71   :  { %v6037_v51 = vpop.eup %6036 }
 0xa72   :  { %v3690_v62 = vsub.f32 %v8536_v14, %v6037_v51  ;;  %v3691_v35 = vmul.f32 %v6035_v54, %v3689_v41  ;;  %v6039_v10 = vpop.eup %6038  ;;  %v8878_v14 = vld [vmem:[#allocation15 + $0x1c] ss:$12 sps:$4 sm:$0xff]  }
 0xa73   :  { %v8918_v54 = vld [vmem:[#allocation15 + $0x68] ss:$12 sps:$4 sm:$0xff]  }
 0xa74   :  { %v3692_v37 = vmul.f32 %v6039_v10, %v3690_v62  ;;  %v8862_v16 = vadd.f32 %v6033_v5, %v3691_v35  ;;  %v8915_v5 = vld [vmem:[#allocation15 + $0x60] ss:$12 sps:$4 sm:$0xff]   ;;  %v8921_v41 = vld [vmem:[#allocation15 + $0x7c] ss:$12 sps:$4 sm:$0xff]  }
 0xa75   :  { %9706 = vst [vmem:[#allocation74_spill] sm:$0xff] %v8921_v41  ;;  %v8928_v62 = vld [vmem:[#allocation15 + $0x80] ss:$12 sps:$4 sm:$0xff]   ;;  %v8935_v10 = vld [vmem:[#allocation15 + $0x90] ss:$12 sps:$4 sm:$0xff]  }
 0xa76   :  { %v8864_v2 = vadd.f32 %v6037_v51, %v3692_v37  ;;  %v8925_v51 = vld [vmem:[#allocation15 + $0x78] ss:$12 sps:$4 sm:$0xff]   ;;  %9707 = vst [vmem:[#allocation75_spill] sm:$0xff] %v8928_v62  ;;  %v8931_v35 = vld [vmem:[#allocation15 + $0x94] ss:$12 sps:$4 sm:$0xff]   ;;  %9709 = vst [vmem:[#allocation77_spill] sm:$0xff] %v8935_v10 }
 0xa77   :  { %9708 = vst [vmem:[#allocation76_spill] sm:$0xff] %v8931_v35  ;;  %v8938_v37 = vld [vmem:[#allocation15 + $0x98] ss:$12 sps:$4 sm:$0xff]  }
 0xa78   :  { %v8868_v13 = vpack.c.bf16 %v8864_v2, %v8862_v16 }
 0xa7a   :  { %3729 = vmatmul.mubr.bf16.vlgmr.msra.gmra.mrb[52].mxu0 %v8868_v13  ;;  %5392 = vmatmul.mubr.bf16.vlgmr.msra.gmra.mrb[104].mxu1 %v8868_v13 }
 0xa7b   :  { %3782 = vmatpush1.bf16.msra.mxu0 %v8872_v28  ;;  %5396 = vmatpush3.bf16.msra.mxu1 %v8875_v52 }
 0xa7c   :  { %3783 = vmatprep.subr.bf16.mxu0 %v8878_v14  ;;  %5397 = vmatprep.subr.bf16.mxu1 %v9419_v57 }
 0xa7d   :  { %3813 = vmatprep.mubr.bf16.mxu0 %v9420_v50  ;;  %5411 = vmatprep.mubr.msk.bf16.mxu1 %vm6692_vm0, %v9419_v57 }
 0xa7f   :  { %3784 = vmatpush1.bf16.msra.mxu0 %v8885_v43  ;;  %5398 = vmatpush3.bf16.msra.mxu1 %v8888_v11 }
 0xa80   :  { %3785 = vmatprep.subr.bf16.mxu0 %v8891_v15  ;;  %5399 = vmatprep.subr.bf16.mxu1 %v9419_v57 }
 0xa83   :  { %3786 = vmatpush1.bf16.msra.mxu0 %v8895_v20  ;;  %5400 = vmatpush3.bf16.msra.mxu1 %v8898_v22 }
 0xa84   :  { %3787 = vmatprep.subr.bf16.mxu0 %v8901_v49  ;;  %5401 = vmatprep.subr.bf16.mxu1 %v9419_v57 }
 0xa87   :  { %3788 = vmatpush1.bf16.msra.mxu0 %v8905_v23  ;;  %5402 = vmatpush3.bf16.msra.mxu1 %v8908_v24 }
 0xa88   :  { %3789 = vmatprep.subr.bf16.mxu0 %v8911_v36  ;;  %5403 = vmatprep.subr.bf16.mxu1 %v9419_v57 }
 0xa8b   :  { %3790 = vmatpush1.bf16.msra.mxu0 %v8915_v5  ;;  %5404 = vmatpush3.bf16.msra.mxu1 %v8918_v54 }
 0xa8c   :  { %3791 = vmatprep.subr.bf16.mxu0 %v8921_v41  ;;  %5405 = vmatprep.subr.bf16.mxu1 %v9419_v57  ;;  %v8941_v41 = vld [vmem:[#allocation15 + $0xac] ss:$12 sps:$4 sm:$0xff]  }
 0xa8f   :  { %3792 = vmatpush1.bf16.msra.mxu0 %v8925_v51  ;;  %5406 = vmatpush3.bf16.msra.mxu1 %v8928_v62  ;;  %v8945_v62 = vld [vmem:[#allocation15 + $0xa8] ss:$12 sps:$4 sm:$0xff]  }
 0xa90   :  { %3793 = vmatprep.subr.bf16.mxu0 %v8931_v35  ;;  %5407 = vmatprep.subr.bf16.mxu1 %v9419_v57  ;;  %v8948_v35 = vld [vmem:[#allocation15 + $0xb0] ss:$12 sps:$4 sm:$0xff]  }
 0xa93   :  { %3794 = vmatpush1.bf16.msra.mxu0 %v8935_v10  ;;  %5408 = vmatpush3.bf16.msra.mxu1 %v8938_v37  ;;  %v3780_v10 = vpack.c.bf16 %v8846_v19, %v8844_v21 }
 0xa94   :  { %3795 = vmatprep.subr.bf16.mxu0 %v8941_v41  ;;  %5409 = vmatprep.subr.bf16.mxu1 %v9419_v57 }
 0xa97   :  { %3796 = vmatpush1.bf16.msra.mxu0 %v8945_v62  ;;  %5410 = vmatpush3.bf16.msra.mxu1 %v8948_v35 }
 0xa98   :  { %3919 = vmatprep.subr.bf16.mxu0 %v8579_v63  ;;  %5415 = vmatprep.subr.bf16.mxu1 %v9419_v57  ;;  %v5779_v63 = vld [vmem:[#allocation3 + $0x38] sm:$0xff]  }
 0xa9a   :  { %3814 = vmatmul.mubr.bf16.vlgmr.msra.gmra.mrb[52].mxu0 %v3780_v10  ;;  %5412 = vmatmul.mubr.bf16.vlgmr.msra.gmra.mrb[108].mxu1 %v3780_v10  ;;  %v9741_v10 = vld [vmem:[#allocation63_spill] sm:$0xff] }
 0xa9b   :  { %3920 = vmatpush1.bf16.msra.mxu0 %v8583_v12  ;;  %5416 = vmatpush3.bf16.msra.mxu1 %v8586_v61  ;;  %v9710_v12 = vld [vmem:[#allocation36_spill] sm:$0xff] }
 0xa9c   :  { %3921 = vmatprep.subr.bf16.mxu0 %v8589_v31  ;;  %5417 = vmatprep.subr.bf16.mxu1 %v9419_v57  ;;  %v9711_v61 = vld [vmem:[#allocation32_spill] sm:$0xff]  ;;  %v9712_v31 = vld [vmem:[#allocation33_spill] sm:$0xff] }
 0xa9d   :  { %3951 = vmatprep.mubr.bf16.mxu0 %v9420_v50  ;;  %5431 = vmatprep.mubr.msk.bf16.mxu1 %vm6692_vm0, %v9419_v57 }
 0xa9f   :  { %3922 = vmatpush1.bf16.msra.mxu0 %v8596_v47  ;;  %5418 = vmatpush3.bf16.msra.mxu1 %v8599_v56  ;;  %v9713_v47 = vld [vmem:[#allocation37_spill] sm:$0xff]  ;;  %v9714_v56 = vld [vmem:[#allocation34_spill] sm:$0xff] }
 0xaa0   :  { %3923 = vmatprep.subr.bf16.mxu0 %v8602_v1  ;;  %5419 = vmatprep.subr.bf16.mxu1 %v9419_v57  ;;  %v9715_v1 = vld [vmem:[#allocation35_spill] sm:$0xff] }
 0xaa3   :  { %3924 = vmatpush1.bf16.msra.mxu0 %v8606_v59  ;;  %5420 = vmatpush3.bf16.msra.mxu1 %v8609_v40  ;;  %v9716_v59 = vld [vmem:[#allocation38_spill] sm:$0xff]  ;;  %v9717_v40 = vld [vmem:[#allocation39_spill] sm:$0xff] }
 0xaa4   :  { %3925 = vmatprep.subr.bf16.mxu0 %v8612_v4  ;;  %5421 = vmatprep.subr.bf16.mxu1 %v9419_v57  ;;  %v9718_v4 = vld [vmem:[#allocation40_spill] sm:$0xff] }
 0xaa7   :  { %3926 = vmatpush1.bf16.msra.mxu0 %v8616_v18  ;;  %5422 = vmatpush3.bf16.msra.mxu1 %v8619_v60  ;;  %v9719_v18 = vld [vmem:[#allocation41_spill] sm:$0xff]  ;;  %v9720_v60 = vld [vmem:[#allocation42_spill] sm:$0xff] }
 0xaa8   :  { %3927 = vmatprep.subr.bf16.mxu0 %v8622_v26  ;;  %5423 = vmatprep.subr.bf16.mxu1 %v9419_v57  ;;  %v9721_v26 = vld [vmem:[#allocation43_spill] sm:$0xff] }
 0xaab   :  { %3928 = vmatpush1.bf16.msra.mxu0 %v8626_v44  ;;  %5424 = vmatpush3.bf16.msra.mxu1 %v8629_v3  ;;  %v9722_v44 = vld [vmem:[#allocation44_spill] sm:$0xff]  ;;  %v9723_v3 = vld [vmem:[#allocation45_spill] sm:$0xff] }
 0xaac   :  { %3929 = vmatprep.subr.bf16.mxu0 %v8632_v8  ;;  %5425 = vmatprep.subr.bf16.mxu1 %v9419_v57  ;;  %v9724_v8 = vld [vmem:[#allocation46_spill] sm:$0xff] }
 0xaaf   :  { %3930 = vmatpush1.bf16.msra.mxu0 %v8636_v48  ;;  %5426 = vmatpush3.bf16.msra.mxu1 %v8639_v55  ;;  %v9725_v48 = vld [vmem:[#allocation47_spill] sm:$0xff]  ;;  %v9726_v55 = vld [vmem:[#allocation48_spill] sm:$0xff] }
 0xab0   :  { %3931 = vmatprep.subr.bf16.mxu0 %v8642_v33  ;;  %5427 = vmatprep.subr.bf16.mxu1 %v9419_v57  ;;  %v9727_v33 = vld [vmem:[#allocation49_spill] sm:$0xff] }
 0xab3   :  { %3932 = vmatpush1.bf16.msra.mxu0 %v8646_v34  ;;  %5428 = vmatpush3.bf16.msra.mxu1 %v8649_v38  ;;  %v9728_v34 = vld [vmem:[#allocation50_spill] sm:$0xff]  ;;  %v9729_v38 = vld [vmem:[#allocation51_spill] sm:$0xff] }
 0xab4   :  { %3933 = vmatprep.subr.bf16.mxu0 %v8652_v42  ;;  %5429 = vmatprep.subr.bf16.mxu1 %v9419_v57  ;;  %v9730_v42 = vld [vmem:[#allocation52_spill] sm:$0xff] }
 0xab7   :  { %3934 = vmatpush1.bf16.msra.mxu0 %v8656_v30  ;;  %5430 = vmatpush3.bf16.msra.mxu1 %v8659_v53  ;;  %v9731_v30 = vld [vmem:[#allocation53_spill] sm:$0xff]  ;;  %v9732_v53 = vld [vmem:[#allocation54_spill] sm:$0xff] }
 0xab8   :  { %4003 = vmatprep.subr.bf16.mxu0 %v8662_v7  ;;  %5435 = vmatprep.subr.bf16.mxu1 %v9419_v57  ;;  %v9733_v7 = vld [vmem:[#allocation55_spill] sm:$0xff] }
 0xaba   :  { %3952 = vmatmul.mubr.bf16.vlgmr.msra.gmra.mrb[56].mxu0 %v5779_v63  ;;  %5432 = vmatmul.mubr.bf16.vlgmr.msra.gmra.mrb[112].mxu1 %v5779_v63  ;;  %v9742_v63 = vld [vmem:[#allocation64_spill] sm:$0xff] }
 0xabb   :  { %4004 = vmatpush1.bf16.msra.mxu0 %v8666_v58  ;;  %5436 = vmatpush3.bf16.msra.mxu1 %v8669_v45  ;;  %v9734_v58 = vld [vmem:[#allocation56_spill] sm:$0xff]  ;;  %v9735_v45 = vld [vmem:[#allocation57_spill] sm:$0xff] }
 0xabc   :  { %4005 = vmatprep.subr.bf16.mxu0 %v8672_v9  ;;  %5437 = vmatprep.subr.bf16.mxu1 %v9419_v57  ;;  %v9736_v9 = vld [vmem:[#allocation58_spill] sm:$0xff] }
 0xabd   :  { %4035 = vmatprep.mubr.bf16.mxu0 %v9420_v50  ;;  %5451 = vmatprep.mubr.msk.bf16.mxu1 %vm6692_vm0, %v9419_v57 }
 0xabf   :  { %4006 = vmatpush1.bf16.msra.mxu0 %v8679_v25  ;;  %5438 = vmatpush3.bf16.msra.mxu1 %v8682_v32  ;;  %v9737_v25 = vld [vmem:[#allocation59_spill] sm:$0xff]  ;;  %v9738_v32 = vld [vmem:[#allocation60_spill] sm:$0xff] }
 0xac0   :  { %4007 = vmatprep.subr.bf16.mxu0 %v8685_v39  ;;  %5439 = vmatprep.subr.bf16.mxu1 %v9419_v57  ;;  %v9739_v39 = vld [vmem:[#allocation61_spill] sm:$0xff] }
 0xac3   :  { %4008 = vmatpush1.bf16.msra.mxu0 %v9710_v12  ;;  %5440 = vmatpush3.bf16.msra.mxu1 %v9711_v61  ;;  %v9743_v12 = vld [vmem:[#allocation65_spill] sm:$0xff]  ;;  %v9744_v61 = vld [vmem:[#allocation66_spill] sm:$0xff] }
 0xac4   :  { %4009 = vmatprep.subr.bf16.mxu0 %v9712_v31  ;;  %5441 = vmatprep.subr.bf16.mxu1 %v9419_v57  ;;  %v9745_v31 = vld [vmem:[#allocation67_spill] sm:$0xff] }
 0xac7   :  { %4010 = vmatpush1.bf16.msra.mxu0 %v9713_v47  ;;  %5442 = vmatpush3.bf16.msra.mxu1 %v9714_v56  ;;  %v9746_v47 = vld [vmem:[#allocation68_spill] sm:$0xff]  ;;  %v9747_v56 = vld [vmem:[#allocation69_spill] sm:$0xff] }
 0xac8   :  { %4011 = vmatprep.subr.bf16.mxu0 %v9715_v1  ;;  %5443 = vmatprep.subr.bf16.mxu1 %v9419_v57  ;;  %v9748_v1 = vld [vmem:[#allocation70_spill] sm:$0xff] }
 0xacb   :  { %4012 = vmatpush1.bf16.msra.mxu0 %v9716_v59  ;;  %5444 = vmatpush3.bf16.msra.mxu1 %v9717_v40  ;;  %v9749_v59 = vld [vmem:[#allocation71_spill] sm:$0xff]  ;;  %v9750_v40 = vld [vmem:[#allocation72_spill] sm:$0xff] }
 0xacc   :  { %4013 = vmatprep.subr.bf16.mxu0 %v9718_v4  ;;  %5445 = vmatprep.subr.bf16.mxu1 %v9419_v57  ;;  %v9751_v4 = vld [vmem:[#allocation73_spill] sm:$0xff] }
 0xacf   :  { %4014 = vmatpush1.bf16.msra.mxu0 %v9719_v18  ;;  %5446 = vmatpush3.bf16.msra.mxu1 %v9720_v60 }
 0xad0   :  { %4015 = vmatprep.subr.bf16.mxu0 %v9721_v26  ;;  %5447 = vmatprep.subr.bf16.mxu1 %v9419_v57 }
 0xad3   :  { %4016 = vmatpush1.bf16.msra.mxu0 %v9722_v44  ;;  %5448 = vmatpush3.bf16.msra.mxu1 %v9723_v3 }
 0xad4   :  { %4017 = vmatprep.subr.bf16.mxu0 %v9724_v8  ;;  %5449 = vmatprep.subr.bf16.mxu1 %v9419_v57 }
 0xad7   :  { %4018 = vmatpush1.bf16.msra.mxu0 %v9725_v48  ;;  %5450 = vmatpush3.bf16.msra.mxu1 %v9726_v55 }
 0xad8   :  { %4130 = vmatprep.subr.bf16.mxu0 %v9727_v33  ;;  %5455 = vmatprep.subr.bf16.mxu1 %v9419_v57 }
 0xada   :  { %4036 = vmatmul.mubr.bf16.vlgmr.msra.gmra.mrb[56].mxu0 %v8868_v13  ;;  %5452 = vmatmul.mubr.bf16.vlgmr.msra.gmra.mrb[116].mxu1 %v8868_v13  ;;  %v9740_v13 = vld [vmem:[#allocation62_spill] sm:$0xff] }
 0xadb   :  { %4131 = vmatpush1.bf16.msra.mxu0 %v9728_v34  ;;  %5456 = vmatpush3.bf16.msra.mxu1 %v9729_v38 }
 0xadc   :  { %4132 = vmatprep.subr.bf16.mxu0 %v9730_v42  ;;  %5457 = vmatprep.subr.bf16.mxu1 %v9419_v57 }
 0xadd   :  { %4162 = vmatprep.mubr.bf16.mxu0 %v9420_v50  ;;  %5471 = vmatprep.mubr.msk.bf16.mxu1 %vm6692_vm0, %v9419_v57 }
 0xadf   :  { %4133 = vmatpush1.bf16.msra.mxu0 %v9731_v30  ;;  %5458 = vmatpush3.bf16.msra.mxu1 %v9732_v53 }
 0xae0   :  { %4134 = vmatprep.subr.bf16.mxu0 %v9733_v7  ;;  %5459 = vmatprep.subr.bf16.mxu1 %v9419_v57 }
 0xae3   :  { %4135 = vmatpush1.bf16.msra.mxu0 %v9734_v58  ;;  %5460 = vmatpush3.bf16.msra.mxu1 %v9735_v45  ;;  %v9752_v45 = vld [vmem:[#allocation31_spill] sm:$0xff] }
 0xae4   :  { %4136 = vmatprep.subr.bf16.mxu0 %v9736_v9  ;;  %5461 = vmatprep.subr.bf16.mxu1 %v9419_v57 }
 0xae7   :  { %4137 = vmatpush1.bf16.msra.mxu0 %v9737_v25  ;;  %5462 = vmatpush3.bf16.msra.mxu1 %v9738_v32 }
 0xae8   :  { %4138 = vmatprep.subr.bf16.mxu0 %v9739_v39  ;;  %5463 = vmatprep.subr.bf16.mxu1 %v9419_v57 }
 0xaeb   :  { %4139 = vmatpush1.bf16.msra.mxu0 %v9740_v13  ;;  %5464 = vmatpush3.bf16.msra.mxu1 %v9741_v10 }
 0xaec   :  { %4140 = vmatprep.subr.bf16.mxu0 %v9742_v63  ;;  %5465 = vmatprep.subr.bf16.mxu1 %v9419_v57 }
 0xaef   :  { %4141 = vmatpush1.bf16.msra.mxu0 %v9743_v12  ;;  %5466 = vmatpush3.bf16.msra.mxu1 %v9744_v61 }
 0xaf0   :  { %4142 = vmatprep.subr.bf16.mxu0 %v9745_v31  ;;  %5467 = vmatprep.subr.bf16.mxu1 %v9419_v57  ;;  %v9066_v31 = vld [vmem:[#allocation18] ss:$0 sm:$0xff] }
 0xaf3   :  { %4143 = vmatpush1.bf16.msra.mxu0 %v9746_v47  ;;  %5468 = vmatpush3.bf16.msra.mxu1 %v9747_v56 }
 0xaf4   :  { %4144 = vmatprep.subr.bf16.mxu0 %v9748_v1  ;;  %5469 = vmatprep.subr.bf16.mxu1 %v9419_v57 }
 0xaf7   :  { %4145 = vmatpush1.bf16.msra.mxu0 %v9749_v59  ;;  %5470 = vmatpush3.bf16.msra.mxu1 %v9750_v40 }
 0xaf8   :  { %4215 = vmatprep.subr.bf16.mxu0 %v9751_v4  ;;  %5475 = vmatprep.subr.bf16.mxu1 %v9419_v57 }
 0xb4d   :  { %v3773_v18 = vpop.f32.mrb[104].mxu1 }
 0xb4e   :  { %v5393_v60 = vpop.f32.mrb[105].mxu1  ;;  %v3774_v59 = vadd.f32 %v3773_v18, %v7398_v27 }
 0xb4f   :  { %v3776_v26 = vpop.f32.mrb[106].mxu1 }
 0xb50   :  { %v5394_v44 = vpop.f32.mrb[107].mxu1 }
 0xb6d   :  { %v3815_v3 = vpop.f32.mrb[52].mxu0  ;;  %v3858_v8 = vpop.f32.mrb[108].mxu1 }
 0xb6e   :  { %v5547_v48 = vadd.f32 %v3815_v3, %v7384_v46  ;;  %v3817_v55 = vpop.f32.mrb[53].mxu0  ;;  %v5413_v33 = vpop.f32.mrb[109].mxu1  ;;  %v3893_v47 = vadd.f32 %v9066_v31, %v3858_v8  ;;  %v3777_v3 = vadd.f32 %v3776_v26, %v7398_v27 }
 0xb6f   :  { %v3819_v34 = vpop.f32.mrb[54].mxu0  ;;  %v3861_v38 = vpop.f32.mrb[110].mxu1  ;;  %v5548_v9 = vadd.f32 %v3817_v55, %v9752_v45 }
 0xb70   :  { %v4554_v42 = vmul.f32 -1.442695, %v5547_v48  ;;  %v5549_v30 = vadd.f32 %v3819_v34, %v7384_v46  ;;  %v3821_v53 = vpop.f32.mrb[55].mxu0  ;;  %v5414_v7 = vpop.f32.mrb[111].mxu1  ;;  %v3894_v4 = vadd.f32 %v9066_v31, %v3861_v38 }
 0xb71   :  { %v5550_v25 = vadd.f32 %v3821_v53, %v9752_v45  ;;  %v4556_v32 = vmul.f32 -1.442695, %v5548_v9 }
 0xb72   :  { %6040 = vpow2.f32 %v4554_v42  ;;  %v4555_v58 = vmul.f32 -1.442695, %v5549_v30 }
 0xb73   :  { %v4557_v13 = vmul.f32 -1.442695, %v5550_v25 }
 0xb74   :  { %6042 = vpow2.f32 %v4555_v58 }
 0xb75   :  { %6044 = vpow2.f32 %v4556_v32 }
 0xb7c   :  { %v6041_v39 = vpop.eup %6040 }
 0xb7d   :  { %v3873_v10 = vadd.f32 1.0, %v6041_v39 }
 0xb7e   :  { %v6043_v63 = vpop.eup %6042 }
 0xb7f   :  { %6046 = vrcp.f32 %v3873_v10  ;;  %v3874_v12 = vadd.f32 1.0, %v6043_v63  ;;  %v6045_v61 = vpop.eup %6044 }
 0xb80   :  { %6048 = vpow2.f32 %v4557_v13  ;;  %v3887_v44 = vadd.f32 1.0, %v6045_v61 }
 0xb81   :  { %6050 = vrcp.f32 %v3874_v12 }
 0xb89   :  { %v6047_v56 = vpop.eup %6046 }
 0xb8a   :  { %v6049_v1 = vpop.eup %6048  ;;  %v3895_v40 = vmul.f32 %v6047_v56, %v3893_v47 }
 0xb8b   :  { %v6051_v60 = vpop.eup %6050  ;;  %v3888_v42 = vadd.f32 1.0, %v6049_v1 }
 0xb8c   :  { %v3897_v48 = vadd.f32 %v3895_v40, %v3774_v59  ;;  %v3896_v55 = vmul.f32 %v6051_v60, %v3894_v4 }
 0xb8d   :  { %v3996_v33 = vpop.f32.mrb[112].mxu1 }
 0xb8e   :  { %6052 = vtanh.f32 %v3897_v48  ;;  %v3898_v34 = vadd.f32 %v3896_v55, %v3777_v3  ;;  %v5433_v30 = vpop.f32.mrb[113].mxu1 }
 0xb8f   :  { %6054 = vrcp.f32 %v3887_v44  ;;  %v3999_v8 = vpop.f32.mrb[114].mxu1 }
 0xb90   :  { %6056 = vtanh.f32 %v3898_v34  ;;  %v5434_v53 = vpop.f32.mrb[115].mxu1 }
 0xb91   :  { %6058 = vrcp.f32 %v3888_v42 }
 0xb98   :  { %v6053_v18 = vpop.eup %6052 }
 0xb99   :  { %v6055_v7 = vpop.eup %6054  ;;  %v3901_v38 = vsub.f32 %v8844_v21, %v6053_v18 }
 0xb9a   :  { %v6057_v58 = vpop.eup %6056 }
 0xb9b   :  { %v3902_v9 = vsub.f32 %v8846_v19, %v6057_v58  ;;  %v3903_v26 = vmul.f32 %v6055_v7, %v3901_v38  ;;  %v6059_v25 = vpop.eup %6058  ;;  %v3997_v38 = vadd.f32 %v3996_v33, %v7170_v0 }
 0xb9d   :  { %v3904_v32 = vmul.f32 %v6059_v25, %v3902_v9  ;;  %v9074_v39 = vadd.f32 %v6053_v18, %v3903_v26  ;;  %v4000_v25 = vadd.f32 %v3999_v8, %v7170_v0 }
 0xb9f   :  { %v9076_v13 = vadd.f32 %v6057_v58, %v3904_v32  ;;  %3908 = vst [vmem:[#allocation20 + $0x60] sm:$0xff] %v9074_v39 }
 0xba1   :  { %3909 = vst [vmem:[#allocation20 + $0x68] sm:$0xff] %v9076_v13 }
 0xbad   :  { %v4037_v10 = vpop.f32.mrb[56].mxu0  ;;  %v4080_v63 = vpop.f32.mrb[116].mxu1 }
 0xbae   :  { %v5551_v12 = vadd.f32 %v4037_v10, %v9467_v17  ;;  %v4039_v61 = vpop.f32.mrb[57].mxu0  ;;  %v5453_v21 = vpop.f32.mrb[117].mxu1  ;;  %v4115_v53 = vadd.f32 %v8854_v6, %v4080_v63 }
 0xbaf   :  { %v4041_v47 = vpop.f32.mrb[58].mxu0  ;;  %v4083_v56 = vpop.f32.mrb[118].mxu1  ;;  %v5552_v60 = vadd.f32 %v4039_v61, %v9468_v29 }
 0xbb0   :  { %v4559_v19 = vmul.f32 -1.442695, %v5551_v12  ;;  %v5553_v1 = vadd.f32 %v4041_v47, %v9467_v17  ;;  %v4043_v59 = vpop.f32.mrb[59].mxu0  ;;  %v5454_v40 = vpop.f32.mrb[119].mxu1 }
 0xbb1   :  { %v5554_v44 = vadd.f32 %v4043_v59, %v9468_v29  ;;  %v4561_v3 = vmul.f32 -1.442695, %v5552_v60  ;;  %v4116_v29 = vadd.f32 %v8854_v6, %v4083_v56 }
 0xbb2   :  { %6060 = vpow2.f32 %v4559_v19  ;;  %v4560_v4 = vmul.f32 -1.442695, %v5553_v1 }
 0xbb3   :  { %v4562_v55 = vmul.f32 -1.442695, %v5554_v44 }
 0xbb4   :  { %6062 = vpow2.f32 %v4560_v4 }
 0xbb5   :  { %6064 = vpow2.f32 %v4561_v3 }
 0xbbc   :  { %v6061_v48 = vpop.eup %6060 }
 0xbbd   :  { %v4095_v34 = vadd.f32 1.0, %v6061_v48 }
 0xbbe   :  { %v6063_v42 = vpop.eup %6062 }
 0xbbf   :  { %6066 = vrcp.f32 %v4095_v34  ;;  %v4096_v30 = vadd.f32 1.0, %v6063_v42  ;;  %v6065_v17 = vpop.eup %6064 }
 0xbc0   :  { %6068 = vpow2.f32 %v4562_v55  ;;  %v4109_v26 = vadd.f32 1.0, %v6065_v17 }
 0xbc1   :  { %6070 = vrcp.f32 %v4096_v30 }
 0xbc9   :  { %v6067_v18 = vpop.eup %6066 }
 0xbca   :  { %v6069_v7 = vpop.eup %6068  ;;  %v4117_v58 = vmul.f32 %v6067_v18, %v4115_v53 }
 0xbcb   :  { %v6071_v9 = vpop.eup %6070  ;;  %v4110_v61 = vadd.f32 1.0, %v6069_v7 }
 0xbcc   :  { %v4119_v32 = vadd.f32 %v4117_v58, %v3997_v38  ;;  %v4118_v10 = vmul.f32 %v6071_v9, %v4116_v29 }
 0xbce   :  { %6072 = vtanh.f32 %v4119_v32  ;;  %v4120_v12 = vadd.f32 %v4118_v10, %v4000_v25 }
 0xbcf   :  { %6074 = vrcp.f32 %v4109_v26 }
 0xbd0   :  { %6076 = vtanh.f32 %v4120_v12 }
 0xbd1   :  { %6078 = vrcp.f32 %v4110_v61 }
 0xbd8   :  { %v6073_v63 = vpop.eup %6072 }
 0xbd9   :  { %v6075_v21 = vpop.eup %6074  ;;  %v4123_v47 = vsub.f32 %v8862_v16, %v6073_v63  ;;  %v9754_v16 = vld [vmem:[#allocation75_spill] sm:$0xff] }
 0xbda   :  { %v6077_v33 = vpop.eup %6076 }
 0xbdb   :  { %v4124_v19 = vsub.f32 %v8864_v2, %v6077_v33  ;;  %v4125_v6 = vmul.f32 %v6075_v21, %v4123_v47  ;;  %v6079_v56 = vpop.eup %6078  ;;  %v9755_v2 = vld [vmem:[#allocation76_spill] sm:$0xff] }
 0xbdd   :  { %v4126_v1 = vmul.f32 %v6079_v56, %v4124_v19  ;;  %v4127_v59 = vadd.f32 %v6073_v63, %v4125_v6 }
 0xbdf   :  { %v4128_v0 = vadd.f32 %v6077_v33, %v4126_v1  ;;  %4355 = vst [vmem:[#allocation21] sm:$0xff] %v4127_v59 }
 0xbe1   :  { %v4129_v8 = vpack.c.bf16 %v4128_v0, %v4127_v59  ;;  %4356 = vst [vmem:[#allocation21 + $0x8] sm:$0xff] %v4128_v0 }
 0xbe3   :  { %4163 = vmatmul.mubr.bf16.vlgmr.msra.gmra.mrb[60].mxu0 %v4129_v8  ;;  %5472 = vmatmul.mubr.bf16.vlgmr.msra.gmra.mrb[120].mxu1 %v4129_v8 }
 0xbe4   :  { %4216 = vmatpush1.bf16.msra.mxu0 %v8872_v28  ;;  %5476 = vmatpush3.bf16.msra.mxu1 %v8875_v52  ;;  %v9756_v28 = vld [vmem:[#allocation77_spill] sm:$0xff]  ;;  %v4214_v52 = vpack.c.bf16 %v9076_v13, %v9074_v39 }
 0xbe5   :  { %4217 = vmatprep.subr.bf16.mxu0 %v8878_v14  ;;  %5477 = vmatprep.subr.bf16.mxu1 %v9419_v57 }
 0xbe6   :  { %4247 = vmatprep.mubr.bf16.mxu0 %v9420_v50  ;;  %5491 = vmatprep.mubr.msk.bf16.mxu1 %vm6692_vm0, %v9419_v57  ;;  %v9753_v50 = vld [vmem:[#allocation74_spill] sm:$0xff] }
 0xbe8   :  { %4218 = vmatpush1.bf16.msra.mxu0 %v8885_v43  ;;  %5478 = vmatpush3.bf16.msra.mxu1 %v8888_v11 }
 0xbe9   :  { %4219 = vmatprep.subr.bf16.mxu0 %v8891_v15  ;;  %5479 = vmatprep.subr.bf16.mxu1 %v9419_v57 }
 0xbec   :  { %4220 = vmatpush1.bf16.msra.mxu0 %v8895_v20  ;;  %5480 = vmatpush3.bf16.msra.mxu1 %v8898_v22 }
 0xbed   :  { %4221 = vmatprep.subr.bf16.mxu0 %v8901_v49  ;;  %5481 = vmatprep.subr.bf16.mxu1 %v9419_v57 }
 0xbf0   :  { %4222 = vmatpush1.bf16.msra.mxu0 %v8905_v23  ;;  %5482 = vmatpush3.bf16.msra.mxu1 %v8908_v24 }
 0xbf1   :  { %4223 = vmatprep.subr.bf16.mxu0 %v8911_v36  ;;  %5483 = vmatprep.subr.bf16.mxu1 %v9419_v57 }
 0xbf4   :  { %4224 = vmatpush1.bf16.msra.mxu0 %v8915_v5  ;;  %5484 = vmatpush3.bf16.msra.mxu1 %v8918_v54 }
 0xbf5   :  { %4225 = vmatprep.subr.bf16.mxu0 %v9753_v50  ;;  %5485 = vmatprep.subr.bf16.mxu1 %v9419_v57 }
 0xbf8   :  { %4226 = vmatpush1.bf16.msra.mxu0 %v8925_v51  ;;  %5486 = vmatpush3.bf16.msra.mxu1 %v9754_v16 }
 0xbf9   :  { %4227 = vmatprep.subr.bf16.mxu0 %v9755_v2  ;;  %5487 = vmatprep.subr.bf16.mxu1 %v9419_v57 }
 0xbfc   :  { %4228 = vmatpush1.bf16.msra.mxu0 %v9756_v28  ;;  %5488 = vmatpush3.bf16.msra.mxu1 %v8938_v37 }
 0xbfd   :  { %4229 = vmatprep.subr.bf16.mxu0 %v8941_v41  ;;  %5489 = vmatprep.subr.bf16.mxu1 %v9419_v57 }
 0xc00   :  { %4230 = vmatpush1.bf16.msra.mxu0 %v8945_v62  ;;  %5490 = vmatpush3.bf16.msra.mxu1 %v8948_v35 }
 0xc03   :  { %4248 = vmatmul.mubr.bf16.vlgmr.msra.gmra.mrb[60].mxu0 %v4214_v52  ;;  %5492 = vmatmul.mubr.bf16.vlgmr.msra.gmra.mrb[124].mxu1 %v4214_v52 }
 0xcb6   :  { %v4207_v14 = vpop.f32.mrb[120].mxu1 }
 0xcb7   :  { %v5473_v43 = vpop.f32.mrb[121].mxu1  ;;  %v4208_v30 = vadd.f32 %v4207_v14, %v7398_v27 }
 0xcb8   :  { %v4210_v11 = vpop.f32.mrb[122].mxu1 }
 0xcb9   :  { %v5474_v15 = vpop.f32.mrb[123].mxu1  ;;  %v4211_v7 = vadd.f32 %v4210_v11, %v7398_v27 }
 0xcd6   :  { %v4249_v20 = vpop.f32.mrb[60].mxu0  ;;  %v4292_v22 = vpop.f32.mrb[124].mxu1 }
 0xcd7   :  { %v5555_v49 = vadd.f32 %v4249_v20, %v7384_v46  ;;  %v4251_v23 = vpop.f32.mrb[61].mxu0  ;;  %v5493_v24 = vpop.f32.mrb[125].mxu1  ;;  %v4327_v55 = vadd.f32 %v9066_v31, %v4292_v22 }
 0xcd8   :  { %v4253_v57 = vpop.f32.mrb[62].mxu0  ;;  %v4295_v36 = vpop.f32.mrb[126].mxu1  ;;  %v5556_v35 = vadd.f32 %v4251_v23, %v9752_v45 }
 0xcd9   :  { %v4563_v5 = vmul.f32 -1.442695, %v5555_v49  ;;  %v5557_v54 = vadd.f32 %v4253_v57, %v7384_v46  ;;  %v4255_v41 = vpop.f32.mrb[63].mxu0  ;;  %v5494_v51 = vpop.f32.mrb[127].mxu1 }
 0xcda   :  { %v5558_v37 = vadd.f32 %v4255_v41, %v9752_v45  ;;  %v4565_v40 = vmul.f32 -1.442695, %v5556_v35  ;;  %v4328_v45 = vadd.f32 %v9066_v31, %v4295_v36 }
 0xcdb   :  { %6080 = vpow2.f32 %v4563_v5  ;;  %v4564_v62 = vmul.f32 -1.442695, %v5557_v54 }
 0xcdc   :  { %v4566_v60 = vmul.f32 -1.442695, %v5558_v37 }
 0xcdd   :  { %6082 = vpow2.f32 %v4564_v62 }
 0xcde   :  { %6084 = vpow2.f32 %v4565_v40 }
 0xce5   :  { %v6081_v4 = vpop.eup %6080 }
 0xce6   :  { %v4307_v44 = vadd.f32 1.0, %v6081_v4 }
 0xce7   :  { %v6083_v3 = vpop.eup %6082 }
 0xce8   :  { %6086 = vrcp.f32 %v4307_v44  ;;  %v4308_v48 = vadd.f32 1.0, %v6083_v3  ;;  %v6085_v46 = vpop.eup %6084 }
 0xce9   :  { %6088 = vpow2.f32 %v4566_v60  ;;  %v4321_v18 = vadd.f32 1.0, %v6085_v46 }
 0xcea   :  { %6090 = vrcp.f32 %v4308_v48 }
 0xcf2   :  { %v6087_v34 = vpop.eup %6086 }
 0xcf3   :  { %v6089_v42 = vpop.eup %6088  ;;  %v4329_v17 = vmul.f32 %v6087_v34, %v4327_v55 }
 0xcf4   :  { %v6091_v53 = vpop.eup %6090  ;;  %v4322_v9 = vadd.f32 1.0, %v6089_v42 }
 0xcf5   :  { %v4331_v38 = vadd.f32 %v4329_v17, %v4208_v30  ;;  %v4330_v58 = vmul.f32 %v6091_v53, %v4328_v45 }
 0xcf7   :  { %6092 = vtanh.f32 %v4331_v38  ;;  %v4332_v29 = vadd.f32 %v4330_v58, %v4211_v7 }
 0xcf8   :  { %6094 = vrcp.f32 %v4321_v18 }
 0xcf9   :  { %6096 = vtanh.f32 %v4332_v29 }
 0xcfa   :  { %6098 = vrcp.f32 %v4322_v9 }
 0xd01   :  { %v6093_v26 = vpop.eup %6092 }
 0xd02   :  { %v6095_v25 = vpop.eup %6094  ;;  %v4335_v32 = vsub.f32 %v9074_v39, %v6093_v26 }
 0xd03   :  { %v6097_v10 = vpop.eup %6096 }
 0xd04   :  { %v4337_v12 = vmul.f32 %v6095_v25, %v4335_v32  ;;  %v4336_v31 = vsub.f32 %v9076_v13, %v6097_v10  ;;  %v6099_v61 = vpop.eup %6098 }
 0xd06   :  { %v4339_v27 = vadd.f32 %v6093_v26, %v4337_v12  ;;  %v4338_v63 = vmul.f32 %v6099_v61, %v4336_v31 }
 0xd08   :  { %4342 = vst [vmem:[#allocation20 + $0x70] sm:$0xff] %v4339_v27  ;;  %4357 = vst [vmem:[#allocation21 + $0x10] sm:$0xff] %v4339_v27  ;;  %v4340_v21 = vadd.f32 %v6097_v10, %v4338_v63 }
 0xd0a   :  { %4343 = vst [vmem:[#allocation20 + $0x78] sm:$0xff] %v4340_v21  ;;  %4358 = vst [vmem:[#allocation21 + $0x18] sm:$0xff] %v4340_v21 }
 0xd0b   :  { %6625 = shalt.err (!%p6622_p0)
}
 0xd0c   :  { %s6626_s17 = scalar_lea.hbm %s9182_s10, 2048 }
 0xd0d   :  { %p6627_p1 = scmp.ne.s32.totalorder %s9182_s10, %s6626_s17  ;;  %p6630_p2 = scmp.lt.u32.totalorder %s6626_s17, %s9182_s10 }
 0xd0f   :  { %p6632_p3 = pnand %p6630_p2, %p6627_p1 }
 0xd11   :  { %6635 = shalt.err (!%p6632_p3)
}
 0xd12   :  { %4370 = dma.vmem_to_hbm [thread:$0]  %s4365_s5, 2048, %s9182_s10, [#allocation5], %s6675_s27, %s6675_s27, %s6676_s28  }
 0xd13   :  { %s6636_s24 = scalar_lea.vmem %s9135_s23, 512  ;;  %p6641_p5 = scmp.lt.s32.totalorder %s9135_s23, %s9135_s23 }
 0xd14   :  { %p6637_p4 = scmp.ne.s32.totalorder %s9135_s23, %s6636_s24  ;;  %p6642_p6 = scmp.lt.s32.totalorder %s6636_s24, %s6636_s24 }
 0xd16   :  { %p6643_p7 = por %p6642_p6, %p6641_p5 }
 0xd18   :  { %p6644_p8 = pnand %p6643_p7, %p6637_p4 }
 0xd1a   :  { %6647 = shalt.err (!%p6644_p8)
}
 0xd1b   :  { %s6648_s13 = scalar_lea.hbm %s9183_s11, 512 }
 0xd1c   :  { %p6649_p9 = scmp.ne.s32.totalorder %s9183_s11, %s6648_s13  ;;  %p6652_p10 = scmp.lt.u32.totalorder %s6648_s13, %s9183_s11 }
 0xd1e   :  { %p6654_p11 = pnand %p6652_p10, %p6649_p9 }
 0xd20   :  { %6657 = shalt.err (!%p6654_p11)
}
 0xd21   :  { %4382 = dma.vmem_to_hbm [thread:$0]  %s9135_s23, 512, %s9183_s11, [#allocation22], %s6675_s27, %s6675_s27, %s6676_s28  }
 0xd22   :  { %6670 = dma.done.wait [#allocation5], 2048  }
 0xd23   :  { %6671 = vsyncadd [#allocation5], 4294965248 }
 0xd24   :  { %6672 = dma.done.wait [#allocation22], 512  }
 0xd25   :  { %6673 = vsyncadd [#allocation22], 4294966784 }
 0xd26   :  { %4389 = vsyncpa [#allocation4], 1 }
 0xd27   :  { %4390 = vsyncpa [#allocation7], 1 }
 0xd28   :  { %4391 = vsyncpa [#allocation10], 1 }
 0xd29   :  { %4392 = vsyncpa [#allocation13], 1 }
 0xd2a   :  { %4393 = vsyncpa [#allocation16], 1 }
 0xd2b   :  { %4394 = vsyncpa [#allocation19], 1 }
 0xd2c   :  { %4395 = vsyncpa [#allocation5], 1 }
 0xd2d   :  { %4396 = vsyncpa [#allocation22], 1 }

</bundles_post_ra>
